<compile_context>
chip_gen: v7x
topology: tpu7x:2x2x1
jax: 0.10.0
libtpu: 0.0.40
codegen_flags: <defaults>
</compile_context>

<pallas_src>
import jax
import jax.numpy as jnp
import numpy as np
from jax.experimental import pallas as pl
from jax.experimental.pallas import tpu as pltpu


# ----------------------------- Fused Pallas kernel ---------------------------

def _make_convnet_kernel(H, C, KS, NB, WC):
    """Per-sample fused 8-block + head kernel (static shapes)."""
    PAD = KS // 2

    def kernel(x_ref, w_ref, b_ref, fcw_ref, fcb_ref, o_ref, act_ref):
        # x_ref:   (1, Hp, Wp*C) f32  spatially zero-padded, lane-folded input
        # w_ref:   (NB, KS, Wp*C, W*C) bf16  block-Toeplitz conv weights (BN folded)
        # b_ref:   (NB, 1, W*C) f32   per-channel bias tiled over W
        # fcw_ref: (W*C, NCLS)  f32   fc weight tiled over W, scaled by 1/(H*W)
        # fcb_ref: (1, NCLS)    f32
        # o_ref:   (1, 1, NCLS) f32
        # act_ref: (Hp, Wp*C)   f32   resident padded activation (halo stays 0)
        act_ref[...] = x_ref[0]

        y = None
        for blk in range(NB):                       # unrolled: static weight idx
            acc = jnp.zeros((H, WC), jnp.float32)   # 4 vregs, no spill
            for dh in range(KS):                    # 5 lane-dense large-K matmuls
                lhs = act_ref[dh:dh + H, :].astype(jnp.bfloat16)   # (H, Wp*C)
                acc = acc + jnp.dot(lhs, w_ref[blk, dh],
                                    preferred_element_type=jnp.float32)
            y = jnp.maximum(acc + b_ref[blk], 0.0)  # folded-BN bias + ReLU (f32)
            # write interior back; halo rows/cols are never touched -> stay zero
            act_ref[PAD:PAD + H, PAD * C:PAD * C + WC] = y

        # Head fused with the last block: pooling is folded into fcw (tiled /HW),
        # so it is one small f32 matmul on the in-register y + a sublane sum.
        z = jnp.dot(y, fcw_ref[...], preferred_element_type=jnp.float32)  # (H, NCLS)
        o_ref[0] = jnp.sum(z, axis=0, keepdims=True) + fcb_ref[...]

    return kernel


# --------------------------- Wrapper / weight prep ----------------------------

def _toeplitz(w_hwio, W, Wp, KS, C):
    """T[dh, wp*C+ci, w*C+co] = w_hwio[dh, wp-w, ci, co] if 0 <= wp-w < KS else 0."""
    wp = jnp.arange(Wp)[:, None]                     # (Wp, 1)
    w = jnp.arange(W)[None, :]                       # (1, W)
    dw = wp - w                                      # (Wp, W)
    valid = (dw >= 0) & (dw < KS)
    dwc = jnp.clip(dw, 0, KS - 1)
    g = w_hwio[:, dwc, :, :]                         # (KS, Wp, W, C, C)
    g = jnp.where(valid[None, :, :, None, None], g, 0.0)
    return jnp.transpose(g, (0, 1, 3, 2, 4)).reshape(KS, Wp * C, W * C)


def convnet_pallas(x_nchw, params):
    """Full ConvNet forward in one pallas_call. x_nchw: (N, Cin, H, W) f32."""
    blocks = params["blocks"]
    fc_w, fc_b = params["fc_w"], params["fc_b"]
    KS = blocks[0][0].shape[0]
    C = blocks[0][0].shape[3]
    NCLS = fc_w.shape[1]
    NB = len(blocks)
    PAD = KS // 2
    N, Cin, H, W = x_nchw.shape
    Hp, Wp = H + 2 * PAD, W + 2 * PAD
    WC = W * C

    # Input: NCHW -> NHWC, zero-pad channels to C, zero-pad spatially (SAME halo),
    # fold (Wp, C) onto the lane axis.
    x = jnp.transpose(x_nchw, (0, 2, 3, 1)).astype(jnp.float32)
    x = jnp.pad(x, ((0, 0), (PAD, PAD), (PAD, PAD), (0, C - Cin)))
    x_in = x.reshape(N, Hp, Wp * C)

    # Block-Toeplitz weights (one (Wp*C, W*C) slab per (block, dh)) + tiled biases.
    w_list, b_list = [], []
    for w_f, b_eff in blocks:                        # w_f: BN scale already folded
        cin_i = w_f.shape[2]
        if cin_i < C:
            w_f = jnp.pad(w_f, ((0, 0), (0, 0), (0, C - cin_i), (0, 0)))
        w_list.append(_toeplitz(w_f, W, Wp, KS, C))
        b_list.append(jnp.tile(b_eff, W).reshape(1, WC))
    w_stack = jnp.stack(w_list).astype(jnp.bfloat16)   # (NB, KS, Wp*C, W*C) bf16
    b_stack = jnp.stack(b_list)                        # (NB, 1, W*C) f32

    # Fold global-average-pool into the FC weight (tile over W, scale by 1/(H*W)).
    fc_big = jnp.tile(fc_w / (H * W), (W, 1))          # (W*C, NCLS) f32
    fc_b2 = fc_b.reshape(1, NCLS)

    kernel = _make_convnet_kernel(H, C, KS, NB, WC)
    out = pl.pallas_call(
        kernel,
        out_shape=jax.ShapeDtypeStruct((N, 1, NCLS), jnp.float32),
        grid=(N,),
        in_specs=[
            pl.BlockSpec((1, Hp, Wp * C), lambda n: (n, 0, 0)),
            pl.BlockSpec((NB, KS, Wp * C, WC), lambda n: (0, 0, 0, 0)),
            pl.BlockSpec((NB, 1, WC), lambda n: (0, 0, 0)),
            pl.BlockSpec((WC, NCLS), lambda n: (0, 0)),
            pl.BlockSpec((1, NCLS), lambda n: (0, 0)),
        ],
        out_specs=pl.BlockSpec((1, 1, NCLS), lambda n: (n, 0, 0)),
        scratch_shapes=[
            pltpu.VMEM((Hp, Wp * C), jnp.float32),   # resident padded activation
        ],
        compiler_params=pltpu.CompilerParams(
            dimension_semantics=("parallel",),        # both TCs on v7x
            vmem_limit_bytes=32 * 1024 * 1024),
    )(x_in, w_stack, b_stack, fc_big, fc_b2)
    return out.reshape(N, NCLS)


# --------------------------- Parameter init ----------------------------------

def init_params(key, input_channels, num_classes=12, num_channels=16,
                kernel_size=5, num_blocks=8, eps=1e-5):
    """Synthetic parameters matching the torch module's shapes.

    Conv weights in HWIO layout; eval-mode BatchNorm running stats / affine
    params (and the conv bias) are folded into the weights and a per-channel
    bias:  scale = gamma/sqrt(var+eps);  W_folded = W * scale;
    bias_eff = beta + (conv_b - rmean) * scale.
    """
    blocks = []
    cin = input_channels
    for _ in range(num_blocks):
        key, kw_, kb_, kg_, kbe_, km_, kv_ = jax.random.split(key, 7)
        fan_in = kernel_size * kernel_size * cin
        w = jax.random.normal(
            kw_, (kernel_size, kernel_size, cin, num_channels),
            jnp.float32) * jnp.sqrt(2.0 / fan_in)
        conv_b = 0.05 * jax.random.normal(kb_, (num_channels,), jnp.float32)
        gamma = 1.0 + 0.1 * jax.random.normal(kg_, (num_channels,), jnp.float32)
        beta = 0.1 * jax.random.normal(kbe_, (num_channels,), jnp.float32)
        rmean = 0.05 * jax.random.normal(km_, (num_channels,), jnp.float32)
        rvar = 1.0 + 0.1 * jax.random.uniform(kv_, (num_channels,), jnp.float32)
        scale = gamma / jnp.sqrt(rvar + eps)
        bias_eff = beta + (conv_b - rmean) * scale
        w_folded = w * scale                       # fold BN scale into weights
        blocks.append((w_folded, bias_eff))
        cin = num_channels
    key, kfw, kfb = jax.random.split(key, 3)
    fc_w = jax.random.normal(kfw, (num_channels, num_classes),
                             jnp.float32) * jnp.sqrt(1.0 / num_channels)
    fc_b = 0.05 * jax.random.normal(kfb, (num_classes,), jnp.float32)
    return {"blocks": blocks, "fc_w": fc_w, "fc_b": fc_b}


# ----------------------------- Reference (XLA) --------------------------------

def ref_forward(x_nchw, params):
    """XLA reference at matched precision (bf16 conv operands, f32 accumulate)."""
    x = jnp.transpose(x_nchw, (0, 2, 3, 1)).astype(jnp.float32)
    for (w_f, b_eff) in params["blocks"]:
        y = jax.lax.conv_general_dilated(
            x.astype(jnp.bfloat16), w_f.astype(jnp.bfloat16),
            window_strides=(1, 1), padding="SAME",
            dimension_numbers=("NHWC", "HWIO", "NHWC"),
            preferred_element_type=jnp.float32)
        x = jnp.maximum(y + b_eff, 0.0)
    pooled = jnp.mean(x, axis=(1, 2))
    return pooled @ params["fc_w"] + params["fc_b"]


# ---------------------------------- Main --------------------------------------

if __name__ == "__main__":
    key = jax.random.PRNGKey(0)
    kx, kp = jax.random.split(key)

    # Shapes consistent with ConvNet(input_channels=4): NCHW = (2, 4, 16, 16)
    N, Cin, H, W = 2, 4, 16, 16
    x_nchw = jax.random.normal(kx, (N, Cin, H, W), jnp.float32)
    params = init_params(kp, input_channels=Cin)

    fwd = jax.jit(convnet_pallas)
    out = jax.block_until_ready(fwd(x_nchw, params))
    assert out.shape == (N, 12), out.shape

    ref = ref_forward(x_nchw, params)
    np.testing.assert_allclose(np.asarray(out), np.asarray(ref),
                               rtol=1e-2, atol=1e-2)

    print("KERNEL_OK")
</pallas_src>

<mosaic_0001>
module attributes {stable_mosaic.version = 11 : i64} {
  func.func @kernel(%arg0: i32, %arg1: memref<1x20x320xf32, #tpu.memory_space<vmem>>, %arg2: memref<8x5x320x256xbf16, #tpu.memory_space<vmem>>, %arg3: memref<8x1x256xf32, #tpu.memory_space<vmem>>, %arg4: memref<256x12xf32, #tpu.memory_space<vmem>>, %arg5: memref<1x12xf32, #tpu.memory_space<vmem>>, %arg6: memref<1x1x12xf32, #tpu.memory_space<vmem>>, %arg7: memref<20x320xf32, #tpu.memory_space<vmem>>) attributes {dimension_semantics = [#tpu.dimension_semantics<parallel>], iteration_bounds = array<i64: 2>, scalar_prefetch = 0 : i64, scratch_operands = 1 : i64, tpu.core_type = #tpu.core_type<tc>, window_params = [{transform_indices = @transform_0, window_bounds = array<i64: 1, 20, 320>}, {pipeline_mode = #tpu.pipeline_mode<synchronous>, transform_indices = @transform_1, window_bounds = array<i64: 8, 5, 320, 256>}, {pipeline_mode = #tpu.pipeline_mode<synchronous>, transform_indices = @transform_2, window_bounds = array<i64: 8, 1, 256>}, {pipeline_mode = #tpu.pipeline_mode<synchronous>, transform_indices = @transform_3, window_bounds = array<i64: 256, 12>}, {pipeline_mode = #tpu.pipeline_mode<synchronous>, transform_indices = @transform_4, window_bounds = array<i64: 1, 12>}, {transform_indices = @transform_5, window_bounds = array<i64: 1, 1, 12>}]} {
    %c0 = arith.constant 0 : index
    %c0_0 = arith.constant 0 : index
    %c0_1 = arith.constant 0 : index
    %0 = vector.load %arg1[%c0, %c0_0, %c0_1] : memref<1x20x320xf32, #tpu.memory_space<vmem>>, vector<1x20x320xf32>
    %1 = vector.shape_cast %0 : vector<1x20x320xf32> to vector<20x320xf32>
    %c0_2 = arith.constant 0 : index
    %c0_3 = arith.constant 0 : index
    %2 = vector.load %arg7[%c0_2, %c0_3] : memref<20x320xf32, #tpu.memory_space<vmem>>, vector<20x320xf32>
    tpu.vector_store %arg7[%c0_2, %c0_3], %1 {strides = array<i32>} : memref<20x320xf32, #tpu.memory_space<vmem>>, vector<20x320xf32>,
    %cst = arith.constant 0.000000e+00 : f32
    %3 = vector.broadcast %cst : f32 to vector<16x256xf32>
    %c0_4 = arith.constant 0 : index
    %c0_5 = arith.constant 0 : index
    %4 = vector.load %arg7[%c0_4, %c0_5] : memref<20x320xf32, #tpu.memory_space<vmem>>, vector<16x320xf32>
    %5 = arith.truncf %4 : vector<16x320xf32> to vector<16x320xbf16>
    %c0_6 = arith.constant 0 : index
    %c0_7 = arith.constant 0 : index
    %c0_8 = arith.constant 0 : index
    %c0_9 = arith.constant 0 : index
    %6 = vector.load %arg2[%c0_6, %c0_7, %c0_8, %c0_9] : memref<8x5x320x256xbf16, #tpu.memory_space<vmem>>, vector<1x1x320x256xbf16>
    %7 = vector.shape_cast %6 : vector<1x1x320x256xbf16> to vector<320x256xbf16>
    %cst_10 = arith.constant dense<0.000000e+00> : vector<16x256xf32>
    %8 = tpu.matmul %5, %7, %cst_10 {dimension_numbers = #tpu.dot_dimension_numbers<[1], [0], [0], [1], [0, 0, 1, 1], [], []>} : vector<16x320xbf16>, vector<320x256xbf16>, vector<16x256xf32> -> vector<16x256xf32>
    %9 = arith.addf %3, %8 : vector<16x256xf32>
    %c1 = arith.constant 1 : index
    %c0_11 = arith.constant 0 : index
    %10 = vector.load %arg7[%c1, %c0_11] : memref<20x320xf32, #tpu.memory_space<vmem>>, vector<16x320xf32>
    %11 = arith.truncf %10 : vector<16x320xf32> to vector<16x320xbf16>
    %c0_12 = arith.constant 0 : index
    %c1_13 = arith.constant 1 : index
    %c0_14 = arith.constant 0 : index
    %c0_15 = arith.constant 0 : index
    %12 = vector.load %arg2[%c0_12, %c1_13, %c0_14, %c0_15] : memref<8x5x320x256xbf16, #tpu.memory_space<vmem>>, vector<1x1x320x256xbf16>
    %13 = vector.shape_cast %12 : vector<1x1x320x256xbf16> to vector<320x256xbf16>
    %cst_16 = arith.constant dense<0.000000e+00> : vector<16x256xf32>
    %14 = tpu.matmul %11, %13, %cst_16 {dimension_numbers = #tpu.dot_dimension_numbers<[1], [0], [0], [1], [0, 0, 1, 1], [], []>} : vector<16x320xbf16>, vector<320x256xbf16>, vector<16x256xf32> -> vector<16x256xf32>
    %15 = arith.addf %9, %14 : vector<16x256xf32>
    %c2 = arith.constant 2 : index
    %c0_17 = arith.constant 0 : index
    %16 = vector.load %arg7[%c2, %c0_17] : memref<20x320xf32, #tpu.memory_space<vmem>>, vector<16x320xf32>
    %17 = arith.truncf %16 : vector<16x320xf32> to vector<16x320xbf16>
    %c0_18 = arith.constant 0 : index
    %c2_19 = arith.constant 2 : index
    %c0_20 = arith.constant 0 : index
    %c0_21 = arith.constant 0 : index
    %18 = vector.load %arg2[%c0_18, %c2_19, %c0_20, %c0_21] : memref<8x5x320x256xbf16, #tpu.memory_space<vmem>>, vector<1x1x320x256xbf16>
    %19 = vector.shape_cast %18 : vector<1x1x320x256xbf16> to vector<320x256xbf16>
    %cst_22 = arith.constant dense<0.000000e+00> : vector<16x256xf32>
    %20 = tpu.matmul %17, %19, %cst_22 {dimension_numbers = #tpu.dot_dimension_numbers<[1], [0], [0], [1], [0, 0, 1, 1], [], []>} : vector<16x320xbf16>, vector<320x256xbf16>, vector<16x256xf32> -> vector<16x256xf32>
    %21 = arith.addf %15, %20 : vector<16x256xf32>
    %c3 = arith.constant 3 : index
    %c0_23 = arith.constant 0 : index
    %22 = vector.load %arg7[%c3, %c0_23] : memref<20x320xf32, #tpu.memory_space<vmem>>, vector<16x320xf32>
    %23 = arith.truncf %22 : vector<16x320xf32> to vector<16x320xbf16>
    %c0_24 = arith.constant 0 : index
    %c3_25 = arith.constant 3 : index
    %c0_26 = arith.constant 0 : index
    %c0_27 = arith.constant 0 : index
    %24 = vector.load %arg2[%c0_24, %c3_25, %c0_26, %c0_27] : memref<8x5x320x256xbf16, #tpu.memory_space<vmem>>, vector<1x1x320x256xbf16>
    %25 = vector.shape_cast %24 : vector<1x1x320x256xbf16> to vector<320x256xbf16>
    %cst_28 = arith.constant dense<0.000000e+00> : vector<16x256xf32>
    %26 = tpu.matmul %23, %25, %cst_28 {dimension_numbers = #tpu.dot_dimension_numbers<[1], [0], [0], [1], [0, 0, 1, 1], [], []>} : vector<16x320xbf16>, vector<320x256xbf16>, vector<16x256xf32> -> vector<16x256xf32>
    %27 = arith.addf %21, %26 : vector<16x256xf32>
    %c4 = arith.constant 4 : index
    %c0_29 = arith.constant 0 : index
    %28 = vector.load %arg7[%c4, %c0_29] : memref<20x320xf32, #tpu.memory_space<vmem>>, vector<16x320xf32>
    %29 = arith.truncf %28 : vector<16x320xf32> to vector<16x320xbf16>
    %c0_30 = arith.constant 0 : index
    %c4_31 = arith.constant 4 : index
    %c0_32 = arith.constant 0 : index
    %c0_33 = arith.constant 0 : index
    %30 = vector.load %arg2[%c0_30, %c4_31, %c0_32, %c0_33] : memref<8x5x320x256xbf16, #tpu.memory_space<vmem>>, vector<1x1x320x256xbf16>
    %31 = vector.shape_cast %30 : vector<1x1x320x256xbf16> to vector<320x256xbf16>
    %cst_34 = arith.constant dense<0.000000e+00> : vector<16x256xf32>
    %32 = tpu.matmul %29, %31, %cst_34 {dimension_numbers = #tpu.dot_dimension_numbers<[1], [0], [0], [1], [0, 0, 1, 1], [], []>} : vector<16x320xbf16>, vector<320x256xbf16>, vector<16x256xf32> -> vector<16x256xf32>
    %33 = arith.addf %27, %32 : vector<16x256xf32>
    %c0_35 = arith.constant 0 : index
    %c0_36 = arith.constant 0 : index
    %c0_37 = arith.constant 0 : index
    %34 = vector.load %arg3[%c0_35, %c0_36, %c0_37] : memref<8x1x256xf32, #tpu.memory_space<vmem>>, vector<1x1x256xf32>
    %35 = vector.shape_cast %34 : vector<1x1x256xf32> to vector<1x256xf32>
    %36 = vector.broadcast %35 : vector<1x256xf32> to vector<16x256xf32>
    %37 = arith.addf %33, %36 : vector<16x256xf32>
    %cst_38 = arith.constant 0.000000e+00 : f32
    %38 = vector.broadcast %cst_38 : f32 to vector<16x256xf32>
    %39 = arith.maximumf %37, %38 : vector<16x256xf32>
    %c2_39 = arith.constant 2 : index
    %c32 = arith.constant 32 : index
    %40 = vector.load %arg7[%c2_39, %c32] : memref<20x320xf32, #tpu.memory_space<vmem>>, vector<16x256xf32>
    tpu.vector_store %arg7[%c2_39, %c32], %39 {strides = array<i32>} : memref<20x320xf32, #tpu.memory_space<vmem>>, vector<16x256xf32>,
    %cst_40 = arith.constant 0.000000e+00 : f32
    %41 = vector.broadcast %cst_40 : f32 to vector<16x256xf32>
    %c0_41 = arith.constant 0 : index
    %c0_42 = arith.constant 0 : index
    %42 = vector.load %arg7[%c0_41, %c0_42] : memref<20x320xf32, #tpu.memory_space<vmem>>, vector<16x320xf32>
    %43 = arith.truncf %42 : vector<16x320xf32> to vector<16x320xbf16>
    %c1_43 = arith.constant 1 : index
    %c0_44 = arith.constant 0 : index
    %c0_45 = arith.constant 0 : index
    %c0_46 = arith.constant 0 : index
    %44 = vector.load %arg2[%c1_43, %c0_44, %c0_45, %c0_46] : memref<8x5x320x256xbf16, #tpu.memory_space<vmem>>, vector<1x1x320x256xbf16>
    %45 = vector.shape_cast %44 : vector<1x1x320x256xbf16> to vector<320x256xbf16>
    %cst_47 = arith.constant dense<0.000000e+00> : vector<16x256xf32>
    %46 = tpu.matmul %43, %45, %cst_47 {dimension_numbers = #tpu.dot_dimension_numbers<[1], [0], [0], [1], [0, 0, 1, 1], [], []>} : vector<16x320xbf16>, vector<320x256xbf16>, vector<16x256xf32> -> vector<16x256xf32>
    %47 = arith.addf %41, %46 : vector<16x256xf32>
    %c1_48 = arith.constant 1 : index
    %c0_49 = arith.constant 0 : index
    %48 = vector.load %arg7[%c1_48, %c0_49] : memref<20x320xf32, #tpu.memory_space<vmem>>, vector<16x320xf32>
    %49 = arith.truncf %48 : vector<16x320xf32> to vector<16x320xbf16>
    %c1_50 = arith.constant 1 : index
    %c1_51 = arith.constant 1 : index
    %c0_52 = arith.constant 0 : index
    %c0_53 = arith.constant 0 : index
    %50 = vector.load %arg2[%c1_50, %c1_51, %c0_52, %c0_53] : memref<8x5x320x256xbf16, #tpu.memory_space<vmem>>, vector<1x1x320x256xbf16>
    %51 = vector.shape_cast %50 : vector<1x1x320x256xbf16> to vector<320x256xbf16>
    %cst_54 = arith.constant dense<0.000000e+00> : vector<16x256xf32>
    %52 = tpu.matmul %49, %51, %cst_54 {dimension_numbers = #tpu.dot_dimension_numbers<[1], [0], [0], [1], [0, 0, 1, 1], [], []>} : vector<16x320xbf16>, vector<320x256xbf16>, vector<16x256xf32> -> vector<16x256xf32>
    %53 = arith.addf %47, %52 : vector<16x256xf32>
    %c2_55 = arith.constant 2 : index
    %c0_56 = arith.constant 0 : index
    %54 = vector.load %arg7[%c2_55, %c0_56] : memref<20x320xf32, #tpu.memory_space<vmem>>, vector<16x320xf32>
    %55 = arith.truncf %54 : vector<16x320xf32> to vector<16x320xbf16>
    %c1_57 = arith.constant 1 : index
    %c2_58 = arith.constant 2 : index
    %c0_59 = arith.constant 0 : index
    %c0_60 = arith.constant 0 : index
    %56 = vector.load %arg2[%c1_57, %c2_58, %c0_59, %c0_60] : memref<8x5x320x256xbf16, #tpu.memory_space<vmem>>, vector<1x1x320x256xbf16>
    %57 = vector.shape_cast %56 : vector<1x1x320x256xbf16> to vector<320x256xbf16>
    %cst_61 = arith.constant dense<0.000000e+00> : vector<16x256xf32>
    %58 = tpu.matmul %55, %57, %cst_61 {dimension_numbers = #tpu.dot_dimension_numbers<[1], [0], [0], [1], [0, 0, 1, 1], [], []>} : vector<16x320xbf16>, vector<320x256xbf16>, vector<16x256xf32> -> vector<16x256xf32>
    %59 = arith.addf %53, %58 : vector<16x256xf32>
    %c3_62 = arith.constant 3 : index
    %c0_63 = arith.constant 0 : index
    %60 = vector.load %arg7[%c3_62, %c0_63] : memref<20x320xf32, #tpu.memory_space<vmem>>, vector<16x320xf32>
    %61 = arith.truncf %60 : vector<16x320xf32> to vector<16x320xbf16>
    %c1_64 = arith.constant 1 : index
    %c3_65 = arith.constant 3 : index
    %c0_66 = arith.constant 0 : index
    %c0_67 = arith.constant 0 : index
    %62 = vector.load %arg2[%c1_64, %c3_65, %c0_66, %c0_67] : memref<8x5x320x256xbf16, #tpu.memory_space<vmem>>, vector<1x1x320x256xbf16>
    %63 = vector.shape_cast %62 : vector<1x1x320x256xbf16> to vector<320x256xbf16>
    %cst_68 = arith.constant dense<0.000000e+00> : vector<16x256xf32>
    %64 = tpu.matmul %61, %63, %cst_68 {dimension_numbers = #tpu.dot_dimension_numbers<[1], [0], [0], [1], [0, 0, 1, 1], [], []>} : vector<16x320xbf16>, vector<320x256xbf16>, vector<16x256xf32> -> vector<16x256xf32>
    %65 = arith.addf %59, %64 : vector<16x256xf32>
    %c4_69 = arith.constant 4 : index
    %c0_70 = arith.constant 0 : index
    %66 = vector.load %arg7[%c4_69, %c0_70] : memref<20x320xf32, #tpu.memory_space<vmem>>, vector<16x320xf32>
    %67 = arith.truncf %66 : vector<16x320xf32> to vector<16x320xbf16>
    %c1_71 = arith.constant 1 : index
    %c4_72 = arith.constant 4 : index
    %c0_73 = arith.constant 0 : index
    %c0_74 = arith.constant 0 : index
    %68 = vector.load %arg2[%c1_71, %c4_72, %c0_73, %c0_74] : memref<8x5x320x256xbf16, #tpu.memory_space<vmem>>, vector<1x1x320x256xbf16>
    %69 = vector.shape_cast %68 : vector<1x1x320x256xbf16> to vector<320x256xbf16>
    %cst_75 = arith.constant dense<0.000000e+00> : vector<16x256xf32>
    %70 = tpu.matmul %67, %69, %cst_75 {dimension_numbers = #tpu.dot_dimension_numbers<[1], [0], [0], [1], [0, 0, 1, 1], [], []>} : vector<16x320xbf16>, vector<320x256xbf16>, vector<16x256xf32> -> vector<16x256xf32>
    %71 = arith.addf %65, %70 : vector<16x256xf32>
    %c1_76 = arith.constant 1 : index
    %c0_77 = arith.constant 0 : index
    %c0_78 = arith.constant 0 : index
    %72 = vector.load %arg3[%c1_76, %c0_77, %c0_78] : memref<8x1x256xf32, #tpu.memory_space<vmem>>, vector<1x1x256xf32>
    %73 = vector.shape_cast %72 : vector<1x1x256xf32> to vector<1x256xf32>
    %74 = vector.broadcast %73 : vector<1x256xf32> to vector<16x256xf32>
    %75 = arith.addf %71, %74 : vector<16x256xf32>
    %cst_79 = arith.constant 0.000000e+00 : f32
    %76 = vector.broadcast %cst_79 : f32 to vector<16x256xf32>
    %77 = arith.maximumf %75, %76 : vector<16x256xf32>
    %c2_80 = arith.constant 2 : index
    %c32_81 = arith.constant 32 : index
    %78 = vector.load %arg7[%c2_80, %c32_81] : memref<20x320xf32, #tpu.memory_space<vmem>>, vector<16x256xf32>
    tpu.vector_store %arg7[%c2_80, %c32_81], %77 {strides = array<i32>} : memref<20x320xf32, #tpu.memory_space<vmem>>, vector<16x256xf32>,
    %cst_82 = arith.constant 0.000000e+00 : f32
    %79 = vector.broadcast %cst_82 : f32 to vector<16x256xf32>
    %c0_83 = arith.constant 0 : index
    %c0_84 = arith.constant 0 : index
    %80 = vector.load %arg7[%c0_83, %c0_84] : memref<20x320xf32, #tpu.memory_space<vmem>>, vector<16x320xf32>
    %81 = arith.truncf %80 : vector<16x320xf32> to vector<16x320xbf16>
    %c2_85 = arith.constant 2 : index
    %c0_86 = arith.constant 0 : index
    %c0_87 = arith.constant 0 : index
    %c0_88 = arith.constant 0 : index
    %82 = vector.load %arg2[%c2_85, %c0_86, %c0_87, %c0_88] : memref<8x5x320x256xbf16, #tpu.memory_space<vmem>>, vector<1x1x320x256xbf16>
    %83 = vector.shape_cast %82 : vector<1x1x320x256xbf16> to vector<320x256xbf16>
    %cst_89 = arith.constant dense<0.000000e+00> : vector<16x256xf32>
    %84 = tpu.matmul %81, %83, %cst_89 {dimension_numbers = #tpu.dot_dimension_numbers<[1], [0], [0], [1], [0, 0, 1, 1], [], []>} : vector<16x320xbf16>, vector<320x256xbf16>, vector<16x256xf32> -> vector<16x256xf32>
    %85 = arith.addf %79, %84 : vector<16x256xf32>
    %c1_90 = arith.constant 1 : index
    %c0_91 = arith.constant 0 : index
    %86 = vector.load %arg7[%c1_90, %c0_91] : memref<20x320xf32, #tpu.memory_space<vmem>>, vector<16x320xf32>
    %87 = arith.truncf %86 : vector<16x320xf32> to vector<16x320xbf16>
    %c2_92 = arith.constant 2 : index
    %c1_93 = arith.constant 1 : index
    %c0_94 = arith.constant 0 : index
    %c0_95 = arith.constant 0 : index
    %88 = vector.load %arg2[%c2_92, %c1_93, %c0_94, %c0_95] : memref<8x5x320x256xbf16, #tpu.memory_space<vmem>>, vector<1x1x320x256xbf16>
    %89 = vector.shape_cast %88 : vector<1x1x320x256xbf16> to vector<320x256xbf16>
    %cst_96 = arith.constant dense<0.000000e+00> : vector<16x256xf32>
    %90 = tpu.matmul %87, %89, %cst_96 {dimension_numbers = #tpu.dot_dimension_numbers<[1], [0], [0], [1], [0, 0, 1, 1], [], []>} : vector<16x320xbf16>, vector<320x256xbf16>, vector<16x256xf32> -> vector<16x256xf32>
    %91 = arith.addf %85, %90 : vector<16x256xf32>
    %c2_97 = arith.constant 2 : index
    %c0_98 = arith.constant 0 : index
    %92 = vector.load %arg7[%c2_97, %c0_98] : memref<20x320xf32, #tpu.memory_space<vmem>>, vector<16x320xf32>
    %93 = arith.truncf %92 : vector<16x320xf32> to vector<16x320xbf16>
    %c2_99 = arith.constant 2 : index
    %c2_100 = arith.constant 2 : index
    %c0_101 = arith.constant 0 : index
    %c0_102 = arith.constant 0 : index
    %94 = vector.load %arg2[%c2_99, %c2_100, %c0_101, %c0_102] : memref<8x5x320x256xbf16, #tpu.memory_space<vmem>>, vector<1x1x320x256xbf16>
    %95 = vector.shape_cast %94 : vector<1x1x320x256xbf16> to vector<320x256xbf16>
    %cst_103 = arith.constant dense<0.000000e+00> : vector<16x256xf32>
    %96 = tpu.matmul %93, %95, %cst_103 {dimension_numbers = #tpu.dot_dimension_numbers<[1], [0], [0], [1], [0, 0, 1, 1], [], []>} : vector<16x320xbf16>, vector<320x256xbf16>, vector<16x256xf32> -> vector<16x256xf32>
    %97 = arith.addf %91, %96 : vector<16x256xf32>
    %c3_104 = arith.constant 3 : index
    %c0_105 = arith.constant 0 : index
    %98 = vector.load %arg7[%c3_104, %c0_105] : memref<20x320xf32, #tpu.memory_space<vmem>>, vector<16x320xf32>
    %99 = arith.truncf %98 : vector<16x320xf32> to vector<16x320xbf16>
    %c2_106 = arith.constant 2 : index
    %c3_107 = arith.constant 3 : index
    %c0_108 = arith.constant 0 : index
    %c0_109 = arith.constant 0 : index
    %100 = vector.load %arg2[%c2_106, %c3_107, %c0_108, %c0_109] : memref<8x5x320x256xbf16, #tpu.memory_space<vmem>>, vector<1x1x320x256xbf16>
    %101 = vector.shape_cast %100 : vector<1x1x320x256xbf16> to vector<320x256xbf16>
    %cst_110 = arith.constant dense<0.000000e+00> : vector<16x256xf32>
    %102 = tpu.matmul %99, %101, %cst_110 {dimension_numbers = #tpu.dot_dimension_numbers<[1], [0], [0], [1], [0, 0, 1, 1], [], []>} : vector<16x320xbf16>, vector<320x256xbf16>, vector<16x256xf32> -> vector<16x256xf32>
    %103 = arith.addf %97, %102 : vector<16x256xf32>
    %c4_111 = arith.constant 4 : index
    %c0_112 = arith.constant 0 : index
    %104 = vector.load %arg7[%c4_111, %c0_112] : memref<20x320xf32, #tpu.memory_space<vmem>>, vector<16x320xf32>
    %105 = arith.truncf %104 : vector<16x320xf32> to vector<16x320xbf16>
    %c2_113 = arith.constant 2 : index
    %c4_114 = arith.constant 4 : index
    %c0_115 = arith.constant 0 : index
    %c0_116 = arith.constant 0 : index
    %106 = vector.load %arg2[%c2_113, %c4_114, %c0_115, %c0_116] : memref<8x5x320x256xbf16, #tpu.memory_space<vmem>>, vector<1x1x320x256xbf16>
    %107 = vector.shape_cast %106 : vector<1x1x320x256xbf16> to vector<320x256xbf16>
    %cst_117 = arith.constant dense<0.000000e+00> : vector<16x256xf32>
    %108 = tpu.matmul %105, %107, %cst_117 {dimension_numbers = #tpu.dot_dimension_numbers<[1], [0], [0], [1], [0, 0, 1, 1], [], []>} : vector<16x320xbf16>, vector<320x256xbf16>, vector<16x256xf32> -> vector<16x256xf32>
    %109 = arith.addf %103, %108 : vector<16x256xf32>
    %c2_118 = arith.constant 2 : index
    %c0_119 = arith.constant 0 : index
    %c0_120 = arith.constant 0 : index
    %110 = vector.load %arg3[%c2_118, %c0_119, %c0_120] : memref<8x1x256xf32, #tpu.memory_space<vmem>>, vector<1x1x256xf32>
    %111 = vector.shape_cast %110 : vector<1x1x256xf32> to vector<1x256xf32>
    %112 = vector.broadcast %111 : vector<1x256xf32> to vector<16x256xf32>
    %113 = arith.addf %109, %112 : vector<16x256xf32>
    %cst_121 = arith.constant 0.000000e+00 : f32
    %114 = vector.broadcast %cst_121 : f32 to vector<16x256xf32>
    %115 = arith.maximumf %113, %114 : vector<16x256xf32>
    %c2_122 = arith.constant 2 : index
    %c32_123 = arith.constant 32 : index
    %116 = vector.load %arg7[%c2_122, %c32_123] : memref<20x320xf32, #tpu.memory_space<vmem>>, vector<16x256xf32>
    tpu.vector_store %arg7[%c2_122, %c32_123], %115 {strides = array<i32>} : memref<20x320xf32, #tpu.memory_space<vmem>>, vector<16x256xf32>,
    %cst_124 = arith.constant 0.000000e+00 : f32
    %117 = vector.broadcast %cst_124 : f32 to vector<16x256xf32>
    %c0_125 = arith.constant 0 : index
    %c0_126 = arith.constant 0 : index
    %118 = vector.load %arg7[%c0_125, %c0_126] : memref<20x320xf32, #tpu.memory_space<vmem>>, vector<16x320xf32>
    %119 = arith.truncf %118 : vector<16x320xf32> to vector<16x320xbf16>
    %c3_127 = arith.constant 3 : index
    %c0_128 = arith.constant 0 : index
    %c0_129 = arith.constant 0 : index
    %c0_130 = arith.constant 0 : index
    %120 = vector.load %arg2[%c3_127, %c0_128, %c0_129, %c0_130] : memref<8x5x320x256xbf16, #tpu.memory_space<vmem>>, vector<1x1x320x256xbf16>
    %121 = vector.shape_cast %120 : vector<1x1x320x256xbf16> to vector<320x256xbf16>
    %cst_131 = arith.constant dense<0.000000e+00> : vector<16x256xf32>
    %122 = tpu.matmul %119, %121, %cst_131 {dimension_numbers = #tpu.dot_dimension_numbers<[1], [0], [0], [1], [0, 0, 1, 1], [], []>} : vector<16x320xbf16>, vector<320x256xbf16>, vector<16x256xf32> -> vector<16x256xf32>
    %123 = arith.addf %117, %122 : vector<16x256xf32>
    %c1_132 = arith.constant 1 : index
    %c0_133 = arith.constant 0 : index
    %124 = vector.load %arg7[%c1_132, %c0_133] : memref<20x320xf32, #tpu.memory_space<vmem>>, vector<16x320xf32>
    %125 = arith.truncf %124 : vector<16x320xf32> to vector<16x320xbf16>
    %c3_134 = arith.constant 3 : index
    %c1_135 = arith.constant 1 : index
    %c0_136 = arith.constant 0 : index
    %c0_137 = arith.constant 0 : index
    %126 = vector.load %arg2[%c3_134, %c1_135, %c0_136, %c0_137] : memref<8x5x320x256xbf16, #tpu.memory_space<vmem>>, vector<1x1x320x256xbf16>
    %127 = vector.shape_cast %126 : vector<1x1x320x256xbf16> to vector<320x256xbf16>
    %cst_138 = arith.constant dense<0.000000e+00> : vector<16x256xf32>
    %128 = tpu.matmul %125, %127, %cst_138 {dimension_numbers = #tpu.dot_dimension_numbers<[1], [0], [0], [1], [0, 0, 1, 1], [], []>} : vector<16x320xbf16>, vector<320x256xbf16>, vector<16x256xf32> -> vector<16x256xf32>
    %129 = arith.addf %123, %128 : vector<16x256xf32>
    %c2_139 = arith.constant 2 : index
    %c0_140 = arith.constant 0 : index
    %130 = vector.load %arg7[%c2_139, %c0_140] : memref<20x320xf32, #tpu.memory_space<vmem>>, vector<16x320xf32>
    %131 = arith.truncf %130 : vector<16x320xf32> to vector<16x320xbf16>
    %c3_141 = arith.constant 3 : index
    %c2_142 = arith.constant 2 : index
    %c0_143 = arith.constant 0 : index
    %c0_144 = arith.constant 0 : index
    %132 = vector.load %arg2[%c3_141, %c2_142, %c0_143, %c0_144] : memref<8x5x320x256xbf16, #tpu.memory_space<vmem>>, vector<1x1x320x256xbf16>
    %133 = vector.shape_cast %132 : vector<1x1x320x256xbf16> to vector<320x256xbf16>
    %cst_145 = arith.constant dense<0.000000e+00> : vector<16x256xf32>
    %134 = tpu.matmul %131, %133, %cst_145 {dimension_numbers = #tpu.dot_dimension_numbers<[1], [0], [0], [1], [0, 0, 1, 1], [], []>} : vector<16x320xbf16>, vector<320x256xbf16>, vector<16x256xf32> -> vector<16x256xf32>
    %135 = arith.addf %129, %134 : vector<16x256xf32>
    %c3_146 = arith.constant 3 : index
    %c0_147 = arith.constant 0 : index
    %136 = vector.load %arg7[%c3_146, %c0_147] : memref<20x320xf32, #tpu.memory_space<vmem>>, vector<16x320xf32>
    %137 = arith.truncf %136 : vector<16x320xf32> to vector<16x320xbf16>
    %c3_148 = arith.constant 3 : index
    %c3_149 = arith.constant 3 : index
    %c0_150 = arith.constant 0 : index
    %c0_151 = arith.constant 0 : index
    %138 = vector.load %arg2[%c3_148, %c3_149, %c0_150, %c0_151] : memref<8x5x320x256xbf16, #tpu.memory_space<vmem>>, vector<1x1x320x256xbf16>
    %139 = vector.shape_cast %138 : vector<1x1x320x256xbf16> to vector<320x256xbf16>
    %cst_152 = arith.constant dense<0.000000e+00> : vector<16x256xf32>
    %140 = tpu.matmul %137, %139, %cst_152 {dimension_numbers = #tpu.dot_dimension_numbers<[1], [0], [0], [1], [0, 0, 1, 1], [], []>} : vector<16x320xbf16>, vector<320x256xbf16>, vector<16x256xf32> -> vector<16x256xf32>
    %141 = arith.addf %135, %140 : vector<16x256xf32>
    %c4_153 = arith.constant 4 : index
    %c0_154 = arith.constant 0 : index
    %142 = vector.load %arg7[%c4_153, %c0_154] : memref<20x320xf32, #tpu.memory_space<vmem>>, vector<16x320xf32>
    %143 = arith.truncf %142 : vector<16x320xf32> to vector<16x320xbf16>
    %c3_155 = arith.constant 3 : index
    %c4_156 = arith.constant 4 : index
    %c0_157 = arith.constant 0 : index
    %c0_158 = arith.constant 0 : index
    %144 = vector.load %arg2[%c3_155, %c4_156, %c0_157, %c0_158] : memref<8x5x320x256xbf16, #tpu.memory_space<vmem>>, vector<1x1x320x256xbf16>
    %145 = vector.shape_cast %144 : vector<1x1x320x256xbf16> to vector<320x256xbf16>
    %cst_159 = arith.constant dense<0.000000e+00> : vector<16x256xf32>
    %146 = tpu.matmul %143, %145, %cst_159 {dimension_numbers = #tpu.dot_dimension_numbers<[1], [0], [0], [1], [0, 0, 1, 1], [], []>} : vector<16x320xbf16>, vector<320x256xbf16>, vector<16x256xf32> -> vector<16x256xf32>
    %147 = arith.addf %141, %146 : vector<16x256xf32>
    %c3_160 = arith.constant 3 : index
    %c0_161 = arith.constant 0 : index
    %c0_162 = arith.constant 0 : index
    %148 = vector.load %arg3[%c3_160, %c0_161, %c0_162] : memref<8x1x256xf32, #tpu.memory_space<vmem>>, vector<1x1x256xf32>
    %149 = vector.shape_cast %148 : vector<1x1x256xf32> to vector<1x256xf32>
    %150 = vector.broadcast %149 : vector<1x256xf32> to vector<16x256xf32>
    %151 = arith.addf %147, %150 : vector<16x256xf32>
    %cst_163 = arith.constant 0.000000e+00 : f32
    %152 = vector.broadcast %cst_163 : f32 to vector<16x256xf32>
    %153 = arith.maximumf %151, %152 : vector<16x256xf32>
    %c2_164 = arith.constant 2 : index
    %c32_165 = arith.constant 32 : index
    %154 = vector.load %arg7[%c2_164, %c32_165] : memref<20x320xf32, #tpu.memory_space<vmem>>, vector<16x256xf32>
    tpu.vector_store %arg7[%c2_164, %c32_165], %153 {strides = array<i32>} : memref<20x320xf32, #tpu.memory_space<vmem>>, vector<16x256xf32>,
    %cst_166 = arith.constant 0.000000e+00 : f32
    %155 = vector.broadcast %cst_166 : f32 to vector<16x256xf32>
    %c0_167 = arith.constant 0 : index
    %c0_168 = arith.constant 0 : index
    %156 = vector.load %arg7[%c0_167, %c0_168] : memref<20x320xf32, #tpu.memory_space<vmem>>, vector<16x320xf32>
    %157 = arith.truncf %156 : vector<16x320xf32> to vector<16x320xbf16>
    %c4_169 = arith.constant 4 : index
    %c0_170 = arith.constant 0 : index
    %c0_171 = arith.constant 0 : index
    %c0_172 = arith.constant 0 : index
    %158 = vector.load %arg2[%c4_169, %c0_170, %c0_171, %c0_172] : memref<8x5x320x256xbf16, #tpu.memory_space<vmem>>, vector<1x1x320x256xbf16>
    %159 = vector.shape_cast %158 : vector<1x1x320x256xbf16> to vector<320x256xbf16>
    %cst_173 = arith.constant dense<0.000000e+00> : vector<16x256xf32>
    %160 = tpu.matmul %157, %159, %cst_173 {dimension_numbers = #tpu.dot_dimension_numbers<[1], [0], [0], [1], [0, 0, 1, 1], [], []>} : vector<16x320xbf16>, vector<320x256xbf16>, vector<16x256xf32> -> vector<16x256xf32>
    %161 = arith.addf %155, %160 : vector<16x256xf32>
    %c1_174 = arith.constant 1 : index
    %c0_175 = arith.constant 0 : index
    %162 = vector.load %arg7[%c1_174, %c0_175] : memref<20x320xf32, #tpu.memory_space<vmem>>, vector<16x320xf32>
    %163 = arith.truncf %162 : vector<16x320xf32> to vector<16x320xbf16>
    %c4_176 = arith.constant 4 : index
    %c1_177 = arith.constant 1 : index
    %c0_178 = arith.constant 0 : index
    %c0_179 = arith.constant 0 : index
    %164 = vector.load %arg2[%c4_176, %c1_177, %c0_178, %c0_179] : memref<8x5x320x256xbf16, #tpu.memory_space<vmem>>, vector<1x1x320x256xbf16>
    %165 = vector.shape_cast %164 : vector<1x1x320x256xbf16> to vector<320x256xbf16>
    %cst_180 = arith.constant dense<0.000000e+00> : vector<16x256xf32>
    %166 = tpu.matmul %163, %165, %cst_180 {dimension_numbers = #tpu.dot_dimension_numbers<[1], [0], [0], [1], [0, 0, 1, 1], [], []>} : vector<16x320xbf16>, vector<320x256xbf16>, vector<16x256xf32> -> vector<16x256xf32>
    %167 = arith.addf %161, %166 : vector<16x256xf32>
    %c2_181 = arith.constant 2 : index
    %c0_182 = arith.constant 0 : index
    %168 = vector.load %arg7[%c2_181, %c0_182] : memref<20x320xf32, #tpu.memory_space<vmem>>, vector<16x320xf32>
    %169 = arith.truncf %168 : vector<16x320xf32> to vector<16x320xbf16>
    %c4_183 = arith.constant 4 : index
    %c2_184 = arith.constant 2 : index
    %c0_185 = arith.constant 0 : index
    %c0_186 = arith.constant 0 : index
    %170 = vector.load %arg2[%c4_183, %c2_184, %c0_185, %c0_186] : memref<8x5x320x256xbf16, #tpu.memory_space<vmem>>, vector<1x1x320x256xbf16>
    %171 = vector.shape_cast %170 : vector<1x1x320x256xbf16> to vector<320x256xbf16>
    %cst_187 = arith.constant dense<0.000000e+00> : vector<16x256xf32>
    %172 = tpu.matmul %169, %171, %cst_187 {dimension_numbers = #tpu.dot_dimension_numbers<[1], [0], [0], [1], [0, 0, 1, 1], [], []>} : vector<16x320xbf16>, vector<320x256xbf16>, vector<16x256xf32> -> vector<16x256xf32>
    %173 = arith.addf %167, %172 : vector<16x256xf32>
    %c3_188 = arith.constant 3 : index
    %c0_189 = arith.constant 0 : index
    %174 = vector.load %arg7[%c3_188, %c0_189] : memref<20x320xf32, #tpu.memory_space<vmem>>, vector<16x320xf32>
    %175 = arith.truncf %174 : vector<16x320xf32> to vector<16x320xbf16>
    %c4_190 = arith.constant 4 : index
    %c3_191 = arith.constant 3 : index
    %c0_192 = arith.constant 0 : index
    %c0_193 = arith.constant 0 : index
    %176 = vector.load %arg2[%c4_190, %c3_191, %c0_192, %c0_193] : memref<8x5x320x256xbf16, #tpu.memory_space<vmem>>, vector<1x1x320x256xbf16>
    %177 = vector.shape_cast %176 : vector<1x1x320x256xbf16> to vector<320x256xbf16>
    %cst_194 = arith.constant dense<0.000000e+00> : vector<16x256xf32>
    %178 = tpu.matmul %175, %177, %cst_194 {dimension_numbers = #tpu.dot_dimension_numbers<[1], [0], [0], [1], [0, 0, 1, 1], [], []>} : vector<16x320xbf16>, vector<320x256xbf16>, vector<16x256xf32> -> vector<16x256xf32>
    %179 = arith.addf %173, %178 : vector<16x256xf32>
    %c4_195 = arith.constant 4 : index
    %c0_196 = arith.constant 0 : index
    %180 = vector.load %arg7[%c4_195, %c0_196] : memref<20x320xf32, #tpu.memory_space<vmem>>, vector<16x320xf32>
    %181 = arith.truncf %180 : vector<16x320xf32> to vector<16x320xbf16>
    %c4_197 = arith.constant 4 : index
    %c4_198 = arith.constant 4 : index
    %c0_199 = arith.constant 0 : index
    %c0_200 = arith.constant 0 : index
    %182 = vector.load %arg2[%c4_197, %c4_198, %c0_199, %c0_200] : memref<8x5x320x256xbf16, #tpu.memory_space<vmem>>, vector<1x1x320x256xbf16>
    %183 = vector.shape_cast %182 : vector<1x1x320x256xbf16> to vector<320x256xbf16>
    %cst_201 = arith.constant dense<0.000000e+00> : vector<16x256xf32>
    %184 = tpu.matmul %181, %183, %cst_201 {dimension_numbers = #tpu.dot_dimension_numbers<[1], [0], [0], [1], [0, 0, 1, 1], [], []>} : vector<16x320xbf16>, vector<320x256xbf16>, vector<16x256xf32> -> vector<16x256xf32>
    %185 = arith.addf %179, %184 : vector<16x256xf32>
    %c4_202 = arith.constant 4 : index
    %c0_203 = arith.constant 0 : index
    %c0_204 = arith.constant 0 : index
    %186 = vector.load %arg3[%c4_202, %c0_203, %c0_204] : memref<8x1x256xf32, #tpu.memory_space<vmem>>, vector<1x1x256xf32>
    %187 = vector.shape_cast %186 : vector<1x1x256xf32> to vector<1x256xf32>
    %188 = vector.broadcast %187 : vector<1x256xf32> to vector<16x256xf32>
    %189 = arith.addf %185, %188 : vector<16x256xf32>
    %cst_205 = arith.constant 0.000000e+00 : f32
    %190 = vector.broadcast %cst_205 : f32 to vector<16x256xf32>
    %191 = arith.maximumf %189, %190 : vector<16x256xf32>
    %c2_206 = arith.constant 2 : index
    %c32_207 = arith.constant 32 : index
    %192 = vector.load %arg7[%c2_206, %c32_207] : memref<20x320xf32, #tpu.memory_space<vmem>>, vector<16x256xf32>
    tpu.vector_store %arg7[%c2_206, %c32_207], %191 {strides = array<i32>} : memref<20x320xf32, #tpu.memory_space<vmem>>, vector<16x256xf32>,
    %cst_208 = arith.constant 0.000000e+00 : f32
    %193 = vector.broadcast %cst_208 : f32 to vector<16x256xf32>
    %c0_209 = arith.constant 0 : index
    %c0_210 = arith.constant 0 : index
    %194 = vector.load %arg7[%c0_209, %c0_210] : memref<20x320xf32, #tpu.memory_space<vmem>>, vector<16x320xf32>
    %195 = arith.truncf %194 : vector<16x320xf32> to vector<16x320xbf16>
    %c5 = arith.constant 5 : index
    %c0_211 = arith.constant 0 : index
    %c0_212 = arith.constant 0 : index
    %c0_213 = arith.constant 0 : index
    %196 = vector.load %arg2[%c5, %c0_211, %c0_212, %c0_213] : memref<8x5x320x256xbf16, #tpu.memory_space<vmem>>, vector<1x1x320x256xbf16>
    %197 = vector.shape_cast %196 : vector<1x1x320x256xbf16> to vector<320x256xbf16>
    %cst_214 = arith.constant dense<0.000000e+00> : vector<16x256xf32>
    %198 = tpu.matmul %195, %197, %cst_214 {dimension_numbers = #tpu.dot_dimension_numbers<[1], [0], [0], [1], [0, 0, 1, 1], [], []>} : vector<16x320xbf16>, vector<320x256xbf16>, vector<16x256xf32> -> vector<16x256xf32>
    %199 = arith.addf %193, %198 : vector<16x256xf32>
    %c1_215 = arith.constant 1 : index
    %c0_216 = arith.constant 0 : index
    %200 = vector.load %arg7[%c1_215, %c0_216] : memref<20x320xf32, #tpu.memory_space<vmem>>, vector<16x320xf32>
    %201 = arith.truncf %200 : vector<16x320xf32> to vector<16x320xbf16>
    %c5_217 = arith.constant 5 : index
    %c1_218 = arith.constant 1 : index
    %c0_219 = arith.constant 0 : index
    %c0_220 = arith.constant 0 : index
    %202 = vector.load %arg2[%c5_217, %c1_218, %c0_219, %c0_220] : memref<8x5x320x256xbf16, #tpu.memory_space<vmem>>, vector<1x1x320x256xbf16>
    %203 = vector.shape_cast %202 : vector<1x1x320x256xbf16> to vector<320x256xbf16>
    %cst_221 = arith.constant dense<0.000000e+00> : vector<16x256xf32>
    %204 = tpu.matmul %201, %203, %cst_221 {dimension_numbers = #tpu.dot_dimension_numbers<[1], [0], [0], [1], [0, 0, 1, 1], [], []>} : vector<16x320xbf16>, vector<320x256xbf16>, vector<16x256xf32> -> vector<16x256xf32>
    %205 = arith.addf %199, %204 : vector<16x256xf32>
    %c2_222 = arith.constant 2 : index
    %c0_223 = arith.constant 0 : index
    %206 = vector.load %arg7[%c2_222, %c0_223] : memref<20x320xf32, #tpu.memory_space<vmem>>, vector<16x320xf32>
    %207 = arith.truncf %206 : vector<16x320xf32> to vector<16x320xbf16>
    %c5_224 = arith.constant 5 : index
    %c2_225 = arith.constant 2 : index
    %c0_226 = arith.constant 0 : index
    %c0_227 = arith.constant 0 : index
    %208 = vector.load %arg2[%c5_224, %c2_225, %c0_226, %c0_227] : memref<8x5x320x256xbf16, #tpu.memory_space<vmem>>, vector<1x1x320x256xbf16>
    %209 = vector.shape_cast %208 : vector<1x1x320x256xbf16> to vector<320x256xbf16>
    %cst_228 = arith.constant dense<0.000000e+00> : vector<16x256xf32>
    %210 = tpu.matmul %207, %209, %cst_228 {dimension_numbers = #tpu.dot_dimension_numbers<[1], [0], [0], [1], [0, 0, 1, 1], [], []>} : vector<16x320xbf16>, vector<320x256xbf16>, vector<16x256xf32> -> vector<16x256xf32>
    %211 = arith.addf %205, %210 : vector<16x256xf32>
    %c3_229 = arith.constant 3 : index
    %c0_230 = arith.constant 0 : index
    %212 = vector.load %arg7[%c3_229, %c0_230] : memref<20x320xf32, #tpu.memory_space<vmem>>, vector<16x320xf32>
    %213 = arith.truncf %212 : vector<16x320xf32> to vector<16x320xbf16>
    %c5_231 = arith.constant 5 : index
    %c3_232 = arith.constant 3 : index
    %c0_233 = arith.constant 0 : index
    %c0_234 = arith.constant 0 : index
    %214 = vector.load %arg2[%c5_231, %c3_232, %c0_233, %c0_234] : memref<8x5x320x256xbf16, #tpu.memory_space<vmem>>, vector<1x1x320x256xbf16>
    %215 = vector.shape_cast %214 : vector<1x1x320x256xbf16> to vector<320x256xbf16>
    %cst_235 = arith.constant dense<0.000000e+00> : vector<16x256xf32>
    %216 = tpu.matmul %213, %215, %cst_235 {dimension_numbers = #tpu.dot_dimension_numbers<[1], [0], [0], [1], [0, 0, 1, 1], [], []>} : vector<16x320xbf16>, vector<320x256xbf16>, vector<16x256xf32> -> vector<16x256xf32>
    %217 = arith.addf %211, %216 : vector<16x256xf32>
    %c4_236 = arith.constant 4 : index
    %c0_237 = arith.constant 0 : index
    %218 = vector.load %arg7[%c4_236, %c0_237] : memref<20x320xf32, #tpu.memory_space<vmem>>, vector<16x320xf32>
    %219 = arith.truncf %218 : vector<16x320xf32> to vector<16x320xbf16>
    %c5_238 = arith.constant 5 : index
    %c4_239 = arith.constant 4 : index
    %c0_240 = arith.constant 0 : index
    %c0_241 = arith.constant 0 : index
    %220 = vector.load %arg2[%c5_238, %c4_239, %c0_240, %c0_241] : memref<8x5x320x256xbf16, #tpu.memory_space<vmem>>, vector<1x1x320x256xbf16>
    %221 = vector.shape_cast %220 : vector<1x1x320x256xbf16> to vector<320x256xbf16>
    %cst_242 = arith.constant dense<0.000000e+00> : vector<16x256xf32>
    %222 = tpu.matmul %219, %221, %cst_242 {dimension_numbers = #tpu.dot_dimension_numbers<[1], [0], [0], [1], [0, 0, 1, 1], [], []>} : vector<16x320xbf16>, vector<320x256xbf16>, vector<16x256xf32> -> vector<16x256xf32>
    %223 = arith.addf %217, %222 : vector<16x256xf32>
    %c5_243 = arith.constant 5 : index
    %c0_244 = arith.constant 0 : index
    %c0_245 = arith.constant 0 : index
    %224 = vector.load %arg3[%c5_243, %c0_244, %c0_245] : memref<8x1x256xf32, #tpu.memory_space<vmem>>, vector<1x1x256xf32>
    %225 = vector.shape_cast %224 : vector<1x1x256xf32> to vector<1x256xf32>
    %226 = vector.broadcast %225 : vector<1x256xf32> to vector<16x256xf32>
    %227 = arith.addf %223, %226 : vector<16x256xf32>
    %cst_246 = arith.constant 0.000000e+00 : f32
    %228 = vector.broadcast %cst_246 : f32 to vector<16x256xf32>
    %229 = arith.maximumf %227, %228 : vector<16x256xf32>
    %c2_247 = arith.constant 2 : index
    %c32_248 = arith.constant 32 : index
    %230 = vector.load %arg7[%c2_247, %c32_248] : memref<20x320xf32, #tpu.memory_space<vmem>>, vector<16x256xf32>
    tpu.vector_store %arg7[%c2_247, %c32_248], %229 {strides = array<i32>} : memref<20x320xf32, #tpu.memory_space<vmem>>, vector<16x256xf32>,
    %cst_249 = arith.constant 0.000000e+00 : f32
    %231 = vector.broadcast %cst_249 : f32 to vector<16x256xf32>
    %c0_250 = arith.constant 0 : index
    %c0_251 = arith.constant 0 : index
    %232 = vector.load %arg7[%c0_250, %c0_251] : memref<20x320xf32, #tpu.memory_space<vmem>>, vector<16x320xf32>
    %233 = arith.truncf %232 : vector<16x320xf32> to vector<16x320xbf16>
    %c6 = arith.constant 6 : index
    %c0_252 = arith.constant 0 : index
    %c0_253 = arith.constant 0 : index
    %c0_254 = arith.constant 0 : index
    %234 = vector.load %arg2[%c6, %c0_252, %c0_253, %c0_254] : memref<8x5x320x256xbf16, #tpu.memory_space<vmem>>, vector<1x1x320x256xbf16>
    %235 = vector.shape_cast %234 : vector<1x1x320x256xbf16> to vector<320x256xbf16>
    %cst_255 = arith.constant dense<0.000000e+00> : vector<16x256xf32>
    %236 = tpu.matmul %233, %235, %cst_255 {dimension_numbers = #tpu.dot_dimension_numbers<[1], [0], [0], [1], [0, 0, 1, 1], [], []>} : vector<16x320xbf16>, vector<320x256xbf16>, vector<16x256xf32> -> vector<16x256xf32>
    %237 = arith.addf %231, %236 : vector<16x256xf32>
    %c1_256 = arith.constant 1 : index
    %c0_257 = arith.constant 0 : index
    %238 = vector.load %arg7[%c1_256, %c0_257] : memref<20x320xf32, #tpu.memory_space<vmem>>, vector<16x320xf32>
    %239 = arith.truncf %238 : vector<16x320xf32> to vector<16x320xbf16>
    %c6_258 = arith.constant 6 : index
    %c1_259 = arith.constant 1 : index
    %c0_260 = arith.constant 0 : index
    %c0_261 = arith.constant 0 : index
    %240 = vector.load %arg2[%c6_258, %c1_259, %c0_260, %c0_261] : memref<8x5x320x256xbf16, #tpu.memory_space<vmem>>, vector<1x1x320x256xbf16>
    %241 = vector.shape_cast %240 : vector<1x1x320x256xbf16> to vector<320x256xbf16>
    %cst_262 = arith.constant dense<0.000000e+00> : vector<16x256xf32>
    %242 = tpu.matmul %239, %241, %cst_262 {dimension_numbers = #tpu.dot_dimension_numbers<[1], [0], [0], [1], [0, 0, 1, 1], [], []>} : vector<16x320xbf16>, vector<320x256xbf16>, vector<16x256xf32> -> vector<16x256xf32>
    %243 = arith.addf %237, %242 : vector<16x256xf32>
    %c2_263 = arith.constant 2 : index
    %c0_264 = arith.constant 0 : index
    %244 = vector.load %arg7[%c2_263, %c0_264] : memref<20x320xf32, #tpu.memory_space<vmem>>, vector<16x320xf32>
    %245 = arith.truncf %244 : vector<16x320xf32> to vector<16x320xbf16>
    %c6_265 = arith.constant 6 : index
    %c2_266 = arith.constant 2 : index
    %c0_267 = arith.constant 0 : index
    %c0_268 = arith.constant 0 : index
    %246 = vector.load %arg2[%c6_265, %c2_266, %c0_267, %c0_268] : memref<8x5x320x256xbf16, #tpu.memory_space<vmem>>, vector<1x1x320x256xbf16>
    %247 = vector.shape_cast %246 : vector<1x1x320x256xbf16> to vector<320x256xbf16>
    %cst_269 = arith.constant dense<0.000000e+00> : vector<16x256xf32>
    %248 = tpu.matmul %245, %247, %cst_269 {dimension_numbers = #tpu.dot_dimension_numbers<[1], [0], [0], [1], [0, 0, 1, 1], [], []>} : vector<16x320xbf16>, vector<320x256xbf16>, vector<16x256xf32> -> vector<16x256xf32>
    %249 = arith.addf %243, %248 : vector<16x256xf32>
    %c3_270 = arith.constant 3 : index
    %c0_271 = arith.constant 0 : index
    %250 = vector.load %arg7[%c3_270, %c0_271] : memref<20x320xf32, #tpu.memory_space<vmem>>, vector<16x320xf32>
    %251 = arith.truncf %250 : vector<16x320xf32> to vector<16x320xbf16>
    %c6_272 = arith.constant 6 : index
    %c3_273 = arith.constant 3 : index
    %c0_274 = arith.constant 0 : index
    %c0_275 = arith.constant 0 : index
    %252 = vector.load %arg2[%c6_272, %c3_273, %c0_274, %c0_275] : memref<8x5x320x256xbf16, #tpu.memory_space<vmem>>, vector<1x1x320x256xbf16>
    %253 = vector.shape_cast %252 : vector<1x1x320x256xbf16> to vector<320x256xbf16>
    %cst_276 = arith.constant dense<0.000000e+00> : vector<16x256xf32>
    %254 = tpu.matmul %251, %253, %cst_276 {dimension_numbers = #tpu.dot_dimension_numbers<[1], [0], [0], [1], [0, 0, 1, 1], [], []>} : vector<16x320xbf16>, vector<320x256xbf16>, vector<16x256xf32> -> vector<16x256xf32>
    %255 = arith.addf %249, %254 : vector<16x256xf32>
    %c4_277 = arith.constant 4 : index
    %c0_278 = arith.constant 0 : index
    %256 = vector.load %arg7[%c4_277, %c0_278] : memref<20x320xf32, #tpu.memory_space<vmem>>, vector<16x320xf32>
    %257 = arith.truncf %256 : vector<16x320xf32> to vector<16x320xbf16>
    %c6_279 = arith.constant 6 : index
    %c4_280 = arith.constant 4 : index
    %c0_281 = arith.constant 0 : index
    %c0_282 = arith.constant 0 : index
    %258 = vector.load %arg2[%c6_279, %c4_280, %c0_281, %c0_282] : memref<8x5x320x256xbf16, #tpu.memory_space<vmem>>, vector<1x1x320x256xbf16>
    %259 = vector.shape_cast %258 : vector<1x1x320x256xbf16> to vector<320x256xbf16>
    %cst_283 = arith.constant dense<0.000000e+00> : vector<16x256xf32>
    %260 = tpu.matmul %257, %259, %cst_283 {dimension_numbers = #tpu.dot_dimension_numbers<[1], [0], [0], [1], [0, 0, 1, 1], [], []>} : vector<16x320xbf16>, vector<320x256xbf16>, vector<16x256xf32> -> vector<16x256xf32>
    %261 = arith.addf %255, %260 : vector<16x256xf32>
    %c6_284 = arith.constant 6 : index
    %c0_285 = arith.constant 0 : index
    %c0_286 = arith.constant 0 : index
    %262 = vector.load %arg3[%c6_284, %c0_285, %c0_286] : memref<8x1x256xf32, #tpu.memory_space<vmem>>, vector<1x1x256xf32>
    %263 = vector.shape_cast %262 : vector<1x1x256xf32> to vector<1x256xf32>
    %264 = vector.broadcast %263 : vector<1x256xf32> to vector<16x256xf32>
    %265 = arith.addf %261, %264 : vector<16x256xf32>
    %cst_287 = arith.constant 0.000000e+00 : f32
    %266 = vector.broadcast %cst_287 : f32 to vector<16x256xf32>
    %267 = arith.maximumf %265, %266 : vector<16x256xf32>
    %c2_288 = arith.constant 2 : index
    %c32_289 = arith.constant 32 : index
    %268 = vector.load %arg7[%c2_288, %c32_289] : memref<20x320xf32, #tpu.memory_space<vmem>>, vector<16x256xf32>
    tpu.vector_store %arg7[%c2_288, %c32_289], %267 {strides = array<i32>} : memref<20x320xf32, #tpu.memory_space<vmem>>, vector<16x256xf32>,
    %cst_290 = arith.constant 0.000000e+00 : f32
    %269 = vector.broadcast %cst_290 : f32 to vector<16x256xf32>
    %c0_291 = arith.constant 0 : index
    %c0_292 = arith.constant 0 : index
    %270 = vector.load %arg7[%c0_291, %c0_292] : memref<20x320xf32, #tpu.memory_space<vmem>>, vector<16x320xf32>
    %271 = arith.truncf %270 : vector<16x320xf32> to vector<16x320xbf16>
    %c7 = arith.constant 7 : index
    %c0_293 = arith.constant 0 : index
    %c0_294 = arith.constant 0 : index
    %c0_295 = arith.constant 0 : index
    %272 = vector.load %arg2[%c7, %c0_293, %c0_294, %c0_295] : memref<8x5x320x256xbf16, #tpu.memory_space<vmem>>, vector<1x1x320x256xbf16>
    %273 = vector.shape_cast %272 : vector<1x1x320x256xbf16> to vector<320x256xbf16>
    %cst_296 = arith.constant dense<0.000000e+00> : vector<16x256xf32>
    %274 = tpu.matmul %271, %273, %cst_296 {dimension_numbers = #tpu.dot_dimension_numbers<[1], [0], [0], [1], [0, 0, 1, 1], [], []>} : vector<16x320xbf16>, vector<320x256xbf16>, vector<16x256xf32> -> vector<16x256xf32>
    %275 = arith.addf %269, %274 : vector<16x256xf32>
    %c1_297 = arith.constant 1 : index
    %c0_298 = arith.constant 0 : index
    %276 = vector.load %arg7[%c1_297, %c0_298] : memref<20x320xf32, #tpu.memory_space<vmem>>, vector<16x320xf32>
    %277 = arith.truncf %276 : vector<16x320xf32> to vector<16x320xbf16>
    %c7_299 = arith.constant 7 : index
    %c1_300 = arith.constant 1 : index
    %c0_301 = arith.constant 0 : index
    %c0_302 = arith.constant 0 : index
    %278 = vector.load %arg2[%c7_299, %c1_300, %c0_301, %c0_302] : memref<8x5x320x256xbf16, #tpu.memory_space<vmem>>, vector<1x1x320x256xbf16>
    %279 = vector.shape_cast %278 : vector<1x1x320x256xbf16> to vector<320x256xbf16>
    %cst_303 = arith.constant dense<0.000000e+00> : vector<16x256xf32>
    %280 = tpu.matmul %277, %279, %cst_303 {dimension_numbers = #tpu.dot_dimension_numbers<[1], [0], [0], [1], [0, 0, 1, 1], [], []>} : vector<16x320xbf16>, vector<320x256xbf16>, vector<16x256xf32> -> vector<16x256xf32>
    %281 = arith.addf %275, %280 : vector<16x256xf32>
    %c2_304 = arith.constant 2 : index
    %c0_305 = arith.constant 0 : index
    %282 = vector.load %arg7[%c2_304, %c0_305] : memref<20x320xf32, #tpu.memory_space<vmem>>, vector<16x320xf32>
    %283 = arith.truncf %282 : vector<16x320xf32> to vector<16x320xbf16>
    %c7_306 = arith.constant 7 : index
    %c2_307 = arith.constant 2 : index
    %c0_308 = arith.constant 0 : index
    %c0_309 = arith.constant 0 : index
    %284 = vector.load %arg2[%c7_306, %c2_307, %c0_308, %c0_309] : memref<8x5x320x256xbf16, #tpu.memory_space<vmem>>, vector<1x1x320x256xbf16>
    %285 = vector.shape_cast %284 : vector<1x1x320x256xbf16> to vector<320x256xbf16>
    %cst_310 = arith.constant dense<0.000000e+00> : vector<16x256xf32>
    %286 = tpu.matmul %283, %285, %cst_310 {dimension_numbers = #tpu.dot_dimension_numbers<[1], [0], [0], [1], [0, 0, 1, 1], [], []>} : vector<16x320xbf16>, vector<320x256xbf16>, vector<16x256xf32> -> vector<16x256xf32>
    %287 = arith.addf %281, %286 : vector<16x256xf32>
    %c3_311 = arith.constant 3 : index
    %c0_312 = arith.constant 0 : index
    %288 = vector.load %arg7[%c3_311, %c0_312] : memref<20x320xf32, #tpu.memory_space<vmem>>, vector<16x320xf32>
    %289 = arith.truncf %288 : vector<16x320xf32> to vector<16x320xbf16>
    %c7_313 = arith.constant 7 : index
    %c3_314 = arith.constant 3 : index
    %c0_315 = arith.constant 0 : index
    %c0_316 = arith.constant 0 : index
    %290 = vector.load %arg2[%c7_313, %c3_314, %c0_315, %c0_316] : memref<8x5x320x256xbf16, #tpu.memory_space<vmem>>, vector<1x1x320x256xbf16>
    %291 = vector.shape_cast %290 : vector<1x1x320x256xbf16> to vector<320x256xbf16>
    %cst_317 = arith.constant dense<0.000000e+00> : vector<16x256xf32>
    %292 = tpu.matmul %289, %291, %cst_317 {dimension_numbers = #tpu.dot_dimension_numbers<[1], [0], [0], [1], [0, 0, 1, 1], [], []>} : vector<16x320xbf16>, vector<320x256xbf16>, vector<16x256xf32> -> vector<16x256xf32>
    %293 = arith.addf %287, %292 : vector<16x256xf32>
    %c4_318 = arith.constant 4 : index
    %c0_319 = arith.constant 0 : index
    %294 = vector.load %arg7[%c4_318, %c0_319] : memref<20x320xf32, #tpu.memory_space<vmem>>, vector<16x320xf32>
    %295 = arith.truncf %294 : vector<16x320xf32> to vector<16x320xbf16>
    %c7_320 = arith.constant 7 : index
    %c4_321 = arith.constant 4 : index
    %c0_322 = arith.constant 0 : index
    %c0_323 = arith.constant 0 : index
    %296 = vector.load %arg2[%c7_320, %c4_321, %c0_322, %c0_323] : memref<8x5x320x256xbf16, #tpu.memory_space<vmem>>, vector<1x1x320x256xbf16>
    %297 = vector.shape_cast %296 : vector<1x1x320x256xbf16> to vector<320x256xbf16>
    %cst_324 = arith.constant dense<0.000000e+00> : vector<16x256xf32>
    %298 = tpu.matmul %295, %297, %cst_324 {dimension_numbers = #tpu.dot_dimension_numbers<[1], [0], [0], [1], [0, 0, 1, 1], [], []>} : vector<16x320xbf16>, vector<320x256xbf16>, vector<16x256xf32> -> vector<16x256xf32>
    %299 = arith.addf %293, %298 : vector<16x256xf32>
    %c7_325 = arith.constant 7 : index
    %c0_326 = arith.constant 0 : index
    %c0_327 = arith.constant 0 : index
    %300 = vector.load %arg3[%c7_325, %c0_326, %c0_327] : memref<8x1x256xf32, #tpu.memory_space<vmem>>, vector<1x1x256xf32>
    %301 = vector.shape_cast %300 : vector<1x1x256xf32> to vector<1x256xf32>
    %302 = vector.broadcast %301 : vector<1x256xf32> to vector<16x256xf32>
    %303 = arith.addf %299, %302 : vector<16x256xf32>
    %cst_328 = arith.constant 0.000000e+00 : f32
    %304 = vector.broadcast %cst_328 : f32 to vector<16x256xf32>
    %305 = arith.maximumf %303, %304 : vector<16x256xf32>
    %c2_329 = arith.constant 2 : index
    %c32_330 = arith.constant 32 : index
    %306 = vector.load %arg7[%c2_329, %c32_330] : memref<20x320xf32, #tpu.memory_space<vmem>>, vector<16x256xf32>
    tpu.vector_store %arg7[%c2_329, %c32_330], %305 {strides = array<i32>} : memref<20x320xf32, #tpu.memory_space<vmem>>, vector<16x256xf32>,
    %c0_331 = arith.constant 0 : index
    %c0_332 = arith.constant 0 : index
    %307 = vector.load %arg4[%c0_331, %c0_332] : memref<256x12xf32, #tpu.memory_space<vmem>>, vector<256x12xf32>
    %cst_333 = arith.constant dense<0.000000e+00> : vector<16x12xf32>
    %308 = tpu.matmul %305, %307, %cst_333 {dimension_numbers = #tpu.dot_dimension_numbers<[1], [0], [0], [1], [0, 0, 1, 1], [], []>} : vector<16x256xf32>, vector<256x12xf32>, vector<16x12xf32> -> vector<16x12xf32>
    %cst_334 = arith.constant dense<0.000000e+00> : vector<12xf32>
    %309 = vector.multi_reduction <add>, %308, %cst_334 [0] : vector<16x12xf32> to vector<12xf32>
    %310 = vector.shape_cast %309 : vector<12xf32> to vector<1x12xf32>
    %c0_335 = arith.constant 0 : index
    %c0_336 = arith.constant 0 : index
    %311 = vector.load %arg5[%c0_335, %c0_336] : memref<1x12xf32, #tpu.memory_space<vmem>>, vector<1x12xf32>
    %312 = arith.addf %310, %311 : vector<1x12xf32>
    %c0_337 = arith.constant 0 : index
    %c0_338 = arith.constant 0 : index
    %c0_339 = arith.constant 0 : index
    %313 = vector.load %arg6[%c0_337, %c0_338, %c0_339] : memref<1x1x12xf32, #tpu.memory_space<vmem>>, vector<1x1x12xf32>
    %314 = vector.shape_cast %313 : vector<1x1x12xf32> to vector<1x12xf32>
    %315 = vector.shape_cast %312 : vector<1x12xf32> to vector<1x1x12xf32>
    tpu.vector_store %arg6[%c0_337, %c0_338, %c0_339], %315 {strides = array<i32>} : memref<1x1x12xf32, #tpu.memory_space<vmem>>, vector<1x1x12xf32>,
    return
  }
  func.func @transform_0(%arg0: i32) -> (i32, i32, i32) {
    %c0_i32 = arith.constant 0 : i32
    %c0_i32_0 = arith.constant 0 : i32
    %c0_i32_1 = arith.constant 0 : i32
    return %arg0, %c0_i32, %c0_i32_0 : i32, i32, i32
  }
  func.func @transform_1(%arg0: i32) -> (i32, i32, i32, i32) {
    %c0_i32 = arith.constant 0 : i32
    %c0_i32_0 = arith.constant 0 : i32
    %c0_i32_1 = arith.constant 0 : i32
    %c0_i32_2 = arith.constant 0 : i32
    %c0_i32_3 = arith.constant 0 : i32
    return %c0_i32, %c0_i32_0, %c0_i32_1, %c0_i32_2 : i32, i32, i32, i32
  }
  func.func @transform_2(%arg0: i32) -> (i32, i32, i32) {
    %c0_i32 = arith.constant 0 : i32
    %c0_i32_0 = arith.constant 0 : i32
    %c0_i32_1 = arith.constant 0 : i32
    %c0_i32_2 = arith.constant 0 : i32
    return %c0_i32, %c0_i32_0, %c0_i32_1 : i32, i32, i32
  }
  func.func @transform_3(%arg0: i32) -> (i32, i32) {
    %c0_i32 = arith.constant 0 : i32
    %c0_i32_0 = arith.constant 0 : i32
    %c0_i32_1 = arith.constant 0 : i32
    return %c0_i32, %c0_i32_0 : i32, i32
  }
  func.func @transform_4(%arg0: i32) -> (i32, i32) {
    %c0_i32 = arith.constant 0 : i32
    %c0_i32_0 = arith.constant 0 : i32
    %c0_i32_1 = arith.constant 0 : i32
    return %c0_i32, %c0_i32_0 : i32, i32
  }
  func.func @transform_5(%arg0: i32) -> (i32, i32, i32) {
    %c0_i32 = arith.constant 0 : i32
    %c0_i32_0 = arith.constant 0 : i32
    %c0_i32_1 = arith.constant 0 : i32
    return %arg0, %c0_i32, %c0_i32_0 : i32, i32, i32
  }
}

</mosaic_0001>

<bundles_post_ra>
// kernel: tile.48
= control target key start
LH: loop header
LB: loop body
LE: loop exit
PB: predicated region body
PF: predicated region fallthrough
CT: control target
= control target key end

     0   :  { %s28_s0 = inlined_call_operand.vmem [shape: f32[16], index: 0, kind: input, shape index: {}]   ;;  %s29_s1 = inlined_call_operand.vmem [shape: f32[16,16], index: 1, kind: output, shape index: {}]  }
   0x1   :  { %v4_v0 = vld [vmem:[%s28_s0] ss:$0 sm:$0xff] }
   0x2   :  { %5 = vst [vmem:[%s29_s1] sm:$0xff] %v4_v0  ;;  %8 = vst [vmem:[%s29_s1 + $0x8] sm:$0xff] %v4_v0 }

// kernel: tile.77
= control target key start
LH: loop header
LB: loop body
LE: loop exit
PB: predicated region body
PF: predicated region fallthrough
CT: control target
= control target key end

     0   :  { %s7_s6 = smov 3  ;;  %s21_s9 = smov 3  ;;  %vm4_vm0 = vcmask 130048   ;;  %vm11_vm1 = vcmask 1048448   ;;  %vm18_vm2 = vcmask 917248   ;;  %vm25_vm3 = vcmask 786048   ;;  %s128_s0 = inlined_call_operand.vmem [shape: f32[16,16], index: 0, kind: input, shape index: {}]   ;;  %s129_s1 = inlined_call_operand.vmem [shape: f32[1,1,256], index: 1, kind: output, shape index: {}]  }
   0x1   :  { %v66_v0 = vld [vmem:[%s128_s0 + $0x7] ss:$8 sm:%s7_s6]   ;;  %s81_s10 = smov 112   ;;  %v68_v1 = vld [vmem:[%s128_s0 + $0x5] ss:$8 sm:%s21_s9]   ;;  %s14_s13 = smov 3 }
   0x2   :  { %9 = vrot.lane.b32.xlu0 %v66_v0, %s81_s10  ;;  %s82_s14 = smov 80   ;;  %v67_v2 = vld [vmem:[%s128_s0 + $0x6] ss:$8 sm:%s14_s13]   ;;  %s28_s17 = smov 3  ;;  %vm32_vm4 = vcmask 654848   ;;  %vm39_vm5 = vcmask 523648  }
   0x3   :  { %23 = vrot.lane.b32.xlu1 %v68_v1, %s82_s14  ;;  %v69_v3 = vld [vmem:[%s128_s0 + $0x4] ss:$8 sm:%s28_s17]   ;;  %s35_s20 = smov 3  ;;  %s42_s21 = smov 3  ;;  %vm46_vm6 = vcmask 392448   ;;  %vm53_vm7 = vcmask 261248  }
   0x4   :  { %s83_s22 = smov 96   ;;  %s84_s23 = smov 64   ;;  %v70_v4 = vld [vmem:[%s128_s0 + $0x3] ss:$8 sm:%s35_s20]   ;;  %v71_v5 = vld [vmem:[%s128_s0 + $0x2] ss:$8 sm:%s42_s21]  }
   0x5   :  { %s2_s26 = smov 3  ;;  %s49_s29 = smov 3 }
   0x6   :  { %16 = vrot.lane.b32.xlu0 %v67_v2, %s83_s22  ;;  %v3_v6 = vld [vmem:[%s128_s0] ss:$8 sm:%s2_s26]   ;;  %s85_s3 = smov 48   ;;  %s86_s4 = smov 32  }
   0x7   :  { %30 = vrot.lane.b32.xlu1 %v69_v3, %s84_s23  ;;  %5 = vst.msk [vmem:[#allocation0] ss:$8 sm:$0x3] %vm4_vm0, %v3_v6   ;;  %v72_v7 = vld [vmem:[%s128_s0 + $0x1] ss:$8 sm:%s49_s29]   ;;  %s87_s0 = smov 16  }
   0xa   :  { %37 = vrot.lane.b32.xlu0 %v70_v4, %s85_s3 }
   0xb   :  { %44 = vrot.lane.b32.xlu1 %v71_v5, %s86_s4 }
   0xe   :  { %51 = vrot.lane.b32.xlu0 %v72_v7, %s87_s0 }
  0x74   :  { %v10_v8 = vpop.permute.xlu0 %9  }
  0x75   :  { %12 = vst.msk [vmem:[#allocation0] ss:$8 sm:$0x3] %vm11_vm1, %v10_v8   ;;  %v24_v9 = vpop.permute.xlu1 %23  }
  0x78   :  { %v17_v10 = vpop.permute.xlu0 %16  }
  0x79   :  { %19 = vst.msk [vmem:[#allocation0] ss:$8 sm:$0x3] %vm18_vm2, %v17_v10   ;;  %v31_v11 = vpop.permute.xlu1 %30  }
  0x7a   :  { %26 = vst.msk [vmem:[#allocation0] ss:$8 sm:$0x3] %vm25_vm3, %v24_v9  }
  0x7b   :  { %33 = vst.msk [vmem:[#allocation0] ss:$8 sm:$0x3] %vm32_vm4, %v31_v11  }
  0x7c   :  { %v38_v12 = vpop.permute.xlu0 %37  }
  0x7d   :  { %40 = vst.msk [vmem:[#allocation0] ss:$8 sm:$0x3] %vm39_vm5, %v38_v12   ;;  %v45_v13 = vpop.permute.xlu1 %44  }
  0x7e   :  { %47 = vst.msk [vmem:[#allocation0] ss:$8 sm:$0x3] %vm46_vm6, %v45_v13  }
  0x80   :  { %v52_v14 = vpop.permute.xlu0 %51  }
  0x81   :  { %54 = vst.msk [vmem:[#allocation0] ss:$8 sm:$0x3] %vm53_vm7, %v52_v14  }
  0x88   :  { %v58_v15 = vld [vmem:[#allocation0] sm:$0x1]  ;;  %v62_v16 = vld [vmem:[#allocation0 + $0x8] sm:$0x1] }
  0x89   :  { %60 = vst [vmem:[%s129_s1] sm:$0x1] %v58_v15  ;;  %73 = vst [vmem:[%s129_s1 + $0x1] sm:$0x1] %v62_v16 }

// kernel: convnet_pallas.1
= control target key start
LH: loop header
LB: loop body
LE: loop exit
PB: predicated region body
PF: predicated region fallthrough
CT: control target
= control target key end

     0   :  { %10 = vsyncpa [#allocation4], 0  ;;  %s21136_s0 = inlined_call_operand.vmem [shape: f32[2,20,320], index: 0, kind: input, shape index: {}]   ;;  %s21137_s1 = inlined_call_operand.hbm [shape: bf16[8,5,320,256], index: 1, kind: input, shape index: {}]   ;;  %s21138_s2 = inlined_call_operand.vmem [shape: f32[8,1,256], index: 2, kind: input, shape index: {}]   ;;  %s21139_s3 = inlined_call_operand.vmem [shape: f32[256,12], index: 3, kind: input, shape index: {}]   ;;  %s21140_s4 = inlined_call_operand.vmem [shape: f32[1,12], index: 4, kind: input, shape index: {}]   ;;  %s21141_s5 = inlined_call_operand.hbm [shape: f32[2,1,12], index: 5, kind: output, shape index: {}]  }
   0x1   :  { %11 = vsyncpa [#allocation5], 0 }
   0x2   :  { %13 = vsyncpa [#allocation5 + $0x1], 0  ;;  %s20339_s18 = smov 0   ;;  %s20341_s19 = smov 0  }
   0x3   :  { %s20343_s20 = smov 0   ;;  %s20345_s21 = smov 0  }
   0x4 LB: > { %s20360_s22 = sadd.s32 4294967295, %s20301_s21   ;;  %s15732_s23 = sadd.s32 4294967294, %s20301_s21   ;;  %s20301_s21 = sphi %s20345_s21, %s21157_s21   ;;  %s20297_s20 = sphi %s20343_s20, %s21156_s20   ;;  %s20293_s19 = sphi %s20341_s19, %s21155_s19   ;;  %s20289_s18 = sphi %s20339_s18, %s21154_s18  }
   0x5   : > { %s20364_s24 = sadd.s32 1, %s20301_s21   ;;  %s136_s25 = sadd.s32 1, %s20297_s20 }
   0x6   : > { %s133_s26 = ssub.s32 %s20301_s21, %s20364_s24  ;;  %p146_p0 = scmp.ne.s32.totalorder %s20297_s20, %s20293_s19 }
   0x7   : > { %p134_p1 = scmp.eq.s32.totalorder %s133_s26, 0  ;;  %p147_p2 = scmp.eq.s32.totalorder %s20360_s22, 1 }
   0x8   : > { %p152_p3 = scmp.ne.s32.totalorder %s20293_s19, %s20289_s18  ;;  %p153_p4 = scmp.eq.s32.totalorder %s15732_s23, 1 }
   0x9   : > { %s20375_s27 = scalar_select %p134_p1, %s20297_s20, %s136_s25  }
   0xa   : > { %p20377_p5 = por %p147_p2, %p146_p0  ;;  %p20381_p6 = por %p153_p4, %p152_p3 }
   0xb   : > { %p15733_p7 = scmp.ge.s32.totalorder %s20301_s21, 1  ;;  %p160_p8 = scmp.lt.s32.totalorder %s20301_s21, 3 }
   0xc   : > { %s21145_s28 = scalar_select %p20377_p5, 1, 0 }
   0xd   : > { %s21146_s29 = scalar_select %p20381_p6, 1, 0 }
   0xe   : > { %p21142_p9 = scmp.eq.s32.totalorder %s20360_s22, 0  ;;  %p20388_p10 = pnand %p15733_p7, %p160_p8 }
   0xf   : > { %s20303_s6 = smov [#allocation3]   ;;  %s20207_s11 = scalar_lea.hbm %s21137_s1, 204800 }
  0x10   : > { %s21147_s30 = scalar_select %p20388_p10, 1, 0 }
  0x11   : > { %s172_s7 = sshll.u32 %s20303_s6, 4  ;;  %p17754_p11 = pneg %p20388_p10  ;;  %s173_s7 = int_to_ptr.vmem [resolvable:$true] %s172_s7 }
  0x12   : > { %p20208_p13 = scmp.ne.s32.totalorder %s21137_s1, %s20207_s11  ;;  %p20214_p3 = scmp.lt.u32.totalorder %s20207_s11, %s21137_s1 }
  0x13   : > { %p20396_p12 = pnand %p21142_p9, %p17754_p11 }
  0x15   : > { %p20209_p0 = pneg %p20396_p12 }
  0x17   : > { %p20210_p1 = pnand %p20209_p0, %p20208_p13 }
  0x19   : > { %p20211_p2 = pneg %p20210_p1 }
  0x1b   : > { %p20216_p4 = pnand %p20214_p3, %p20211_p2 }
  0x1d   : > { %20219 = shalt.err (!%p20216_p4)
}
  0x1e   : > { %s20220_s16 = scalar_lea.vmem %s173_s7, 204800  ;;  %p20228_p9 = scmp.lt.s32.totalorder %s173_s7, %s173_s7 }
  0x1f   : > { %p20221_p7 = scmp.ne.s32.totalorder %s173_s7, %s20220_s16  ;;  %p20229_p6 = scmp.lt.s32.totalorder %s20220_s16, %s20220_s16 }
  0x21   : > { %p20223_p8 = pnand %p20221_p7, %p20209_p0  ;;  %p20230_p5 = por %p20229_p6, %p20228_p9 }
  0x23   : > { %p20224_p11 = pneg %p20223_p8 }
  0x25   : > { %p20231_p10 = pnand %p20230_p5, %p20224_p11 }
  0x27   : > { %20234 = shalt.err (!%p20231_p10)
}
  0x28   : > { %s20304_s17 = smov 128   ;;  %s20305_s23 = smov 8  }
  0x29   : > { %17757 = dma.hbm_to_vmem [thread:$0]  (!%p20396_p12), %s21137_s1, 204800, %s173_s7, [#allocation4], %s20304_s17, %s20304_s17, %s20305_s23  }
  0x2a   : > { %p21149_p13 = scmp.ne.s32.totalorder %s21147_s30, 0 }
  0x2b   : > { %p21150_p1 = scmp.eq.s32.totalorder (!%p21149_p13), %s20360_s22, 0 }
  0x2c   : > { %205 = sbr.rel (%p21149_p13) target bundleno = 5774 (0x168e), region = 40 }
  0x33   : > { %20280 = dma.done.wait (%p21150_p1), [#allocation4], 204800   ;;  %p21151_p0 = pmov %p21150_p1 }
  0x34   : > { %v20306_v0 = vmov 0   ;;  %v17802_v1 = vld [vmem:[#allocation3 + $0x144] ss:$8 sps:$4 sm:$0xff]   ;;  %v17804_v2 = vld [vmem:[#allocation3 + $0x140] ss:$8 sps:$4 sm:$0xff]   ;;  %p232_p5 = scmp.lt.s32.totalorder %s20360_s22, 1 }
  0x35   : > { %20282 = vsyncadd (%p21151_p0), [#allocation4], 4294762496  ;;  %677 = vmatprep.mubr.bf16.mxu1 %v20306_v0  ;;  %602 = vmatprep.subr.bf16.mxu0 %v17802_v1  ;;  %v17805_v3 = vld [vmem:[#allocation3 + $0x154] ss:$8 sps:$4 sm:$0xff]   ;;  %v17807_v4 = vld [vmem:[#allocation3 + $0x150] ss:$8 sps:$4 sm:$0xff]  }
  0x36   : > { %603 = vmatpush1.bf16.msra.mxu0 %v17804_v2  ;;  %v17808_v5 = vld [vmem:[#allocation3 + $0x164] ss:$8 sps:$4 sm:$0xff]   ;;  %v17810_v6 = vld [vmem:[#allocation3 + $0x160] ss:$8 sps:$4 sm:$0xff]   ;;  %v17811_v7 = vld [vmem:[#allocation3 + $0x174] ss:$8 sps:$4 sm:$0xff]  }
  0x37   : > { %604 = vmatprep.subr.bf16.mxu0 %v17805_v3  ;;  %v17813_v8 = vld [vmem:[#allocation3 + $0x170] ss:$8 sps:$4 sm:$0xff]   ;;  %v17814_v9 = vld [vmem:[#allocation3 + $0x184] ss:$8 sps:$4 sm:$0xff]   ;;  %v17816_v10 = vld [vmem:[#allocation3 + $0x180] ss:$8 sps:$4 sm:$0xff]  }
  0x38   : > { %s233_s30 = scalar_select %p232_p5, %s20360_s22, 1  ;;  %v17817_v11 = vld [vmem:[#allocation3 + $0x194] ss:$8 sps:$4 sm:$0xff]   ;;  %v17840_v12 = vld [vmem:[#allocation3 + $0x244] ss:$8 sps:$4 sm:$0xff]   ;;  %vm249_vm0 = vcmask 523264  }
  0x39   : > { %v17843_v13 = vld [vmem:[#allocation3 + $0x240] ss:$8 sps:$4 sm:$0xff]   ;;  %v17819_v14 = vld [vmem:[#allocation3 + $0x190] ss:$8 sps:$4 sm:$0xff]   ;;  %645 = vmatprep.subr.bf16.mxu1 %v17840_v12  ;;  %v17820_v15 = vld [vmem:[#allocation3 + $0x1a4] ss:$8 sps:$4 sm:$0xff]  }
  0x3a   : > { %605 = vmatpush1.bf16.msra.mxu0 %v17807_v4  ;;  %s17747_s6 = smul.u32 72, %s233_s30  ;;  %646 = vmatpush1.bf16.msra.mxu1 %v17843_v13  ;;  %v17846_v16 = vld [vmem:[#allocation3 + $0x254] ss:$8 sps:$4 sm:$0xff]   ;;  %v17849_v17 = vld [vmem:[#allocation3 + $0x250] ss:$8 sps:$4 sm:$0xff]   ;;  %vm256_vm1 = vcmask 519168  }
  0x3b   : > { %606 = vmatprep.subr.bf16.mxu0 %v17808_v5  ;;  %647 = vmatprep.subr.bf16.mxu1 %v17846_v16  ;;  %v17822_v18 = vld [vmem:[#allocation3 + $0x1a0] ss:$8 sps:$4 sm:$0xff]   ;;  %v17823_v19 = vld [vmem:[#allocation3 + $0x1b4] ss:$8 sps:$4 sm:$0xff]   ;;  %v17852_v20 = vld [vmem:[#allocation3 + $0x264] ss:$8 sps:$4 sm:$0xff]  }
  0x3c   : > { %s20428_s9 = scalar_lea.vmem %s21136_s0, %s17747_s6  ;;  %v17855_v21 = vld [vmem:[#allocation3 + $0x260] ss:$8 sps:$4 sm:$0xff]   ;;  %v17858_v22 = vld [vmem:[#allocation3 + $0x274] ss:$8 sps:$4 sm:$0xff]   ;;  %v17825_v23 = vld [vmem:[#allocation3 + $0x1b0] ss:$8 sps:$4 sm:$0xff]  }
  0x3d   : > { %v17826_v24 = vld [vmem:[#allocation3 + $0x1c4] ss:$8 sps:$4 sm:$0xff]   ;;  %v20431_v25 = vld [vmem:[%s20428_s9 + $0x8] sm:$0xff]  ;;  %v245_v27 = vld [vmem:[%s20428_s9 + $0x38] sm:$0xf]  ;;  %vm1036_vm3 = vcmask 1046528  }
  0x3e   : > { %607 = vmatpush1.bf16.msra.mxu0 %v17810_v6  ;;  %648 = vmatpush1.bf16.msra.mxu1 %v17849_v17  ;;  %v17861_v26 = vld [vmem:[#allocation3 + $0x270] ss:$8 sps:$4 sm:$0xff]   ;;  %248 = vst [vmem:[#allocation2 + $0x8] sm:$0xff] %v20431_v25  ;;  %v20436_v28 = vld [vmem:[%s20428_s9] sm:$0xff]  ;;  %255 = vst [vmem:[#allocation2 + $0x38] sm:$0xf] %v245_v27 }
  0x3f   : > { %608 = vmatprep.subr.bf16.mxu0 %v17811_v7  ;;  %649 = vmatprep.subr.bf16.mxu1 %v17852_v20  ;;  %v20439_v29 = vld [vmem:[%s20428_s9 + $0x18] sm:$0xff]  ;;  %v244_v30 = vld [vmem:[%s20428_s9 + $0x30] sm:$0xf]  ;;  %247 = vst [vmem:[#allocation2] sm:$0xff] %v20436_v28  ;;  %v243_v32 = vld [vmem:[%s20428_s9 + $0x28] sm:$0xff]  ;;  %vm1800_vm5 = vcmask 1045504  }
  0x40   : > { %v240_v31 = vld [vmem:[%s20428_s9 + $0x10] sm:$0xff]  ;;  %251 = vst [vmem:[#allocation2 + $0x18] sm:$0xff] %v20439_v29  ;;  %254 = vst [vmem:[#allocation2 + $0x30] sm:$0xf] %v244_v30  ;;  %v246_v33 = vld [vmem:[%s20428_s9 + $0x40] sm:$0xf] }
  0x41   : > { %250 = vst.msk [vmem:[#allocation2 + $0x10] sm:$0xff] %vm249_vm0, %v240_v31  ;;  %v17828_v34 = vld [vmem:[#allocation3 + $0x1c0] ss:$8 sps:$4 sm:$0xff]   ;;  %253 = vst.msk [vmem:[#allocation2 + $0x28] sm:$0xff] %vm249_vm0, %v243_v32  ;;  %v17829_v35 = vld [vmem:[#allocation3 + $0x1d4] ss:$8 sps:$4 sm:$0xff]  }
  0x42   : > { %609 = vmatpush1.bf16.msra.mxu0 %v17813_v8  ;;  %650 = vmatpush1.bf16.msra.mxu1 %v17855_v21  ;;  %257 = vst.msk [vmem:[#allocation2 + $0x40] sm:$0xf] %vm256_vm1, %v246_v33  ;;  %v20451_v36 = vld [vmem:[%s20428_s9 + $0x20] sm:$0xff]  ;;  %v17831_v38 = vld [vmem:[#allocation3 + $0x1d0] ss:$8 sps:$4 sm:$0xff]   ;;  %vm2129_vm6 = vcmask 1041408  }
  0x43   : > { %610 = vmatprep.subr.bf16.mxu0 %v17814_v9  ;;  %651 = vmatprep.subr.bf16.mxu1 %v17858_v22  ;;  %v17832_v41 = vld [vmem:[#allocation3 + $0x1e4] ss:$8 sps:$4 sm:$0xff]   ;;  %vm360_vm2 = vsmask.f32 7424  ;;  %v17834_v50 = vld [vmem:[#allocation3 + $0x1e0] ss:$8 sps:$4 sm:$0xff]  }
  0x44   : > { %v17835_v53 = vld [vmem:[#allocation3 + $0x1f4] ss:$8 sps:$4 sm:$0xff]   ;;  %v17837_v60 = vld [vmem:[#allocation3 + $0x1f0] ss:$8 sps:$4 sm:$0xff]   ;;  %v17838_v63 = vld [vmem:[#allocation3 + $0x204] ss:$8 sps:$4 sm:$0xff]  }
  0x45   : > { %v308_v37 = vld [vmem:[#allocation2 + $0x8] sm:$0xfe]  ;;  %v311_v39 = vld [vmem:[#allocation2 + $0x38] sm:$0x1]  ;;  %v17844_v6 = vld [vmem:[#allocation3 + $0x214] ss:$8 sps:$4 sm:$0xff]  }
  0x46   : > { %611 = vmatpush1.bf16.msra.mxu0 %v17816_v10  ;;  %652 = vmatpush1.bf16.msra.mxu1 %v17861_v26  ;;  %v314_v40 = vpack.c.bf16 %v20451_v36, %v308_v37  ;;  %v317_v42 = vpack.c.bf16 %v311_v39, %v311_v39  ;;  %v307_v1 = vld [vmem:[#allocation2] sm:$0xfe]  ;;  %v17842_v4 = vld [vmem:[#allocation3 + $0x200] ss:$8 sps:$4 sm:$0xff]   ;;  %v17864_v20 = vld [vmem:[#allocation3 + $0x4] ss:$8 sps:$4 sm:$0xff]  }
  0x47   : > { %612 = vmatprep.subr.bf16.mxu0 %v17817_v11  ;;  %v313_v5 = vpack.c.bf16 %v20439_v29, %v307_v1  ;;  %v310_v7 = vld [vmem:[#allocation2 + $0x30] sm:$0x1]  ;;  %v17848_v8 = vld [vmem:[#allocation3 + $0x210] ss:$8 sps:$4 sm:$0xff]   ;;  %v17850_v11 = vld [vmem:[#allocation3 + $0x224] ss:$8 sps:$4 sm:$0xff]  }
  0x48   : > { %v309_v43 = vld [vmem:[#allocation2 + $0x10] sm:$0xfe]  ;;  %v374_v44 = vshrl.u32 %v314_v40, 16  ;;  %v376_v45 = vshll.u32 %v314_v40, 16  ;;  %v20454_v46 = vld [vmem:[#allocation2 + $0x28] sm:$0xff]  ;;  %v381_v48 = vshll.u32 %v317_v42, 16  ;;  %v316_v9 = vpack.c.bf16 %v310_v7, %v310_v7 }
  0x49   : > { %v312_v47 = vld [vmem:[#allocation2 + $0x40] sm:$0x1]  ;;  %v315_v49 = vpack.c.bf16 %v20454_v46, %v309_v43  ;;  %v364_v10 = vshll.u32 %v313_v5, 16  ;;  %v17854_v12 = vld [vmem:[#allocation3 + $0x220] ss:$8 sps:$4 sm:$0xff]   ;;  %v362_v13 = vshrl.u32 %v313_v5, 16 }
  0x4a   : > { %613 = vmatpush1.bf16.msra.mxu0 %v17819_v14  ;;  %v378_v51 = vrot.slane %v376_v45, 1  ;;  %v318_v52 = vpack.c.bf16 %v312_v47, %v312_v47  ;;  %v383_v54 = vrot.slane %v381_v48, 1  ;;  %v17856_v16 = vld [vmem:[#allocation3 + $0x234] ss:$8 sps:$4 sm:$0xff]   ;;  %v17860_v17 = vld [vmem:[#allocation3 + $0x230] ss:$8 sps:$4 sm:$0xff]  }
  0x4b   : > { %614 = vmatprep.subr.bf16.mxu0 %v17820_v15  ;;  %v386_v55 = vshrl.u32 %v315_v49, 16  ;;  %v388_v56 = vshll.u32 %v315_v49, 16  ;;  %v366_v14 = vrot.slane %v364_v10, 1  ;;  %v369_v15 = vshll.u32 %v316_v9, 16  ;;  %v17862_v22 = vld [vmem:[#allocation3] ss:$8 sps:$4 sm:$0xff]  }
  0x4c   : > { %v379_v57 = vor.u32 %v378_v51, %v374_v44  ;;  %v393_v58 = vshll.u32 %v318_v52, 16  ;;  %v17865_v26 = vld [vmem:[#allocation3 + $0x10] ss:$8 sps:$4 sm:$0xff]   ;;  %v17870_v27 = vld [vmem:[#allocation3 + $0x24] ss:$8 sps:$4 sm:$0xff]   ;;  %s20307_s12 = smov 32  }
  0x4d   : > { %v390_v59 = vrot.slane %v388_v56, 1  ;;  %v17868_v30 = vld [vmem:[#allocation3 + $0x20] ss:$8 sps:$4 sm:$0xff]   ;;  %v17873_v31 = vld [vmem:[#allocation3 + $0x34] ss:$8 sps:$4 sm:$0xff]   ;;  %vm2161_vm7 = vcmask 1047810  }
  0x4e   : > { %615 = vmatpush1.bf16.msra.mxu0 %v17822_v18  ;;  %v384_v61 = vsel %vm360_vm2, %v379_v57, %v383_v54  ;;  %v395_v62 = vrot.slane %v393_v58, 1  ;;  %v367_v18 = vor.u32 %v366_v14, %v362_v13  ;;  %v17871_v32 = vld [vmem:[#allocation3 + $0x30] ss:$8 sps:$4 sm:$0xff]   ;;  %v17876_v33 = vld [vmem:[#allocation3 + $0x44] ss:$8 sps:$4 sm:$0xff]   ;;  %vm2166_vm8 = vcmask 1047808  }
  0x4f   : > { %616 = vmatprep.subr.bf16.mxu0 %v17823_v19  ;;  %634 = vmatprep.mubr.bf16.mxu0 %v384_v61  ;;  %v391_v2 = vor.u32 %v390_v59, %v386_v55  ;;  %v371_v19 = vrot.slane %v369_v15, 1  ;;  %v17882_v37 = vld [vmem:[#allocation3 + $0x64] ss:$8 sps:$4 sm:$0xff]   ;;  %v17885_v39 = vld [vmem:[#allocation3 + $0x74] ss:$8 sps:$4 sm:$0xff]   ;;  %v264_v59 = vpack.c.bf16 %v20439_v29, %v20436_v28  ;;  %vm2148_vm9 = vcmask 261120  }
  0x50   : > { %v17883_v40 = vld [vmem:[#allocation3 + $0x70] ss:$8 sps:$4 sm:$0xff]   ;;  %v17886_v42 = vld [vmem:[#allocation3 + $0x80] ss:$8 sps:$4 sm:$0xff]   ;;  %v17891_v43 = vld [vmem:[#allocation3 + $0x94] ss:$8 sps:$4 sm:$0xff]  }
  0x51   : > { %v396_v3 = vsel %vm360_vm2, %v391_v2, %v395_v62  ;;  %v372_v21 = vsel %vm360_vm2, %v367_v18, %v371_v19  ;;  %v17889_v44 = vld [vmem:[#allocation3 + $0x90] ss:$8 sps:$4 sm:$0xff]   ;;  %v17894_v45 = vld [vmem:[#allocation3 + $0xa4] ss:$8 sps:$4 sm:$0xff]   ;;  %v17892_v47 = vld [vmem:[#allocation3 + $0xa0] ss:$8 sps:$4 sm:$0xff]  }
  0x52   : > { %617 = vmatpush1.bf16.msra.mxu0 %v17825_v23  ;;  %15779 = vmatmul.mubr.msk.bf16.vlgmr.msra.gmra.mrb[0].mxu1 %vm249_vm0, %v396_v3  ;;  %v265_v23 = vpack.c.bf16 %v20451_v36, %v20431_v25  ;;  %v17879_v25 = vld [vmem:[#allocation3 + $0x54] ss:$8 sps:$4 sm:$0xff]   ;;  %v17895_v49 = vld [vmem:[#allocation3 + $0xb0] ss:$8 sps:$4 sm:$0xff]   ;;  %v17898_v51 = vld [vmem:[#allocation3 + $0xc0] ss:$8 sps:$4 sm:$0xff]  }
  0x53   : > { %618 = vmatprep.subr.bf16.mxu0 %v17826_v24  ;;  %v17867_v24 = vld [vmem:[#allocation3 + $0x14] ss:$8 sps:$4 sm:$0xff]   ;;  %v17906_v54 = vld [vmem:[#allocation3 + $0xe4] ss:$8 sps:$4 sm:$0xff]   ;;  %v17904_v55 = vld [vmem:[#allocation3 + $0xe0] ss:$8 sps:$4 sm:$0xff]  }
  0x54   : > { %v17897_v48 = vld [vmem:[#allocation3 + $0xb4] ss:$8 sps:$4 sm:$0xff]   ;;  %v17907_v57 = vld [vmem:[#allocation3 + $0xf0] ss:$8 sps:$4 sm:$0xff]   ;;  %v17912_v58 = vld [vmem:[#allocation3 + $0x104] ss:$8 sps:$4 sm:$0xff]  }
  0x55   : > { %v17903_v52 = vld [vmem:[#allocation3 + $0xd4] ss:$8 sps:$4 sm:$0xff]   ;;  %v17913_v62 = vld [vmem:[#allocation3 + $0x110] ss:$8 sps:$4 sm:$0xff]   ;;  %v978_v1 = vld [vmem:[#allocation2 + $0x8] sm:$0xfc] }
  0x56   : > { %619 = vmatpush1.bf16.msra.mxu0 %v17828_v34  ;;  %v17874_v34 = vld [vmem:[#allocation3 + $0x40] ss:$8 sps:$4 sm:$0xff]   ;;  %v17909_v56 = vld [vmem:[#allocation3 + $0xf4] ss:$8 sps:$4 sm:$0xff]   ;;  %v981_v2 = vld [vmem:[#allocation2 + $0x38] sm:$0x3]  ;;  %v984_v5 = vpack.c.bf16 %v20451_v36, %v978_v1 }
  0x57   : > { %620 = vmatprep.subr.bf16.mxu0 %v17829_v35  ;;  %v17877_v35 = vld [vmem:[#allocation3 + $0x50] ss:$8 sps:$4 sm:$0xff]   ;;  %v17915_v61 = vld [vmem:[#allocation3 + $0x114] ss:$8 sps:$4 sm:$0xff]   ;;  %v17916_v3 = vld [vmem:[#allocation3 + $0x120] ss:$8 sps:$4 sm:$0xff]   ;;  %v987_v28 = vpack.c.bf16 %v981_v2, %v981_v2 }
  0x58   : > { %v17919_v29 = vld [vmem:[#allocation3 + $0x130] ss:$8 sps:$4 sm:$0xff]   ;;  %v260_v7 = vld [vmem:[#allocation2 + $0x10] sm:$0xff]  ;;  %v17939_v19 = vld [vmem:[#allocation3 + $0x2d4] ss:$8 sps:$4 sm:$0xff]   ;;  %vm2164_vm10 = vcmask 261122  }
  0x59   : > { %v1041_v9 = vrot.slane %v987_v28, 1  ;;  %v266_v10 = vpack.c.bf16 %v20454_v46, %v260_v7  ;;  %v17925_v14 = vld [vmem:[#allocation3 + $0x290] ss:$8 sps:$4 sm:$0xff]   ;;  %v17930_v36 = vld [vmem:[#allocation3 + $0x2a4] ss:$8 sps:$4 sm:$0xff]   ;;  %vm2170_vm11 = vcmask 1041664  }
  0x5a   : > { %621 = vmatpush1.bf16.msra.mxu0 %v17831_v38  ;;  %v17880_v38 = vld [vmem:[#allocation3 + $0x60] ss:$8 sps:$4 sm:$0xff]   ;;  %v17936_v46 = vld [vmem:[#allocation3 + $0x2c4] ss:$8 sps:$4 sm:$0xff]   ;;  %v982_v1 = vld [vmem:[#allocation2 + $0x40] sm:$0x3] }
  0x5b   : > { %622 = vmatprep.subr.bf16.mxu0 %v17832_v41  ;;  %v17888_v41 = vld [vmem:[#allocation3 + $0x84] ss:$8 sps:$4 sm:$0xff]   ;;  %v17928_v15 = vld [vmem:[#allocation3 + $0x2a0] ss:$8 sps:$4 sm:$0xff]   ;;  %vm1394_vm4 = vsmask.f32 6400 }
  0x5c   : > { %v17934_v18 = vld [vmem:[#allocation3 + $0x2c0] ss:$8 sps:$4 sm:$0xff]   ;;  %vm2173_vm12 = vcmask 254976   ;;  %vm15638_vm13 = vcmask 97280   ;;  %s17386_s23 = sshll.u32 %s20360_s22, 4  ;;  %vm15650_vm14 = vcmask 90112  }
  0x5d   : > { %v17976_v28 = vld [vmem:[#allocation3 + $0x3a0] ss:$8 sps:$4 sm:$0xff]   ;;  %s21094_s7 = scalar_lea.hbm %s21141_s5, %s17386_s23  ;;  %p21152_p9 = scmp.ne.s32.totalorder %s21145_s28, 0 }
  0x5e   : > { %623 = vmatpush1.bf16.msra.mxu0 %v17834_v50  ;;  %v17900_v50 = vld [vmem:[#allocation3 + $0xc4] ss:$8 sps:$4 sm:$0xff]   ;;  %s20308_s22 = smov [#allocation6]  }
  0x5f   : > { %624 = vmatprep.subr.bf16.mxu0 %v17835_v53  ;;  %v17901_v53 = vld [vmem:[#allocation3 + $0xd0] ss:$8 sps:$4 sm:$0xff]   ;;  %s20239_s10 = sshll.u32 %s20308_s22, 4  ;;  %s20240_s10 = int_to_ptr.vmem [resolvable:$false] %s20239_s10 }
  0x60   : > { %s20241_s11 = scalar_lea.vmem %s20240_s10, 32 }
  0x62   : > { %625 = vmatpush1.bf16.msra.mxu0 %v17837_v60  ;;  %v17910_v60 = vld [vmem:[#allocation3 + $0x100] ss:$8 sps:$4 sm:$0xff]  }
  0x63   : > { %626 = vmatprep.subr.bf16.mxu0 %v17838_v63  ;;  %v17918_v63 = vld [vmem:[#allocation3 + $0x124] ss:$8 sps:$4 sm:$0xff]  }
  0x66   : > { %627 = vmatpush1.bf16.msra.mxu0 %v17842_v4  ;;  %v17921_v4 = vld [vmem:[#allocation3 + $0x134] ss:$8 sps:$4 sm:$0xff]  }
  0x67   : > { %628 = vmatprep.subr.bf16.mxu0 %v17844_v6  ;;  %v17924_v6 = vld [vmem:[#allocation3 + $0x284] ss:$8 sps:$4 sm:$0xff]  }
  0x6a   : > { %629 = vmatpush1.bf16.msra.mxu0 %v17848_v8  ;;  %v1040_v8 = vrot.slane %v984_v5, 1 }
  0x6b   : > { %630 = vmatprep.subr.bf16.mxu0 %v17850_v11  ;;  %v17922_v11 = vld [vmem:[#allocation3 + $0x280] ss:$8 sps:$4 sm:$0xff]  }
  0x6c   : > { %v1042_v13 = vsel %vm1036_vm3, %v1040_v8, %v1041_v9  ;;  %v988_v8 = vpack.c.bf16 %v982_v1, %v982_v1 }
  0x6e   : > { %631 = vmatpush1.bf16.msra.mxu0 %v17854_v12  ;;  %v17927_v12 = vld [vmem:[#allocation3 + $0x294] ss:$8 sps:$4 sm:$0xff]  }
  0x6f   : > { %632 = vmatprep.subr.bf16.mxu0 %v17856_v16  ;;  %v17933_v16 = vld [vmem:[#allocation3 + $0x2b4] ss:$8 sps:$4 sm:$0xff]  }
  0x72   : > { %633 = vmatpush1.bf16.msra.mxu0 %v17860_v17  ;;  %v17931_v17 = vld [vmem:[#allocation3 + $0x2b0] ss:$8 sps:$4 sm:$0xff]  }
  0x73   : > { %891 = vmatprep.subr.bf16.mxu0 %v17864_v20  ;;  %v17937_v20 = vld [vmem:[#allocation3 + $0x2d0] ss:$8 sps:$4 sm:$0xff]  }
  0x75   : > { %635 = vmatmul.mubr.bf16.vlgmr.msra.gmra.mrb[0].mxu0 %v372_v21  ;;  %v17942_v21 = vld [vmem:[#allocation3 + $0x2e4] ss:$8 sps:$4 sm:$0xff]  }
  0x76   : > { %892 = vmatpush1.bf16.msra.mxu0 %v17862_v22  ;;  %923 = vmatprep.mubr.bf16.mxu0 %v265_v23  ;;  %v17940_v22 = vld [vmem:[#allocation3 + $0x2e0] ss:$8 sps:$4 sm:$0xff]   ;;  %v17945_v23 = vld [vmem:[#allocation3 + $0x2f4] ss:$8 sps:$4 sm:$0xff]  }
  0x77   : > { %893 = vmatprep.subr.bf16.mxu0 %v17867_v24  ;;  %v17943_v24 = vld [vmem:[#allocation3 + $0x2f0] ss:$8 sps:$4 sm:$0xff]  }
  0x7a   : > { %894 = vmatpush1.bf16.msra.mxu0 %v17865_v26  ;;  %v17948_v26 = vld [vmem:[#allocation3 + $0x304] ss:$8 sps:$4 sm:$0xff]  }
  0x7b   : > { %895 = vmatprep.subr.bf16.mxu0 %v17870_v27  ;;  %v17946_v27 = vld [vmem:[#allocation3 + $0x300] ss:$8 sps:$4 sm:$0xff]  }
  0x7e   : > { %896 = vmatpush1.bf16.msra.mxu0 %v17868_v30  ;;  %v17951_v30 = vld [vmem:[#allocation3 + $0x314] ss:$8 sps:$4 sm:$0xff]  }
  0x7f   : > { %897 = vmatprep.subr.bf16.mxu0 %v17873_v31  ;;  %v17949_v31 = vld [vmem:[#allocation3 + $0x310] ss:$8 sps:$4 sm:$0xff]  }
  0x82   : > { %898 = vmatpush1.bf16.msra.mxu0 %v17871_v32  ;;  %v17954_v32 = vld [vmem:[#allocation3 + $0x324] ss:$8 sps:$4 sm:$0xff]  }
  0x83   : > { %899 = vmatprep.subr.bf16.mxu0 %v17876_v33  ;;  %v17952_v33 = vld [vmem:[#allocation3 + $0x320] ss:$8 sps:$4 sm:$0xff]  }
  0x86   : > { %900 = vmatpush1.bf16.msra.mxu0 %v17874_v34  ;;  %v17957_v34 = vld [vmem:[#allocation3 + $0x334] ss:$8 sps:$4 sm:$0xff]  }
  0x87   : > { %901 = vmatprep.subr.bf16.mxu0 %v17879_v25  ;;  %v17955_v25 = vld [vmem:[#allocation3 + $0x330] ss:$8 sps:$4 sm:$0xff]  }
  0x8a   : > { %902 = vmatpush1.bf16.msra.mxu0 %v17877_v35  ;;  %v17960_v35 = vld [vmem:[#allocation3 + $0x344] ss:$8 sps:$4 sm:$0xff]  }
  0x8b   : > { %903 = vmatprep.subr.bf16.mxu0 %v17882_v37  ;;  %v17958_v37 = vld [vmem:[#allocation3 + $0x340] ss:$8 sps:$4 sm:$0xff]  }
  0x8e   : > { %904 = vmatpush1.bf16.msra.mxu0 %v17880_v38  ;;  %v17963_v38 = vld [vmem:[#allocation3 + $0x354] ss:$8 sps:$4 sm:$0xff]  }
  0x8f   : > { %905 = vmatprep.subr.bf16.mxu0 %v17885_v39  ;;  %v17961_v39 = vld [vmem:[#allocation3 + $0x350] ss:$8 sps:$4 sm:$0xff]  }
  0x92   : > { %906 = vmatpush1.bf16.msra.mxu0 %v17883_v40  ;;  %v17966_v40 = vld [vmem:[#allocation3 + $0x364] ss:$8 sps:$4 sm:$0xff]  }
  0x93   : > { %907 = vmatprep.subr.bf16.mxu0 %v17888_v41  ;;  %v977_v41 = vld [vmem:[#allocation2] sm:$0xfc] }
  0x96   : > { %908 = vmatpush1.bf16.msra.mxu0 %v17886_v42  ;;  %v980_v42 = vld [vmem:[#allocation2 + $0x30] sm:$0x3] }
  0x97   : > { %909 = vmatprep.subr.bf16.mxu0 %v17891_v43  ;;  %v20471_v43 = vld [vmem:[#allocation2 + $0x18] sm:$0xff] }
  0x9a   : > { %910 = vmatpush1.bf16.msra.mxu0 %v17889_v44  ;;  %v983_v44 = vpack.c.bf16 %v20471_v43, %v977_v41  ;;  %v18014_v41 = vld [vmem:[#allocation3 + $0x464] ss:$8 sps:$4 sm:$0xff]  }
  0x9b   : > { %911 = vmatprep.subr.bf16.mxu0 %v17894_v45  ;;  %v17964_v45 = vld [vmem:[#allocation3 + $0x360] ss:$8 sps:$4 sm:$0xff]  }
  0x9e   : > { %912 = vmatpush1.bf16.msra.mxu0 %v17892_v47  ;;  %v17969_v47 = vld [vmem:[#allocation3 + $0x374] ss:$8 sps:$4 sm:$0xff]  }
  0x9f   : > { %913 = vmatprep.subr.bf16.mxu0 %v17897_v48  ;;  %v986_v48 = vpack.c.bf16 %v980_v42, %v980_v42 }
  0xa2   : > { %914 = vmatpush1.bf16.msra.mxu0 %v17895_v49  ;;  %v17967_v49 = vld [vmem:[#allocation3 + $0x370] ss:$8 sps:$4 sm:$0xff]  }
  0xa3   : > { %915 = vmatprep.subr.bf16.mxu0 %v17900_v50  ;;  %v17972_v50 = vld [vmem:[#allocation3 + $0x384] ss:$8 sps:$4 sm:$0xff]  }
  0xa6   : > { %916 = vmatpush1.bf16.msra.mxu0 %v17898_v51  ;;  %v1037_v51 = vrot.slane %v983_v44, 1 }
  0xa7   : > { %917 = vmatprep.subr.bf16.mxu0 %v17903_v52  ;;  %v1038_v52 = vrot.slane %v986_v48, 1 }
  0xaa   : > { %918 = vmatpush1.bf16.msra.mxu0 %v17901_v53  ;;  %v1342_v53 = vld [vmem:[#allocation2 + $0x8] sm:$0xf8] }
  0xab   : > { %919 = vmatprep.subr.bf16.mxu0 %v17906_v54  ;;  %v1345_v54 = vld [vmem:[#allocation2 + $0x38] sm:$0x7] }
  0xae   : > { %920 = vmatpush1.bf16.msra.mxu0 %v17904_v55  ;;  %v17970_v55 = vld [vmem:[#allocation3 + $0x380] ss:$8 sps:$4 sm:$0xff]  }
  0xaf   : > { %921 = vmatprep.subr.bf16.mxu0 %v17909_v56  ;;  %v1039_v56 = vsel %vm1036_vm3, %v1037_v51, %v1038_v52  ;;  %v1341_v51 = vld [vmem:[#allocation2] sm:$0xf8]  ;;  %v18020_v52 = vld [vmem:[#allocation3 + $0x484] ss:$8 sps:$4 sm:$0xff]  }
  0xb2   : > { %922 = vmatpush1.bf16.msra.mxu0 %v17907_v57  ;;  %v17975_v57 = vld [vmem:[#allocation3 + $0x394] ss:$8 sps:$4 sm:$0xff]  }
  0xb3   : > { %934 = vmatprep.subr.bf16.mxu0 %v17912_v58  ;;  %v20476_v58 = vld [vmem:[%s20428_s9 + $0x20] sm:$0xff] }
  0xb5   : > { %924 = vmatmul.mubr.bf16.vlgmr.msra.gmra.mrb[4].mxu0 %v264_v59  ;;  %v1348_v59 = vpack.c.bf16 %v20476_v58, %v1342_v53  ;;  %v1344_v53 = vld [vmem:[#allocation2 + $0x30] sm:$0x7] }
  0xb6   : > { %935 = vmatpush1.bf16.msra.mxu0 %v17910_v60  ;;  %966 = vmatprep.mubr.bf16.mxu0 %v20306_v0  ;;  %v1351_v60 = vpack.c.bf16 %v1345_v54, %v1345_v54  ;;  %v18018_v54 = vld [vmem:[#allocation3 + $0x480] ss:$8 sps:$4 sm:$0xff]  }
  0xb7   : > { %936 = vmatprep.subr.bf16.mxu0 %v17915_v61  ;;  %v17973_v61 = vld [vmem:[#allocation3 + $0x390] ss:$8 sps:$4 sm:$0xff]   ;;  %v1413_v2 = vshrl.u32 %v1348_v59, 16 }
  0xb8   : > { %v1424_v5 = vshll.u32 %v1351_v60, 16 }
  0xb9   : > { %v1415_v9 = vrot.slane %v1413_v2, 1 }
  0xba   : > { %937 = vmatpush1.bf16.msra.mxu0 %v17913_v62  ;;  %v17978_v62 = vld [vmem:[#allocation3 + $0x3a4] ss:$8 sps:$4 sm:$0xff]  }
  0xbb   : > { %938 = vmatprep.subr.bf16.mxu0 %v17918_v63  ;;  %v979_v63 = vld [vmem:[#allocation2 + $0x10] sm:$0xfc] }
  0xbe   : > { %939 = vmatpush1.bf16.msra.mxu0 %v17916_v3  ;;  %v1416_v3 = vshll.u32 %v1348_v59, 16  ;;  %v18021_v59 = vld [vmem:[#allocation3 + $0x490] ss:$8 sps:$4 sm:$0xff]  }
  0xbf   : > { %940 = vmatprep.subr.bf16.mxu0 %v17921_v4  ;;  %v1421_v4 = vshrl.u32 %v1351_v60, 16  ;;  %v18026_v60 = vld [vmem:[#allocation3 + $0x4a4] ss:$8 sps:$4 sm:$0xff]  }
  0xc2   : > { %941 = vmatpush1.bf16.msra.mxu0 %v17919_v29  ;;  %v17981_v29 = vld [vmem:[#allocation3 + $0x3b4] ss:$8 sps:$4 sm:$0xff]  }
  0xc3   : > { %1251 = vmatprep.subr.bf16.mxu0 %v17924_v6  ;;  %v20480_v6 = vld [vmem:[#allocation2 + $0x28] sm:$0xff] }
  0xc4   : > { %v985_v7 = vpack.c.bf16 %v20480_v6, %v979_v63 }
  0xc5   : > { %15820 = vmatmul.mubr.msk.bf16.vlgmr.msra.gmra.mrb[4].mxu0 %vm249_vm0, %v266_v10  ;;  %v1418_v10 = vrot.slane %v1416_v3, 2  ;;  %v18024_v3 = vld [vmem:[#allocation3 + $0x4a0] ss:$8 sps:$4 sm:$0xff]  }
  0xc6   : > { %1252 = vmatpush1.bf16.msra.mxu0 %v17922_v11  ;;  %1283 = vmatprep.mubr.bf16.mxu0 %v1042_v13  ;;  %v1423_v11 = vrot.slane %v1421_v4, 1  ;;  %v17979_v13 = vld [vmem:[#allocation3 + $0x3b0] ss:$8 sps:$4 sm:$0xff]  }
  0xc7   : > { %1253 = vmatprep.subr.bf16.mxu0 %v17927_v12  ;;  %v1426_v12 = vrot.slane %v1424_v5, 2 }
  0xca   : > { %1254 = vmatpush1.bf16.msra.mxu0 %v17925_v14  ;;  %v17984_v14 = vld [vmem:[#allocation3 + $0x3c4] ss:$8 sps:$4 sm:$0xff]  }
  0xcb   : > { %1255 = vmatprep.subr.bf16.mxu0 %v17930_v36  ;;  %v1043_v36 = vrot.slane %v985_v7, 1 }
  0xce   : > { %1256 = vmatpush1.bf16.msra.mxu0 %v17928_v15  ;;  %v1044_v15 = vrot.slane %v988_v8, 1 }
  0xcf   : > { %1257 = vmatprep.subr.bf16.mxu0 %v17933_v16  ;;  %v1419_v16 = vor.u32 %v1418_v10, %v1415_v9 }
  0xd2   : > { %1258 = vmatpush1.bf16.msra.mxu0 %v17931_v17  ;;  %v1427_v17 = vor.u32 %v1426_v12, %v1423_v11 }
  0xd3   : > { %1259 = vmatprep.subr.bf16.mxu0 %v17936_v46  ;;  %v17982_v46 = vld [vmem:[#allocation3 + $0x3c0] ss:$8 sps:$4 sm:$0xff]  }
  0xd6   : > { %1260 = vmatpush1.bf16.msra.mxu0 %v17934_v18  ;;  %v1045_v18 = vsel %vm1036_vm3, %v1043_v36, %v1044_v15  ;;  %v1343_v36 = vld [vmem:[#allocation2 + $0x10] sm:$0xf8] }
  0xd7   : > { %1261 = vmatprep.subr.bf16.mxu0 %v17939_v19  ;;  %v17987_v19 = vld [vmem:[#allocation3 + $0x3d4] ss:$8 sps:$4 sm:$0xff]   ;;  %v18032_v15 = vld [vmem:[#allocation3 + $0x4c4] ss:$8 sps:$4 sm:$0xff]  }
  0xda   : > { %1262 = vmatpush1.bf16.msra.mxu0 %v17937_v20  ;;  %v1428_v20 = vsel %vm1394_vm4, %v1419_v16, %v1427_v17  ;;  %v1346_v16 = vld [vmem:[#allocation2 + $0x40] sm:$0x7] }
  0xdb   : > { %1263 = vmatprep.subr.bf16.mxu0 %v17942_v21  ;;  %v17985_v21 = vld [vmem:[#allocation3 + $0x3d0] ss:$8 sps:$4 sm:$0xff]  }
  0xde   : > { %1264 = vmatpush1.bf16.msra.mxu0 %v17940_v22  ;;  %v17990_v22 = vld [vmem:[#allocation3 + $0x3e4] ss:$8 sps:$4 sm:$0xff]  }
  0xdf   : > { %1265 = vmatprep.subr.bf16.mxu0 %v17945_v23  ;;  %v17988_v23 = vld [vmem:[#allocation3 + $0x3e0] ss:$8 sps:$4 sm:$0xff]  }
  0xe2   : > { %1266 = vmatpush1.bf16.msra.mxu0 %v17943_v24  ;;  %v17993_v24 = vld [vmem:[#allocation3 + $0x3f4] ss:$8 sps:$4 sm:$0xff]  }
  0xe3   : > { %1267 = vmatprep.subr.bf16.mxu0 %v17948_v26  ;;  %v17991_v26 = vld [vmem:[#allocation3 + $0x3f0] ss:$8 sps:$4 sm:$0xff]  }
  0xe6   : > { %1268 = vmatpush1.bf16.msra.mxu0 %v17946_v27  ;;  %v17996_v27 = vld [vmem:[#allocation3 + $0x404] ss:$8 sps:$4 sm:$0xff]  }
  0xe7   : > { %1269 = vmatprep.subr.bf16.mxu0 %v17951_v30  ;;  %v17994_v30 = vld [vmem:[#allocation3 + $0x400] ss:$8 sps:$4 sm:$0xff]  }
  0xea   : > { %1270 = vmatpush1.bf16.msra.mxu0 %v17949_v31  ;;  %v17999_v31 = vld [vmem:[#allocation3 + $0x414] ss:$8 sps:$4 sm:$0xff]  }
  0xeb   : > { %1271 = vmatprep.subr.bf16.mxu0 %v17954_v32  ;;  %v17997_v32 = vld [vmem:[#allocation3 + $0x410] ss:$8 sps:$4 sm:$0xff]  }
  0xee   : > { %1272 = vmatpush1.bf16.msra.mxu0 %v17952_v33  ;;  %v18002_v33 = vld [vmem:[#allocation3 + $0x424] ss:$8 sps:$4 sm:$0xff]  }
  0xef   : > { %1273 = vmatprep.subr.bf16.mxu0 %v17957_v34  ;;  %v18000_v34 = vld [vmem:[#allocation3 + $0x420] ss:$8 sps:$4 sm:$0xff]  }
  0xf2   : > { %1274 = vmatpush1.bf16.msra.mxu0 %v17955_v25  ;;  %v18005_v25 = vld [vmem:[#allocation3 + $0x434] ss:$8 sps:$4 sm:$0xff]  }
  0xf3   : > { %1275 = vmatprep.subr.bf16.mxu0 %v17960_v35  ;;  %v18003_v35 = vld [vmem:[#allocation3 + $0x430] ss:$8 sps:$4 sm:$0xff]  }
  0xf6   : > { %1276 = vmatpush1.bf16.msra.mxu0 %v17958_v37  ;;  %v18008_v37 = vld [vmem:[#allocation3 + $0x444] ss:$8 sps:$4 sm:$0xff]  }
  0xf7   : > { %1277 = vmatprep.subr.bf16.mxu0 %v17963_v38  ;;  %v18006_v38 = vld [vmem:[#allocation3 + $0x440] ss:$8 sps:$4 sm:$0xff]  }
  0xfa   : > { %1278 = vmatpush1.bf16.msra.mxu0 %v17961_v39  ;;  %v18011_v39 = vld [vmem:[#allocation3 + $0x454] ss:$8 sps:$4 sm:$0xff]  }
  0xfb   : > { %1279 = vmatprep.subr.bf16.mxu0 %v17966_v40  ;;  %v18009_v40 = vld [vmem:[#allocation3 + $0x450] ss:$8 sps:$4 sm:$0xff]  }
  0xfe   : > { %1280 = vmatpush1.bf16.msra.mxu0 %v17964_v45 }
  0xff   : > { %1281 = vmatprep.subr.bf16.mxu0 %v17969_v47  ;;  %v18012_v47 = vld [vmem:[#allocation3 + $0x460] ss:$8 sps:$4 sm:$0xff]  }
 0x102   : > { %1282 = vmatpush1.bf16.msra.mxu0 %v17967_v49  ;;  %v18017_v49 = vld [vmem:[#allocation3 + $0x474] ss:$8 sps:$4 sm:$0xff]  }
 0x103   : > { %1294 = vmatprep.subr.bf16.mxu0 %v17972_v50  ;;  %v18015_v50 = vld [vmem:[#allocation3 + $0x470] ss:$8 sps:$4 sm:$0xff]  }
 0x105   : > { %1284 = vmatmul.mubr.bf16.vlgmr.msra.gmra.mrb[4].mxu0 %v1039_v56  ;;  %v1347_v56 = vpack.c.bf16 %v20471_v43, %v1341_v51 }
 0x106   : > { %1295 = vmatpush1.bf16.msra.mxu0 %v17970_v55  ;;  %1326 = vmatprep.mubr.bf16.mxu0 %v20306_v0  ;;  %v18023_v55 = vld [vmem:[#allocation3 + $0x494] ss:$8 sps:$4 sm:$0xff]  }
 0x107   : > { %1296 = vmatprep.subr.bf16.mxu0 %v17975_v57  ;;  %v1350_v57 = vpack.c.bf16 %v1344_v53, %v1344_v53  ;;  %v18045_v53 = vld [vmem:[#allocation3 + $0x510] ss:$8 sps:$4 sm:$0xff]  }
 0x109   : > { %v1404_v63 = vshrl.u32 %v1350_v57, 16  ;;  %v1407_v1 = vshll.u32 %v1350_v57, 16  ;;  %v18056_v57 = vld [vmem:[#allocation3 + $0x544] ss:$8 sps:$4 sm:$0xff]  }
 0x10a   : > { %1297 = vmatpush1.bf16.msra.mxu0 %v17973_v61  ;;  %v1396_v61 = vshrl.u32 %v1347_v56, 16 }
 0x10b   : > { %1298 = vmatprep.subr.bf16.mxu0 %v17978_v62  ;;  %v1399_v62 = vshll.u32 %v1347_v56, 16  ;;  %v1406_v9 = vrot.slane %v1404_v63, 1  ;;  %v1409_v10 = vrot.slane %v1407_v1, 2  ;;  %v18051_v56 = vld [vmem:[#allocation3 + $0x530] ss:$8 sps:$4 sm:$0xff]  }
 0x10c   : > { %v18060_v63 = vld [vmem:[#allocation3 + $0x560] ss:$8 sps:$4 sm:$0xff]   ;;  %v18065_v1 = vld [vmem:[#allocation3 + $0x574] ss:$8 sps:$4 sm:$0xff]  }
 0x10d   : > { %v1401_v7 = vrot.slane %v1399_v62, 2  ;;  %v18062_v62 = vld [vmem:[#allocation3 + $0x564] ss:$8 sps:$4 sm:$0xff]  }
 0x10e   : > { %1299 = vmatpush1.bf16.msra.mxu0 %v17976_v28  ;;  %v18029_v28 = vld [vmem:[#allocation3 + $0x4b4] ss:$8 sps:$4 sm:$0xff]  }
 0x10f   : > { %1300 = vmatprep.subr.bf16.mxu0 %v17981_v29  ;;  %v1398_v29 = vrot.slane %v1396_v61, 1  ;;  %v18057_v61 = vld [vmem:[#allocation3 + $0x550] ss:$8 sps:$4 sm:$0xff]  }
 0x111   : > { %v1402_v17 = vor.u32 %v1401_v7, %v1398_v29  ;;  %v18069_v29 = vld [vmem:[#allocation3 + $0x590] ss:$8 sps:$4 sm:$0xff]   ;;  %v18074_v7 = vld [vmem:[#allocation3 + $0x5a4] ss:$8 sps:$4 sm:$0xff]  }
 0x112   : > { %1301 = vmatpush1.bf16.msra.mxu0 %v17979_v13 }
 0x113   : > { %1651 = vmatprep.subr.bf16.mxu0 %v17984_v14  ;;  %v18027_v14 = vld [vmem:[#allocation3 + $0x4b0] ss:$8 sps:$4 sm:$0xff]  }
 0x115   : > { %15861 = vmatmul.mubr.msk.bf16.vlgmr.msra.gmra.mrb[4].mxu0 %vm249_vm0, %v1045_v18  ;;  %v18030_v18 = vld [vmem:[#allocation3 + $0x4c0] ss:$8 sps:$4 sm:$0xff]  }
 0x116   : > { %1652 = vmatpush1.bf16.msra.mxu0 %v17982_v46  ;;  %1683 = vmatprep.mubr.bf16.mxu0 %v1428_v20  ;;  %v1410_v46 = vor.u32 %v1409_v10, %v1406_v9  ;;  %v1349_v20 = vpack.c.bf16 %v20480_v6, %v1343_v36  ;;  %v18041_v6 = vld [vmem:[#allocation3 + $0x4f4] ss:$8 sps:$4 sm:$0xff]   ;;  %v18075_v10 = vld [vmem:[#allocation3 + $0x5b0] ss:$8 sps:$4 sm:$0xff]  }
 0x117   : > { %1653 = vmatprep.subr.bf16.mxu0 %v17987_v19  ;;  %v18035_v19 = vld [vmem:[#allocation3 + $0x4d4] ss:$8 sps:$4 sm:$0xff]  }
 0x118   : > { %v18077_v9 = vld [vmem:[#allocation3 + $0x5b4] ss:$8 sps:$4 sm:$0xff]  }
 0x119   : > { %v18083_v36 = vld [vmem:[#allocation3 + $0x5d4] ss:$8 sps:$4 sm:$0xff]  }
 0x11a   : > { %1654 = vmatpush1.bf16.msra.mxu0 %v17985_v21  ;;  %v1411_v21 = vsel %vm1394_vm4, %v1402_v17, %v1410_v46  ;;  %v1741_v17 = vld [vmem:[#allocation2] sm:$0xf0]  ;;  %v1744_v46 = vld [vmem:[#allocation2 + $0x30] sm:$0xf] }
 0x11b   : > { %1655 = vmatprep.subr.bf16.mxu0 %v17990_v22  ;;  %v1352_v22 = vpack.c.bf16 %v1346_v16, %v1346_v16  ;;  %v18086_v16 = vld [vmem:[#allocation3 + $0x5e4] ss:$8 sps:$4 sm:$0xff]  }
 0x11e   : > { %1656 = vmatpush1.bf16.msra.mxu0 %v17988_v23  ;;  %v18033_v23 = vld [vmem:[#allocation3 + $0x4d0] ss:$8 sps:$4 sm:$0xff]  }
 0x11f   : > { %1657 = vmatprep.subr.bf16.mxu0 %v17993_v24  ;;  %v18038_v24 = vld [vmem:[#allocation3 + $0x4e4] ss:$8 sps:$4 sm:$0xff]  }
 0x122   : > { %1658 = vmatpush1.bf16.msra.mxu0 %v17991_v26  ;;  %v1430_v26 = vshrl.u32 %v1349_v20, 16 }
 0x123   : > { %1659 = vmatprep.subr.bf16.mxu0 %v17996_v27  ;;  %v1433_v27 = vshll.u32 %v1349_v20, 16  ;;  %v20205_v20 = vld [vmem:[#allocation2 + $0x18] sm:$0xff] }
 0x125   : > { %v679_v42 = vpop.f32.mrb[0].mxu1 }
 0x126   : > { %1660 = vmatpush1.bf16.msra.mxu0 %v17994_v30  ;;  %v681_v44 = vpop.f32.mrb[1].mxu1  ;;  %v1438_v30 = vshrl.u32 %v1352_v22, 16 }
 0x127   : > { %1661 = vmatprep.subr.bf16.mxu0 %v17999_v31  ;;  %v683_v45 = vpop.f32.mrb[2].mxu1  ;;  %v1441_v31 = vshll.u32 %v1352_v22, 16  ;;  %v1750_v22 = vpack.c.bf16 %v1744_v46, %v1744_v46 }
 0x128   : > { %v685_v48 = vpop.f32.mrb[3].mxu1 }
 0x12a   : > { %1662 = vmatpush1.bf16.msra.mxu0 %v17997_v32  ;;  %v1742_v32 = vld [vmem:[#allocation2 + $0x8] sm:$0xf0] }
 0x12b   : > { %1663 = vmatprep.subr.bf16.mxu0 %v18002_v33  ;;  %v1745_v33 = vld [vmem:[#allocation2 + $0x38] sm:$0xf] }
 0x12e   : > { %1664 = vmatpush1.bf16.msra.mxu0 %v18000_v34  ;;  %v18036_v34 = vld [vmem:[#allocation3 + $0x4e0] ss:$8 sps:$4 sm:$0xff]  }
 0x12f   : > { %1665 = vmatprep.subr.bf16.mxu0 %v18005_v25  ;;  %v1432_v25 = vrot.slane %v1430_v26, 1 }
 0x132   : > { %1666 = vmatpush1.bf16.msra.mxu0 %v18003_v35  ;;  %v1435_v35 = vrot.slane %v1433_v27, 2  ;;  %v1802_v27 = vrot.slane %v1750_v22, 2 }
 0x133   : > { %1667 = vmatprep.subr.bf16.mxu0 %v18008_v37  ;;  %v1440_v37 = vrot.slane %v1438_v30, 1  ;;  %v18090_v30 = vld [vmem:[#allocation3 + $0x600] ss:$8 sps:$4 sm:$0xff]  }
 0x136   : > { %1668 = vmatpush1.bf16.msra.mxu0 %v18006_v38  ;;  %v1443_v38 = vrot.slane %v1441_v31, 2  ;;  %v18095_v31 = vld [vmem:[#allocation3 + $0x614] ss:$8 sps:$4 sm:$0xff]  }
 0x137   : > { %1669 = vmatprep.subr.bf16.mxu0 %v18011_v39  ;;  %v1748_v39 = vpack.c.bf16 %v20476_v58, %v1742_v32  ;;  %v18050_v58 = vld [vmem:[#allocation3 + $0x524] ss:$8 sps:$4 sm:$0xff]  }
 0x13a   : > { %1670 = vmatpush1.bf16.msra.mxu0 %v18009_v40  ;;  %v1751_v40 = vpack.c.bf16 %v1745_v33, %v1745_v33  ;;  %v18093_v33 = vld [vmem:[#allocation3 + $0x610] ss:$8 sps:$4 sm:$0xff]  }
 0x13b   : > { %1671 = vmatprep.subr.bf16.mxu0 %v18014_v41  ;;  %v18039_v41 = vld [vmem:[#allocation3 + $0x4f0] ss:$8 sps:$4 sm:$0xff]  }
 0x13e   : > { %1672 = vmatpush1.bf16.msra.mxu0 %v18012_v47  ;;  %v1804_v47 = vrot.slane %v1748_v39, 2 }
 0x13f   : > { %1673 = vmatprep.subr.bf16.mxu0 %v18017_v49  ;;  %v18042_v49 = vld [vmem:[#allocation3 + $0x500] ss:$8 sps:$4 sm:$0xff]  }
 0x142   : > { %1674 = vmatpush1.bf16.msra.mxu0 %v18015_v50  ;;  %v18047_v50 = vld [vmem:[#allocation3 + $0x514] ss:$8 sps:$4 sm:$0xff]  }
 0x143   : > { %1675 = vmatprep.subr.bf16.mxu0 %v18020_v52 }
 0x146   : > { %1676 = vmatpush1.bf16.msra.mxu0 %v18018_v54  ;;  %v18048_v54 = vld [vmem:[#allocation3 + $0x520] ss:$8 sps:$4 sm:$0xff]  }
 0x147   : > { %1677 = vmatprep.subr.bf16.mxu0 %v18023_v55  ;;  %v18053_v55 = vld [vmem:[#allocation3 + $0x534] ss:$8 sps:$4 sm:$0xff]  }
 0x148   : > { %v636_v2 = vpop.f32.mrb[0].mxu0 }
 0x149   : > { %v20487_v4 = vadd.f32 %v679_v42, %v636_v2  ;;  %v638_v5 = vpop.f32.mrb[1].mxu0  ;;  %v18044_v42 = vld [vmem:[#allocation3 + $0x504] ss:$8 sps:$4 sm:$0xff]   ;;  %v18063_v2 = vld [vmem:[#allocation3 + $0x570] ss:$8 sps:$4 sm:$0xff]  }
 0x14a   : > { %v20489_v43 = vadd.f32 %v681_v44, %v638_v5  ;;  %v640_v8 = vpop.f32.mrb[2].mxu0  ;;  %1678 = vmatpush1.bf16.msra.mxu0 %v18021_v59  ;;  %v1436_v44 = vor.u32 %v1435_v35, %v1432_v25  ;;  %v18054_v59 = vld [vmem:[#allocation3 + $0x540] ss:$8 sps:$4 sm:$0xff]   ;;  %v1746_v25 = vld [vmem:[#allocation2 + $0x40] sm:$0xf] }
 0x14b   : > { %v20491_v11 = vadd.f32 %v683_v45, %v640_v8  ;;  %v642_v12 = vpop.f32.mrb[3].mxu0  ;;  %1679 = vmatprep.subr.bf16.mxu0 %v18026_v60  ;;  %v1444_v45 = vor.u32 %v1443_v38, %v1440_v37  ;;  %v18059_v60 = vld [vmem:[#allocation3 + $0x554] ss:$8 sps:$4 sm:$0xff]   ;;  %v18066_v5 = vld [vmem:[#allocation3 + $0x580] ss:$8 sps:$4 sm:$0xff]  }
 0x14c   : > { %v20493_v13 = vadd.f32 %v685_v48, %v642_v12  ;;  %v1805_v48 = vrot.slane %v1751_v40, 2  ;;  %v18072_v8 = vld [vmem:[#allocation3 + $0x5a0] ss:$8 sps:$4 sm:$0xff]   ;;  %v18080_v12 = vld [vmem:[#allocation3 + $0x5c4] ss:$8 sps:$4 sm:$0xff]   ;;  %v1752_v40 = vpack.c.bf16 %v1746_v25, %v1746_v25 }
 0x14d   : > { %v1445_v51 = vsel %vm1394_vm4, %v1436_v44, %v1444_v45  ;;  %v18096_v35 = vld [vmem:[#allocation3 + $0x620] ss:$8 sps:$4 sm:$0xff]   ;;  %v18101_v37 = vld [vmem:[#allocation3 + $0x634] ss:$8 sps:$4 sm:$0xff]  }
 0x14e   : > { %1680 = vmatpush1.bf16.msra.mxu0 %v18024_v3  ;;  %v1806_v52 = vsel %vm1800_vm5, %v1804_v47, %v1805_v48  ;;  %v18068_v3 = vld [vmem:[#allocation3 + $0x584] ss:$8 sps:$4 sm:$0xff]   ;;  %v1808_v44 = vrot.slane %v1752_v40, 2  ;;  %v18102_v47 = vld [vmem:[#allocation3 + $0x780] ss:$8 sps:$4 sm:$0xff]  }
 0x14f   : > { %1681 = vmatprep.subr.bf16.mxu0 %v18029_v28  ;;  %v18071_v28 = vld [vmem:[#allocation3 + $0x594] ss:$8 sps:$4 sm:$0xff]   ;;  %v20206_v38 = vld [vmem:[#allocation2 + $0x28] sm:$0xff] }
 0x150   : > { %v18104_v48 = vld [vmem:[#allocation3 + $0x784] ss:$8 sps:$4 sm:$0xff]   ;;  %v18149_v40 = vld [vmem:[#allocation3 + $0x874] ss:$8 sps:$4 sm:$0xff]  }
 0x151   : > { %2519 = vmatprep.subr.bf16.mxu1 %v18104_v48 }
 0x152   : > { %1682 = vmatpush1.bf16.msra.mxu0 %v18027_v14  ;;  %v18078_v14 = vld [vmem:[#allocation3 + $0x5c0] ss:$8 sps:$4 sm:$0xff]   ;;  %2520 = vmatpush1.bf16.msra.mxu1 %v18102_v47 }
 0x153   : > { %1694 = vmatprep.subr.bf16.mxu0 %v18032_v15  ;;  %v18081_v15 = vld [vmem:[#allocation3 + $0x5d0] ss:$8 sps:$4 sm:$0xff]  }
 0x155   : > { %1684 = vmatmul.mubr.bf16.vlgmr.msra.gmra.mrb[4].mxu0 %v1411_v21  ;;  %v1747_v21 = vpack.c.bf16 %v20205_v20, %v1741_v17  ;;  %v18137_v17 = vld [vmem:[#allocation3 + $0x834] ss:$8 sps:$4 sm:$0xff]  }
 0x156   : > { %1695 = vmatpush1.bf16.msra.mxu0 %v18030_v18  ;;  %1726 = vmatprep.mubr.bf16.mxu0 %v20306_v0  ;;  %v18084_v18 = vld [vmem:[#allocation3 + $0x5e0] ss:$8 sps:$4 sm:$0xff]  }
 0x157   : > { %1696 = vmatprep.subr.bf16.mxu0 %v18035_v19  ;;  %v18089_v19 = vld [vmem:[#allocation3 + $0x5f4] ss:$8 sps:$4 sm:$0xff]   ;;  %v1801_v26 = vrot.slane %v1747_v21, 2 }
 0x159   : > { %v1803_v32 = vsel %vm1800_vm5, %v1801_v26, %v1802_v27 }
 0x15a   : > { %1697 = vmatpush1.bf16.msra.mxu0 %v18033_v23  ;;  %v18087_v23 = vld [vmem:[#allocation3 + $0x5f0] ss:$8 sps:$4 sm:$0xff]  }
 0x15b   : > { %1698 = vmatprep.subr.bf16.mxu0 %v18038_v24  ;;  %v18092_v24 = vld [vmem:[#allocation3 + $0x604] ss:$8 sps:$4 sm:$0xff]  }
 0x15e   : > { %1699 = vmatpush1.bf16.msra.mxu0 %v18036_v34  ;;  %v18098_v34 = vld [vmem:[#allocation3 + $0x624] ss:$8 sps:$4 sm:$0xff]  }
 0x15f   : > { %1700 = vmatprep.subr.bf16.mxu0 %v18041_v6  ;;  %v1743_v6 = vld [vmem:[#allocation2 + $0x10] sm:$0xf0] }
 0x160   : > { %v1749_v39 = vpack.c.bf16 %v20206_v38, %v1743_v6  ;;  %v18143_v6 = vld [vmem:[#allocation3 + $0x854] ss:$8 sps:$4 sm:$0xff]   ;;  %v18144_v38 = vld [vmem:[#allocation3 + $0x860] ss:$8 sps:$4 sm:$0xff]  }
 0x162   : > { %1701 = vmatpush1.bf16.msra.mxu0 %v18039_v41  ;;  %v18099_v41 = vld [vmem:[#allocation3 + $0x630] ss:$8 sps:$4 sm:$0xff]  }
 0x163   : > { %2015 = vmatprep.subr.bf16.mxu0 %v18044_v42  ;;  %v1807_v42 = vrot.slane %v1749_v39, 2 }
 0x165   : > { %15902 = vmatmul.mubr.msk.bf16.vlgmr.msra.gmra.mrb[4].mxu0 %vm249_vm0, %v1445_v51  ;;  %v1809_v45 = vsel %vm1800_vm5, %v1807_v42, %v1808_v44  ;;  %v18110_v51 = vld [vmem:[#allocation3 + $0x7a4] ss:$8 sps:$4 sm:$0xff]   ;;  %v18147_v42 = vld [vmem:[#allocation3 + $0x870] ss:$8 sps:$4 sm:$0xff]  }
 0x166   : > { %2016 = vmatpush1.bf16.msra.mxu0 %v18042_v49  ;;  %2047 = vmatprep.mubr.bf16.mxu0 %v1806_v52  ;;  %v18107_v49 = vld [vmem:[#allocation3 + $0x794] ss:$8 sps:$4 sm:$0xff]   ;;  %v18108_v52 = vld [vmem:[#allocation3 + $0x7a0] ss:$8 sps:$4 sm:$0xff]   ;;  %v18152_v44 = vld [vmem:[#allocation3 + $0x884] ss:$8 sps:$4 sm:$0xff]  }
 0x167   : > { %2017 = vmatprep.subr.bf16.mxu0 %v18047_v50  ;;  %v18105_v50 = vld [vmem:[#allocation3 + $0x790] ss:$8 sps:$4 sm:$0xff]   ;;  %2521 = vmatprep.subr.bf16.mxu1 %v18107_v49 }
 0x168   : > { %2522 = vmatpush1.bf16.msra.mxu1 %v18105_v50 }
 0x169   : > { %2523 = vmatprep.subr.bf16.mxu1 %v18110_v51 }
 0x16a   : > { %2018 = vmatpush1.bf16.msra.mxu0 %v18045_v53  ;;  %v18113_v53 = vld [vmem:[#allocation3 + $0x7b4] ss:$8 sps:$4 sm:$0xff]  }
 0x16b   : > { %2019 = vmatprep.subr.bf16.mxu0 %v18050_v58  ;;  %v18111_v58 = vld [vmem:[#allocation3 + $0x7b0] ss:$8 sps:$4 sm:$0xff]  }
 0x16c   : > { %2524 = vmatpush1.bf16.msra.mxu1 %v18108_v52 }
 0x16d   : > { %2525 = vmatprep.subr.bf16.mxu1 %v18113_v53 }
 0x16e   : > { %2020 = vmatpush1.bf16.msra.mxu0 %v18048_v54  ;;  %v18116_v54 = vld [vmem:[#allocation3 + $0x7c4] ss:$8 sps:$4 sm:$0xff]  }
 0x16f   : > { %2021 = vmatprep.subr.bf16.mxu0 %v18053_v55  ;;  %v18114_v55 = vld [vmem:[#allocation3 + $0x7c0] ss:$8 sps:$4 sm:$0xff]  }
 0x170   : > { %2526 = vmatpush1.bf16.msra.mxu1 %v18111_v58 }
 0x171   : > { %2527 = vmatprep.subr.bf16.mxu1 %v18116_v54 }
 0x172   : > { %2022 = vmatpush1.bf16.msra.mxu0 %v18051_v56  ;;  %v18119_v56 = vld [vmem:[#allocation3 + $0x7d4] ss:$8 sps:$4 sm:$0xff]  }
 0x173   : > { %2023 = vmatprep.subr.bf16.mxu0 %v18056_v57  ;;  %v18117_v57 = vld [vmem:[#allocation3 + $0x7d0] ss:$8 sps:$4 sm:$0xff]  }
 0x174   : > { %2528 = vmatpush1.bf16.msra.mxu1 %v18114_v55 }
 0x175   : > { %2529 = vmatprep.subr.bf16.mxu1 %v18119_v56 }
 0x176   : > { %2024 = vmatpush1.bf16.msra.mxu0 %v18054_v59  ;;  %v18122_v59 = vld [vmem:[#allocation3 + $0x7e4] ss:$8 sps:$4 sm:$0xff]  }
 0x177   : > { %2025 = vmatprep.subr.bf16.mxu0 %v18059_v60  ;;  %v18120_v60 = vld [vmem:[#allocation3 + $0x7e0] ss:$8 sps:$4 sm:$0xff]  }
 0x178   : > { %2530 = vmatpush1.bf16.msra.mxu1 %v18117_v57 }
 0x179   : > { %2531 = vmatprep.subr.bf16.mxu1 %v18122_v59 }
 0x17a   : > { %2026 = vmatpush1.bf16.msra.mxu0 %v18057_v61  ;;  %v18125_v61 = vld [vmem:[#allocation3 + $0x7f4] ss:$8 sps:$4 sm:$0xff]  }
 0x17b   : > { %2027 = vmatprep.subr.bf16.mxu0 %v18062_v62  ;;  %v18123_v62 = vld [vmem:[#allocation3 + $0x7f0] ss:$8 sps:$4 sm:$0xff]  }
 0x17c   : > { %2532 = vmatpush1.bf16.msra.mxu1 %v18120_v60 }
 0x17d   : > { %2533 = vmatprep.subr.bf16.mxu1 %v18125_v61 }
 0x17e   : > { %2028 = vmatpush1.bf16.msra.mxu0 %v18060_v63  ;;  %v18128_v63 = vld [vmem:[#allocation3 + $0x804] ss:$8 sps:$4 sm:$0xff]  }
 0x17f   : > { %2029 = vmatprep.subr.bf16.mxu0 %v18065_v1  ;;  %v18126_v1 = vld [vmem:[#allocation3 + $0x800] ss:$8 sps:$4 sm:$0xff]  }
 0x180   : > { %2534 = vmatpush1.bf16.msra.mxu1 %v18123_v62 }
 0x181   : > { %2535 = vmatprep.subr.bf16.mxu1 %v18128_v63 }
 0x182   : > { %2030 = vmatpush1.bf16.msra.mxu0 %v18063_v2  ;;  %v18131_v2 = vld [vmem:[#allocation3 + $0x814] ss:$8 sps:$4 sm:$0xff]  }
 0x183   : > { %2031 = vmatprep.subr.bf16.mxu0 %v18068_v3  ;;  %v18129_v3 = vld [vmem:[#allocation3 + $0x810] ss:$8 sps:$4 sm:$0xff]  }
 0x184   : > { %2536 = vmatpush1.bf16.msra.mxu1 %v18126_v1 }
 0x185   : > { %2537 = vmatprep.subr.bf16.mxu1 %v18131_v2 }
 0x186   : > { %2032 = vmatpush1.bf16.msra.mxu0 %v18066_v5  ;;  %v2107_v5 = vlaneseq }
 0x187   : > { %2033 = vmatprep.subr.bf16.mxu0 %v18071_v28 }
 0x188   : > { %2538 = vmatpush1.bf16.msra.mxu1 %v18129_v3  ;;  %v2108_v28 = vshrl.u32 %v2107_v5, 7 }
 0x18a   : > { %2034 = vmatpush1.bf16.msra.mxu0 %v18069_v29  ;;  %v2105_v29 = vld [vmem:[%s21138_s2] sm:$0x3] }
 0x18b   : > { %2035 = vmatprep.subr.bf16.mxu0 %v18074_v7  ;;  %v20509_v7 = vsub.s32 0, %v2108_v28 }
 0x18e   : > { %2036 = vmatpush1.bf16.msra.mxu0 %v18072_v8  ;;  %v20511_v8 = vsub.s32 1, %v2108_v28 }
 0x18f   : > { %2037 = vmatprep.subr.bf16.mxu0 %v18077_v9  ;;  %v18134_v9 = vld [vmem:[#allocation3 + $0x824] ss:$8 sps:$4 sm:$0xff]  }
 0x190   : > { %2539 = vmatprep.subr.bf16.mxu1 %v18134_v9 }
 0x192   : > { %2038 = vmatpush1.bf16.msra.mxu0 %v18075_v10  ;;  %v18132_v10 = vld [vmem:[#allocation3 + $0x820] ss:$8 sps:$4 sm:$0xff]  }
 0x193   : > { %2039 = vmatprep.subr.bf16.mxu0 %v18080_v12  ;;  %v2110_v12 = vrot.slane %v2105_v29, %v20509_v7  ;;  %2540 = vmatpush1.bf16.msra.mxu1 %v18132_v10 }
 0x194   : > { %2541 = vmatprep.subr.bf16.mxu1 %v18137_v17 }
 0x196   : > { %2040 = vmatpush1.bf16.msra.mxu0 %v18078_v14 }
 0x197   : > { %2041 = vmatprep.subr.bf16.mxu0 %v18083_v36  ;;  %v2114_v36 = vrot.slane %v2105_v29, %v20511_v8 }
 0x19a   : > { %2042 = vmatpush1.bf16.msra.mxu0 %v18081_v15 }
 0x19b   : > { %2043 = vmatprep.subr.bf16.mxu0 %v18086_v16 }
 0x19e   : > { %2044 = vmatpush1.bf16.msra.mxu0 %v18084_v18 }
 0x19f   : > { %2045 = vmatprep.subr.bf16.mxu0 %v18089_v19  ;;  %v18135_v19 = vld [vmem:[#allocation3 + $0x830] ss:$8 sps:$4 sm:$0xff]  }
 0x1a0   : > { %2542 = vmatpush1.bf16.msra.mxu1 %v18135_v19 }
 0x1a2   : > { %2046 = vmatpush1.bf16.msra.mxu0 %v18087_v23 }
 0x1a3   : > { %2058 = vmatprep.subr.bf16.mxu0 %v18092_v24 }
 0x1a5   : > { %2048 = vmatmul.mubr.bf16.vlgmr.msra.gmra.mrb[4].mxu0 %v1803_v32  ;;  %v18138_v32 = vld [vmem:[#allocation3 + $0x840] ss:$8 sps:$4 sm:$0xff]  }
 0x1a6   : > { %2059 = vmatpush1.bf16.msra.mxu0 %v18090_v30  ;;  %2090 = vmatprep.mubr.bf16.mxu0 %v20306_v0  ;;  %v18140_v30 = vld [vmem:[#allocation3 + $0x844] ss:$8 sps:$4 sm:$0xff]  }
 0x1a7   : > { %2060 = vmatprep.subr.bf16.mxu0 %v18095_v31  ;;  %2543 = vmatprep.subr.bf16.mxu1 %v18140_v30 }
 0x1a8   : > { %2544 = vmatpush1.bf16.msra.mxu1 %v18138_v32  ;;  %v18159_v32 = vld [vmem:[#allocation3 + $0x8b0] ss:$8 sps:$4 sm:$0xff]  }
 0x1a9   : > { %2545 = vmatprep.subr.bf16.mxu1 %v18143_v6 }
 0x1aa   : > { %2061 = vmatpush1.bf16.msra.mxu0 %v18093_v33 }
 0x1ab   : > { %2062 = vmatprep.subr.bf16.mxu0 %v18098_v34 }
 0x1ae   : > { %2063 = vmatpush1.bf16.msra.mxu0 %v18096_v35 }
 0x1af   : > { %2064 = vmatprep.subr.bf16.mxu0 %v18101_v37 }
 0x1b2   : > { %2065 = vmatpush1.bf16.msra.mxu0 %v18099_v41 }
 0x1b5   : > { %15943 = vmatmul.mubr.msk.bf16.vlgmr.msra.gmra.mrb[4].mxu0 %vm249_vm0, %v1809_v45 }
 0x288   : > { %v2092_v14 = vpop.f32.mrb[4].mxu0 }
 0x289   : > { %v17460_v15 = vadd.f32 %v2092_v14, %v20487_v4  ;;  %v2094_v16 = vpop.f32.mrb[5].mxu0 }
 0x28a   : > { %v17462_v46 = vadd.f32 %v2094_v16, %v20489_v43  ;;  %v2096_v18 = vpop.f32.mrb[6].mxu0 }
 0x28b   : > { %v17464_v20 = vadd.f32 %v2096_v18, %v20491_v11  ;;  %v2098_v21 = vpop.f32.mrb[7].mxu0  ;;  %v2117_v22 = vadd.f32 %v17460_v15, %v2110_v12  ;;  %v18141_v11 = vld [vmem:[#allocation3 + $0x850] ss:$8 sps:$4 sm:$0xff]   ;;  %v18150_v15 = vld [vmem:[#allocation3 + $0x880] ss:$8 sps:$4 sm:$0xff]  }
 0x28c   : > { %v2118_v23 = vadd.f32 %v17462_v46, %v2114_v36  ;;  %v17466_v24 = vadd.f32 %v2098_v21, %v20493_v13  ;;  %v18146_v13 = vld [vmem:[#allocation3 + $0x864] ss:$8 sps:$4 sm:$0xff]   ;;  %2546 = vmatpush1.bf16.msra.mxu1 %v18141_v11  ;;  %v18155_v46 = vld [vmem:[#allocation3 + $0x894] ss:$8 sps:$4 sm:$0xff]  }
 0x28d   : > { %v2119_v26 = vadd.f32 %v17464_v20, %v2110_v12  ;;  %v2121_v27 = vmax.f32 %v2117_v22, 0.0  ;;  %2547 = vmatprep.subr.bf16.mxu1 %v18146_v13  ;;  %v18153_v22 = vld [vmem:[#allocation3 + $0x890] ss:$8 sps:$4 sm:$0xff]   ;;  %v18162_v13 = vld [vmem:[#allocation3 + $0x640] ss:$8 sps:$4 sm:$0xff]  }
 0x28e   : > { %v2122_v31 = vmax.f32 %v2118_v23, 0.0  ;;  %v2120_v4 = vadd.f32 %v17466_v24, %v2114_v36  ;;  %v18158_v24 = vld [vmem:[#allocation3 + $0x8a4] ss:$8 sps:$4 sm:$0xff]  }
 0x28f   : > { %v2123_v33 = vmax.f32 %v2119_v26, 0.0  ;;  %v2130_v34 = vrot.slane %v2121_v27, 6  ;;  %v18156_v27 = vld [vmem:[#allocation3 + $0x8a0] ss:$8 sps:$4 sm:$0xff]  }
 0x290   : > { %v2124_v43 = vmax.f32 %v2120_v4, 0.0  ;;  %v2131_v35 = vrot.slane %v2122_v31, 6  ;;  %2548 = vmatpush1.bf16.msra.mxu1 %v18144_v38  ;;  %v18161_v31 = vld [vmem:[#allocation3 + $0x8b4] ss:$8 sps:$4 sm:$0xff]  }
 0x291   : > { %v2132_v25 = vrot.slane %v2123_v33, 6  ;;  %2136 = vrot.lane.b32.xlu0 %v2130_v34, %s20307_s12  ;;  %2549 = vmatprep.subr.bf16.mxu1 %v18149_v40  ;;  %v18170_v40 = vld [vmem:[#allocation3 + $0x664] ss:$8 sps:$4 sm:$0xff]  }
 0x292   : > { %v2134_v37 = vrot.slane %v2124_v43, 6 }
 0x293   : > { %v2133_v39 = vsel %vm2129_vm6, %v2130_v34, %v2132_v25  ;;  %v18164_v34 = vld [vmem:[#allocation3 + $0x644] ss:$8 sps:$4 sm:$0xff]  }
 0x294   : > { %2140 = vrot.lane.b32.xlu1 %v2133_v39, %s20307_s12  ;;  %v2135_v41 = vsel %vm2129_vm6, %v2131_v35, %v2134_v37  ;;  %2550 = vmatpush1.bf16.msra.mxu1 %v18147_v42  ;;  %v18165_v39 = vld [vmem:[#allocation3 + $0x650] ss:$8 sps:$4 sm:$0xff]   ;;  %v18173_v42 = vld [vmem:[#allocation3 + $0x674] ss:$8 sps:$4 sm:$0xff]  }
 0x295   : > { %2138 = vrot.lane.b32.xlu0 %v2131_v35, %s20307_s12  ;;  %2562 = vmatprep.subr.bf16.mxu1 %v18152_v44  ;;  %v18167_v35 = vld [vmem:[#allocation3 + $0x654] ss:$8 sps:$4 sm:$0xff]   ;;  %v18171_v44 = vld [vmem:[#allocation3 + $0x670] ss:$8 sps:$4 sm:$0xff]  }
 0x298   : > { %2142 = vrot.lane.b32.xlu1 %v2135_v41, %s20307_s12  ;;  %v18168_v41 = vld [vmem:[#allocation3 + $0x660] ss:$8 sps:$4 sm:$0xff]  }
 0x299   : > { %2144 = vrot.lane.b32.xlu0 %v2132_v25, %s20307_s12 }
 0x29c   : > { %2146 = vrot.lane.b32.xlu1 %v2134_v37, %s20307_s12 }
 0x303   : > { %v2137_v45 = vpop.permute.xlu0 %2136 }
 0x304   : > { %2162 = vst.msk [vmem:[#allocation2] sm:$0xfc] %vm2161_vm7, %v2137_v45 }
 0x306   : > { %v2141_v47 = vpop.permute.xlu1 %2140 }
 0x307   : > { %2167 = vst.msk [vmem:[#allocation2 + $0x18] sm:$0xff] %vm2166_vm8, %v2141_v47  ;;  %v2139_v48 = vpop.permute.xlu0 %2138 }
 0x308   : > { %v2149_v49 = vsel %vm2148_vm9, %v2137_v45, %v2139_v48  ;;  %2165 = vst.msk [vmem:[#allocation2 + $0x10] sm:$0xfc] %vm2164_vm10, %v2139_v48  ;;  %v18176_v45 = vld [vmem:[#allocation3 + $0x684] ss:$8 sps:$4 sm:$0xff]   ;;  %v18179_v48 = vld [vmem:[#allocation3 + $0x694] ss:$8 sps:$4 sm:$0xff]  }
 0x309   : > { %2163 = vst [vmem:[#allocation2 + $0x8] sm:$0xfc] %v2149_v49  ;;  %v18177_v49 = vld [vmem:[#allocation3 + $0x690] ss:$8 sps:$4 sm:$0xff]  }
 0x30a   : > { %v2143_v50 = vpop.permute.xlu1 %2142 }
 0x30b   : > { %2169 = vst.msk [vmem:[#allocation2 + $0x28] sm:$0xff] %vm2148_vm9, %v2143_v50  ;;  %v2145_v51 = vpop.permute.xlu0 %2144  ;;  %v20538_v54 = vsel %vm2148_vm9, %v2141_v47, %v2143_v50  ;;  %v2225_v56 = vld [vmem:[#allocation2] sm:$0xfe]  ;;  %v18174_v47 = vld [vmem:[#allocation3 + $0x680] ss:$8 sps:$4 sm:$0xff]  }
 0x30c   : > { %2171 = vst.msk [vmem:[#allocation2 + $0x30] sm:$0x3] %vm2170_vm11, %v2145_v51  ;;  %v18182_v50 = vld [vmem:[#allocation3 + $0x6a4] ss:$8 sps:$4 sm:$0xff]  }
 0x30e   : > { %v2147_v52 = vpop.permute.xlu1 %2146  ;;  %v20533_v53 = vld [vmem:[#allocation2 + $0x18] sm:$0xff] }
 0x30f   : > { %v2151_v58 = vsel %vm2148_vm9, %v2145_v51, %v2147_v52  ;;  %2174 = vst.msk [vmem:[#allocation2 + $0x40] sm:$0x3] %vm2173_vm12, %v2147_v52  ;;  %v2231_v59 = vpack.c.bf16 %v20533_v53, %v2225_v56  ;;  %v2227_v20 = vld [vmem:[#allocation2 + $0x10] sm:$0xfe]  ;;  %v18185_v52 = vld [vmem:[#allocation3 + $0x6b4] ss:$8 sps:$4 sm:$0xff]  }
 0x310   : > { %2172 = vst [vmem:[#allocation2 + $0x38] sm:$0x3] %v2151_v58  ;;  %v2226_v55 = vld [vmem:[#allocation2 + $0x8] sm:$0xfe]  ;;  %v18183_v58 = vld [vmem:[#allocation3 + $0x6b0] ss:$8 sps:$4 sm:$0xff]  }
 0x311   : > { %v2232_v57 = vpack.c.bf16 %v20538_v54, %v2226_v55  ;;  %v2281_v63 = vshll.u32 %v2231_v59, 16  ;;  %v2279_v10 = vshrl.u32 %v2231_v59, 16  ;;  %v2176_v6 = vld [vmem:[#allocation2 + $0x8] sm:$0xff]  ;;  %v18189_v59 = vld [vmem:[#allocation3 + $0x6d0] ss:$8 sps:$4 sm:$0xff]  }
 0x312   : > { %v20543_v18 = vld [vmem:[#allocation2 + $0x28] sm:$0xff]  ;;  %v2182_v38 = vpack.c.bf16 %v20538_v54, %v2176_v6 }
 0x313   : > { %v2228_v60 = vld [vmem:[#allocation2 + $0x30] sm:$0x1]  ;;  %v2293_v61 = vshll.u32 %v2232_v57, 16  ;;  %v2283_v28 = vrot.slane %v2281_v63, 1  ;;  %v2291_v29 = vshrl.u32 %v2232_v57, 16  ;;  %v2233_v23 = vpack.c.bf16 %v20543_v18, %v2227_v20 }
 0x314   : > { %v2234_v62 = vpack.c.bf16 %v2228_v60, %v2228_v60  ;;  %v18180_v51 = vld [vmem:[#allocation3 + $0x6a0] ss:$8 sps:$4 sm:$0xff]   ;;  %v18188_v55 = vld [vmem:[#allocation3 + $0x6c4] ss:$8 sps:$4 sm:$0xff]   ;;  %v18191_v57 = vld [vmem:[#allocation3 + $0x6d4] ss:$8 sps:$4 sm:$0xff]  }
 0x315   : > { %v2295_v5 = vrot.slane %v2293_v61, 1  ;;  %v2284_v16 = vor.u32 %v2283_v28, %v2279_v10  ;;  %v2305_v30 = vshll.u32 %v2233_v23, 16  ;;  %v2303_v43 = vshrl.u32 %v2233_v23, 16  ;;  %v18186_v56 = vld [vmem:[#allocation3 + $0x6c0] ss:$8 sps:$4 sm:$0xff]  }
 0x316   : > { %v2286_v2 = vshll.u32 %v2234_v62, 16  ;;  %v2230_v21 = vld [vmem:[#allocation2 + $0x40] sm:$0x1]  ;;  %v18194_v60 = vld [vmem:[#allocation3 + $0x6e4] ss:$8 sps:$4 sm:$0xff]  }
 0x317   : > { %v2229_v1 = vld [vmem:[#allocation2 + $0x38] sm:$0x1]  ;;  %v2296_v14 = vor.u32 %v2295_v5, %v2291_v29  ;;  %v2236_v26 = vpack.c.bf16 %v2230_v21, %v2230_v21  ;;  %v2307_v33 = vrot.slane %v2305_v30, 1  ;;  %v18192_v61 = vld [vmem:[#allocation3 + $0x6e0] ss:$8 sps:$4 sm:$0xff]  }
 0x318   : > { %v2235_v3 = vpack.c.bf16 %v2229_v1, %v2229_v1  ;;  %v2288_v12 = vrot.slane %v2286_v2, 1  ;;  %v18197_v62 = vld [vmem:[#allocation3 + $0x6f4] ss:$8 sps:$4 sm:$0xff]   ;;  %v18195_v63 = vld [vmem:[#allocation3 + $0x6f0] ss:$8 sps:$4 sm:$0xff]  }
 0x319   : > { %v2310_v4 = vshll.u32 %v2236_v26, 16  ;;  %v2308_v25 = vor.u32 %v2307_v33, %v2303_v43  ;;  %v18200_v1 = vld [vmem:[#allocation3 + $0x704] ss:$8 sps:$4 sm:$0xff]   ;;  %v18198_v2 = vld [vmem:[#allocation3 + $0x700] ss:$8 sps:$4 sm:$0xff]  }
 0x31a   : > { %v2298_v9 = vshll.u32 %v2235_v3, 16  ;;  %v2289_v19 = vsel %vm360_vm2, %v2284_v16, %v2288_v12  ;;  %v18203_v3 = vld [vmem:[#allocation3 + $0x714] ss:$8 sps:$4 sm:$0xff]   ;;  %v18201_v5 = vld [vmem:[#allocation3 + $0x710] ss:$8 sps:$4 sm:$0xff]  }
 0x31b   : > { %v2312_v11 = vrot.slane %v2310_v4, 1  ;;  %v18206_v28 = vld [vmem:[#allocation3 + $0x724] ss:$8 sps:$4 sm:$0xff]   ;;  %v18204_v29 = vld [vmem:[#allocation3 + $0x720] ss:$8 sps:$4 sm:$0xff]  }
 0x31c   : > { %v2300_v36 = vrot.slane %v2298_v9, 1  ;;  %v18209_v9 = vld [vmem:[#allocation3 + $0x734] ss:$8 sps:$4 sm:$0xff]   ;;  %v18207_v10 = vld [vmem:[#allocation3 + $0x730] ss:$8 sps:$4 sm:$0xff]  }
 0x31d   : > { %v2313_v37 = vsel %vm360_vm2, %v2308_v25, %v2312_v11  ;;  %v18212_v12 = vld [vmem:[#allocation3 + $0x744] ss:$8 sps:$4 sm:$0xff]   ;;  %v18215_v16 = vld [vmem:[#allocation3 + $0x754] ss:$8 sps:$4 sm:$0xff]   ;;  %v2898_v20 = vld [vmem:[#allocation2 + $0x38] sm:$0x3] }
 0x31e   : > { %v2301_v17 = vsel %vm360_vm2, %v2296_v14, %v2300_v36  ;;  %v2175_v14 = vld [vmem:[#allocation2] sm:$0xff]  ;;  %v18210_v36 = vld [vmem:[#allocation3 + $0x740] ss:$8 sps:$4 sm:$0xff]   ;;  %v2904_v23 = vpack.c.bf16 %v2898_v20, %v2898_v20  ;;  %v18224_v26 = vld [vmem:[#allocation3 + $0x8c4] ss:$8 sps:$4 sm:$0xff]  }
 0x31f   : > { %2551 = vmatprep.mubr.bf16.mxu1 %v2301_v17  ;;  %v18213_v17 = vld [vmem:[#allocation3 + $0x750] ss:$8 sps:$4 sm:$0xff]   ;;  %v18221_v21 = vld [vmem:[#allocation3 + $0x774] ss:$8 sps:$4 sm:$0xff]   ;;  %v18222_v4 = vld [vmem:[#allocation3 + $0x8c0] ss:$8 sps:$4 sm:$0xff]  }
 0x320   : > { %2552 = vmatmul.mubr.bf16.vlgmr.msra.gmra.mrb[4].mxu1 %v2289_v19  ;;  %v18216_v19 = vld [vmem:[#allocation3 + $0x760] ss:$8 sps:$4 sm:$0xff]   ;;  %v2957_v30 = vrot.slane %v2904_v23, 1  ;;  %v18225_v11 = vld [vmem:[#allocation3 + $0x8d0] ss:$8 sps:$4 sm:$0xff]  }
 0x321   : > { %2563 = vmatpush1.bf16.msra.mxu1 %v18150_v15  ;;  %2594 = vmatprep.mubr.bf16.mxu1 %v20306_v0  ;;  %v2181_v15 = vpack.c.bf16 %v20533_v53, %v2175_v14  ;;  %v18230_v6 = vld [vmem:[#allocation3 + $0x8e4] ss:$8 sps:$4 sm:$0xff]   ;;  %v18228_v25 = vld [vmem:[#allocation3 + $0x8e0] ss:$8 sps:$4 sm:$0xff]   ;;  %v3261_v14 = vld [vmem:[#allocation2 + $0x38] sm:$0x7] }
 0x322   : > { %2564 = vmatprep.subr.bf16.mxu1 %v18155_v46  ;;  %v18218_v46 = vld [vmem:[#allocation3 + $0x764] ss:$8 sps:$4 sm:$0xff]  }
 0x325   : > { %2565 = vmatpush1.bf16.msra.mxu1 %v18153_v22  ;;  %v2895_v22 = vld [vmem:[#allocation2 + $0x8] sm:$0xfc] }
 0x326   : > { %2566 = vmatprep.subr.bf16.mxu1 %v18158_v24  ;;  %v18219_v24 = vld [vmem:[#allocation3 + $0x770] ss:$8 sps:$4 sm:$0xff]  }
 0x329   : > { %2567 = vmatpush1.bf16.msra.mxu1 %v18156_v27  ;;  %v2901_v27 = vpack.c.bf16 %v20538_v54, %v2895_v22 }
 0x32a   : > { %2568 = vmatprep.subr.bf16.mxu1 %v18161_v31  ;;  %v2177_v31 = vld [vmem:[#allocation2 + $0x10] sm:$0xff] }
 0x32b   : > { %v2956_v33 = vrot.slane %v2901_v27, 1 }
 0x32d   : > { %2569 = vmatpush1.bf16.msra.mxu1 %v18159_v32  ;;  %v2183_v32 = vpack.c.bf16 %v20543_v18, %v2177_v31  ;;  %v2958_v43 = vsel %vm1036_vm3, %v2956_v33, %v2957_v30 }
 0x32e   : > { %2808 = vmatprep.subr.bf16.mxu1 %v18164_v34  ;;  %v18227_v34 = vld [vmem:[#allocation3 + $0x8d4] ss:$8 sps:$4 sm:$0xff]  }
 0x330   : > { %15984 = vmatmul.mubr.msk.bf16.vlgmr.msra.gmra.mrb[4].mxu1 %vm249_vm0, %v2313_v37  ;;  %v18236_v37 = vld [vmem:[#allocation3 + $0x904] ss:$8 sps:$4 sm:$0xff]  }
 0x331   : > { %2809 = vmatpush1.bf16.msra.mxu1 %v18162_v13  ;;  %2840 = vmatprep.mubr.bf16.mxu1 %v2182_v38  ;;  %v18233_v13 = vld [vmem:[#allocation3 + $0x8f4] ss:$8 sps:$4 sm:$0xff]   ;;  %v18234_v38 = vld [vmem:[#allocation3 + $0x900] ss:$8 sps:$4 sm:$0xff]  }
 0x332   : > { %2810 = vmatprep.subr.bf16.mxu1 %v18167_v35  ;;  %v18231_v35 = vld [vmem:[#allocation3 + $0x8f0] ss:$8 sps:$4 sm:$0xff]  }
 0x335   : > { %2811 = vmatpush1.bf16.msra.mxu1 %v18165_v39  ;;  %v18239_v39 = vld [vmem:[#allocation3 + $0x914] ss:$8 sps:$4 sm:$0xff]  }
 0x336   : > { %2812 = vmatprep.subr.bf16.mxu1 %v18170_v40  ;;  %v18237_v40 = vld [vmem:[#allocation3 + $0x910] ss:$8 sps:$4 sm:$0xff]  }
 0x339   : > { %2813 = vmatpush1.bf16.msra.mxu1 %v18168_v41  ;;  %v18242_v41 = vld [vmem:[#allocation3 + $0x924] ss:$8 sps:$4 sm:$0xff]  }
 0x33a   : > { %2814 = vmatprep.subr.bf16.mxu1 %v18173_v42  ;;  %v18240_v42 = vld [vmem:[#allocation3 + $0x920] ss:$8 sps:$4 sm:$0xff]  }
 0x33d   : > { %2815 = vmatpush1.bf16.msra.mxu1 %v18171_v44  ;;  %v18245_v44 = vld [vmem:[#allocation3 + $0x934] ss:$8 sps:$4 sm:$0xff]  }
 0x33e   : > { %2816 = vmatprep.subr.bf16.mxu1 %v18176_v45  ;;  %v18243_v45 = vld [vmem:[#allocation3 + $0x930] ss:$8 sps:$4 sm:$0xff]  }
 0x341   : > { %2817 = vmatpush1.bf16.msra.mxu1 %v18174_v47  ;;  %v18248_v47 = vld [vmem:[#allocation3 + $0x944] ss:$8 sps:$4 sm:$0xff]  }
 0x342   : > { %2818 = vmatprep.subr.bf16.mxu1 %v18179_v48  ;;  %v18246_v48 = vld [vmem:[#allocation3 + $0x940] ss:$8 sps:$4 sm:$0xff]  }
 0x345   : > { %2819 = vmatpush1.bf16.msra.mxu1 %v18177_v49  ;;  %v18251_v49 = vld [vmem:[#allocation3 + $0x954] ss:$8 sps:$4 sm:$0xff]  }
 0x346   : > { %2820 = vmatprep.subr.bf16.mxu1 %v18182_v50  ;;  %v18249_v50 = vld [vmem:[#allocation3 + $0x950] ss:$8 sps:$4 sm:$0xff]  }
 0x349   : > { %2821 = vmatpush1.bf16.msra.mxu1 %v18180_v51  ;;  %v18254_v51 = vld [vmem:[#allocation3 + $0x964] ss:$8 sps:$4 sm:$0xff]  }
 0x34a   : > { %2822 = vmatprep.subr.bf16.mxu1 %v18185_v52  ;;  %v18252_v52 = vld [vmem:[#allocation3 + $0x960] ss:$8 sps:$4 sm:$0xff]  }
 0x34d   : > { %2823 = vmatpush1.bf16.msra.mxu1 %v18183_v58  ;;  %v18257_v58 = vld [vmem:[#allocation3 + $0x974] ss:$8 sps:$4 sm:$0xff]  }
 0x34e   : > { %2824 = vmatprep.subr.bf16.mxu1 %v18188_v55  ;;  %v18255_v55 = vld [vmem:[#allocation3 + $0x970] ss:$8 sps:$4 sm:$0xff]  }
 0x351   : > { %2825 = vmatpush1.bf16.msra.mxu1 %v18186_v56  ;;  %v18260_v56 = vld [vmem:[#allocation3 + $0x984] ss:$8 sps:$4 sm:$0xff]  }
 0x352   : > { %2826 = vmatprep.subr.bf16.mxu1 %v18191_v57  ;;  %v18258_v57 = vld [vmem:[#allocation3 + $0x980] ss:$8 sps:$4 sm:$0xff]  }
 0x355   : > { %2827 = vmatpush1.bf16.msra.mxu1 %v18189_v59  ;;  %v18263_v59 = vld [vmem:[#allocation3 + $0x994] ss:$8 sps:$4 sm:$0xff]  }
 0x356   : > { %2828 = vmatprep.subr.bf16.mxu1 %v18194_v60  ;;  %v18261_v60 = vld [vmem:[#allocation3 + $0x990] ss:$8 sps:$4 sm:$0xff]  }
 0x359   : > { %2829 = vmatpush1.bf16.msra.mxu1 %v18192_v61  ;;  %v18266_v61 = vld [vmem:[#allocation3 + $0x9a4] ss:$8 sps:$4 sm:$0xff]  }
 0x35a   : > { %2830 = vmatprep.subr.bf16.mxu1 %v18197_v62  ;;  %v2897_v62 = vld [vmem:[#allocation2 + $0x30] sm:$0x3] }
 0x35d   : > { %2831 = vmatpush1.bf16.msra.mxu1 %v18195_v63  ;;  %v18264_v63 = vld [vmem:[#allocation3 + $0x9a0] ss:$8 sps:$4 sm:$0xff]  }
 0x35e   : > { %2832 = vmatprep.subr.bf16.mxu1 %v18200_v1  ;;  %v18269_v1 = vld [vmem:[#allocation3 + $0x9b4] ss:$8 sps:$4 sm:$0xff]  }
 0x361   : > { %2833 = vmatpush1.bf16.msra.mxu1 %v18198_v2  ;;  %v2903_v2 = vpack.c.bf16 %v2897_v62, %v2897_v62  ;;  %v18311_v62 = vld [vmem:[#allocation3 + $0xa94] ss:$8 sps:$4 sm:$0xff]  }
 0x362   : > { %2834 = vmatprep.subr.bf16.mxu1 %v18203_v3  ;;  %v2894_v3 = vld [vmem:[#allocation2] sm:$0xfc] }
 0x365   : > { %2835 = vmatpush1.bf16.msra.mxu1 %v18201_v5  ;;  %v18267_v5 = vld [vmem:[#allocation3 + $0x9b0] ss:$8 sps:$4 sm:$0xff]  }
 0x366   : > { %2836 = vmatprep.subr.bf16.mxu1 %v18206_v28  ;;  %v2900_v28 = vpack.c.bf16 %v20533_v53, %v2894_v3  ;;  %v18317_v3 = vld [vmem:[#allocation3 + $0xab4] ss:$8 sps:$4 sm:$0xff]  }
 0x369   : > { %2837 = vmatpush1.bf16.msra.mxu1 %v18204_v29  ;;  %v18272_v29 = vld [vmem:[#allocation3 + $0x9c4] ss:$8 sps:$4 sm:$0xff]  }
 0x36a   : > { %2838 = vmatprep.subr.bf16.mxu1 %v18209_v9  ;;  %v2954_v9 = vrot.slane %v2903_v2, 1  ;;  %v18312_v2 = vld [vmem:[#allocation3 + $0xaa0] ss:$8 sps:$4 sm:$0xff]  }
 0x36d   : > { %2839 = vmatpush1.bf16.msra.mxu1 %v18207_v10  ;;  %v2953_v10 = vrot.slane %v2900_v28, 1  ;;  %v18320_v28 = vld [vmem:[#allocation3 + $0xac4] ss:$8 sps:$4 sm:$0xff]  }
 0x36e   : > { %2851 = vmatprep.subr.bf16.mxu1 %v18212_v12  ;;  %v18270_v12 = vld [vmem:[#allocation3 + $0x9c0] ss:$8 sps:$4 sm:$0xff]  }
 0x370   : > { %2841 = vmatmul.mubr.bf16.vlgmr.msra.gmra.mrb[4].mxu1 %v2181_v15  ;;  %v2955_v15 = vsel %vm1036_vm3, %v2953_v10, %v2954_v9  ;;  %v18318_v9 = vld [vmem:[#allocation3 + $0xac0] ss:$8 sps:$4 sm:$0xff]   ;;  %v18323_v10 = vld [vmem:[#allocation3 + $0xad4] ss:$8 sps:$4 sm:$0xff]  }
 0x371   : > { %2852 = vmatpush1.bf16.msra.mxu1 %v18210_v36  ;;  %2883 = vmatprep.mubr.bf16.mxu1 %v20306_v0  ;;  %v18275_v36 = vld [vmem:[#allocation3 + $0x9d4] ss:$8 sps:$4 sm:$0xff]  }
 0x372   : > { %2853 = vmatprep.subr.bf16.mxu1 %v18215_v16  ;;  %v3258_v16 = vld [vmem:[#allocation2 + $0x8] sm:$0xf8] }
 0x373   : > { %v3264_v20 = vpack.c.bf16 %v20538_v54, %v3258_v16  ;;  %v18326_v16 = vld [vmem:[#allocation3 + $0xae4] ss:$8 sps:$4 sm:$0xff]  }
 0x375   : > { %2854 = vmatpush1.bf16.msra.mxu1 %v18213_v17  ;;  %v3267_v17 = vpack.c.bf16 %v3261_v14, %v3261_v14  ;;  %v3328_v27 = vshrl.u32 %v3264_v20, 16  ;;  %v3331_v30 = vshll.u32 %v3264_v20, 16  ;;  %v3257_v14 = vld [vmem:[#allocation2] sm:$0xf8] }
 0x376   : > { %2855 = vmatprep.subr.bf16.mxu1 %v18218_v46  ;;  %v18273_v46 = vld [vmem:[#allocation3 + $0x9d0] ss:$8 sps:$4 sm:$0xff]  }
 0x377   : > { %v3336_v22 = vshrl.u32 %v3267_v17, 16  ;;  %v3339_v23 = vshll.u32 %v3267_v17, 16 }
 0x379   : > { %2856 = vmatpush1.bf16.msra.mxu1 %v18216_v19  ;;  %v18278_v19 = vld [vmem:[#allocation3 + $0x9e4] ss:$8 sps:$4 sm:$0xff]   ;;  %v3341_v33 = vrot.slane %v3339_v23, 2 }
 0x37a   : > { %2857 = vmatprep.subr.bf16.mxu1 %v18221_v21  ;;  %v2899_v21 = vld [vmem:[#allocation2 + $0x40] sm:$0x3] }
 0x37b   : > { %v2905_v31 = vpack.c.bf16 %v2899_v21, %v2899_v21 }
 0x37d   : > { %2858 = vmatpush1.bf16.msra.mxu1 %v18219_v24  ;;  %v18276_v24 = vld [vmem:[#allocation3 + $0x9e0] ss:$8 sps:$4 sm:$0xff]  }
 0x37e   : > { %3167 = vmatprep.subr.bf16.mxu1 %v18224_v26  ;;  %v18281_v26 = vld [vmem:[#allocation3 + $0x9f4] ss:$8 sps:$4 sm:$0xff]  }
 0x380   : > { %16025 = vmatmul.mubr.msk.bf16.vlgmr.msra.gmra.mrb[4].mxu1 %vm249_vm0, %v2183_v32  ;;  %v3338_v32 = vrot.slane %v3336_v22, 1  ;;  %v18329_v22 = vld [vmem:[#allocation3 + $0xaf4] ss:$8 sps:$4 sm:$0xff]  }
 0x381   : > { %3168 = vmatpush1.bf16.msra.mxu1 %v18222_v4  ;;  %3199 = vmatprep.mubr.bf16.mxu1 %v2958_v43  ;;  %v2896_v4 = vld [vmem:[#allocation2 + $0x10] sm:$0xfc] }
 0x382   : > { %3169 = vmatprep.subr.bf16.mxu1 %v18227_v34  ;;  %v18279_v34 = vld [vmem:[#allocation3 + $0x9f0] ss:$8 sps:$4 sm:$0xff]   ;;  %v2902_v43 = vpack.c.bf16 %v20543_v18, %v2896_v4 }
 0x385   : > { %3170 = vmatpush1.bf16.msra.mxu1 %v18225_v11  ;;  %v18284_v11 = vld [vmem:[#allocation3 + $0xa04] ss:$8 sps:$4 sm:$0xff]  }
 0x386   : > { %3171 = vmatprep.subr.bf16.mxu1 %v18230_v6  ;;  %v3330_v6 = vrot.slane %v3328_v27, 1 }
 0x389   : > { %3172 = vmatpush1.bf16.msra.mxu1 %v18228_v25  ;;  %v3333_v25 = vrot.slane %v3331_v30, 2 }
 0x38a   : > { %3173 = vmatprep.subr.bf16.mxu1 %v18233_v13  ;;  %v2960_v13 = vrot.slane %v2905_v31, 1  ;;  %v18332_v31 = vld [vmem:[#allocation3 + $0xb04] ss:$8 sps:$4 sm:$0xff]  }
 0x38d   : > { %3174 = vmatpush1.bf16.msra.mxu1 %v18231_v35  ;;  %v3342_v35 = vor.u32 %v3341_v33, %v3338_v32  ;;  %v3262_v32 = vld [vmem:[#allocation2 + $0x40] sm:$0x7] }
 0x38e   : > { %3175 = vmatprep.subr.bf16.mxu1 %v18236_v37  ;;  %v2959_v37 = vrot.slane %v2902_v43, 1  ;;  %v18335_v43 = vld [vmem:[#allocation3 + $0xb14] ss:$8 sps:$4 sm:$0xff]  }
 0x391   : > { %3176 = vmatpush1.bf16.msra.mxu1 %v18234_v38  ;;  %v18282_v38 = vld [vmem:[#allocation3 + $0xa00] ss:$8 sps:$4 sm:$0xff]  }
 0x392   : > { %3177 = vmatprep.subr.bf16.mxu1 %v18239_v39  ;;  %v3334_v39 = vor.u32 %v3333_v25, %v3330_v6  ;;  %v3268_v6 = vpack.c.bf16 %v3262_v32, %v3262_v32  ;;  %v3259_v25 = vld [vmem:[#allocation2 + $0x10] sm:$0xf8] }
 0x393   : > { %v18386_v32 = vld [vmem:[#allocation3 + $0xc24] ss:$8 sps:$4 sm:$0xff]  }
 0x395   : > { %3178 = vmatpush1.bf16.msra.mxu1 %v18237_v40  ;;  %v18287_v40 = vld [vmem:[#allocation3 + $0xa14] ss:$8 sps:$4 sm:$0xff]  }
 0x396   : > { %3179 = vmatprep.subr.bf16.mxu1 %v18242_v41  ;;  %v2961_v41 = vsel %vm1036_vm3, %v2959_v37, %v2960_v13  ;;  %v18333_v13 = vld [vmem:[#allocation3 + $0xb10] ss:$8 sps:$4 sm:$0xff]   ;;  %v18338_v37 = vld [vmem:[#allocation3 + $0xb24] ss:$8 sps:$4 sm:$0xff]  }
 0x399   : > { %3180 = vmatpush1.bf16.msra.mxu1 %v18240_v42  ;;  %v3343_v42 = vsel %vm1394_vm4, %v3334_v39, %v3342_v35  ;;  %v3265_v35 = vpack.c.bf16 %v20543_v18, %v3259_v25  ;;  %v3356_v39 = vshll.u32 %v3268_v6, 16  ;;  %v18387_v25 = vld [vmem:[#allocation3 + $0xc30] ss:$8 sps:$4 sm:$0xff]  }
 0x39a   : > { %3181 = vmatprep.subr.bf16.mxu1 %v18245_v44  ;;  %v18285_v44 = vld [vmem:[#allocation3 + $0xa10] ss:$8 sps:$4 sm:$0xff]  }
 0x39d   : > { %3182 = vmatpush1.bf16.msra.mxu1 %v18243_v45  ;;  %v18290_v45 = vld [vmem:[#allocation3 + $0xa24] ss:$8 sps:$4 sm:$0xff]  }
 0x39e   : > { %3183 = vmatprep.subr.bf16.mxu1 %v18248_v47  ;;  %v18288_v47 = vld [vmem:[#allocation3 + $0xa20] ss:$8 sps:$4 sm:$0xff]  }
 0x3a1   : > { %3184 = vmatpush1.bf16.msra.mxu1 %v18246_v48  ;;  %v18293_v48 = vld [vmem:[#allocation3 + $0xa34] ss:$8 sps:$4 sm:$0xff]  }
 0x3a2   : > { %3185 = vmatprep.subr.bf16.mxu1 %v18251_v49  ;;  %v18291_v49 = vld [vmem:[#allocation3 + $0xa30] ss:$8 sps:$4 sm:$0xff]  }
 0x3a5   : > { %3186 = vmatpush1.bf16.msra.mxu1 %v18249_v50  ;;  %v18296_v50 = vld [vmem:[#allocation3 + $0xa44] ss:$8 sps:$4 sm:$0xff]  }
 0x3a6   : > { %3187 = vmatprep.subr.bf16.mxu1 %v18254_v51  ;;  %v18294_v51 = vld [vmem:[#allocation3 + $0xa40] ss:$8 sps:$4 sm:$0xff]  }
 0x3a9   : > { %3188 = vmatpush1.bf16.msra.mxu1 %v18252_v52  ;;  %v18299_v52 = vld [vmem:[#allocation3 + $0xa54] ss:$8 sps:$4 sm:$0xff]  }
 0x3aa   : > { %3189 = vmatprep.subr.bf16.mxu1 %v18257_v58  ;;  %v18297_v58 = vld [vmem:[#allocation3 + $0xa50] ss:$8 sps:$4 sm:$0xff]  }
 0x3ad   : > { %3190 = vmatpush1.bf16.msra.mxu1 %v18255_v55  ;;  %v18302_v55 = vld [vmem:[#allocation3 + $0xa64] ss:$8 sps:$4 sm:$0xff]  }
 0x3ae   : > { %3191 = vmatprep.subr.bf16.mxu1 %v18260_v56  ;;  %v18300_v56 = vld [vmem:[#allocation3 + $0xa60] ss:$8 sps:$4 sm:$0xff]  }
 0x3b1   : > { %3192 = vmatpush1.bf16.msra.mxu1 %v18258_v57  ;;  %v18305_v57 = vld [vmem:[#allocation3 + $0xa74] ss:$8 sps:$4 sm:$0xff]  }
 0x3b2   : > { %3193 = vmatprep.subr.bf16.mxu1 %v18263_v59  ;;  %v18303_v59 = vld [vmem:[#allocation3 + $0xa70] ss:$8 sps:$4 sm:$0xff]  }
 0x3b5   : > { %3194 = vmatpush1.bf16.msra.mxu1 %v18261_v60  ;;  %v18308_v60 = vld [vmem:[#allocation3 + $0xa84] ss:$8 sps:$4 sm:$0xff]  }
 0x3b6   : > { %3195 = vmatprep.subr.bf16.mxu1 %v18266_v61  ;;  %v18306_v61 = vld [vmem:[#allocation3 + $0xa80] ss:$8 sps:$4 sm:$0xff]  }
 0x3b9   : > { %3196 = vmatpush1.bf16.msra.mxu1 %v18264_v63  ;;  %v18309_v63 = vld [vmem:[#allocation3 + $0xa90] ss:$8 sps:$4 sm:$0xff]  }
 0x3ba   : > { %3197 = vmatprep.subr.bf16.mxu1 %v18269_v1  ;;  %v18314_v1 = vld [vmem:[#allocation3 + $0xaa4] ss:$8 sps:$4 sm:$0xff]  }
 0x3bd   : > { %3198 = vmatpush1.bf16.msra.mxu1 %v18267_v5  ;;  %v18315_v5 = vld [vmem:[#allocation3 + $0xab0] ss:$8 sps:$4 sm:$0xff]  }
 0x3be   : > { %3210 = vmatprep.subr.bf16.mxu1 %v18272_v29  ;;  %v3260_v29 = vld [vmem:[#allocation2 + $0x30] sm:$0x7] }
 0x3c0   : > { %3200 = vmatmul.mubr.bf16.vlgmr.msra.gmra.mrb[4].mxu1 %v2955_v15  ;;  %v3263_v15 = vpack.c.bf16 %v20533_v53, %v3257_v14  ;;  %v18357_v14 = vld [vmem:[#allocation3 + $0xb90] ss:$8 sps:$4 sm:$0xff]  }
 0x3c1   : > { %3211 = vmatpush1.bf16.msra.mxu1 %v18270_v12  ;;  %3242 = vmatprep.mubr.bf16.mxu1 %v20306_v0  ;;  %v3266_v12 = vpack.c.bf16 %v3260_v29, %v3260_v29  ;;  %v18351_v29 = vld [vmem:[#allocation3 + $0xb70] ss:$8 sps:$4 sm:$0xff]  }
 0x3c2   : > { %3212 = vmatprep.subr.bf16.mxu1 %v18275_v36  ;;  %v18321_v36 = vld [vmem:[#allocation3 + $0xad0] ss:$8 sps:$4 sm:$0xff]   ;;  %v3311_v20 = vshrl.u32 %v3263_v15, 16  ;;  %v3314_v21 = vshll.u32 %v3263_v15, 16  ;;  %v18360_v15 = vld [vmem:[#allocation3 + $0xba0] ss:$8 sps:$4 sm:$0xff]  }
 0x3c3   : > { %v3319_v17 = vshrl.u32 %v3266_v12, 16 }
 0x3c4   : > { %v3313_v27 = vrot.slane %v3311_v20, 1  ;;  %v3316_v30 = vrot.slane %v3314_v21, 2  ;;  %v18371_v20 = vld [vmem:[#allocation3 + $0xbd4] ss:$8 sps:$4 sm:$0xff]   ;;  %v18369_v21 = vld [vmem:[#allocation3 + $0xbd0] ss:$8 sps:$4 sm:$0xff]  }
 0x3c5   : > { %3213 = vmatpush1.bf16.msra.mxu1 %v18273_v46  ;;  %v3322_v46 = vshll.u32 %v3266_v12, 16  ;;  %v3321_v23 = vrot.slane %v3319_v17, 1  ;;  %v18359_v12 = vld [vmem:[#allocation3 + $0xb94] ss:$8 sps:$4 sm:$0xff]   ;;  %v18363_v17 = vld [vmem:[#allocation3 + $0xbb0] ss:$8 sps:$4 sm:$0xff]  }
 0x3c6   : > { %3214 = vmatprep.subr.bf16.mxu1 %v18278_v19  ;;  %v18324_v19 = vld [vmem:[#allocation3 + $0xae0] ss:$8 sps:$4 sm:$0xff]   ;;  %v3317_v33 = vor.u32 %v3316_v30, %v3313_v27  ;;  %v18380_v27 = vld [vmem:[#allocation3 + $0xc04] ss:$8 sps:$4 sm:$0xff]  }
 0x3c7   : > { %v18378_v30 = vld [vmem:[#allocation3 + $0xc00] ss:$8 sps:$4 sm:$0xff]  }
 0x3c9   : > { %3215 = vmatpush1.bf16.msra.mxu1 %v18276_v24  ;;  %v3324_v24 = vrot.slane %v3322_v46, 2  ;;  %v18368_v46 = vld [vmem:[#allocation3 + $0xbc4] ss:$8 sps:$4 sm:$0xff]  }
 0x3ca   : > { %3216 = vmatprep.subr.bf16.mxu1 %v18281_v26  ;;  %v18327_v26 = vld [vmem:[#allocation3 + $0xaf0] ss:$8 sps:$4 sm:$0xff]  }
 0x3cb   : > { %v3325_v4 = vor.u32 %v3324_v24, %v3321_v23  ;;  %v18372_v23 = vld [vmem:[#allocation3 + $0xbe0] ss:$8 sps:$4 sm:$0xff]   ;;  %v18377_v24 = vld [vmem:[#allocation3 + $0xbf4] ss:$8 sps:$4 sm:$0xff]  }
 0x3cd   : > { %3217 = vmatpush1.bf16.msra.mxu1 %v18279_v34  ;;  %v18330_v34 = vld [vmem:[#allocation3 + $0xb00] ss:$8 sps:$4 sm:$0xff]  }
 0x3ce   : > { %3566 = vmatprep.subr.bf16.mxu1 %v18284_v11  ;;  %v3326_v11 = vsel %vm1394_vm4, %v3317_v33, %v3325_v4  ;;  %v18381_v4 = vld [vmem:[#allocation3 + $0xc10] ss:$8 sps:$4 sm:$0xff]   ;;  %v3659_v33 = vld [vmem:[#allocation2 + $0x30] sm:$0xf] }
 0x3d0   : > { %16066 = vmatmul.mubr.msk.bf16.vlgmr.msra.gmra.mrb[4].mxu1 %vm249_vm0, %v2961_v41  ;;  %v3345_v41 = vshrl.u32 %v3265_v35, 16 }
 0x3d1   : > { %3567 = vmatpush1.bf16.msra.mxu1 %v18282_v38  ;;  %3598 = vmatprep.mubr.bf16.mxu1 %v3343_v42  ;;  %v3353_v38 = vshrl.u32 %v3268_v6, 16  ;;  %v3348_v42 = vshll.u32 %v3265_v35, 16  ;;  %v3656_v6 = vld [vmem:[#allocation2] sm:$0xf0]  ;;  %v18392_v35 = vld [vmem:[#allocation3 + $0xc44] ss:$8 sps:$4 sm:$0xff]  }
 0x3d2   : > { %3568 = vmatprep.subr.bf16.mxu1 %v18287_v40  ;;  %v18336_v40 = vld [vmem:[#allocation3 + $0xb20] ss:$8 sps:$4 sm:$0xff]  }
 0x3d5   : > { %3569 = vmatpush1.bf16.msra.mxu1 %v18285_v44  ;;  %v3660_v44 = vld [vmem:[#allocation2 + $0x38] sm:$0xf] }
 0x3d6   : > { %3570 = vmatprep.subr.bf16.mxu1 %v18290_v45  ;;  %v18341_v45 = vld [vmem:[#allocation3 + $0xb34] ss:$8 sps:$4 sm:$0xff]  }
 0x3d9   : > { %3571 = vmatpush1.bf16.msra.mxu1 %v18288_v47  ;;  %v3355_v47 = vrot.slane %v3353_v38, 1 }
 0x3da   : > { %3572 = vmatprep.subr.bf16.mxu1 %v18293_v48  ;;  %v3358_v48 = vrot.slane %v3356_v39, 2  ;;  %v18390_v39 = vld [vmem:[#allocation3 + $0xc40] ss:$8 sps:$4 sm:$0xff]  }
 0x3dd   : > { %3573 = vmatpush1.bf16.msra.mxu1 %v18291_v49  ;;  %v3657_v49 = vld [vmem:[#allocation2 + $0x8] sm:$0xf0] }
 0x3de   : > { %3574 = vmatprep.subr.bf16.mxu1 %v18296_v50  ;;  %v3666_v50 = vpack.c.bf16 %v3660_v44, %v3660_v44  ;;  %v18398_v44 = vld [vmem:[#allocation3 + $0xc64] ss:$8 sps:$4 sm:$0xff]  }
 0x3e1   : > { %3575 = vmatpush1.bf16.msra.mxu1 %v18294_v51  ;;  %v18339_v51 = vld [vmem:[#allocation3 + $0xb30] ss:$8 sps:$4 sm:$0xff]  }
 0x3e2   : > { %3576 = vmatprep.subr.bf16.mxu1 %v18299_v52  ;;  %v3347_v52 = vrot.slane %v3345_v41, 1 }
 0x3e5   : > { %3577 = vmatpush1.bf16.msra.mxu1 %v18297_v58  ;;  %v3350_v58 = vrot.slane %v3348_v42, 2  ;;  %v18393_v42 = vld [vmem:[#allocation3 + $0xc50] ss:$8 sps:$4 sm:$0xff]  }
 0x3e6   : > { %3578 = vmatprep.subr.bf16.mxu1 %v18302_v55  ;;  %v18344_v55 = vld [vmem:[#allocation3 + $0xb44] ss:$8 sps:$4 sm:$0xff]  }
 0x3e9   : > { %3579 = vmatpush1.bf16.msra.mxu1 %v18300_v56  ;;  %v3663_v56 = vpack.c.bf16 %v20538_v54, %v3657_v49  ;;  %v18348_v54 = vld [vmem:[#allocation3 + $0xb60] ss:$8 sps:$4 sm:$0xff]   ;;  %v3658_v49 = vld [vmem:[#allocation2 + $0x10] sm:$0xf0] }
 0x3ea   : > { %3580 = vmatprep.subr.bf16.mxu1 %v18305_v57  ;;  %v3359_v57 = vor.u32 %v3358_v48, %v3355_v47  ;;  %v18401_v47 = vld [vmem:[#allocation3 + $0xc74] ss:$8 sps:$4 sm:$0xff]  }
 0x3ed   : > { %3581 = vmatpush1.bf16.msra.mxu1 %v18303_v59  ;;  %v3719_v59 = vrot.slane %v3666_v50, 2  ;;  %v18399_v50 = vld [vmem:[#allocation3 + $0xc70] ss:$8 sps:$4 sm:$0xff]  }
 0x3ee   : > { %3582 = vmatprep.subr.bf16.mxu1 %v18308_v60  ;;  %v3351_v60 = vor.u32 %v3350_v58, %v3347_v52 }
 0x3f1   : > { %3583 = vmatpush1.bf16.msra.mxu1 %v18306_v61  ;;  %v18342_v61 = vld [vmem:[#allocation3 + $0xb40] ss:$8 sps:$4 sm:$0xff]  }
 0x3f2   : > { %3584 = vmatprep.subr.bf16.mxu1 %v18311_v62  ;;  %v3718_v62 = vrot.slane %v3663_v56, 2  ;;  %v18402_v56 = vld [vmem:[#allocation3 + $0xdc0] ss:$8 sps:$4 sm:$0xff]  }
 0x3f5   : > { %3585 = vmatpush1.bf16.msra.mxu1 %v18309_v63  ;;  %v18347_v63 = vld [vmem:[#allocation3 + $0xb54] ss:$8 sps:$4 sm:$0xff]  }
 0x3f6   : > { %3586 = vmatprep.subr.bf16.mxu1 %v18314_v1  ;;  %v3360_v1 = vsel %vm1394_vm4, %v3351_v60, %v3359_v57  ;;  %v18404_v57 = vld [vmem:[#allocation3 + $0xdc4] ss:$8 sps:$4 sm:$0xff]   ;;  %v18405_v60 = vld [vmem:[#allocation3 + $0xdd0] ss:$8 sps:$4 sm:$0xff]  }
 0x3f7   : > { %4427 = vmatprep.subr.bf16.mxu0 %v18404_v57 }
 0x3f8   : > { %4428 = vmatpush1.bf16.msra.mxu0 %v18402_v56 }
 0x3f9   : > { %3587 = vmatpush1.bf16.msra.mxu1 %v18312_v2  ;;  %v3720_v2 = vsel %vm1800_vm5, %v3718_v62, %v3719_v59  ;;  %v18407_v59 = vld [vmem:[#allocation3 + $0xdd4] ss:$8 sps:$4 sm:$0xff]   ;;  %v18408_v62 = vld [vmem:[#allocation3 + $0xde0] ss:$8 sps:$4 sm:$0xff]  }
 0x3fa   : > { %3588 = vmatprep.subr.bf16.mxu1 %v18317_v3  ;;  %v18345_v3 = vld [vmem:[#allocation3 + $0xb50] ss:$8 sps:$4 sm:$0xff]   ;;  %4429 = vmatprep.subr.bf16.mxu0 %v18407_v59 }
 0x3fc   : > { %4430 = vmatpush1.bf16.msra.mxu0 %v18405_v60 }
 0x3fd   : > { %3589 = vmatpush1.bf16.msra.mxu1 %v18315_v5  ;;  %v18350_v5 = vld [vmem:[#allocation3 + $0xb64] ss:$8 sps:$4 sm:$0xff]  }
 0x3fe   : > { %3590 = vmatprep.subr.bf16.mxu1 %v18320_v28  ;;  %v18353_v28 = vld [vmem:[#allocation3 + $0xb74] ss:$8 sps:$4 sm:$0xff]  }
 0x401   : > { %3591 = vmatpush1.bf16.msra.mxu1 %v18318_v9  ;;  %v18356_v9 = vld [vmem:[#allocation3 + $0xb84] ss:$8 sps:$4 sm:$0xff]  }
 0x402   : > { %3592 = vmatprep.subr.bf16.mxu1 %v18323_v10  ;;  %v18354_v10 = vld [vmem:[#allocation3 + $0xb80] ss:$8 sps:$4 sm:$0xff]  }
 0x405   : > { %3593 = vmatpush1.bf16.msra.mxu1 %v18321_v36  ;;  %v18362_v36 = vld [vmem:[#allocation3 + $0xba4] ss:$8 sps:$4 sm:$0xff]  }
 0x406   : > { %3594 = vmatprep.subr.bf16.mxu1 %v18326_v16  ;;  %v18365_v16 = vld [vmem:[#allocation3 + $0xbb4] ss:$8 sps:$4 sm:$0xff]  }
 0x409   : > { %3595 = vmatpush1.bf16.msra.mxu1 %v18324_v19  ;;  %v18366_v19 = vld [vmem:[#allocation3 + $0xbc0] ss:$8 sps:$4 sm:$0xff]  }
 0x40a   : > { %3596 = vmatprep.subr.bf16.mxu1 %v18329_v22  ;;  %v18374_v22 = vld [vmem:[#allocation3 + $0xbe4] ss:$8 sps:$4 sm:$0xff]  }
 0x40d   : > { %3597 = vmatpush1.bf16.msra.mxu1 %v18327_v26  ;;  %v18375_v26 = vld [vmem:[#allocation3 + $0xbf0] ss:$8 sps:$4 sm:$0xff]  }
 0x40e   : > { %3609 = vmatprep.subr.bf16.mxu1 %v18332_v31  ;;  %v18383_v31 = vld [vmem:[#allocation3 + $0xc14] ss:$8 sps:$4 sm:$0xff]  }
 0x410   : > { %3599 = vmatmul.mubr.bf16.vlgmr.msra.gmra.mrb[4].mxu1 %v3326_v11  ;;  %v3665_v11 = vpack.c.bf16 %v3659_v33, %v3659_v33 }
 0x411   : > { %3610 = vmatpush1.bf16.msra.mxu1 %v18330_v34  ;;  %3641 = vmatprep.mubr.bf16.mxu1 %v20306_v0  ;;  %v18384_v34 = vld [vmem:[#allocation3 + $0xc20] ss:$8 sps:$4 sm:$0xff]  }
 0x412   : > { %3611 = vmatprep.subr.bf16.mxu1 %v18335_v43  ;;  %v18389_v43 = vld [vmem:[#allocation3 + $0xc34] ss:$8 sps:$4 sm:$0xff]  }
 0x415   : > { %3612 = vmatpush1.bf16.msra.mxu1 %v18333_v13  ;;  %v3662_v13 = vpack.c.bf16 %v20533_v53, %v3656_v6  ;;  %v18396_v53 = vld [vmem:[#allocation3 + $0xc60] ss:$8 sps:$4 sm:$0xff]  }
 0x416   : > { %3613 = vmatprep.subr.bf16.mxu1 %v18338_v37  ;;  %v3716_v37 = vrot.slane %v3665_v11, 2 }
 0x417   : > { %v3715_v38 = vrot.slane %v3662_v13, 2 }
 0x419   : > { %3614 = vmatpush1.bf16.msra.mxu1 %v18336_v40  ;;  %v18395_v40 = vld [vmem:[#allocation3 + $0xc54] ss:$8 sps:$4 sm:$0xff]   ;;  %v3717_v41 = vsel %vm1800_vm5, %v3715_v38, %v3716_v37  ;;  %v18441_v38 = vld [vmem:[#allocation3 + $0xe90] ss:$8 sps:$4 sm:$0xff]  }
 0x41a   : > { %3615 = vmatprep.subr.bf16.mxu1 %v18341_v45  ;;  %v3661_v45 = vld [vmem:[#allocation2 + $0x40] sm:$0xf] }
 0x41b   : > { %v3667_v48 = vpack.c.bf16 %v3661_v45, %v3661_v45  ;;  %v18449_v45 = vld [vmem:[#allocation3 + $0xeb4] ss:$8 sps:$4 sm:$0xff]  }
 0x41d   : > { %3616 = vmatpush1.bf16.msra.mxu1 %v18339_v51  ;;  %v3664_v51 = vpack.c.bf16 %v20543_v18, %v3658_v49  ;;  %v3722_v52 = vrot.slane %v3667_v48, 2  ;;  %v18413_v18 = vld [vmem:[#allocation3 + $0xdf4] ss:$8 sps:$4 sm:$0xff]  }
 0x41e   : > { %3929 = vmatprep.subr.bf16.mxu1 %v18344_v55 }
 0x41f   : > { %v3721_v58 = vrot.slane %v3664_v51, 2 }
 0x420   : > { %16107 = vmatmul.mubr.msk.bf16.vlgmr.msra.gmra.mrb[4].mxu1 %vm249_vm0, %v3360_v1  ;;  %v18416_v1 = vld [vmem:[#allocation3 + $0xe04] ss:$8 sps:$4 sm:$0xff]  }
 0x421   : > { %3930 = vmatpush1.bf16.msra.mxu1 %v18342_v61  ;;  %3961 = vmatprep.mubr.bf16.mxu1 %v3720_v2  ;;  %v3723_v55 = vsel %vm1800_vm5, %v3721_v58, %v3722_v52  ;;  %v18410_v61 = vld [vmem:[#allocation3 + $0xde4] ss:$8 sps:$4 sm:$0xff]   ;;  %v18414_v2 = vld [vmem:[#allocation3 + $0xe00] ss:$8 sps:$4 sm:$0xff]  }
 0x422   : > { %3931 = vmatprep.subr.bf16.mxu1 %v18347_v63  ;;  %4431 = vmatprep.subr.bf16.mxu0 %v18410_v61  ;;  %v18411_v63 = vld [vmem:[#allocation3 + $0xdf0] ss:$8 sps:$4 sm:$0xff]  }
 0x423   : > { %4432 = vmatpush1.bf16.msra.mxu0 %v18408_v62 }
 0x424   : > { %4433 = vmatprep.subr.bf16.mxu0 %v18413_v18 }
 0x425   : > { %3932 = vmatpush1.bf16.msra.mxu1 %v18345_v3  ;;  %v18419_v3 = vld [vmem:[#allocation3 + $0xe14] ss:$8 sps:$4 sm:$0xff]  }
 0x426   : > { %3933 = vmatprep.subr.bf16.mxu1 %v18350_v5  ;;  %v18417_v5 = vld [vmem:[#allocation3 + $0xe10] ss:$8 sps:$4 sm:$0xff]  }
 0x427   : > { %4434 = vmatpush1.bf16.msra.mxu0 %v18411_v63 }
 0x428   : > { %4435 = vmatprep.subr.bf16.mxu0 %v18416_v1 }
 0x429   : > { %3934 = vmatpush1.bf16.msra.mxu1 %v18348_v54  ;;  %v18422_v54 = vld [vmem:[#allocation3 + $0xe24] ss:$8 sps:$4 sm:$0xff]  }
 0x42a   : > { %3935 = vmatprep.subr.bf16.mxu1 %v18353_v28  ;;  %v18420_v28 = vld [vmem:[#allocation3 + $0xe20] ss:$8 sps:$4 sm:$0xff]  }
 0x42b   : > { %4436 = vmatpush1.bf16.msra.mxu0 %v18414_v2 }
 0x42c   : > { %4437 = vmatprep.subr.bf16.mxu0 %v18419_v3 }
 0x42d   : > { %3936 = vmatpush1.bf16.msra.mxu1 %v18351_v29  ;;  %v18425_v29 = vld [vmem:[#allocation3 + $0xe34] ss:$8 sps:$4 sm:$0xff]  }
 0x42e   : > { %3937 = vmatprep.subr.bf16.mxu1 %v18356_v9  ;;  %v18423_v9 = vld [vmem:[#allocation3 + $0xe30] ss:$8 sps:$4 sm:$0xff]  }
 0x42f   : > { %4438 = vmatpush1.bf16.msra.mxu0 %v18417_v5 }
 0x430   : > { %4439 = vmatprep.subr.bf16.mxu0 %v18422_v54 }
 0x431   : > { %3938 = vmatpush1.bf16.msra.mxu1 %v18354_v10  ;;  %v18428_v10 = vld [vmem:[#allocation3 + $0xe44] ss:$8 sps:$4 sm:$0xff]  }
 0x432   : > { %3939 = vmatprep.subr.bf16.mxu1 %v18359_v12  ;;  %v18426_v12 = vld [vmem:[#allocation3 + $0xe40] ss:$8 sps:$4 sm:$0xff]  }
 0x433   : > { %4440 = vmatpush1.bf16.msra.mxu0 %v18420_v28 }
 0x434   : > { %4441 = vmatprep.subr.bf16.mxu0 %v18425_v29 }
 0x435   : > { %3940 = vmatpush1.bf16.msra.mxu1 %v18357_v14  ;;  %v18431_v14 = vld [vmem:[#allocation3 + $0xe54] ss:$8 sps:$4 sm:$0xff]  }
 0x436   : > { %3941 = vmatprep.subr.bf16.mxu1 %v18362_v36  ;;  %v18429_v36 = vld [vmem:[#allocation3 + $0xe50] ss:$8 sps:$4 sm:$0xff]  }
 0x437   : > { %4442 = vmatpush1.bf16.msra.mxu0 %v18423_v9 }
 0x438   : > { %4443 = vmatprep.subr.bf16.mxu0 %v18428_v10 }
 0x439   : > { %3942 = vmatpush1.bf16.msra.mxu1 %v18360_v15  ;;  %v16149_v15 = vld [vmem:[%s21138_s2 + $0x2] sm:$0x3] }
 0x43a   : > { %3943 = vmatprep.subr.bf16.mxu1 %v18365_v16  ;;  %v18432_v16 = vld [vmem:[#allocation3 + $0xe60] ss:$8 sps:$4 sm:$0xff]  }
 0x43b   : > { %4444 = vmatpush1.bf16.msra.mxu0 %v18426_v12 }
 0x43c   : > { %4445 = vmatprep.subr.bf16.mxu0 %v18431_v14 }
 0x43d   : > { %3944 = vmatpush1.bf16.msra.mxu1 %v18363_v17  ;;  %v18434_v17 = vld [vmem:[#allocation3 + $0xe64] ss:$8 sps:$4 sm:$0xff]  }
 0x43e   : > { %3945 = vmatprep.subr.bf16.mxu1 %v18368_v46  ;;  %v4025_v46 = vrot.slane %v16149_v15, %v20509_v7 }
 0x43f   : > { %4446 = vmatpush1.bf16.msra.mxu0 %v18429_v36 }
 0x440   : > { %4447 = vmatprep.subr.bf16.mxu0 %v18434_v17  ;;  %v18450_v17 = vld [vmem:[#allocation3 + $0xec0] ss:$8 sps:$4 sm:$0xff]  }
 0x441   : > { %3946 = vmatpush1.bf16.msra.mxu1 %v18366_v19  ;;  %v4029_v19 = vrot.slane %v16149_v15, %v20511_v8 }
 0x442   : > { %3947 = vmatprep.subr.bf16.mxu1 %v18371_v20  ;;  %v18435_v20 = vld [vmem:[#allocation3 + $0xe70] ss:$8 sps:$4 sm:$0xff]  }
 0x443   : > { %4448 = vmatpush1.bf16.msra.mxu0 %v18432_v16 }
 0x445   : > { %3948 = vmatpush1.bf16.msra.mxu1 %v18369_v21  ;;  %v18437_v21 = vld [vmem:[#allocation3 + $0xe74] ss:$8 sps:$4 sm:$0xff]  }
 0x446   : > { %3949 = vmatprep.subr.bf16.mxu1 %v18374_v22  ;;  %4449 = vmatprep.subr.bf16.mxu0 %v18437_v21 }
 0x447   : > { %4450 = vmatpush1.bf16.msra.mxu0 %v18435_v20  ;;  %v18455_v20 = vld [vmem:[#allocation3 + $0xed4] ss:$8 sps:$4 sm:$0xff]  }
 0x449   : > { %3950 = vmatpush1.bf16.msra.mxu1 %v18372_v23 }
 0x44a   : > { %3951 = vmatprep.subr.bf16.mxu1 %v18377_v24 }
 0x44d   : > { %3952 = vmatpush1.bf16.msra.mxu1 %v18375_v26 }
 0x44e   : > { %3953 = vmatprep.subr.bf16.mxu1 %v18380_v27 }
 0x451   : > { %3954 = vmatpush1.bf16.msra.mxu1 %v18378_v30 }
 0x452   : > { %3955 = vmatprep.subr.bf16.mxu1 %v18383_v31 }
 0x455   : > { %3956 = vmatpush1.bf16.msra.mxu1 %v18381_v4 }
 0x456   : > { %3957 = vmatprep.subr.bf16.mxu1 %v18386_v32 }
 0x459   : > { %3958 = vmatpush1.bf16.msra.mxu1 %v18384_v34  ;;  %v18438_v34 = vld [vmem:[#allocation3 + $0xe80] ss:$8 sps:$4 sm:$0xff]  }
 0x45a   : > { %3959 = vmatprep.subr.bf16.mxu1 %v18389_v43  ;;  %v18440_v43 = vld [vmem:[#allocation3 + $0xe84] ss:$8 sps:$4 sm:$0xff]  }
 0x45b   : > { %4451 = vmatprep.subr.bf16.mxu0 %v18440_v43  ;;  %v18459_v43 = vld [vmem:[#allocation3 + $0xef0] ss:$8 sps:$4 sm:$0xff]  }
 0x45c   : > { %4452 = vmatpush1.bf16.msra.mxu0 %v18438_v34 }
 0x45d   : > { %3960 = vmatpush1.bf16.msra.mxu1 %v18387_v25  ;;  %v18443_v25 = vld [vmem:[#allocation3 + $0xe94] ss:$8 sps:$4 sm:$0xff]  }
 0x45e   : > { %3972 = vmatprep.subr.bf16.mxu1 %v18392_v35  ;;  %4453 = vmatprep.subr.bf16.mxu0 %v18443_v25 }
 0x460   : > { %3962 = vmatmul.mubr.bf16.vlgmr.msra.gmra.mrb[4].mxu1 %v3717_v41  ;;  %4454 = vmatpush1.bf16.msra.mxu0 %v18441_v38  ;;  %v18462_v38 = vld [vmem:[#allocation3 + $0xc80] ss:$8 sps:$4 sm:$0xff]  }
 0x461   : > { %3973 = vmatpush1.bf16.msra.mxu1 %v18390_v39  ;;  %4004 = vmatprep.mubr.bf16.mxu1 %v20306_v0 }
 0x462   : > { %3974 = vmatprep.subr.bf16.mxu1 %v18395_v40  ;;  %v18446_v40 = vld [vmem:[#allocation3 + $0xea4] ss:$8 sps:$4 sm:$0xff]  }
 0x463   : > { %4455 = vmatprep.subr.bf16.mxu0 %v18446_v40 }
 0x465   : > { %3975 = vmatpush1.bf16.msra.mxu1 %v18393_v42 }
 0x466   : > { %3976 = vmatprep.subr.bf16.mxu1 %v18398_v44  ;;  %v18444_v44 = vld [vmem:[#allocation3 + $0xea0] ss:$8 sps:$4 sm:$0xff]  }
 0x467   : > { %4456 = vmatpush1.bf16.msra.mxu0 %v18444_v44  ;;  %v18470_v44 = vld [vmem:[#allocation3 + $0xca4] ss:$8 sps:$4 sm:$0xff]  }
 0x468   : > { %4457 = vmatprep.subr.bf16.mxu0 %v18449_v45  ;;  %v18468_v45 = vld [vmem:[#allocation3 + $0xca0] ss:$8 sps:$4 sm:$0xff]  }
 0x469   : > { %3977 = vmatpush1.bf16.msra.mxu1 %v18396_v53  ;;  %v18447_v53 = vld [vmem:[#allocation3 + $0xeb0] ss:$8 sps:$4 sm:$0xff]  }
 0x46a   : > { %3978 = vmatprep.subr.bf16.mxu1 %v18401_v47  ;;  %v18452_v47 = vld [vmem:[#allocation3 + $0xec4] ss:$8 sps:$4 sm:$0xff]  }
 0x46b   : > { %4458 = vmatpush1.bf16.msra.mxu0 %v18447_v53  ;;  %v18473_v53 = vld [vmem:[#allocation3 + $0xcb4] ss:$8 sps:$4 sm:$0xff]  }
 0x46c   : > { %4470 = vmatprep.subr.bf16.mxu0 %v18452_v47  ;;  %v18471_v47 = vld [vmem:[#allocation3 + $0xcb0] ss:$8 sps:$4 sm:$0xff]  }
 0x46d   : > { %3979 = vmatpush1.bf16.msra.mxu1 %v18399_v50 }
 0x470   : > { %16148 = vmatmul.mubr.msk.bf16.vlgmr.msra.gmra.mrb[4].mxu1 %vm249_vm0, %v3723_v55 }
 0x543   : > { %v4006_v22 = vpop.f32.mrb[4].mxu1 }
 0x544   : > { %v4032_v23 = vadd.f32 %v4025_v46, %v4006_v22  ;;  %v4008_v24 = vpop.f32.mrb[5].mxu1 }
 0x545   : > { %v4033_v26 = vadd.f32 %v4029_v19, %v4008_v24  ;;  %v4010_v27 = vpop.f32.mrb[6].mxu1 }
 0x546   : > { %v4036_v30 = vmax.f32 %v4032_v23, 0.0  ;;  %v4034_v31 = vadd.f32 %v4025_v46, %v4010_v27  ;;  %v4012_v4 = vpop.f32.mrb[7].mxu1 }
 0x547   : > { %v4037_v32 = vmax.f32 %v4033_v26, 0.0  ;;  %v4035_v33 = vadd.f32 %v4029_v19, %v4012_v4  ;;  %v18453_v26 = vld [vmem:[#allocation3 + $0xed0] ss:$8 sps:$4 sm:$0xff]   ;;  %v18456_v4 = vld [vmem:[#allocation3 + $0xee0] ss:$8 sps:$4 sm:$0xff]  }
 0x548   : > { %v4044_v11 = vrot.slane %v4036_v30, 6  ;;  %v4038_v6 = vmax.f32 %v4034_v31, 0.0  ;;  %v18458_v30 = vld [vmem:[#allocation3 + $0xee4] ss:$8 sps:$4 sm:$0xff]  }
 0x549   : > { %v4045_v13 = vrot.slane %v4037_v32, 6  ;;  %v4039_v35 = vmax.f32 %v4035_v33, 0.0  ;;  %v18461_v33 = vld [vmem:[#allocation3 + $0xef4] ss:$8 sps:$4 sm:$0xff]  }
 0x54a   : > { %v4046_v37 = vrot.slane %v4038_v6, 6  ;;  %4050 = vrot.lane.b32.xlu0 %v4044_v11, %s20307_s12  ;;  %v18464_v6 = vld [vmem:[#allocation3 + $0xc84] ss:$8 sps:$4 sm:$0xff]  }
 0x54b   : > { %v4048_v39 = vrot.slane %v4039_v35, 6  ;;  %4052 = vrot.lane.b32.xlu1 %v4045_v13, %s20307_s12 }
 0x54c   : > { %v4047_v41 = vsel %vm2129_vm6, %v4044_v11, %v4046_v37 }
 0x54d   : > { %v4049_v42 = vsel %vm2129_vm6, %v4045_v13, %v4048_v39 }
 0x54e   : > { %4054 = vrot.lane.b32.xlu0 %v4047_v41, %s20307_s12 }
 0x54f   : > { %4056 = vrot.lane.b32.xlu1 %v4049_v42, %s20307_s12  ;;  %v18465_v42 = vld [vmem:[#allocation3 + $0xc90] ss:$8 sps:$4 sm:$0xff]  }
 0x552   : > { %4058 = vrot.lane.b32.xlu0 %v4046_v37, %s20307_s12 }
 0x553   : > { %4060 = vrot.lane.b32.xlu1 %v4048_v39, %s20307_s12  ;;  %v18467_v39 = vld [vmem:[#allocation3 + $0xc94] ss:$8 sps:$4 sm:$0xff]  }
 0x5bc   : > { %v4051_v48 = vpop.permute.xlu0 %4050 }
 0x5bd   : > { %4074 = vst.msk [vmem:[#allocation2] sm:$0xfc] %vm2161_vm7, %v4051_v48  ;;  %v4053_v49 = vpop.permute.xlu1 %4052 }
 0x5be   : > { %v4062_v50 = vsel %vm2148_vm9, %v4051_v48, %v4053_v49  ;;  %4076 = vst.msk [vmem:[#allocation2 + $0x10] sm:$0xfc] %vm2164_vm10, %v4053_v49  ;;  %v18476_v48 = vld [vmem:[#allocation3 + $0xcc4] ss:$8 sps:$4 sm:$0xff]   ;;  %v18474_v49 = vld [vmem:[#allocation3 + $0xcc0] ss:$8 sps:$4 sm:$0xff]  }
 0x5bf   : > { %4075 = vst [vmem:[#allocation2 + $0x8] sm:$0xfc] %v4062_v50  ;;  %v18479_v50 = vld [vmem:[#allocation3 + $0xcd4] ss:$8 sps:$4 sm:$0xff]  }
 0x5c0   : > { %v4055_v51 = vpop.permute.xlu0 %4054 }
 0x5c1   : > { %4077 = vst.msk [vmem:[#allocation2 + $0x18] sm:$0xff] %vm2166_vm8, %v4055_v51  ;;  %v4057_v52 = vpop.permute.xlu1 %4056 }
 0x5c2   : > { %4079 = vst.msk [vmem:[#allocation2 + $0x28] sm:$0xff] %vm2148_vm9, %v4057_v52  ;;  %v20599_v56 = vsel %vm2148_vm9, %v4055_v51, %v4057_v52  ;;  %v18477_v51 = vld [vmem:[#allocation3 + $0xcd0] ss:$8 sps:$4 sm:$0xff]   ;;  %v18482_v52 = vld [vmem:[#allocation3 + $0xce4] ss:$8 sps:$4 sm:$0xff]  }
 0x5c4   : > { %v4059_v58 = vpop.permute.xlu0 %4058  ;;  %v4133_v62 = vld [vmem:[#allocation2] sm:$0xfe] }
 0x5c5   : > { %4080 = vst.msk [vmem:[#allocation2 + $0x30] sm:$0x3] %vm2170_vm11, %v4059_v58  ;;  %v4061_v55 = vpop.permute.xlu1 %4060  ;;  %v4135_v23 = vld [vmem:[#allocation2 + $0x10] sm:$0xfe] }
 0x5c6   : > { %v4064_v57 = vsel %vm2148_vm9, %v4059_v58, %v4061_v55  ;;  %4082 = vst.msk [vmem:[#allocation2 + $0x40] sm:$0x3] %vm2173_vm12, %v4061_v55  ;;  %v4134_v59 = vld [vmem:[#allocation2 + $0x8] sm:$0xfe]  ;;  %v18485_v55 = vld [vmem:[#allocation3 + $0xcf4] ss:$8 sps:$4 sm:$0xff]  }
 0x5c7   : > { %4081 = vst [vmem:[#allocation2 + $0x38] sm:$0x3] %v4064_v57  ;;  %v4140_v60 = vpack.c.bf16 %v20599_v56, %v4134_v59  ;;  %v4084_v35 = vld [vmem:[#allocation2 + $0x8] sm:$0xff]  ;;  %v18483_v57 = vld [vmem:[#allocation3 + $0xcf0] ss:$8 sps:$4 sm:$0xff]  }
 0x5c8   : > { %v20604_v61 = vld [vmem:[#allocation2 + $0x18] sm:$0xff]  ;;  %v4090_v41 = vpack.c.bf16 %v20599_v56, %v4084_v35  ;;  %v18480_v58 = vld [vmem:[#allocation3 + $0xce0] ss:$8 sps:$4 sm:$0xff]   ;;  %v18488_v59 = vld [vmem:[#allocation3 + $0xd04] ss:$8 sps:$4 sm:$0xff]  }
 0x5c9   : > { %v4139_v18 = vpack.c.bf16 %v20604_v61, %v4133_v62  ;;  %v4201_v63 = vshll.u32 %v4140_v60, 16  ;;  %v4199_v10 = vshrl.u32 %v4140_v60, 16  ;;  %v20608_v21 = vld [vmem:[#allocation2 + $0x28] sm:$0xff]  ;;  %v18491_v62 = vld [vmem:[#allocation3 + $0xd14] ss:$8 sps:$4 sm:$0xff]  }
 0x5ca   : > { %v4141_v27 = vpack.c.bf16 %v20608_v21, %v4135_v23  ;;  %v18486_v60 = vld [vmem:[#allocation3 + $0xd00] ss:$8 sps:$4 sm:$0xff]   ;;  %v18530_v35 = vld [vmem:[#allocation3 + $0xf24] ss:$8 sps:$4 sm:$0xff]  }
 0x5cb   : > { %v4189_v2 = vshll.u32 %v4139_v18, 16  ;;  %v4203_v28 = vrot.slane %v4201_v63, 1  ;;  %v4187_v14 = vshrl.u32 %v4139_v18, 16  ;;  %v18489_v18 = vld [vmem:[#allocation3 + $0xd10] ss:$8 sps:$4 sm:$0xff]  }
 0x5cc   : > { %v4136_v1 = vld [vmem:[#allocation2 + $0x30] sm:$0x1]  ;;  %v4213_v32 = vshll.u32 %v4141_v27, 16  ;;  %v4211_v25 = vshrl.u32 %v4141_v27, 16  ;;  %v18494_v63 = vld [vmem:[#allocation3 + $0xd24] ss:$8 sps:$4 sm:$0xff]  }
 0x5cd   : > { %v4142_v3 = vpack.c.bf16 %v4136_v1, %v4136_v1  ;;  %v4191_v9 = vrot.slane %v4189_v2, 1  ;;  %v4204_v15 = vor.u32 %v4203_v28, %v4199_v10  ;;  %v4138_v24 = vld [vmem:[#allocation2 + $0x40] sm:$0x1]  ;;  %v18492_v1 = vld [vmem:[#allocation3 + $0xd20] ss:$8 sps:$4 sm:$0xff]  }
 0x5ce   : > { %v4137_v5 = vld [vmem:[#allocation2 + $0x38] sm:$0x1]  ;;  %v4144_v31 = vpack.c.bf16 %v4138_v24, %v4138_v24  ;;  %v4215_v11 = vrot.slane %v4213_v32, 1  ;;  %v18497_v2 = vld [vmem:[#allocation3 + $0xd34] ss:$8 sps:$4 sm:$0xff]  }
 0x5cf   : > { %v4143_v54 = vpack.c.bf16 %v4137_v5, %v4137_v5  ;;  %v4194_v29 = vshll.u32 %v4142_v3, 16  ;;  %v4192_v46 = vor.u32 %v4191_v9, %v4187_v14  ;;  %v18495_v3 = vld [vmem:[#allocation3 + $0xd30] ss:$8 sps:$4 sm:$0xff]   ;;  %v18500_v5 = vld [vmem:[#allocation3 + $0xd44] ss:$8 sps:$4 sm:$0xff]  }
 0x5d0   : > { %v4218_v34 = vshll.u32 %v4144_v31, 16  ;;  %v4216_v37 = vor.u32 %v4215_v11, %v4211_v25  ;;  %v18503_v28 = vld [vmem:[#allocation3 + $0xd54] ss:$8 sps:$4 sm:$0xff]   ;;  %v18506_v9 = vld [vmem:[#allocation3 + $0xd64] ss:$8 sps:$4 sm:$0xff]  }
 0x5d1   : > { %v4206_v12 = vshll.u32 %v4143_v54, 16  ;;  %v4196_v36 = vrot.slane %v4194_v29, 1  ;;  %v18498_v54 = vld [vmem:[#allocation3 + $0xd40] ss:$8 sps:$4 sm:$0xff]   ;;  %v18501_v29 = vld [vmem:[#allocation3 + $0xd50] ss:$8 sps:$4 sm:$0xff]  }
 0x5d2   : > { %v4220_v13 = vrot.slane %v4218_v34, 1  ;;  %v18504_v10 = vld [vmem:[#allocation3 + $0xd60] ss:$8 sps:$4 sm:$0xff]   ;;  %v18507_v14 = vld [vmem:[#allocation3 + $0xd70] ss:$8 sps:$4 sm:$0xff]  }
 0x5d3   : > { %v4208_v16 = vrot.slane %v4206_v12, 1  ;;  %v4197_v22 = vsel %vm360_vm2, %v4192_v46, %v4196_v36  ;;  %v18509_v12 = vld [vmem:[#allocation3 + $0xd74] ss:$8 sps:$4 sm:$0xff]   ;;  %v18512_v36 = vld [vmem:[#allocation3 + $0xd84] ss:$8 sps:$4 sm:$0xff]  }
 0x5d4   : > { %v4221_v40 = vsel %vm360_vm2, %v4216_v37, %v4220_v13  ;;  %v18515_v46 = vld [vmem:[#allocation3 + $0xd94] ss:$8 sps:$4 sm:$0xff]   ;;  %v4806_v23 = vld [vmem:[#allocation2 + $0x38] sm:$0x3]  ;;  %v18524_v31 = vld [vmem:[#allocation3 + $0xf04] ss:$8 sps:$4 sm:$0xff]  }
 0x5d5   : > { %v4209_v19 = vsel %vm360_vm2, %v4204_v15, %v4208_v16  ;;  %v4083_v15 = vld [vmem:[#allocation2] sm:$0xff]  ;;  %v18510_v16 = vld [vmem:[#allocation3 + $0xd80] ss:$8 sps:$4 sm:$0xff]   ;;  %v4812_v27 = vpack.c.bf16 %v4806_v23, %v4806_v23 }
 0x5d6   : > { %4459 = vmatprep.mubr.bf16.mxu0 %v4209_v19  ;;  %v18513_v19 = vld [vmem:[#allocation3 + $0xd90] ss:$8 sps:$4 sm:$0xff]   ;;  %v18521_v24 = vld [vmem:[#allocation3 + $0xdb4] ss:$8 sps:$4 sm:$0xff]   ;;  %v18522_v34 = vld [vmem:[#allocation3 + $0xf00] ss:$8 sps:$4 sm:$0xff]  }
 0x5d7   : > { %4460 = vmatmul.mubr.bf16.vlgmr.msra.gmra.mrb[8].mxu0 %v4197_v22  ;;  %v18516_v22 = vld [vmem:[#allocation3 + $0xda0] ss:$8 sps:$4 sm:$0xff]   ;;  %v4865_v32 = vrot.slane %v4812_v27, 1  ;;  %v18525_v13 = vld [vmem:[#allocation3 + $0xf10] ss:$8 sps:$4 sm:$0xff]  }
 0x5d8   : > { %4471 = vmatpush1.bf16.msra.mxu0 %v18450_v17  ;;  %4502 = vmatprep.mubr.bf16.mxu0 %v20306_v0  ;;  %v4089_v17 = vpack.c.bf16 %v20604_v61, %v4083_v15  ;;  %v18528_v37 = vld [vmem:[#allocation3 + $0xf20] ss:$8 sps:$4 sm:$0xff]   ;;  %v5169_v15 = vld [vmem:[#allocation2 + $0x38] sm:$0x7] }
 0x5d9   : > { %4472 = vmatprep.subr.bf16.mxu0 %v18455_v20  ;;  %v18518_v20 = vld [vmem:[#allocation3 + $0xda4] ss:$8 sps:$4 sm:$0xff]  }
 0x5dc   : > { %4473 = vmatpush1.bf16.msra.mxu0 %v18453_v26  ;;  %v4803_v26 = vld [vmem:[#allocation2 + $0x8] sm:$0xfc] }
 0x5dd   : > { %4474 = vmatprep.subr.bf16.mxu0 %v18458_v30  ;;  %v18519_v30 = vld [vmem:[#allocation3 + $0xdb0] ss:$8 sps:$4 sm:$0xff]  }
 0x5e0   : > { %4475 = vmatpush1.bf16.msra.mxu0 %v18456_v4  ;;  %v4809_v4 = vpack.c.bf16 %v20599_v56, %v4803_v26 }
 0x5e1   : > { %4476 = vmatprep.subr.bf16.mxu0 %v18461_v33  ;;  %v4085_v33 = vld [vmem:[#allocation2 + $0x10] sm:$0xff] }
 0x5e2   : > { %v4864_v11 = vrot.slane %v4809_v4, 1 }
 0x5e4   : > { %4477 = vmatpush1.bf16.msra.mxu0 %v18459_v43  ;;  %v4091_v43 = vpack.c.bf16 %v20608_v21, %v4085_v33  ;;  %v4866_v25 = vsel %vm1036_vm3, %v4864_v11, %v4865_v32 }
 0x5e5   : > { %4716 = vmatprep.subr.bf16.mxu0 %v18464_v6  ;;  %v18527_v6 = vld [vmem:[#allocation3 + $0xf14] ss:$8 sps:$4 sm:$0xff]  }
 0x5e7   : > { %16190 = vmatmul.mubr.msk.bf16.vlgmr.msra.gmra.mrb[8].mxu0 %vm249_vm0, %v4221_v40  ;;  %v18536_v40 = vld [vmem:[#allocation3 + $0xf44] ss:$8 sps:$4 sm:$0xff]  }
 0x5e8   : > { %4717 = vmatpush1.bf16.msra.mxu0 %v18462_v38  ;;  %4748 = vmatprep.mubr.bf16.mxu0 %v4090_v41  ;;  %v18533_v38 = vld [vmem:[#allocation3 + $0xf34] ss:$8 sps:$4 sm:$0xff]   ;;  %v18534_v41 = vld [vmem:[#allocation3 + $0xf40] ss:$8 sps:$4 sm:$0xff]  }
 0x5e9   : > { %4718 = vmatprep.subr.bf16.mxu0 %v18467_v39  ;;  %v18531_v39 = vld [vmem:[#allocation3 + $0xf30] ss:$8 sps:$4 sm:$0xff]  }
 0x5ec   : > { %4719 = vmatpush1.bf16.msra.mxu0 %v18465_v42  ;;  %v18539_v42 = vld [vmem:[#allocation3 + $0xf54] ss:$8 sps:$4 sm:$0xff]  }
 0x5ed   : > { %4720 = vmatprep.subr.bf16.mxu0 %v18470_v44  ;;  %v18537_v44 = vld [vmem:[#allocation3 + $0xf50] ss:$8 sps:$4 sm:$0xff]  }
 0x5f0   : > { %4721 = vmatpush1.bf16.msra.mxu0 %v18468_v45  ;;  %v18542_v45 = vld [vmem:[#allocation3 + $0xf64] ss:$8 sps:$4 sm:$0xff]  }
 0x5f1   : > { %4722 = vmatprep.subr.bf16.mxu0 %v18473_v53  ;;  %v18540_v53 = vld [vmem:[#allocation3 + $0xf60] ss:$8 sps:$4 sm:$0xff]  }
 0x5f4   : > { %4723 = vmatpush1.bf16.msra.mxu0 %v18471_v47  ;;  %v18545_v47 = vld [vmem:[#allocation3 + $0xf74] ss:$8 sps:$4 sm:$0xff]  }
 0x5f5   : > { %4724 = vmatprep.subr.bf16.mxu0 %v18476_v48  ;;  %v18543_v48 = vld [vmem:[#allocation3 + $0xf70] ss:$8 sps:$4 sm:$0xff]  }
 0x5f8   : > { %4725 = vmatpush1.bf16.msra.mxu0 %v18474_v49  ;;  %v18548_v49 = vld [vmem:[#allocation3 + $0xf84] ss:$8 sps:$4 sm:$0xff]  }
 0x5f9   : > { %4726 = vmatprep.subr.bf16.mxu0 %v18479_v50  ;;  %v18546_v50 = vld [vmem:[#allocation3 + $0xf80] ss:$8 sps:$4 sm:$0xff]  }
 0x5fc   : > { %4727 = vmatpush1.bf16.msra.mxu0 %v18477_v51  ;;  %v18551_v51 = vld [vmem:[#allocation3 + $0xf94] ss:$8 sps:$4 sm:$0xff]  }
 0x5fd   : > { %4728 = vmatprep.subr.bf16.mxu0 %v18482_v52  ;;  %v18549_v52 = vld [vmem:[#allocation3 + $0xf90] ss:$8 sps:$4 sm:$0xff]  }
 0x600   : > { %4729 = vmatpush1.bf16.msra.mxu0 %v18480_v58  ;;  %v18554_v58 = vld [vmem:[#allocation3 + $0xfa4] ss:$8 sps:$4 sm:$0xff]  }
 0x601   : > { %4730 = vmatprep.subr.bf16.mxu0 %v18485_v55  ;;  %v18552_v55 = vld [vmem:[#allocation3 + $0xfa0] ss:$8 sps:$4 sm:$0xff]  }
 0x604   : > { %4731 = vmatpush1.bf16.msra.mxu0 %v18483_v57  ;;  %v18557_v57 = vld [vmem:[#allocation3 + $0xfb4] ss:$8 sps:$4 sm:$0xff]  }
 0x605   : > { %4732 = vmatprep.subr.bf16.mxu0 %v18488_v59  ;;  %v18555_v59 = vld [vmem:[#allocation3 + $0xfb0] ss:$8 sps:$4 sm:$0xff]  }
 0x608   : > { %4733 = vmatpush1.bf16.msra.mxu0 %v18486_v60  ;;  %v18560_v60 = vld [vmem:[#allocation3 + $0xfc4] ss:$8 sps:$4 sm:$0xff]  }
 0x609   : > { %4734 = vmatprep.subr.bf16.mxu0 %v18491_v62  ;;  %v18558_v62 = vld [vmem:[#allocation3 + $0xfc0] ss:$8 sps:$4 sm:$0xff]  }
 0x60c   : > { %4735 = vmatpush1.bf16.msra.mxu0 %v18489_v18  ;;  %v18563_v18 = vld [vmem:[#allocation3 + $0xfd4] ss:$8 sps:$4 sm:$0xff]  }
 0x60d   : > { %4736 = vmatprep.subr.bf16.mxu0 %v18494_v63  ;;  %v18561_v63 = vld [vmem:[#allocation3 + $0xfd0] ss:$8 sps:$4 sm:$0xff]  }
 0x610   : > { %4737 = vmatpush1.bf16.msra.mxu0 %v18492_v1  ;;  %v18566_v1 = vld [vmem:[#allocation3 + $0xfe4] ss:$8 sps:$4 sm:$0xff]  }
 0x611   : > { %4738 = vmatprep.subr.bf16.mxu0 %v18497_v2  ;;  %v4805_v2 = vld [vmem:[#allocation2 + $0x30] sm:$0x3] }
 0x614   : > { %4739 = vmatpush1.bf16.msra.mxu0 %v18495_v3  ;;  %v18564_v3 = vld [vmem:[#allocation3 + $0xfe0] ss:$8 sps:$4 sm:$0xff]  }
 0x615   : > { %4740 = vmatprep.subr.bf16.mxu0 %v18500_v5  ;;  %v18569_v5 = vld [vmem:[#allocation3 + $0xff4] ss:$8 sps:$4 sm:$0xff]  }
 0x618   : > { %4741 = vmatpush1.bf16.msra.mxu0 %v18498_v54  ;;  %v4811_v54 = vpack.c.bf16 %v4805_v2, %v4805_v2  ;;  %v18611_v2 = vld [vmem:[#allocation3 + $0x10d4] ss:$8 sps:$4 sm:$0xff]  }
 0x619   : > { %4742 = vmatprep.subr.bf16.mxu0 %v18503_v28  ;;  %v4802_v28 = vld [vmem:[#allocation2] sm:$0xfc] }
 0x61c   : > { %4743 = vmatpush1.bf16.msra.mxu0 %v18501_v29  ;;  %v18567_v29 = vld [vmem:[#allocation3 + $0xff0] ss:$8 sps:$4 sm:$0xff]  }
 0x61d   : > { %4744 = vmatprep.subr.bf16.mxu0 %v18506_v9  ;;  %v4808_v9 = vpack.c.bf16 %v20604_v61, %v4802_v28  ;;  %v18617_v28 = vld [vmem:[#allocation3 + $0x10f4] ss:$8 sps:$4 sm:$0xff]  }
 0x620   : > { %4745 = vmatpush1.bf16.msra.mxu0 %v18504_v10  ;;  %v18572_v10 = vld [vmem:[#allocation3 + $0x1004] ss:$8 sps:$4 sm:$0xff]  }
 0x621   : > { %4746 = vmatprep.subr.bf16.mxu0 %v18509_v12  ;;  %v4862_v12 = vrot.slane %v4811_v54, 1  ;;  %v18612_v54 = vld [vmem:[#allocation3 + $0x10e0] ss:$8 sps:$4 sm:$0xff]  }
 0x624   : > { %4747 = vmatpush1.bf16.msra.mxu0 %v18507_v14  ;;  %v4861_v14 = vrot.slane %v4808_v9, 1  ;;  %v18620_v9 = vld [vmem:[#allocation3 + $0x1104] ss:$8 sps:$4 sm:$0xff]  }
 0x625   : > { %4759 = vmatprep.subr.bf16.mxu0 %v18512_v36  ;;  %v18570_v36 = vld [vmem:[#allocation3 + $0x1000] ss:$8 sps:$4 sm:$0xff]  }
 0x627   : > { %4749 = vmatmul.mubr.bf16.vlgmr.msra.gmra.mrb[8].mxu0 %v4089_v17  ;;  %v4863_v17 = vsel %vm1036_vm3, %v4861_v14, %v4862_v12  ;;  %v18618_v12 = vld [vmem:[#allocation3 + $0x1100] ss:$8 sps:$4 sm:$0xff]   ;;  %v18623_v14 = vld [vmem:[#allocation3 + $0x1114] ss:$8 sps:$4 sm:$0xff]  }
 0x628   : > { %4760 = vmatpush1.bf16.msra.mxu0 %v18510_v16  ;;  %4791 = vmatprep.mubr.bf16.mxu0 %v20306_v0  ;;  %v18575_v16 = vld [vmem:[#allocation3 + $0x1014] ss:$8 sps:$4 sm:$0xff]  }
 0x629   : > { %4761 = vmatprep.subr.bf16.mxu0 %v18515_v46  ;;  %v5166_v46 = vld [vmem:[#allocation2 + $0x8] sm:$0xf8] }
 0x62a   : > { %v5172_v23 = vpack.c.bf16 %v20599_v56, %v5166_v46  ;;  %v18626_v46 = vld [vmem:[#allocation3 + $0x1124] ss:$8 sps:$4 sm:$0xff]  }
 0x62c   : > { %4762 = vmatpush1.bf16.msra.mxu0 %v18513_v19  ;;  %v5175_v19 = vpack.c.bf16 %v5169_v15, %v5169_v15  ;;  %v5236_v4 = vshrl.u32 %v5172_v23, 16  ;;  %v5239_v32 = vshll.u32 %v5172_v23, 16  ;;  %v5165_v15 = vld [vmem:[#allocation2] sm:$0xf8] }
 0x62d   : > { %4763 = vmatprep.subr.bf16.mxu0 %v18518_v20  ;;  %v18573_v20 = vld [vmem:[#allocation3 + $0x1010] ss:$8 sps:$4 sm:$0xff]  }
 0x62e   : > { %v5244_v26 = vshrl.u32 %v5175_v19, 16  ;;  %v5247_v27 = vshll.u32 %v5175_v19, 16 }
 0x630   : > { %4764 = vmatpush1.bf16.msra.mxu0 %v18516_v22  ;;  %v18578_v22 = vld [vmem:[#allocation3 + $0x1024] ss:$8 sps:$4 sm:$0xff]   ;;  %v5249_v11 = vrot.slane %v5247_v27, 2 }
 0x631   : > { %4765 = vmatprep.subr.bf16.mxu0 %v18521_v24  ;;  %v4807_v24 = vld [vmem:[#allocation2 + $0x40] sm:$0x3] }
 0x632   : > { %v4813_v33 = vpack.c.bf16 %v4807_v24, %v4807_v24 }
 0x634   : > { %4766 = vmatpush1.bf16.msra.mxu0 %v18519_v30  ;;  %v18576_v30 = vld [vmem:[#allocation3 + $0x1020] ss:$8 sps:$4 sm:$0xff]  }
 0x635   : > { %5075 = vmatprep.subr.bf16.mxu0 %v18524_v31  ;;  %v18581_v31 = vld [vmem:[#allocation3 + $0x1034] ss:$8 sps:$4 sm:$0xff]  }
 0x637   : > { %16231 = vmatmul.mubr.msk.bf16.vlgmr.msra.gmra.mrb[8].mxu0 %vm249_vm0, %v4091_v43  ;;  %v5246_v43 = vrot.slane %v5244_v26, 1  ;;  %v18629_v26 = vld [vmem:[#allocation3 + $0x1134] ss:$8 sps:$4 sm:$0xff]  }
 0x638   : > { %5076 = vmatpush1.bf16.msra.mxu0 %v18522_v34  ;;  %5107 = vmatprep.mubr.bf16.mxu0 %v4866_v25  ;;  %v4804_v34 = vld [vmem:[#allocation2 + $0x10] sm:$0xfc] }
 0x639   : > { %5077 = vmatprep.subr.bf16.mxu0 %v18527_v6  ;;  %v18579_v6 = vld [vmem:[#allocation3 + $0x1030] ss:$8 sps:$4 sm:$0xff]   ;;  %v4810_v25 = vpack.c.bf16 %v20608_v21, %v4804_v34 }
 0x63c   : > { %5078 = vmatpush1.bf16.msra.mxu0 %v18525_v13  ;;  %v18584_v13 = vld [vmem:[#allocation3 + $0x1044] ss:$8 sps:$4 sm:$0xff]  }
 0x63d   : > { %5079 = vmatprep.subr.bf16.mxu0 %v18530_v35  ;;  %v5238_v35 = vrot.slane %v5236_v4, 1 }
 0x640   : > { %5080 = vmatpush1.bf16.msra.mxu0 %v18528_v37  ;;  %v5241_v37 = vrot.slane %v5239_v32, 2 }
 0x641   : > { %5081 = vmatprep.subr.bf16.mxu0 %v18533_v38  ;;  %v4868_v38 = vrot.slane %v4813_v33, 1  ;;  %v18632_v33 = vld [vmem:[#allocation3 + $0x1144] ss:$8 sps:$4 sm:$0xff]  }
 0x644   : > { %5082 = vmatpush1.bf16.msra.mxu0 %v18531_v39  ;;  %v5250_v39 = vor.u32 %v5249_v11, %v5246_v43  ;;  %v5170_v43 = vld [vmem:[#allocation2 + $0x40] sm:$0x7] }
 0x645   : > { %5083 = vmatprep.subr.bf16.mxu0 %v18536_v40  ;;  %v4867_v40 = vrot.slane %v4810_v25, 1  ;;  %v18635_v25 = vld [vmem:[#allocation3 + $0x1154] ss:$8 sps:$4 sm:$0xff]  }
 0x648   : > { %5084 = vmatpush1.bf16.msra.mxu0 %v18534_v41  ;;  %v18582_v41 = vld [vmem:[#allocation3 + $0x1040] ss:$8 sps:$4 sm:$0xff]  }
 0x649   : > { %5085 = vmatprep.subr.bf16.mxu0 %v18539_v42  ;;  %v5242_v42 = vor.u32 %v5241_v37, %v5238_v35  ;;  %v5176_v35 = vpack.c.bf16 %v5170_v43, %v5170_v43  ;;  %v5167_v37 = vld [vmem:[#allocation2 + $0x10] sm:$0xf8] }
 0x64a   : > { %v18686_v43 = vld [vmem:[#allocation3 + $0x1264] ss:$8 sps:$4 sm:$0xff]  }
 0x64c   : > { %5086 = vmatpush1.bf16.msra.mxu0 %v18537_v44  ;;  %v18587_v44 = vld [vmem:[#allocation3 + $0x1054] ss:$8 sps:$4 sm:$0xff]  }
 0x64d   : > { %5087 = vmatprep.subr.bf16.mxu0 %v18542_v45  ;;  %v4869_v45 = vsel %vm1036_vm3, %v4867_v40, %v4868_v38  ;;  %v18633_v38 = vld [vmem:[#allocation3 + $0x1150] ss:$8 sps:$4 sm:$0xff]   ;;  %v18638_v40 = vld [vmem:[#allocation3 + $0x1164] ss:$8 sps:$4 sm:$0xff]  }
 0x650   : > { %5088 = vmatpush1.bf16.msra.mxu0 %v18540_v53  ;;  %v5251_v53 = vsel %vm1394_vm4, %v5242_v42, %v5250_v39  ;;  %v5173_v39 = vpack.c.bf16 %v20608_v21, %v5167_v37  ;;  %v5264_v42 = vshll.u32 %v5176_v35, 16  ;;  %v18687_v37 = vld [vmem:[#allocation3 + $0x1270] ss:$8 sps:$4 sm:$0xff]  }
 0x651   : > { %5089 = vmatprep.subr.bf16.mxu0 %v18545_v47  ;;  %v18585_v47 = vld [vmem:[#allocation3 + $0x1050] ss:$8 sps:$4 sm:$0xff]  }
 0x654   : > { %5090 = vmatpush1.bf16.msra.mxu0 %v18543_v48  ;;  %v18590_v48 = vld [vmem:[#allocation3 + $0x1064] ss:$8 sps:$4 sm:$0xff]  }
 0x655   : > { %5091 = vmatprep.subr.bf16.mxu0 %v18548_v49  ;;  %v18588_v49 = vld [vmem:[#allocation3 + $0x1060] ss:$8 sps:$4 sm:$0xff]  }
 0x658   : > { %5092 = vmatpush1.bf16.msra.mxu0 %v18546_v50  ;;  %v18593_v50 = vld [vmem:[#allocation3 + $0x1074] ss:$8 sps:$4 sm:$0xff]  }
 0x659   : > { %5093 = vmatprep.subr.bf16.mxu0 %v18551_v51  ;;  %v18591_v51 = vld [vmem:[#allocation3 + $0x1070] ss:$8 sps:$4 sm:$0xff]  }
 0x65c   : > { %5094 = vmatpush1.bf16.msra.mxu0 %v18549_v52  ;;  %v18596_v52 = vld [vmem:[#allocation3 + $0x1084] ss:$8 sps:$4 sm:$0xff]  }
 0x65d   : > { %5095 = vmatprep.subr.bf16.mxu0 %v18554_v58  ;;  %v18594_v58 = vld [vmem:[#allocation3 + $0x1080] ss:$8 sps:$4 sm:$0xff]  }
 0x660   : > { %5096 = vmatpush1.bf16.msra.mxu0 %v18552_v55  ;;  %v18599_v55 = vld [vmem:[#allocation3 + $0x1094] ss:$8 sps:$4 sm:$0xff]  }
 0x661   : > { %5097 = vmatprep.subr.bf16.mxu0 %v18557_v57  ;;  %v18597_v57 = vld [vmem:[#allocation3 + $0x1090] ss:$8 sps:$4 sm:$0xff]  }
 0x664   : > { %5098 = vmatpush1.bf16.msra.mxu0 %v18555_v59  ;;  %v18602_v59 = vld [vmem:[#allocation3 + $0x10a4] ss:$8 sps:$4 sm:$0xff]  }
 0x665   : > { %5099 = vmatprep.subr.bf16.mxu0 %v18560_v60  ;;  %v18600_v60 = vld [vmem:[#allocation3 + $0x10a0] ss:$8 sps:$4 sm:$0xff]  }
 0x668   : > { %5100 = vmatpush1.bf16.msra.mxu0 %v18558_v62  ;;  %v18605_v62 = vld [vmem:[#allocation3 + $0x10b4] ss:$8 sps:$4 sm:$0xff]  }
 0x669   : > { %5101 = vmatprep.subr.bf16.mxu0 %v18563_v18  ;;  %v18603_v18 = vld [vmem:[#allocation3 + $0x10b0] ss:$8 sps:$4 sm:$0xff]  }
 0x66c   : > { %5102 = vmatpush1.bf16.msra.mxu0 %v18561_v63  ;;  %v18608_v63 = vld [vmem:[#allocation3 + $0x10c4] ss:$8 sps:$4 sm:$0xff]  }
 0x66d   : > { %5103 = vmatprep.subr.bf16.mxu0 %v18566_v1  ;;  %v18606_v1 = vld [vmem:[#allocation3 + $0x10c0] ss:$8 sps:$4 sm:$0xff]  }
 0x670   : > { %5104 = vmatpush1.bf16.msra.mxu0 %v18564_v3  ;;  %v18609_v3 = vld [vmem:[#allocation3 + $0x10d0] ss:$8 sps:$4 sm:$0xff]  }
 0x671   : > { %5105 = vmatprep.subr.bf16.mxu0 %v18569_v5  ;;  %v18614_v5 = vld [vmem:[#allocation3 + $0x10e4] ss:$8 sps:$4 sm:$0xff]  }
 0x674   : > { %5106 = vmatpush1.bf16.msra.mxu0 %v18567_v29  ;;  %v18615_v29 = vld [vmem:[#allocation3 + $0x10f0] ss:$8 sps:$4 sm:$0xff]  }
 0x675   : > { %5118 = vmatprep.subr.bf16.mxu0 %v18572_v10  ;;  %v5168_v10 = vld [vmem:[#allocation2 + $0x30] sm:$0x7] }
 0x677   : > { %5108 = vmatmul.mubr.bf16.vlgmr.msra.gmra.mrb[8].mxu0 %v4863_v17  ;;  %v5171_v17 = vpack.c.bf16 %v20604_v61, %v5165_v15  ;;  %v18657_v15 = vld [vmem:[#allocation3 + $0x11d0] ss:$8 sps:$4 sm:$0xff]  }
 0x678   : > { %5119 = vmatpush1.bf16.msra.mxu0 %v18570_v36  ;;  %5150 = vmatprep.mubr.bf16.mxu0 %v20306_v0  ;;  %v5174_v36 = vpack.c.bf16 %v5168_v10, %v5168_v10  ;;  %v18651_v10 = vld [vmem:[#allocation3 + $0x11b0] ss:$8 sps:$4 sm:$0xff]  }
 0x679   : > { %5120 = vmatprep.subr.bf16.mxu0 %v18575_v16  ;;  %v18621_v16 = vld [vmem:[#allocation3 + $0x1110] ss:$8 sps:$4 sm:$0xff]   ;;  %v5219_v23 = vshrl.u32 %v5171_v17, 16  ;;  %v5222_v24 = vshll.u32 %v5171_v17, 16  ;;  %v18660_v17 = vld [vmem:[#allocation3 + $0x11e0] ss:$8 sps:$4 sm:$0xff]  }
 0x67a   : > { %v5227_v19 = vshrl.u32 %v5174_v36, 16 }
 0x67b   : > { %v5221_v4 = vrot.slane %v5219_v23, 1  ;;  %v5224_v32 = vrot.slane %v5222_v24, 2  ;;  %v18671_v23 = vld [vmem:[#allocation3 + $0x1214] ss:$8 sps:$4 sm:$0xff]   ;;  %v18669_v24 = vld [vmem:[#allocation3 + $0x1210] ss:$8 sps:$4 sm:$0xff]  }
 0x67c   : > { %5121 = vmatpush1.bf16.msra.mxu0 %v18573_v20  ;;  %v5230_v20 = vshll.u32 %v5174_v36, 16  ;;  %v5229_v27 = vrot.slane %v5227_v19, 1  ;;  %v18659_v36 = vld [vmem:[#allocation3 + $0x11d4] ss:$8 sps:$4 sm:$0xff]   ;;  %v18663_v19 = vld [vmem:[#allocation3 + $0x11f0] ss:$8 sps:$4 sm:$0xff]  }
 0x67d   : > { %5122 = vmatprep.subr.bf16.mxu0 %v18578_v22  ;;  %v18624_v22 = vld [vmem:[#allocation3 + $0x1120] ss:$8 sps:$4 sm:$0xff]   ;;  %v5225_v11 = vor.u32 %v5224_v32, %v5221_v4  ;;  %v18680_v4 = vld [vmem:[#allocation3 + $0x1244] ss:$8 sps:$4 sm:$0xff]  }
 0x67e   : > { %v18678_v32 = vld [vmem:[#allocation3 + $0x1240] ss:$8 sps:$4 sm:$0xff]  }
 0x680   : > { %5123 = vmatpush1.bf16.msra.mxu0 %v18576_v30  ;;  %v5232_v30 = vrot.slane %v5230_v20, 2  ;;  %v18668_v20 = vld [vmem:[#allocation3 + $0x1204] ss:$8 sps:$4 sm:$0xff]  }
 0x681   : > { %5124 = vmatprep.subr.bf16.mxu0 %v18581_v31  ;;  %v18627_v31 = vld [vmem:[#allocation3 + $0x1130] ss:$8 sps:$4 sm:$0xff]  }
 0x682   : > { %v5233_v34 = vor.u32 %v5232_v30, %v5229_v27  ;;  %v18672_v27 = vld [vmem:[#allocation3 + $0x1220] ss:$8 sps:$4 sm:$0xff]   ;;  %v18677_v30 = vld [vmem:[#allocation3 + $0x1234] ss:$8 sps:$4 sm:$0xff]  }
 0x684   : > { %5125 = vmatpush1.bf16.msra.mxu0 %v18579_v6  ;;  %v18630_v6 = vld [vmem:[#allocation3 + $0x1140] ss:$8 sps:$4 sm:$0xff]  }
 0x685   : > { %5474 = vmatprep.subr.bf16.mxu0 %v18584_v13  ;;  %v5234_v13 = vsel %vm1394_vm4, %v5225_v11, %v5233_v34  ;;  %v18681_v34 = vld [vmem:[#allocation3 + $0x1250] ss:$8 sps:$4 sm:$0xff]   ;;  %v5567_v11 = vld [vmem:[#allocation2 + $0x30] sm:$0xf] }
 0x687   : > { %16272 = vmatmul.mubr.msk.bf16.vlgmr.msra.gmra.mrb[8].mxu0 %vm249_vm0, %v4869_v45  ;;  %v5253_v45 = vshrl.u32 %v5173_v39, 16 }
 0x688   : > { %5475 = vmatpush1.bf16.msra.mxu0 %v18582_v41  ;;  %5506 = vmatprep.mubr.bf16.mxu0 %v5251_v53  ;;  %v5261_v41 = vshrl.u32 %v5176_v35, 16  ;;  %v5256_v53 = vshll.u32 %v5173_v39, 16  ;;  %v5564_v35 = vld [vmem:[#allocation2] sm:$0xf0]  ;;  %v18692_v39 = vld [vmem:[#allocation3 + $0x1284] ss:$8 sps:$4 sm:$0xff]  }
 0x689   : > { %5476 = vmatprep.subr.bf16.mxu0 %v18587_v44  ;;  %v18636_v44 = vld [vmem:[#allocation3 + $0x1160] ss:$8 sps:$4 sm:$0xff]  }
 0x68c   : > { %5477 = vmatpush1.bf16.msra.mxu0 %v18585_v47  ;;  %v5568_v47 = vld [vmem:[#allocation2 + $0x38] sm:$0xf] }
 0x68d   : > { %5478 = vmatprep.subr.bf16.mxu0 %v18590_v48  ;;  %v18641_v48 = vld [vmem:[#allocation3 + $0x1174] ss:$8 sps:$4 sm:$0xff]  }
 0x690   : > { %5479 = vmatpush1.bf16.msra.mxu0 %v18588_v49  ;;  %v5263_v49 = vrot.slane %v5261_v41, 1 }
 0x691   : > { %5480 = vmatprep.subr.bf16.mxu0 %v18593_v50  ;;  %v5266_v50 = vrot.slane %v5264_v42, 2  ;;  %v18690_v42 = vld [vmem:[#allocation3 + $0x1280] ss:$8 sps:$4 sm:$0xff]  }
 0x694   : > { %5481 = vmatpush1.bf16.msra.mxu0 %v18591_v51  ;;  %v5565_v51 = vld [vmem:[#allocation2 + $0x8] sm:$0xf0] }
 0x695   : > { %5482 = vmatprep.subr.bf16.mxu0 %v18596_v52  ;;  %v5574_v52 = vpack.c.bf16 %v5568_v47, %v5568_v47  ;;  %v18698_v47 = vld [vmem:[#allocation3 + $0x12a4] ss:$8 sps:$4 sm:$0xff]  }
 0x698   : > { %5483 = vmatpush1.bf16.msra.mxu0 %v18594_v58  ;;  %v18639_v58 = vld [vmem:[#allocation3 + $0x1170] ss:$8 sps:$4 sm:$0xff]  }
 0x699   : > { %5484 = vmatprep.subr.bf16.mxu0 %v18599_v55  ;;  %v5255_v55 = vrot.slane %v5253_v45, 1 }
 0x69c   : > { %5485 = vmatpush1.bf16.msra.mxu0 %v18597_v57  ;;  %v5258_v57 = vrot.slane %v5256_v53, 2  ;;  %v18693_v53 = vld [vmem:[#allocation3 + $0x1290] ss:$8 sps:$4 sm:$0xff]  }
 0x69d   : > { %5486 = vmatprep.subr.bf16.mxu0 %v18602_v59  ;;  %v18644_v59 = vld [vmem:[#allocation3 + $0x1184] ss:$8 sps:$4 sm:$0xff]  }
 0x6a0   : > { %5487 = vmatpush1.bf16.msra.mxu0 %v18600_v60  ;;  %v5571_v60 = vpack.c.bf16 %v20599_v56, %v5565_v51  ;;  %v18648_v56 = vld [vmem:[#allocation3 + $0x11a0] ss:$8 sps:$4 sm:$0xff]   ;;  %v5566_v51 = vld [vmem:[#allocation2 + $0x10] sm:$0xf0] }
 0x6a1   : > { %5488 = vmatprep.subr.bf16.mxu0 %v18605_v62  ;;  %v5267_v62 = vor.u32 %v5266_v50, %v5263_v49  ;;  %v18701_v49 = vld [vmem:[#allocation3 + $0x12b4] ss:$8 sps:$4 sm:$0xff]  }
 0x6a4   : > { %5489 = vmatpush1.bf16.msra.mxu0 %v18603_v18  ;;  %v5627_v18 = vrot.slane %v5574_v52, 2  ;;  %v18699_v52 = vld [vmem:[#allocation3 + $0x12b0] ss:$8 sps:$4 sm:$0xff]  }
 0x6a5   : > { %5490 = vmatprep.subr.bf16.mxu0 %v18608_v63  ;;  %v5259_v63 = vor.u32 %v5258_v57, %v5255_v55 }
 0x6a8   : > { %5491 = vmatpush1.bf16.msra.mxu0 %v18606_v1  ;;  %v18642_v1 = vld [vmem:[#allocation3 + $0x1180] ss:$8 sps:$4 sm:$0xff]  }
 0x6a9   : > { %5492 = vmatprep.subr.bf16.mxu0 %v18611_v2  ;;  %v5626_v2 = vrot.slane %v5571_v60, 2  ;;  %v18702_v60 = vld [vmem:[#allocation3 + $0x1400] ss:$8 sps:$4 sm:$0xff]  }
 0x6ac   : > { %5493 = vmatpush1.bf16.msra.mxu0 %v18609_v3  ;;  %v18647_v3 = vld [vmem:[#allocation3 + $0x1194] ss:$8 sps:$4 sm:$0xff]  }
 0x6ad   : > { %5494 = vmatprep.subr.bf16.mxu0 %v18614_v5  ;;  %v5268_v5 = vsel %vm1394_vm4, %v5259_v63, %v5267_v62  ;;  %v18704_v62 = vld [vmem:[#allocation3 + $0x1404] ss:$8 sps:$4 sm:$0xff]   ;;  %v18705_v63 = vld [vmem:[#allocation3 + $0x1410] ss:$8 sps:$4 sm:$0xff]  }
 0x6ae   : > { %6335 = vmatprep.subr.bf16.mxu1 %v18704_v62 }
 0x6af   : > { %6336 = vmatpush1.bf16.msra.mxu1 %v18702_v60 }
 0x6b0   : > { %5495 = vmatpush1.bf16.msra.mxu0 %v18612_v54  ;;  %v5628_v54 = vsel %vm1800_vm5, %v5626_v2, %v5627_v18  ;;  %v18707_v18 = vld [vmem:[#allocation3 + $0x1414] ss:$8 sps:$4 sm:$0xff]   ;;  %v18708_v2 = vld [vmem:[#allocation3 + $0x1420] ss:$8 sps:$4 sm:$0xff]  }
 0x6b1   : > { %5496 = vmatprep.subr.bf16.mxu0 %v18617_v28  ;;  %v18645_v28 = vld [vmem:[#allocation3 + $0x1190] ss:$8 sps:$4 sm:$0xff]   ;;  %6337 = vmatprep.subr.bf16.mxu1 %v18707_v18 }
 0x6b3   : > { %6338 = vmatpush1.bf16.msra.mxu1 %v18705_v63 }
 0x6b4   : > { %5497 = vmatpush1.bf16.msra.mxu0 %v18615_v29  ;;  %v18650_v29 = vld [vmem:[#allocation3 + $0x11a4] ss:$8 sps:$4 sm:$0xff]  }
 0x6b5   : > { %5498 = vmatprep.subr.bf16.mxu0 %v18620_v9  ;;  %v18653_v9 = vld [vmem:[#allocation3 + $0x11b4] ss:$8 sps:$4 sm:$0xff]  }
 0x6b8   : > { %5499 = vmatpush1.bf16.msra.mxu0 %v18618_v12  ;;  %v18656_v12 = vld [vmem:[#allocation3 + $0x11c4] ss:$8 sps:$4 sm:$0xff]  }
 0x6b9   : > { %5500 = vmatprep.subr.bf16.mxu0 %v18623_v14  ;;  %v18654_v14 = vld [vmem:[#allocation3 + $0x11c0] ss:$8 sps:$4 sm:$0xff]  }
 0x6bc   : > { %5501 = vmatpush1.bf16.msra.mxu0 %v18621_v16  ;;  %v18662_v16 = vld [vmem:[#allocation3 + $0x11e4] ss:$8 sps:$4 sm:$0xff]  }
 0x6bd   : > { %5502 = vmatprep.subr.bf16.mxu0 %v18626_v46  ;;  %v18665_v46 = vld [vmem:[#allocation3 + $0x11f4] ss:$8 sps:$4 sm:$0xff]  }
 0x6c0   : > { %5503 = vmatpush1.bf16.msra.mxu0 %v18624_v22  ;;  %v18666_v22 = vld [vmem:[#allocation3 + $0x1200] ss:$8 sps:$4 sm:$0xff]  }
 0x6c1   : > { %5504 = vmatprep.subr.bf16.mxu0 %v18629_v26  ;;  %v18674_v26 = vld [vmem:[#allocation3 + $0x1224] ss:$8 sps:$4 sm:$0xff]  }
 0x6c4   : > { %5505 = vmatpush1.bf16.msra.mxu0 %v18627_v31  ;;  %v18675_v31 = vld [vmem:[#allocation3 + $0x1230] ss:$8 sps:$4 sm:$0xff]  }
 0x6c5   : > { %5517 = vmatprep.subr.bf16.mxu0 %v18632_v33  ;;  %v18683_v33 = vld [vmem:[#allocation3 + $0x1254] ss:$8 sps:$4 sm:$0xff]  }
 0x6c7   : > { %5507 = vmatmul.mubr.bf16.vlgmr.msra.gmra.mrb[8].mxu0 %v5234_v13  ;;  %v5573_v13 = vpack.c.bf16 %v5567_v11, %v5567_v11 }
 0x6c8   : > { %5518 = vmatpush1.bf16.msra.mxu0 %v18630_v6  ;;  %5549 = vmatprep.mubr.bf16.mxu0 %v20306_v0  ;;  %v18684_v6 = vld [vmem:[#allocation3 + $0x1260] ss:$8 sps:$4 sm:$0xff]  }
 0x6c9   : > { %5519 = vmatprep.subr.bf16.mxu0 %v18635_v25  ;;  %v18689_v25 = vld [vmem:[#allocation3 + $0x1274] ss:$8 sps:$4 sm:$0xff]  }
 0x6cc   : > { %5520 = vmatpush1.bf16.msra.mxu0 %v18633_v38  ;;  %v5570_v38 = vpack.c.bf16 %v20604_v61, %v5564_v35  ;;  %v18696_v61 = vld [vmem:[#allocation3 + $0x12a0] ss:$8 sps:$4 sm:$0xff]  }
 0x6cd   : > { %5521 = vmatprep.subr.bf16.mxu0 %v18638_v40  ;;  %v5624_v40 = vrot.slane %v5573_v13, 2 }
 0x6ce   : > { %v5623_v41 = vrot.slane %v5570_v38, 2 }
 0x6d0   : > { %5522 = vmatpush1.bf16.msra.mxu0 %v18636_v44  ;;  %v18695_v44 = vld [vmem:[#allocation3 + $0x1294] ss:$8 sps:$4 sm:$0xff]   ;;  %v5625_v45 = vsel %vm1800_vm5, %v5623_v41, %v5624_v40  ;;  %v18741_v41 = vld [vmem:[#allocation3 + $0x14d0] ss:$8 sps:$4 sm:$0xff]  }
 0x6d1   : > { %5523 = vmatprep.subr.bf16.mxu0 %v18641_v48  ;;  %v5569_v48 = vld [vmem:[#allocation2 + $0x40] sm:$0xf] }
 0x6d2   : > { %v5575_v50 = vpack.c.bf16 %v5569_v48, %v5569_v48  ;;  %v18749_v48 = vld [vmem:[#allocation3 + $0x14f4] ss:$8 sps:$4 sm:$0xff]  }
 0x6d4   : > { %5524 = vmatpush1.bf16.msra.mxu0 %v18639_v58  ;;  %v5572_v58 = vpack.c.bf16 %v20608_v21, %v5566_v51  ;;  %v5630_v55 = vrot.slane %v5575_v50, 2  ;;  %v18713_v21 = vld [vmem:[#allocation3 + $0x1434] ss:$8 sps:$4 sm:$0xff]  }
 0x6d5   : > { %5837 = vmatprep.subr.bf16.mxu0 %v18644_v59 }
 0x6d6   : > { %v5629_v57 = vrot.slane %v5572_v58, 2 }
 0x6d7   : > { %16313 = vmatmul.mubr.msk.bf16.vlgmr.msra.gmra.mrb[8].mxu0 %vm249_vm0, %v5268_v5  ;;  %v18716_v5 = vld [vmem:[#allocation3 + $0x1444] ss:$8 sps:$4 sm:$0xff]  }
 0x6d8   : > { %5838 = vmatpush1.bf16.msra.mxu0 %v18642_v1  ;;  %5869 = vmatprep.mubr.bf16.mxu0 %v5628_v54  ;;  %v5631_v59 = vsel %vm1800_vm5, %v5629_v57, %v5630_v55  ;;  %v18710_v1 = vld [vmem:[#allocation3 + $0x1424] ss:$8 sps:$4 sm:$0xff]   ;;  %v18714_v54 = vld [vmem:[#allocation3 + $0x1440] ss:$8 sps:$4 sm:$0xff]  }
 0x6d9   : > { %5839 = vmatprep.subr.bf16.mxu0 %v18647_v3  ;;  %6339 = vmatprep.subr.bf16.mxu1 %v18710_v1  ;;  %v18711_v3 = vld [vmem:[#allocation3 + $0x1430] ss:$8 sps:$4 sm:$0xff]  }
 0x6da   : > { %6340 = vmatpush1.bf16.msra.mxu1 %v18708_v2 }
 0x6db   : > { %6341 = vmatprep.subr.bf16.mxu1 %v18713_v21 }
 0x6dc   : > { %5840 = vmatpush1.bf16.msra.mxu0 %v18645_v28  ;;  %v18719_v28 = vld [vmem:[#allocation3 + $0x1454] ss:$8 sps:$4 sm:$0xff]  }
 0x6dd   : > { %5841 = vmatprep.subr.bf16.mxu0 %v18650_v29  ;;  %v18717_v29 = vld [vmem:[#allocation3 + $0x1450] ss:$8 sps:$4 sm:$0xff]  }
 0x6de   : > { %6342 = vmatpush1.bf16.msra.mxu1 %v18711_v3 }
 0x6df   : > { %6343 = vmatprep.subr.bf16.mxu1 %v18716_v5 }
 0x6e0   : > { %5842 = vmatpush1.bf16.msra.mxu0 %v18648_v56  ;;  %v18722_v56 = vld [vmem:[#allocation3 + $0x1464] ss:$8 sps:$4 sm:$0xff]  }
 0x6e1   : > { %5843 = vmatprep.subr.bf16.mxu0 %v18653_v9  ;;  %v18720_v9 = vld [vmem:[#allocation3 + $0x1460] ss:$8 sps:$4 sm:$0xff]  }
 0x6e2   : > { %6344 = vmatpush1.bf16.msra.mxu1 %v18714_v54 }
 0x6e3   : > { %6345 = vmatprep.subr.bf16.mxu1 %v18719_v28 }
 0x6e4   : > { %5844 = vmatpush1.bf16.msra.mxu0 %v18651_v10  ;;  %v18725_v10 = vld [vmem:[#allocation3 + $0x1474] ss:$8 sps:$4 sm:$0xff]  }
 0x6e5   : > { %5845 = vmatprep.subr.bf16.mxu0 %v18656_v12  ;;  %v18723_v12 = vld [vmem:[#allocation3 + $0x1470] ss:$8 sps:$4 sm:$0xff]  }
 0x6e6   : > { %6346 = vmatpush1.bf16.msra.mxu1 %v18717_v29 }
 0x6e7   : > { %6347 = vmatprep.subr.bf16.mxu1 %v18722_v56 }
 0x6e8   : > { %5846 = vmatpush1.bf16.msra.mxu0 %v18654_v14  ;;  %v18728_v14 = vld [vmem:[#allocation3 + $0x1484] ss:$8 sps:$4 sm:$0xff]  }
 0x6e9   : > { %5847 = vmatprep.subr.bf16.mxu0 %v18659_v36  ;;  %v18726_v36 = vld [vmem:[#allocation3 + $0x1480] ss:$8 sps:$4 sm:$0xff]  }
 0x6ea   : > { %6348 = vmatpush1.bf16.msra.mxu1 %v18720_v9 }
 0x6eb   : > { %6349 = vmatprep.subr.bf16.mxu1 %v18725_v10 }
 0x6ec   : > { %5848 = vmatpush1.bf16.msra.mxu0 %v18657_v15  ;;  %v18731_v15 = vld [vmem:[#allocation3 + $0x1494] ss:$8 sps:$4 sm:$0xff]  }
 0x6ed   : > { %5849 = vmatprep.subr.bf16.mxu0 %v18662_v16  ;;  %v18729_v16 = vld [vmem:[#allocation3 + $0x1490] ss:$8 sps:$4 sm:$0xff]  }
 0x6ee   : > { %6350 = vmatpush1.bf16.msra.mxu1 %v18723_v12 }
 0x6ef   : > { %6351 = vmatprep.subr.bf16.mxu1 %v18728_v14 }
 0x6f0   : > { %5850 = vmatpush1.bf16.msra.mxu0 %v18660_v17  ;;  %v16355_v17 = vld [vmem:[%s21138_s2 + $0x4] sm:$0x3] }
 0x6f1   : > { %5851 = vmatprep.subr.bf16.mxu0 %v18665_v46  ;;  %v18732_v46 = vld [vmem:[#allocation3 + $0x14a0] ss:$8 sps:$4 sm:$0xff]  }
 0x6f2   : > { %6352 = vmatpush1.bf16.msra.mxu1 %v18726_v36 }
 0x6f3   : > { %6353 = vmatprep.subr.bf16.mxu1 %v18731_v15 }
 0x6f4   : > { %5852 = vmatpush1.bf16.msra.mxu0 %v18663_v19  ;;  %v18734_v19 = vld [vmem:[#allocation3 + $0x14a4] ss:$8 sps:$4 sm:$0xff]  }
 0x6f5   : > { %5853 = vmatprep.subr.bf16.mxu0 %v18668_v20  ;;  %v5933_v20 = vrot.slane %v16355_v17, %v20509_v7 }
 0x6f6   : > { %6354 = vmatpush1.bf16.msra.mxu1 %v18729_v16 }
 0x6f7   : > { %6355 = vmatprep.subr.bf16.mxu1 %v18734_v19  ;;  %v18750_v19 = vld [vmem:[#allocation3 + $0x1500] ss:$8 sps:$4 sm:$0xff]  }
 0x6f8   : > { %5854 = vmatpush1.bf16.msra.mxu0 %v18666_v22  ;;  %v5937_v22 = vrot.slane %v16355_v17, %v20511_v8 }
 0x6f9   : > { %5855 = vmatprep.subr.bf16.mxu0 %v18671_v23  ;;  %v18735_v23 = vld [vmem:[#allocation3 + $0x14b0] ss:$8 sps:$4 sm:$0xff]  }
 0x6fa   : > { %6356 = vmatpush1.bf16.msra.mxu1 %v18732_v46 }
 0x6fc   : > { %5856 = vmatpush1.bf16.msra.mxu0 %v18669_v24  ;;  %v18737_v24 = vld [vmem:[#allocation3 + $0x14b4] ss:$8 sps:$4 sm:$0xff]  }
 0x6fd   : > { %5857 = vmatprep.subr.bf16.mxu0 %v18674_v26  ;;  %6357 = vmatprep.subr.bf16.mxu1 %v18737_v24 }
 0x6fe   : > { %6358 = vmatpush1.bf16.msra.mxu1 %v18735_v23  ;;  %v18755_v23 = vld [vmem:[#allocation3 + $0x1514] ss:$8 sps:$4 sm:$0xff]  }
 0x700   : > { %5858 = vmatpush1.bf16.msra.mxu0 %v18672_v27 }
 0x701   : > { %5859 = vmatprep.subr.bf16.mxu0 %v18677_v30 }
 0x704   : > { %5860 = vmatpush1.bf16.msra.mxu0 %v18675_v31 }
 0x705   : > { %5861 = vmatprep.subr.bf16.mxu0 %v18680_v4 }
 0x708   : > { %5862 = vmatpush1.bf16.msra.mxu0 %v18678_v32 }
 0x709   : > { %5863 = vmatprep.subr.bf16.mxu0 %v18683_v33 }
 0x70c   : > { %5864 = vmatpush1.bf16.msra.mxu0 %v18681_v34 }
 0x70d   : > { %5865 = vmatprep.subr.bf16.mxu0 %v18686_v43 }
 0x710   : > { %5866 = vmatpush1.bf16.msra.mxu0 %v18684_v6  ;;  %v18738_v6 = vld [vmem:[#allocation3 + $0x14c0] ss:$8 sps:$4 sm:$0xff]  }
 0x711   : > { %5867 = vmatprep.subr.bf16.mxu0 %v18689_v25  ;;  %v18740_v25 = vld [vmem:[#allocation3 + $0x14c4] ss:$8 sps:$4 sm:$0xff]  }
 0x712   : > { %6359 = vmatprep.subr.bf16.mxu1 %v18740_v25  ;;  %v18759_v25 = vld [vmem:[#allocation3 + $0x1530] ss:$8 sps:$4 sm:$0xff]  }
 0x713   : > { %6360 = vmatpush1.bf16.msra.mxu1 %v18738_v6 }
 0x714   : > { %5868 = vmatpush1.bf16.msra.mxu0 %v18687_v37  ;;  %v18743_v37 = vld [vmem:[#allocation3 + $0x14d4] ss:$8 sps:$4 sm:$0xff]  }
 0x715   : > { %5880 = vmatprep.subr.bf16.mxu0 %v18692_v39  ;;  %6361 = vmatprep.subr.bf16.mxu1 %v18743_v37 }
 0x717   : > { %5870 = vmatmul.mubr.bf16.vlgmr.msra.gmra.mrb[8].mxu0 %v5625_v45  ;;  %6362 = vmatpush1.bf16.msra.mxu1 %v18741_v41  ;;  %v18762_v41 = vld [vmem:[#allocation3 + $0x12c0] ss:$8 sps:$4 sm:$0xff]  }
 0x718   : > { %5881 = vmatpush1.bf16.msra.mxu0 %v18690_v42  ;;  %5912 = vmatprep.mubr.bf16.mxu0 %v20306_v0 }
 0x719   : > { %5882 = vmatprep.subr.bf16.mxu0 %v18695_v44  ;;  %v18746_v44 = vld [vmem:[#allocation3 + $0x14e4] ss:$8 sps:$4 sm:$0xff]  }
 0x71a   : > { %6363 = vmatprep.subr.bf16.mxu1 %v18746_v44 }
 0x71c   : > { %5883 = vmatpush1.bf16.msra.mxu0 %v18693_v53 }
 0x71d   : > { %5884 = vmatprep.subr.bf16.mxu0 %v18698_v47  ;;  %v18744_v47 = vld [vmem:[#allocation3 + $0x14e0] ss:$8 sps:$4 sm:$0xff]  }
 0x71e   : > { %6364 = vmatpush1.bf16.msra.mxu1 %v18744_v47  ;;  %v18770_v47 = vld [vmem:[#allocation3 + $0x12e4] ss:$8 sps:$4 sm:$0xff]  }
 0x71f   : > { %6365 = vmatprep.subr.bf16.mxu1 %v18749_v48  ;;  %v18768_v48 = vld [vmem:[#allocation3 + $0x12e0] ss:$8 sps:$4 sm:$0xff]  }
 0x720   : > { %5885 = vmatpush1.bf16.msra.mxu0 %v18696_v61  ;;  %v18747_v61 = vld [vmem:[#allocation3 + $0x14f0] ss:$8 sps:$4 sm:$0xff]  }
 0x721   : > { %5886 = vmatprep.subr.bf16.mxu0 %v18701_v49  ;;  %v18752_v49 = vld [vmem:[#allocation3 + $0x1504] ss:$8 sps:$4 sm:$0xff]  }
 0x722   : > { %6366 = vmatpush1.bf16.msra.mxu1 %v18747_v61  ;;  %v18773_v61 = vld [vmem:[#allocation3 + $0x12f4] ss:$8 sps:$4 sm:$0xff]  }
 0x723   : > { %6378 = vmatprep.subr.bf16.mxu1 %v18752_v49  ;;  %v18771_v49 = vld [vmem:[#allocation3 + $0x12f0] ss:$8 sps:$4 sm:$0xff]  }
 0x724   : > { %5887 = vmatpush1.bf16.msra.mxu0 %v18699_v52 }
 0x727   : > { %16354 = vmatmul.mubr.msk.bf16.vlgmr.msra.gmra.mrb[8].mxu0 %vm249_vm0, %v5631_v59 }
 0x7fa   : > { %v5914_v26 = vpop.f32.mrb[8].mxu0 }
 0x7fb   : > { %v5940_v27 = vadd.f32 %v5933_v20, %v5914_v26  ;;  %v5916_v30 = vpop.f32.mrb[9].mxu0 }
 0x7fc   : > { %v5941_v31 = vadd.f32 %v5937_v22, %v5916_v30  ;;  %v5918_v4 = vpop.f32.mrb[10].mxu0 }
 0x7fd   : > { %v5944_v32 = vmax.f32 %v5940_v27, 0.0  ;;  %v5942_v33 = vadd.f32 %v5933_v20, %v5918_v4  ;;  %v5920_v34 = vpop.f32.mrb[11].mxu0 }
 0x7fe   : > { %v5945_v43 = vmax.f32 %v5941_v31, 0.0  ;;  %v5943_v11 = vadd.f32 %v5937_v22, %v5920_v34  ;;  %v18753_v31 = vld [vmem:[#allocation3 + $0x1510] ss:$8 sps:$4 sm:$0xff]   ;;  %v18756_v34 = vld [vmem:[#allocation3 + $0x1520] ss:$8 sps:$4 sm:$0xff]  }
 0x7ff   : > { %v5952_v13 = vrot.slane %v5944_v32, 6  ;;  %v5946_v35 = vmax.f32 %v5942_v33, 0.0  ;;  %v18758_v32 = vld [vmem:[#allocation3 + $0x1524] ss:$8 sps:$4 sm:$0xff]  }
 0x800   : > { %v5953_v38 = vrot.slane %v5945_v43, 6  ;;  %v5947_v39 = vmax.f32 %v5943_v11, 0.0  ;;  %v18761_v11 = vld [vmem:[#allocation3 + $0x1534] ss:$8 sps:$4 sm:$0xff]  }
 0x801   : > { %v5954_v40 = vrot.slane %v5946_v35, 6  ;;  %5958 = vrot.lane.b32.xlu0 %v5952_v13, %s20307_s12  ;;  %v18764_v35 = vld [vmem:[#allocation3 + $0x12c4] ss:$8 sps:$4 sm:$0xff]  }
 0x802   : > { %v5956_v42 = vrot.slane %v5947_v39, 6  ;;  %5960 = vrot.lane.b32.xlu1 %v5953_v38, %s20307_s12 }
 0x803   : > { %v5955_v45 = vsel %vm2129_vm6, %v5952_v13, %v5954_v40 }
 0x804   : > { %v5957_v53 = vsel %vm2129_vm6, %v5953_v38, %v5956_v42 }
 0x805   : > { %5962 = vrot.lane.b32.xlu0 %v5955_v45, %s20307_s12 }
 0x806   : > { %5964 = vrot.lane.b32.xlu1 %v5957_v53, %s20307_s12  ;;  %v18765_v53 = vld [vmem:[#allocation3 + $0x12d0] ss:$8 sps:$4 sm:$0xff]  }
 0x809   : > { %5966 = vrot.lane.b32.xlu0 %v5954_v40, %s20307_s12 }
 0x80a   : > { %5968 = vrot.lane.b32.xlu1 %v5956_v42, %s20307_s12  ;;  %v18767_v42 = vld [vmem:[#allocation3 + $0x12d4] ss:$8 sps:$4 sm:$0xff]  }
 0x873   : > { %v5959_v50 = vpop.permute.xlu0 %5958 }
 0x874   : > { %5982 = vst.msk [vmem:[#allocation2] sm:$0xfc] %vm2161_vm7, %v5959_v50  ;;  %v5961_v51 = vpop.permute.xlu1 %5960 }
 0x875   : > { %v5970_v52 = vsel %vm2148_vm9, %v5959_v50, %v5961_v51  ;;  %5984 = vst.msk [vmem:[#allocation2 + $0x10] sm:$0xfc] %vm2164_vm10, %v5961_v51  ;;  %v18776_v50 = vld [vmem:[#allocation3 + $0x1304] ss:$8 sps:$4 sm:$0xff]   ;;  %v18774_v51 = vld [vmem:[#allocation3 + $0x1300] ss:$8 sps:$4 sm:$0xff]  }
 0x876   : > { %5983 = vst [vmem:[#allocation2 + $0x8] sm:$0xfc] %v5970_v52  ;;  %v18779_v52 = vld [vmem:[#allocation3 + $0x1314] ss:$8 sps:$4 sm:$0xff]  }
 0x877   : > { %v5963_v58 = vpop.permute.xlu0 %5962 }
 0x878   : > { %5985 = vst.msk [vmem:[#allocation2 + $0x18] sm:$0xff] %vm2166_vm8, %v5963_v58  ;;  %v5965_v55 = vpop.permute.xlu1 %5964 }
 0x879   : > { %5987 = vst.msk [vmem:[#allocation2 + $0x28] sm:$0xff] %vm2148_vm9, %v5965_v55  ;;  %v20664_v60 = vsel %vm2148_vm9, %v5963_v58, %v5965_v55  ;;  %v18777_v58 = vld [vmem:[#allocation3 + $0x1310] ss:$8 sps:$4 sm:$0xff]   ;;  %v18782_v55 = vld [vmem:[#allocation3 + $0x1324] ss:$8 sps:$4 sm:$0xff]  }
 0x87b   : > { %v5967_v57 = vpop.permute.xlu0 %5966  ;;  %v6041_v2 = vld [vmem:[#allocation2] sm:$0xfe] }
 0x87c   : > { %5988 = vst.msk [vmem:[#allocation2 + $0x30] sm:$0x3] %vm2170_vm11, %v5967_v57  ;;  %v5969_v59 = vpop.permute.xlu1 %5968  ;;  %v6043_v27 = vld [vmem:[#allocation2 + $0x10] sm:$0xfe] }
 0x87d   : > { %v5972_v62 = vsel %vm2148_vm9, %v5967_v57, %v5969_v59  ;;  %5990 = vst.msk [vmem:[#allocation2 + $0x40] sm:$0x3] %vm2173_vm12, %v5969_v59  ;;  %v6042_v18 = vld [vmem:[#allocation2 + $0x8] sm:$0xfe]  ;;  %v18785_v59 = vld [vmem:[#allocation3 + $0x1334] ss:$8 sps:$4 sm:$0xff]  }
 0x87e   : > { %5989 = vst [vmem:[#allocation2 + $0x38] sm:$0x3] %v5972_v62  ;;  %v6048_v63 = vpack.c.bf16 %v20664_v60, %v6042_v18  ;;  %v5992_v39 = vld [vmem:[#allocation2 + $0x8] sm:$0xff]  ;;  %v18783_v62 = vld [vmem:[#allocation3 + $0x1330] ss:$8 sps:$4 sm:$0xff]  }
 0x87f   : > { %v20669_v1 = vld [vmem:[#allocation2 + $0x18] sm:$0xff]  ;;  %v5998_v45 = vpack.c.bf16 %v20664_v60, %v5992_v39  ;;  %v18780_v57 = vld [vmem:[#allocation3 + $0x1320] ss:$8 sps:$4 sm:$0xff]   ;;  %v18788_v18 = vld [vmem:[#allocation3 + $0x1344] ss:$8 sps:$4 sm:$0xff]  }
 0x880   : > { %v6047_v21 = vpack.c.bf16 %v20669_v1, %v6041_v2  ;;  %v6109_v3 = vshll.u32 %v6048_v63, 16  ;;  %v6107_v14 = vshrl.u32 %v6048_v63, 16  ;;  %v20673_v24 = vld [vmem:[#allocation2 + $0x28] sm:$0xff]  ;;  %v18791_v2 = vld [vmem:[#allocation3 + $0x1354] ss:$8 sps:$4 sm:$0xff]  }
 0x881   : > { %v6049_v4 = vpack.c.bf16 %v20673_v24, %v6043_v27  ;;  %v18786_v63 = vld [vmem:[#allocation3 + $0x1340] ss:$8 sps:$4 sm:$0xff]   ;;  %v18830_v39 = vld [vmem:[#allocation3 + $0x1564] ss:$8 sps:$4 sm:$0xff]  }
 0x882   : > { %v6097_v54 = vshll.u32 %v6047_v21, 16  ;;  %v6111_v9 = vrot.slane %v6109_v3, 1  ;;  %v6095_v15 = vshrl.u32 %v6047_v21, 16  ;;  %v18789_v21 = vld [vmem:[#allocation3 + $0x1350] ss:$8 sps:$4 sm:$0xff]  }
 0x883   : > { %v6044_v5 = vld [vmem:[#allocation2 + $0x30] sm:$0x1]  ;;  %v6121_v43 = vshll.u32 %v6049_v4, 16  ;;  %v6119_v37 = vshrl.u32 %v6049_v4, 16  ;;  %v18794_v3 = vld [vmem:[#allocation3 + $0x1364] ss:$8 sps:$4 sm:$0xff]  }
 0x884   : > { %v6050_v28 = vpack.c.bf16 %v6044_v5, %v6044_v5  ;;  %v6099_v12 = vrot.slane %v6097_v54, 1  ;;  %v6112_v17 = vor.u32 %v6111_v9, %v6107_v14  ;;  %v6046_v30 = vld [vmem:[#allocation2 + $0x40] sm:$0x1]  ;;  %v18792_v5 = vld [vmem:[#allocation3 + $0x1360] ss:$8 sps:$4 sm:$0xff]  }
 0x885   : > { %v6045_v29 = vld [vmem:[#allocation2 + $0x38] sm:$0x1]  ;;  %v6052_v33 = vpack.c.bf16 %v6046_v30, %v6046_v30  ;;  %v6123_v13 = vrot.slane %v6121_v43, 1  ;;  %v18797_v54 = vld [vmem:[#allocation3 + $0x1374] ss:$8 sps:$4 sm:$0xff]  }
 0x886   : > { %v6051_v56 = vpack.c.bf16 %v6045_v29, %v6045_v29  ;;  %v6102_v10 = vshll.u32 %v6050_v28, 16  ;;  %v6100_v20 = vor.u32 %v6099_v12, %v6095_v15  ;;  %v18795_v28 = vld [vmem:[#allocation3 + $0x1370] ss:$8 sps:$4 sm:$0xff]   ;;  %v18800_v29 = vld [vmem:[#allocation3 + $0x1384] ss:$8 sps:$4 sm:$0xff]  }
 0x887   : > { %v6126_v6 = vshll.u32 %v6052_v33, 16  ;;  %v6124_v40 = vor.u32 %v6123_v13, %v6119_v37  ;;  %v18803_v9 = vld [vmem:[#allocation3 + $0x1394] ss:$8 sps:$4 sm:$0xff]   ;;  %v18806_v12 = vld [vmem:[#allocation3 + $0x13a4] ss:$8 sps:$4 sm:$0xff]  }
 0x888   : > { %v6114_v36 = vshll.u32 %v6051_v56, 16  ;;  %v6104_v16 = vrot.slane %v6102_v10, 1  ;;  %v18798_v56 = vld [vmem:[#allocation3 + $0x1380] ss:$8 sps:$4 sm:$0xff]   ;;  %v18801_v10 = vld [vmem:[#allocation3 + $0x1390] ss:$8 sps:$4 sm:$0xff]  }
 0x889   : > { %v6128_v38 = vrot.slane %v6126_v6, 1  ;;  %v18804_v14 = vld [vmem:[#allocation3 + $0x13a0] ss:$8 sps:$4 sm:$0xff]   ;;  %v18807_v15 = vld [vmem:[#allocation3 + $0x13b0] ss:$8 sps:$4 sm:$0xff]  }
 0x88a   : > { %v6116_v46 = vrot.slane %v6114_v36, 1  ;;  %v6105_v26 = vsel %vm360_vm2, %v6100_v20, %v6104_v16  ;;  %v18809_v36 = vld [vmem:[#allocation3 + $0x13b4] ss:$8 sps:$4 sm:$0xff]   ;;  %v18812_v16 = vld [vmem:[#allocation3 + $0x13c4] ss:$8 sps:$4 sm:$0xff]  }
 0x88b   : > { %v6129_v44 = vsel %vm360_vm2, %v6124_v40, %v6128_v38  ;;  %v18815_v20 = vld [vmem:[#allocation3 + $0x13d4] ss:$8 sps:$4 sm:$0xff]   ;;  %v6714_v27 = vld [vmem:[#allocation2 + $0x38] sm:$0x3]  ;;  %v18824_v33 = vld [vmem:[#allocation3 + $0x1544] ss:$8 sps:$4 sm:$0xff]  }
 0x88c   : > { %v6117_v22 = vsel %vm360_vm2, %v6112_v17, %v6116_v46  ;;  %v5991_v17 = vld [vmem:[#allocation2] sm:$0xff]  ;;  %v18810_v46 = vld [vmem:[#allocation3 + $0x13c0] ss:$8 sps:$4 sm:$0xff]   ;;  %v6720_v4 = vpack.c.bf16 %v6714_v27, %v6714_v27 }
 0x88d   : > { %6367 = vmatprep.mubr.bf16.mxu1 %v6117_v22  ;;  %v18813_v22 = vld [vmem:[#allocation3 + $0x13d0] ss:$8 sps:$4 sm:$0xff]   ;;  %v18821_v30 = vld [vmem:[#allocation3 + $0x13f4] ss:$8 sps:$4 sm:$0xff]   ;;  %v18822_v6 = vld [vmem:[#allocation3 + $0x1540] ss:$8 sps:$4 sm:$0xff]  }
 0x88e   : > { %6368 = vmatmul.mubr.bf16.vlgmr.msra.gmra.mrb[8].mxu1 %v6105_v26  ;;  %v18816_v26 = vld [vmem:[#allocation3 + $0x13e0] ss:$8 sps:$4 sm:$0xff]   ;;  %v6773_v43 = vrot.slane %v6720_v4, 1  ;;  %v18825_v38 = vld [vmem:[#allocation3 + $0x1550] ss:$8 sps:$4 sm:$0xff]  }
 0x88f   : > { %6379 = vmatpush1.bf16.msra.mxu1 %v18750_v19  ;;  %6410 = vmatprep.mubr.bf16.mxu1 %v20306_v0  ;;  %v5997_v19 = vpack.c.bf16 %v20669_v1, %v5991_v17  ;;  %v18828_v40 = vld [vmem:[#allocation3 + $0x1560] ss:$8 sps:$4 sm:$0xff]   ;;  %v7077_v17 = vld [vmem:[#allocation2 + $0x38] sm:$0x7] }
 0x890   : > { %6380 = vmatprep.subr.bf16.mxu1 %v18755_v23  ;;  %v18818_v23 = vld [vmem:[#allocation3 + $0x13e4] ss:$8 sps:$4 sm:$0xff]  }
 0x893   : > { %6381 = vmatpush1.bf16.msra.mxu1 %v18753_v31  ;;  %v6711_v31 = vld [vmem:[#allocation2 + $0x8] sm:$0xfc] }
 0x894   : > { %6382 = vmatprep.subr.bf16.mxu1 %v18758_v32  ;;  %v18819_v32 = vld [vmem:[#allocation3 + $0x13f0] ss:$8 sps:$4 sm:$0xff]  }
 0x897   : > { %6383 = vmatpush1.bf16.msra.mxu1 %v18756_v34  ;;  %v6717_v34 = vpack.c.bf16 %v20664_v60, %v6711_v31 }
 0x898   : > { %6384 = vmatprep.subr.bf16.mxu1 %v18761_v11  ;;  %v5993_v11 = vld [vmem:[#allocation2 + $0x10] sm:$0xff] }
 0x899   : > { %v6772_v13 = vrot.slane %v6717_v34, 1 }
 0x89b   : > { %6385 = vmatpush1.bf16.msra.mxu1 %v18759_v25  ;;  %v5999_v25 = vpack.c.bf16 %v20673_v24, %v5993_v11  ;;  %v6774_v37 = vsel %vm1036_vm3, %v6772_v13, %v6773_v43 }
 0x89c   : > { %6624 = vmatprep.subr.bf16.mxu1 %v18764_v35  ;;  %v18827_v35 = vld [vmem:[#allocation3 + $0x1554] ss:$8 sps:$4 sm:$0xff]  }
 0x89e   : > { %16396 = vmatmul.mubr.msk.bf16.vlgmr.msra.gmra.mrb[8].mxu1 %vm249_vm0, %v6129_v44  ;;  %v18836_v44 = vld [vmem:[#allocation3 + $0x1584] ss:$8 sps:$4 sm:$0xff]  }
 0x89f   : > { %6625 = vmatpush1.bf16.msra.mxu1 %v18762_v41  ;;  %6656 = vmatprep.mubr.bf16.mxu1 %v5998_v45  ;;  %v18833_v41 = vld [vmem:[#allocation3 + $0x1574] ss:$8 sps:$4 sm:$0xff]   ;;  %v18834_v45 = vld [vmem:[#allocation3 + $0x1580] ss:$8 sps:$4 sm:$0xff]  }
 0x8a0   : > { %6626 = vmatprep.subr.bf16.mxu1 %v18767_v42  ;;  %v18831_v42 = vld [vmem:[#allocation3 + $0x1570] ss:$8 sps:$4 sm:$0xff]  }
 0x8a3   : > { %6627 = vmatpush1.bf16.msra.mxu1 %v18765_v53  ;;  %v18839_v53 = vld [vmem:[#allocation3 + $0x1594] ss:$8 sps:$4 sm:$0xff]  }
 0x8a4   : > { %6628 = vmatprep.subr.bf16.mxu1 %v18770_v47  ;;  %v18837_v47 = vld [vmem:[#allocation3 + $0x1590] ss:$8 sps:$4 sm:$0xff]  }
 0x8a7   : > { %6629 = vmatpush1.bf16.msra.mxu1 %v18768_v48  ;;  %v18842_v48 = vld [vmem:[#allocation3 + $0x15a4] ss:$8 sps:$4 sm:$0xff]  }
 0x8a8   : > { %6630 = vmatprep.subr.bf16.mxu1 %v18773_v61  ;;  %v18840_v61 = vld [vmem:[#allocation3 + $0x15a0] ss:$8 sps:$4 sm:$0xff]  }
 0x8ab   : > { %6631 = vmatpush1.bf16.msra.mxu1 %v18771_v49  ;;  %v18845_v49 = vld [vmem:[#allocation3 + $0x15b4] ss:$8 sps:$4 sm:$0xff]  }
 0x8ac   : > { %6632 = vmatprep.subr.bf16.mxu1 %v18776_v50  ;;  %v18843_v50 = vld [vmem:[#allocation3 + $0x15b0] ss:$8 sps:$4 sm:$0xff]  }
 0x8af   : > { %6633 = vmatpush1.bf16.msra.mxu1 %v18774_v51  ;;  %v18848_v51 = vld [vmem:[#allocation3 + $0x15c4] ss:$8 sps:$4 sm:$0xff]  }
 0x8b0   : > { %6634 = vmatprep.subr.bf16.mxu1 %v18779_v52  ;;  %v18846_v52 = vld [vmem:[#allocation3 + $0x15c0] ss:$8 sps:$4 sm:$0xff]  }
 0x8b3   : > { %6635 = vmatpush1.bf16.msra.mxu1 %v18777_v58  ;;  %v18851_v58 = vld [vmem:[#allocation3 + $0x15d4] ss:$8 sps:$4 sm:$0xff]  }
 0x8b4   : > { %6636 = vmatprep.subr.bf16.mxu1 %v18782_v55  ;;  %v18849_v55 = vld [vmem:[#allocation3 + $0x15d0] ss:$8 sps:$4 sm:$0xff]  }
 0x8b7   : > { %6637 = vmatpush1.bf16.msra.mxu1 %v18780_v57  ;;  %v18854_v57 = vld [vmem:[#allocation3 + $0x15e4] ss:$8 sps:$4 sm:$0xff]  }
 0x8b8   : > { %6638 = vmatprep.subr.bf16.mxu1 %v18785_v59  ;;  %v18852_v59 = vld [vmem:[#allocation3 + $0x15e0] ss:$8 sps:$4 sm:$0xff]  }
 0x8bb   : > { %6639 = vmatpush1.bf16.msra.mxu1 %v18783_v62  ;;  %v18857_v62 = vld [vmem:[#allocation3 + $0x15f4] ss:$8 sps:$4 sm:$0xff]  }
 0x8bc   : > { %6640 = vmatprep.subr.bf16.mxu1 %v18788_v18  ;;  %v18855_v18 = vld [vmem:[#allocation3 + $0x15f0] ss:$8 sps:$4 sm:$0xff]  }
 0x8bf   : > { %6641 = vmatpush1.bf16.msra.mxu1 %v18786_v63  ;;  %v18860_v63 = vld [vmem:[#allocation3 + $0x1604] ss:$8 sps:$4 sm:$0xff]  }
 0x8c0   : > { %6642 = vmatprep.subr.bf16.mxu1 %v18791_v2  ;;  %v18858_v2 = vld [vmem:[#allocation3 + $0x1600] ss:$8 sps:$4 sm:$0xff]  }
 0x8c3   : > { %6643 = vmatpush1.bf16.msra.mxu1 %v18789_v21  ;;  %v18863_v21 = vld [vmem:[#allocation3 + $0x1614] ss:$8 sps:$4 sm:$0xff]  }
 0x8c4   : > { %6644 = vmatprep.subr.bf16.mxu1 %v18794_v3  ;;  %v18861_v3 = vld [vmem:[#allocation3 + $0x1610] ss:$8 sps:$4 sm:$0xff]  }
 0x8c7   : > { %6645 = vmatpush1.bf16.msra.mxu1 %v18792_v5  ;;  %v18866_v5 = vld [vmem:[#allocation3 + $0x1624] ss:$8 sps:$4 sm:$0xff]  }
 0x8c8   : > { %6646 = vmatprep.subr.bf16.mxu1 %v18797_v54  ;;  %v6713_v54 = vld [vmem:[#allocation2 + $0x30] sm:$0x3] }
 0x8cb   : > { %6647 = vmatpush1.bf16.msra.mxu1 %v18795_v28  ;;  %v18864_v28 = vld [vmem:[#allocation3 + $0x1620] ss:$8 sps:$4 sm:$0xff]  }
 0x8cc   : > { %6648 = vmatprep.subr.bf16.mxu1 %v18800_v29  ;;  %v18869_v29 = vld [vmem:[#allocation3 + $0x1634] ss:$8 sps:$4 sm:$0xff]  }
 0x8cf   : > { %6649 = vmatpush1.bf16.msra.mxu1 %v18798_v56  ;;  %v6719_v56 = vpack.c.bf16 %v6713_v54, %v6713_v54  ;;  %v18911_v54 = vld [vmem:[#allocation3 + $0x1714] ss:$8 sps:$4 sm:$0xff]  }
 0x8d0   : > { %6650 = vmatprep.subr.bf16.mxu1 %v18803_v9  ;;  %v6710_v9 = vld [vmem:[#allocation2] sm:$0xfc] }
 0x8d3   : > { %6651 = vmatpush1.bf16.msra.mxu1 %v18801_v10  ;;  %v18867_v10 = vld [vmem:[#allocation3 + $0x1630] ss:$8 sps:$4 sm:$0xff]  }
 0x8d4   : > { %6652 = vmatprep.subr.bf16.mxu1 %v18806_v12  ;;  %v6716_v12 = vpack.c.bf16 %v20669_v1, %v6710_v9  ;;  %v18917_v9 = vld [vmem:[#allocation3 + $0x1734] ss:$8 sps:$4 sm:$0xff]  }
 0x8d7   : > { %6653 = vmatpush1.bf16.msra.mxu1 %v18804_v14  ;;  %v18872_v14 = vld [vmem:[#allocation3 + $0x1644] ss:$8 sps:$4 sm:$0xff]  }
 0x8d8   : > { %6654 = vmatprep.subr.bf16.mxu1 %v18809_v36  ;;  %v6770_v36 = vrot.slane %v6719_v56, 1  ;;  %v18912_v56 = vld [vmem:[#allocation3 + $0x1720] ss:$8 sps:$4 sm:$0xff]  }
 0x8db   : > { %6655 = vmatpush1.bf16.msra.mxu1 %v18807_v15  ;;  %v6769_v15 = vrot.slane %v6716_v12, 1  ;;  %v18920_v12 = vld [vmem:[#allocation3 + $0x1744] ss:$8 sps:$4 sm:$0xff]  }
 0x8dc   : > { %6667 = vmatprep.subr.bf16.mxu1 %v18812_v16  ;;  %v18870_v16 = vld [vmem:[#allocation3 + $0x1640] ss:$8 sps:$4 sm:$0xff]  }
 0x8de   : > { %6657 = vmatmul.mubr.bf16.vlgmr.msra.gmra.mrb[8].mxu1 %v5997_v19  ;;  %v6771_v19 = vsel %vm1036_vm3, %v6769_v15, %v6770_v36  ;;  %v18918_v36 = vld [vmem:[#allocation3 + $0x1740] ss:$8 sps:$4 sm:$0xff]   ;;  %v18923_v15 = vld [vmem:[#allocation3 + $0x1754] ss:$8 sps:$4 sm:$0xff]  }
 0x8df   : > { %6668 = vmatpush1.bf16.msra.mxu1 %v18810_v46  ;;  %6699 = vmatprep.mubr.bf16.mxu1 %v20306_v0  ;;  %v18875_v46 = vld [vmem:[#allocation3 + $0x1654] ss:$8 sps:$4 sm:$0xff]  }
 0x8e0   : > { %6669 = vmatprep.subr.bf16.mxu1 %v18815_v20  ;;  %v7074_v20 = vld [vmem:[#allocation2 + $0x8] sm:$0xf8] }
 0x8e1   : > { %v7080_v27 = vpack.c.bf16 %v20664_v60, %v7074_v20  ;;  %v18926_v20 = vld [vmem:[#allocation3 + $0x1764] ss:$8 sps:$4 sm:$0xff]  }
 0x8e3   : > { %6670 = vmatpush1.bf16.msra.mxu1 %v18813_v22  ;;  %v7083_v22 = vpack.c.bf16 %v7077_v17, %v7077_v17  ;;  %v7144_v34 = vshrl.u32 %v7080_v27, 16  ;;  %v7147_v43 = vshll.u32 %v7080_v27, 16  ;;  %v7073_v17 = vld [vmem:[#allocation2] sm:$0xf8] }
 0x8e4   : > { %6671 = vmatprep.subr.bf16.mxu1 %v18818_v23  ;;  %v18873_v23 = vld [vmem:[#allocation3 + $0x1650] ss:$8 sps:$4 sm:$0xff]  }
 0x8e5   : > { %v7152_v31 = vshrl.u32 %v7083_v22, 16  ;;  %v7155_v4 = vshll.u32 %v7083_v22, 16 }
 0x8e7   : > { %6672 = vmatpush1.bf16.msra.mxu1 %v18816_v26  ;;  %v18878_v26 = vld [vmem:[#allocation3 + $0x1664] ss:$8 sps:$4 sm:$0xff]   ;;  %v7157_v13 = vrot.slane %v7155_v4, 2 }
 0x8e8   : > { %6673 = vmatprep.subr.bf16.mxu1 %v18821_v30  ;;  %v6715_v30 = vld [vmem:[#allocation2 + $0x40] sm:$0x3] }
 0x8e9   : > { %v6721_v11 = vpack.c.bf16 %v6715_v30, %v6715_v30 }
 0x8eb   : > { %6674 = vmatpush1.bf16.msra.mxu1 %v18819_v32  ;;  %v18876_v32 = vld [vmem:[#allocation3 + $0x1660] ss:$8 sps:$4 sm:$0xff]  }
 0x8ec   : > { %6983 = vmatprep.subr.bf16.mxu1 %v18824_v33  ;;  %v18881_v33 = vld [vmem:[#allocation3 + $0x1674] ss:$8 sps:$4 sm:$0xff]  }
 0x8ee   : > { %16437 = vmatmul.mubr.msk.bf16.vlgmr.msra.gmra.mrb[8].mxu1 %vm249_vm0, %v5999_v25  ;;  %v7154_v25 = vrot.slane %v7152_v31, 1  ;;  %v18929_v31 = vld [vmem:[#allocation3 + $0x1774] ss:$8 sps:$4 sm:$0xff]  }
 0x8ef   : > { %6984 = vmatpush1.bf16.msra.mxu1 %v18822_v6  ;;  %7015 = vmatprep.mubr.bf16.mxu1 %v6774_v37  ;;  %v6712_v6 = vld [vmem:[#allocation2 + $0x10] sm:$0xfc] }
 0x8f0   : > { %6985 = vmatprep.subr.bf16.mxu1 %v18827_v35  ;;  %v18879_v35 = vld [vmem:[#allocation3 + $0x1670] ss:$8 sps:$4 sm:$0xff]   ;;  %v6718_v37 = vpack.c.bf16 %v20673_v24, %v6712_v6 }
 0x8f3   : > { %6986 = vmatpush1.bf16.msra.mxu1 %v18825_v38  ;;  %v18884_v38 = vld [vmem:[#allocation3 + $0x1684] ss:$8 sps:$4 sm:$0xff]  }
 0x8f4   : > { %6987 = vmatprep.subr.bf16.mxu1 %v18830_v39  ;;  %v7146_v39 = vrot.slane %v7144_v34, 1 }
 0x8f7   : > { %6988 = vmatpush1.bf16.msra.mxu1 %v18828_v40  ;;  %v7149_v40 = vrot.slane %v7147_v43, 2 }
 0x8f8   : > { %6989 = vmatprep.subr.bf16.mxu1 %v18833_v41  ;;  %v6776_v41 = vrot.slane %v6721_v11, 1  ;;  %v18932_v11 = vld [vmem:[#allocation3 + $0x1784] ss:$8 sps:$4 sm:$0xff]  }
 0x8fb   : > { %6990 = vmatpush1.bf16.msra.mxu1 %v18831_v42  ;;  %v7158_v42 = vor.u32 %v7157_v13, %v7154_v25  ;;  %v7078_v25 = vld [vmem:[#allocation2 + $0x40] sm:$0x7] }
 0x8fc   : > { %6991 = vmatprep.subr.bf16.mxu1 %v18836_v44  ;;  %v6775_v44 = vrot.slane %v6718_v37, 1  ;;  %v18935_v37 = vld [vmem:[#allocation3 + $0x1794] ss:$8 sps:$4 sm:$0xff]  }
 0x8ff   : > { %6992 = vmatpush1.bf16.msra.mxu1 %v18834_v45  ;;  %v18882_v45 = vld [vmem:[#allocation3 + $0x1680] ss:$8 sps:$4 sm:$0xff]  }
 0x900   : > { %6993 = vmatprep.subr.bf16.mxu1 %v18839_v53  ;;  %v7150_v53 = vor.u32 %v7149_v40, %v7146_v39  ;;  %v7084_v39 = vpack.c.bf16 %v7078_v25, %v7078_v25  ;;  %v7075_v40 = vld [vmem:[#allocation2 + $0x10] sm:$0xf8] }
 0x901   : > { %v18986_v25 = vld [vmem:[#allocation3 + $0x18a4] ss:$8 sps:$4 sm:$0xff]  }
 0x903   : > { %6994 = vmatpush1.bf16.msra.mxu1 %v18837_v47  ;;  %v18887_v47 = vld [vmem:[#allocation3 + $0x1694] ss:$8 sps:$4 sm:$0xff]  }
 0x904   : > { %6995 = vmatprep.subr.bf16.mxu1 %v18842_v48  ;;  %v6777_v48 = vsel %vm1036_vm3, %v6775_v44, %v6776_v41  ;;  %v18933_v41 = vld [vmem:[#allocation3 + $0x1790] ss:$8 sps:$4 sm:$0xff]   ;;  %v18938_v44 = vld [vmem:[#allocation3 + $0x17a4] ss:$8 sps:$4 sm:$0xff]  }
 0x907   : > { %6996 = vmatpush1.bf16.msra.mxu1 %v18840_v61  ;;  %v7159_v61 = vsel %vm1394_vm4, %v7150_v53, %v7158_v42  ;;  %v7081_v42 = vpack.c.bf16 %v20673_v24, %v7075_v40  ;;  %v7172_v53 = vshll.u32 %v7084_v39, 16  ;;  %v18987_v40 = vld [vmem:[#allocation3 + $0x18b0] ss:$8 sps:$4 sm:$0xff]  }
 0x908   : > { %6997 = vmatprep.subr.bf16.mxu1 %v18845_v49  ;;  %v18885_v49 = vld [vmem:[#allocation3 + $0x1690] ss:$8 sps:$4 sm:$0xff]  }
 0x90b   : > { %6998 = vmatpush1.bf16.msra.mxu1 %v18843_v50  ;;  %v18890_v50 = vld [vmem:[#allocation3 + $0x16a4] ss:$8 sps:$4 sm:$0xff]  }
 0x90c   : > { %6999 = vmatprep.subr.bf16.mxu1 %v18848_v51  ;;  %v18888_v51 = vld [vmem:[#allocation3 + $0x16a0] ss:$8 sps:$4 sm:$0xff]  }
 0x90f   : > { %7000 = vmatpush1.bf16.msra.mxu1 %v18846_v52  ;;  %v18893_v52 = vld [vmem:[#allocation3 + $0x16b4] ss:$8 sps:$4 sm:$0xff]  }
 0x910   : > { %7001 = vmatprep.subr.bf16.mxu1 %v18851_v58  ;;  %v18891_v58 = vld [vmem:[#allocation3 + $0x16b0] ss:$8 sps:$4 sm:$0xff]  }
 0x913   : > { %7002 = vmatpush1.bf16.msra.mxu1 %v18849_v55  ;;  %v18896_v55 = vld [vmem:[#allocation3 + $0x16c4] ss:$8 sps:$4 sm:$0xff]  }
 0x914   : > { %7003 = vmatprep.subr.bf16.mxu1 %v18854_v57  ;;  %v18894_v57 = vld [vmem:[#allocation3 + $0x16c0] ss:$8 sps:$4 sm:$0xff]  }
 0x917   : > { %7004 = vmatpush1.bf16.msra.mxu1 %v18852_v59  ;;  %v18899_v59 = vld [vmem:[#allocation3 + $0x16d4] ss:$8 sps:$4 sm:$0xff]  }
 0x918   : > { %7005 = vmatprep.subr.bf16.mxu1 %v18857_v62  ;;  %v18897_v62 = vld [vmem:[#allocation3 + $0x16d0] ss:$8 sps:$4 sm:$0xff]  }
 0x91b   : > { %7006 = vmatpush1.bf16.msra.mxu1 %v18855_v18  ;;  %v18902_v18 = vld [vmem:[#allocation3 + $0x16e4] ss:$8 sps:$4 sm:$0xff]  }
 0x91c   : > { %7007 = vmatprep.subr.bf16.mxu1 %v18860_v63  ;;  %v18900_v63 = vld [vmem:[#allocation3 + $0x16e0] ss:$8 sps:$4 sm:$0xff]  }
 0x91f   : > { %7008 = vmatpush1.bf16.msra.mxu1 %v18858_v2  ;;  %v18905_v2 = vld [vmem:[#allocation3 + $0x16f4] ss:$8 sps:$4 sm:$0xff]  }
 0x920   : > { %7009 = vmatprep.subr.bf16.mxu1 %v18863_v21  ;;  %v18903_v21 = vld [vmem:[#allocation3 + $0x16f0] ss:$8 sps:$4 sm:$0xff]  }
 0x923   : > { %7010 = vmatpush1.bf16.msra.mxu1 %v18861_v3  ;;  %v18908_v3 = vld [vmem:[#allocation3 + $0x1704] ss:$8 sps:$4 sm:$0xff]  }
 0x924   : > { %7011 = vmatprep.subr.bf16.mxu1 %v18866_v5  ;;  %v18906_v5 = vld [vmem:[#allocation3 + $0x1700] ss:$8 sps:$4 sm:$0xff]  }
 0x927   : > { %7012 = vmatpush1.bf16.msra.mxu1 %v18864_v28  ;;  %v18909_v28 = vld [vmem:[#allocation3 + $0x1710] ss:$8 sps:$4 sm:$0xff]  }
 0x928   : > { %7013 = vmatprep.subr.bf16.mxu1 %v18869_v29  ;;  %v18914_v29 = vld [vmem:[#allocation3 + $0x1724] ss:$8 sps:$4 sm:$0xff]  }
 0x92b   : > { %7014 = vmatpush1.bf16.msra.mxu1 %v18867_v10  ;;  %v18915_v10 = vld [vmem:[#allocation3 + $0x1730] ss:$8 sps:$4 sm:$0xff]  }
 0x92c   : > { %7026 = vmatprep.subr.bf16.mxu1 %v18872_v14  ;;  %v7076_v14 = vld [vmem:[#allocation2 + $0x30] sm:$0x7] }
 0x92e   : > { %7016 = vmatmul.mubr.bf16.vlgmr.msra.gmra.mrb[8].mxu1 %v6771_v19  ;;  %v7079_v19 = vpack.c.bf16 %v20669_v1, %v7073_v17  ;;  %v18957_v17 = vld [vmem:[#allocation3 + $0x1810] ss:$8 sps:$4 sm:$0xff]  }
 0x92f   : > { %7027 = vmatpush1.bf16.msra.mxu1 %v18870_v16  ;;  %7058 = vmatprep.mubr.bf16.mxu1 %v20306_v0  ;;  %v7082_v16 = vpack.c.bf16 %v7076_v14, %v7076_v14  ;;  %v18951_v14 = vld [vmem:[#allocation3 + $0x17f0] ss:$8 sps:$4 sm:$0xff]  }
 0x930   : > { %7028 = vmatprep.subr.bf16.mxu1 %v18875_v46  ;;  %v18921_v46 = vld [vmem:[#allocation3 + $0x1750] ss:$8 sps:$4 sm:$0xff]   ;;  %v7127_v27 = vshrl.u32 %v7079_v19, 16  ;;  %v7130_v30 = vshll.u32 %v7079_v19, 16  ;;  %v18960_v19 = vld [vmem:[#allocation3 + $0x1820] ss:$8 sps:$4 sm:$0xff]  }
 0x931   : > { %v7135_v22 = vshrl.u32 %v7082_v16, 16 }
 0x932   : > { %v7129_v34 = vrot.slane %v7127_v27, 1  ;;  %v7132_v43 = vrot.slane %v7130_v30, 2  ;;  %v18971_v27 = vld [vmem:[#allocation3 + $0x1854] ss:$8 sps:$4 sm:$0xff]   ;;  %v18969_v30 = vld [vmem:[#allocation3 + $0x1850] ss:$8 sps:$4 sm:$0xff]  }
 0x933   : > { %7029 = vmatpush1.bf16.msra.mxu1 %v18873_v23  ;;  %v7138_v23 = vshll.u32 %v7082_v16, 16  ;;  %v7137_v4 = vrot.slane %v7135_v22, 1  ;;  %v18959_v16 = vld [vmem:[#allocation3 + $0x1814] ss:$8 sps:$4 sm:$0xff]   ;;  %v18963_v22 = vld [vmem:[#allocation3 + $0x1830] ss:$8 sps:$4 sm:$0xff]  }
 0x934   : > { %7030 = vmatprep.subr.bf16.mxu1 %v18878_v26  ;;  %v18924_v26 = vld [vmem:[#allocation3 + $0x1760] ss:$8 sps:$4 sm:$0xff]   ;;  %v7133_v13 = vor.u32 %v7132_v43, %v7129_v34  ;;  %v18980_v34 = vld [vmem:[#allocation3 + $0x1884] ss:$8 sps:$4 sm:$0xff]  }
 0x935   : > { %v18978_v43 = vld [vmem:[#allocation3 + $0x1880] ss:$8 sps:$4 sm:$0xff]  }
 0x937   : > { %7031 = vmatpush1.bf16.msra.mxu1 %v18876_v32  ;;  %v7140_v32 = vrot.slane %v7138_v23, 2  ;;  %v18968_v23 = vld [vmem:[#allocation3 + $0x1844] ss:$8 sps:$4 sm:$0xff]  }
 0x938   : > { %7032 = vmatprep.subr.bf16.mxu1 %v18881_v33  ;;  %v18927_v33 = vld [vmem:[#allocation3 + $0x1770] ss:$8 sps:$4 sm:$0xff]  }
 0x939   : > { %v7141_v6 = vor.u32 %v7140_v32, %v7137_v4  ;;  %v18972_v4 = vld [vmem:[#allocation3 + $0x1860] ss:$8 sps:$4 sm:$0xff]   ;;  %v18977_v32 = vld [vmem:[#allocation3 + $0x1874] ss:$8 sps:$4 sm:$0xff]  }
 0x93b   : > { %7033 = vmatpush1.bf16.msra.mxu1 %v18879_v35  ;;  %v18930_v35 = vld [vmem:[#allocation3 + $0x1780] ss:$8 sps:$4 sm:$0xff]  }
 0x93c   : > { %7382 = vmatprep.subr.bf16.mxu1 %v18884_v38  ;;  %v7142_v38 = vsel %vm1394_vm4, %v7133_v13, %v7141_v6  ;;  %v18981_v6 = vld [vmem:[#allocation3 + $0x1890] ss:$8 sps:$4 sm:$0xff]   ;;  %v7475_v13 = vld [vmem:[#allocation2 + $0x30] sm:$0xf] }
 0x93e   : > { %16478 = vmatmul.mubr.msk.bf16.vlgmr.msra.gmra.mrb[8].mxu1 %vm249_vm0, %v6777_v48  ;;  %v7161_v48 = vshrl.u32 %v7081_v42, 16 }
 0x93f   : > { %7383 = vmatpush1.bf16.msra.mxu1 %v18882_v45  ;;  %7414 = vmatprep.mubr.bf16.mxu1 %v7159_v61  ;;  %v7169_v45 = vshrl.u32 %v7084_v39, 16  ;;  %v7164_v61 = vshll.u32 %v7081_v42, 16  ;;  %v7472_v39 = vld [vmem:[#allocation2] sm:$0xf0]  ;;  %v18992_v42 = vld [vmem:[#allocation3 + $0x18c4] ss:$8 sps:$4 sm:$0xff]  }
 0x940   : > { %7384 = vmatprep.subr.bf16.mxu1 %v18887_v47  ;;  %v18936_v47 = vld [vmem:[#allocation3 + $0x17a0] ss:$8 sps:$4 sm:$0xff]  }
 0x943   : > { %7385 = vmatpush1.bf16.msra.mxu1 %v18885_v49  ;;  %v7476_v49 = vld [vmem:[#allocation2 + $0x38] sm:$0xf] }
 0x944   : > { %7386 = vmatprep.subr.bf16.mxu1 %v18890_v50  ;;  %v18941_v50 = vld [vmem:[#allocation3 + $0x17b4] ss:$8 sps:$4 sm:$0xff]  }
 0x947   : > { %7387 = vmatpush1.bf16.msra.mxu1 %v18888_v51  ;;  %v7171_v51 = vrot.slane %v7169_v45, 1 }
 0x948   : > { %7388 = vmatprep.subr.bf16.mxu1 %v18893_v52  ;;  %v7174_v52 = vrot.slane %v7172_v53, 2  ;;  %v18990_v53 = vld [vmem:[#allocation3 + $0x18c0] ss:$8 sps:$4 sm:$0xff]  }
 0x94b   : > { %7389 = vmatpush1.bf16.msra.mxu1 %v18891_v58  ;;  %v7473_v58 = vld [vmem:[#allocation2 + $0x8] sm:$0xf0] }
 0x94c   : > { %7390 = vmatprep.subr.bf16.mxu1 %v18896_v55  ;;  %v7482_v55 = vpack.c.bf16 %v7476_v49, %v7476_v49  ;;  %v18998_v49 = vld [vmem:[#allocation3 + $0x18e4] ss:$8 sps:$4 sm:$0xff]  }
 0x94f   : > { %7391 = vmatpush1.bf16.msra.mxu1 %v18894_v57  ;;  %v18939_v57 = vld [vmem:[#allocation3 + $0x17b0] ss:$8 sps:$4 sm:$0xff]  }
 0x950   : > { %7392 = vmatprep.subr.bf16.mxu1 %v18899_v59  ;;  %v7163_v59 = vrot.slane %v7161_v48, 1 }
 0x953   : > { %7393 = vmatpush1.bf16.msra.mxu1 %v18897_v62  ;;  %v7166_v62 = vrot.slane %v7164_v61, 2  ;;  %v18993_v61 = vld [vmem:[#allocation3 + $0x18d0] ss:$8 sps:$4 sm:$0xff]  }
 0x954   : > { %7394 = vmatprep.subr.bf16.mxu1 %v18902_v18  ;;  %v18944_v18 = vld [vmem:[#allocation3 + $0x17c4] ss:$8 sps:$4 sm:$0xff]  }
 0x957   : > { %7395 = vmatpush1.bf16.msra.mxu1 %v18900_v63  ;;  %v7479_v63 = vpack.c.bf16 %v20664_v60, %v7473_v58  ;;  %v18948_v60 = vld [vmem:[#allocation3 + $0x17e0] ss:$8 sps:$4 sm:$0xff]   ;;  %v7474_v58 = vld [vmem:[#allocation2 + $0x10] sm:$0xf0] }
 0x958   : > { %7396 = vmatprep.subr.bf16.mxu1 %v18905_v2  ;;  %v7175_v2 = vor.u32 %v7174_v52, %v7171_v51  ;;  %v19001_v51 = vld [vmem:[#allocation3 + $0x18f4] ss:$8 sps:$4 sm:$0xff]  }
 0x95b   : > { %7397 = vmatpush1.bf16.msra.mxu1 %v18903_v21  ;;  %v7535_v21 = vrot.slane %v7482_v55, 2  ;;  %v18999_v55 = vld [vmem:[#allocation3 + $0x18f0] ss:$8 sps:$4 sm:$0xff]  }
 0x95c   : > { %7398 = vmatprep.subr.bf16.mxu1 %v18908_v3  ;;  %v7167_v3 = vor.u32 %v7166_v62, %v7163_v59 }
 0x95f   : > { %7399 = vmatpush1.bf16.msra.mxu1 %v18906_v5  ;;  %v18942_v5 = vld [vmem:[#allocation3 + $0x17c0] ss:$8 sps:$4 sm:$0xff]  }
 0x960   : > { %7400 = vmatprep.subr.bf16.mxu1 %v18911_v54  ;;  %v7534_v54 = vrot.slane %v7479_v63, 2  ;;  %v19002_v63 = vld [vmem:[#allocation3 + $0x1a40] ss:$8 sps:$4 sm:$0xff]  }
 0x963   : > { %7401 = vmatpush1.bf16.msra.mxu1 %v18909_v28  ;;  %v18947_v28 = vld [vmem:[#allocation3 + $0x17d4] ss:$8 sps:$4 sm:$0xff]  }
 0x964   : > { %7402 = vmatprep.subr.bf16.mxu1 %v18914_v29  ;;  %v7176_v29 = vsel %vm1394_vm4, %v7167_v3, %v7175_v2  ;;  %v19004_v2 = vld [vmem:[#allocation3 + $0x1a44] ss:$8 sps:$4 sm:$0xff]   ;;  %v19005_v3 = vld [vmem:[#allocation3 + $0x1a50] ss:$8 sps:$4 sm:$0xff]  }
 0x965   : > { %8243 = vmatprep.subr.bf16.mxu0 %v19004_v2 }
 0x966   : > { %8244 = vmatpush1.bf16.msra.mxu0 %v19002_v63 }
 0x967   : > { %7403 = vmatpush1.bf16.msra.mxu1 %v18912_v56  ;;  %v7536_v56 = vsel %vm1800_vm5, %v7534_v54, %v7535_v21  ;;  %v19007_v21 = vld [vmem:[#allocation3 + $0x1a54] ss:$8 sps:$4 sm:$0xff]   ;;  %v19008_v54 = vld [vmem:[#allocation3 + $0x1a60] ss:$8 sps:$4 sm:$0xff]  }
 0x968   : > { %7404 = vmatprep.subr.bf16.mxu1 %v18917_v9  ;;  %v18945_v9 = vld [vmem:[#allocation3 + $0x17d0] ss:$8 sps:$4 sm:$0xff]   ;;  %8245 = vmatprep.subr.bf16.mxu0 %v19007_v21 }
 0x96a   : > { %8246 = vmatpush1.bf16.msra.mxu0 %v19005_v3 }
 0x96b   : > { %7405 = vmatpush1.bf16.msra.mxu1 %v18915_v10  ;;  %v18950_v10 = vld [vmem:[#allocation3 + $0x17e4] ss:$8 sps:$4 sm:$0xff]  }
 0x96c   : > { %7406 = vmatprep.subr.bf16.mxu1 %v18920_v12  ;;  %v18953_v12 = vld [vmem:[#allocation3 + $0x17f4] ss:$8 sps:$4 sm:$0xff]  }
 0x96f   : > { %7407 = vmatpush1.bf16.msra.mxu1 %v18918_v36  ;;  %v18956_v36 = vld [vmem:[#allocation3 + $0x1804] ss:$8 sps:$4 sm:$0xff]  }
 0x970   : > { %7408 = vmatprep.subr.bf16.mxu1 %v18923_v15  ;;  %v18954_v15 = vld [vmem:[#allocation3 + $0x1800] ss:$8 sps:$4 sm:$0xff]  }
 0x973   : > { %7409 = vmatpush1.bf16.msra.mxu1 %v18921_v46  ;;  %v18962_v46 = vld [vmem:[#allocation3 + $0x1824] ss:$8 sps:$4 sm:$0xff]  }
 0x974   : > { %7410 = vmatprep.subr.bf16.mxu1 %v18926_v20  ;;  %v18965_v20 = vld [vmem:[#allocation3 + $0x1834] ss:$8 sps:$4 sm:$0xff]  }
 0x977   : > { %7411 = vmatpush1.bf16.msra.mxu1 %v18924_v26  ;;  %v18966_v26 = vld [vmem:[#allocation3 + $0x1840] ss:$8 sps:$4 sm:$0xff]  }
 0x978   : > { %7412 = vmatprep.subr.bf16.mxu1 %v18929_v31  ;;  %v18974_v31 = vld [vmem:[#allocation3 + $0x1864] ss:$8 sps:$4 sm:$0xff]  }
 0x97b   : > { %7413 = vmatpush1.bf16.msra.mxu1 %v18927_v33  ;;  %v18975_v33 = vld [vmem:[#allocation3 + $0x1870] ss:$8 sps:$4 sm:$0xff]  }
 0x97c   : > { %7425 = vmatprep.subr.bf16.mxu1 %v18932_v11  ;;  %v18983_v11 = vld [vmem:[#allocation3 + $0x1894] ss:$8 sps:$4 sm:$0xff]  }
 0x97e   : > { %7415 = vmatmul.mubr.bf16.vlgmr.msra.gmra.mrb[8].mxu1 %v7142_v38  ;;  %v7481_v38 = vpack.c.bf16 %v7475_v13, %v7475_v13 }
 0x97f   : > { %7426 = vmatpush1.bf16.msra.mxu1 %v18930_v35  ;;  %7457 = vmatprep.mubr.bf16.mxu1 %v20306_v0  ;;  %v18984_v35 = vld [vmem:[#allocation3 + $0x18a0] ss:$8 sps:$4 sm:$0xff]  }
 0x980   : > { %7427 = vmatprep.subr.bf16.mxu1 %v18935_v37  ;;  %v18989_v37 = vld [vmem:[#allocation3 + $0x18b4] ss:$8 sps:$4 sm:$0xff]  }
 0x983   : > { %7428 = vmatpush1.bf16.msra.mxu1 %v18933_v41  ;;  %v7478_v41 = vpack.c.bf16 %v20669_v1, %v7472_v39  ;;  %v18996_v1 = vld [vmem:[#allocation3 + $0x18e0] ss:$8 sps:$4 sm:$0xff]  }
 0x984   : > { %7429 = vmatprep.subr.bf16.mxu1 %v18938_v44  ;;  %v7532_v44 = vrot.slane %v7481_v38, 2 }
 0x985   : > { %v7531_v45 = vrot.slane %v7478_v41, 2 }
 0x987   : > { %7430 = vmatpush1.bf16.msra.mxu1 %v18936_v47  ;;  %v18995_v47 = vld [vmem:[#allocation3 + $0x18d4] ss:$8 sps:$4 sm:$0xff]   ;;  %v7533_v48 = vsel %vm1800_vm5, %v7531_v45, %v7532_v44  ;;  %v19041_v45 = vld [vmem:[#allocation3 + $0x1b10] ss:$8 sps:$4 sm:$0xff]  }
 0x988   : > { %7431 = vmatprep.subr.bf16.mxu1 %v18941_v50  ;;  %v7477_v50 = vld [vmem:[#allocation2 + $0x40] sm:$0xf] }
 0x989   : > { %v7483_v52 = vpack.c.bf16 %v7477_v50, %v7477_v50  ;;  %v19049_v50 = vld [vmem:[#allocation3 + $0x1b34] ss:$8 sps:$4 sm:$0xff]  }
 0x98b   : > { %7432 = vmatpush1.bf16.msra.mxu1 %v18939_v57  ;;  %v7480_v57 = vpack.c.bf16 %v20673_v24, %v7474_v58  ;;  %v7538_v59 = vrot.slane %v7483_v52, 2  ;;  %v19013_v24 = vld [vmem:[#allocation3 + $0x1a74] ss:$8 sps:$4 sm:$0xff]  }
 0x98c   : > { %7745 = vmatprep.subr.bf16.mxu1 %v18944_v18 }
 0x98d   : > { %v7537_v62 = vrot.slane %v7480_v57, 2 }
 0x98e   : > { %16519 = vmatmul.mubr.msk.bf16.vlgmr.msra.gmra.mrb[8].mxu1 %vm249_vm0, %v7176_v29  ;;  %v19016_v29 = vld [vmem:[#allocation3 + $0x1a84] ss:$8 sps:$4 sm:$0xff]  }
 0x98f   : > { %7746 = vmatpush1.bf16.msra.mxu1 %v18942_v5  ;;  %7777 = vmatprep.mubr.bf16.mxu1 %v7536_v56  ;;  %v7539_v18 = vsel %vm1800_vm5, %v7537_v62, %v7538_v59  ;;  %v19010_v5 = vld [vmem:[#allocation3 + $0x1a64] ss:$8 sps:$4 sm:$0xff]   ;;  %v19014_v56 = vld [vmem:[#allocation3 + $0x1a80] ss:$8 sps:$4 sm:$0xff]  }
 0x990   : > { %7747 = vmatprep.subr.bf16.mxu1 %v18947_v28  ;;  %8247 = vmatprep.subr.bf16.mxu0 %v19010_v5  ;;  %v19011_v28 = vld [vmem:[#allocation3 + $0x1a70] ss:$8 sps:$4 sm:$0xff]  }
 0x991   : > { %8248 = vmatpush1.bf16.msra.mxu0 %v19008_v54 }
 0x992   : > { %8249 = vmatprep.subr.bf16.mxu0 %v19013_v24 }
 0x993   : > { %7748 = vmatpush1.bf16.msra.mxu1 %v18945_v9  ;;  %v19019_v9 = vld [vmem:[#allocation3 + $0x1a94] ss:$8 sps:$4 sm:$0xff]  }
 0x994   : > { %7749 = vmatprep.subr.bf16.mxu1 %v18950_v10  ;;  %v19017_v10 = vld [vmem:[#allocation3 + $0x1a90] ss:$8 sps:$4 sm:$0xff]  }
 0x995   : > { %8250 = vmatpush1.bf16.msra.mxu0 %v19011_v28 }
 0x996   : > { %8251 = vmatprep.subr.bf16.mxu0 %v19016_v29 }
 0x997   : > { %7750 = vmatpush1.bf16.msra.mxu1 %v18948_v60  ;;  %v19022_v60 = vld [vmem:[#allocation3 + $0x1aa4] ss:$8 sps:$4 sm:$0xff]  }
 0x998   : > { %7751 = vmatprep.subr.bf16.mxu1 %v18953_v12  ;;  %v19020_v12 = vld [vmem:[#allocation3 + $0x1aa0] ss:$8 sps:$4 sm:$0xff]  }
 0x999   : > { %8252 = vmatpush1.bf16.msra.mxu0 %v19014_v56 }
 0x99a   : > { %8253 = vmatprep.subr.bf16.mxu0 %v19019_v9 }
 0x99b   : > { %7752 = vmatpush1.bf16.msra.mxu1 %v18951_v14  ;;  %v19025_v14 = vld [vmem:[#allocation3 + $0x1ab4] ss:$8 sps:$4 sm:$0xff]  }
 0x99c   : > { %7753 = vmatprep.subr.bf16.mxu1 %v18956_v36  ;;  %v19023_v36 = vld [vmem:[#allocation3 + $0x1ab0] ss:$8 sps:$4 sm:$0xff]  }
 0x99d   : > { %8254 = vmatpush1.bf16.msra.mxu0 %v19017_v10 }
 0x99e   : > { %8255 = vmatprep.subr.bf16.mxu0 %v19022_v60 }
 0x99f   : > { %7754 = vmatpush1.bf16.msra.mxu1 %v18954_v15  ;;  %v19028_v15 = vld [vmem:[#allocation3 + $0x1ac4] ss:$8 sps:$4 sm:$0xff]  }
 0x9a0   : > { %7755 = vmatprep.subr.bf16.mxu1 %v18959_v16  ;;  %v19026_v16 = vld [vmem:[#allocation3 + $0x1ac0] ss:$8 sps:$4 sm:$0xff]  }
 0x9a1   : > { %8256 = vmatpush1.bf16.msra.mxu0 %v19020_v12 }
 0x9a2   : > { %8257 = vmatprep.subr.bf16.mxu0 %v19025_v14 }
 0x9a3   : > { %7756 = vmatpush1.bf16.msra.mxu1 %v18957_v17  ;;  %v19031_v17 = vld [vmem:[#allocation3 + $0x1ad4] ss:$8 sps:$4 sm:$0xff]  }
 0x9a4   : > { %7757 = vmatprep.subr.bf16.mxu1 %v18962_v46  ;;  %v19029_v46 = vld [vmem:[#allocation3 + $0x1ad0] ss:$8 sps:$4 sm:$0xff]  }
 0x9a5   : > { %8258 = vmatpush1.bf16.msra.mxu0 %v19023_v36 }
 0x9a6   : > { %8259 = vmatprep.subr.bf16.mxu0 %v19028_v15 }
 0x9a7   : > { %7758 = vmatpush1.bf16.msra.mxu1 %v18960_v19  ;;  %v16561_v19 = vld [vmem:[%s21138_s2 + $0x6] sm:$0x3] }
 0x9a8   : > { %7759 = vmatprep.subr.bf16.mxu1 %v18965_v20  ;;  %v19032_v20 = vld [vmem:[#allocation3 + $0x1ae0] ss:$8 sps:$4 sm:$0xff]  }
 0x9a9   : > { %8260 = vmatpush1.bf16.msra.mxu0 %v19026_v16 }
 0x9aa   : > { %8261 = vmatprep.subr.bf16.mxu0 %v19031_v17 }
 0x9ab   : > { %7760 = vmatpush1.bf16.msra.mxu1 %v18963_v22  ;;  %v19034_v22 = vld [vmem:[#allocation3 + $0x1ae4] ss:$8 sps:$4 sm:$0xff]  }
 0x9ac   : > { %7761 = vmatprep.subr.bf16.mxu1 %v18968_v23  ;;  %v7841_v23 = vrot.slane %v16561_v19, %v20509_v7 }
 0x9ad   : > { %8262 = vmatpush1.bf16.msra.mxu0 %v19029_v46 }
 0x9ae   : > { %8263 = vmatprep.subr.bf16.mxu0 %v19034_v22  ;;  %v19050_v22 = vld [vmem:[#allocation3 + $0x1b40] ss:$8 sps:$4 sm:$0xff]  }
 0x9af   : > { %7762 = vmatpush1.bf16.msra.mxu1 %v18966_v26  ;;  %v7845_v26 = vrot.slane %v16561_v19, %v20511_v8 }
 0x9b0   : > { %7763 = vmatprep.subr.bf16.mxu1 %v18971_v27  ;;  %v19035_v27 = vld [vmem:[#allocation3 + $0x1af0] ss:$8 sps:$4 sm:$0xff]  }
 0x9b1   : > { %8264 = vmatpush1.bf16.msra.mxu0 %v19032_v20 }
 0x9b3   : > { %7764 = vmatpush1.bf16.msra.mxu1 %v18969_v30  ;;  %v19037_v30 = vld [vmem:[#allocation3 + $0x1af4] ss:$8 sps:$4 sm:$0xff]  }
 0x9b4   : > { %7765 = vmatprep.subr.bf16.mxu1 %v18974_v31  ;;  %8265 = vmatprep.subr.bf16.mxu0 %v19037_v30 }
 0x9b5   : > { %8266 = vmatpush1.bf16.msra.mxu0 %v19035_v27  ;;  %v19055_v27 = vld [vmem:[#allocation3 + $0x1b54] ss:$8 sps:$4 sm:$0xff]  }
 0x9b7   : > { %7766 = vmatpush1.bf16.msra.mxu1 %v18972_v4 }
 0x9b8   : > { %7767 = vmatprep.subr.bf16.mxu1 %v18977_v32 }
 0x9bb   : > { %7768 = vmatpush1.bf16.msra.mxu1 %v18975_v33 }
 0x9bc   : > { %7769 = vmatprep.subr.bf16.mxu1 %v18980_v34 }
 0x9bf   : > { %7770 = vmatpush1.bf16.msra.mxu1 %v18978_v43 }
 0x9c0   : > { %7771 = vmatprep.subr.bf16.mxu1 %v18983_v11 }
 0x9c3   : > { %7772 = vmatpush1.bf16.msra.mxu1 %v18981_v6 }
 0x9c4   : > { %7773 = vmatprep.subr.bf16.mxu1 %v18986_v25 }
 0x9c7   : > { %7774 = vmatpush1.bf16.msra.mxu1 %v18984_v35  ;;  %v19038_v35 = vld [vmem:[#allocation3 + $0x1b00] ss:$8 sps:$4 sm:$0xff]  }
 0x9c8   : > { %7775 = vmatprep.subr.bf16.mxu1 %v18989_v37  ;;  %v19040_v37 = vld [vmem:[#allocation3 + $0x1b04] ss:$8 sps:$4 sm:$0xff]  }
 0x9c9   : > { %8267 = vmatprep.subr.bf16.mxu0 %v19040_v37  ;;  %v19059_v37 = vld [vmem:[#allocation3 + $0x1b70] ss:$8 sps:$4 sm:$0xff]  }
 0x9ca   : > { %8268 = vmatpush1.bf16.msra.mxu0 %v19038_v35 }
 0x9cb   : > { %7776 = vmatpush1.bf16.msra.mxu1 %v18987_v40  ;;  %v19043_v40 = vld [vmem:[#allocation3 + $0x1b14] ss:$8 sps:$4 sm:$0xff]  }
 0x9cc   : > { %7788 = vmatprep.subr.bf16.mxu1 %v18992_v42  ;;  %8269 = vmatprep.subr.bf16.mxu0 %v19043_v40 }
 0x9ce   : > { %7778 = vmatmul.mubr.bf16.vlgmr.msra.gmra.mrb[8].mxu1 %v7533_v48  ;;  %8270 = vmatpush1.bf16.msra.mxu0 %v19041_v45  ;;  %v19062_v45 = vld [vmem:[#allocation3 + $0x1900] ss:$8 sps:$4 sm:$0xff]  }
 0x9cf   : > { %7789 = vmatpush1.bf16.msra.mxu1 %v18990_v53  ;;  %7820 = vmatprep.mubr.bf16.mxu1 %v20306_v0 }
 0x9d0   : > { %7790 = vmatprep.subr.bf16.mxu1 %v18995_v47  ;;  %v19046_v47 = vld [vmem:[#allocation3 + $0x1b24] ss:$8 sps:$4 sm:$0xff]  }
 0x9d1   : > { %8271 = vmatprep.subr.bf16.mxu0 %v19046_v47 }
 0x9d3   : > { %7791 = vmatpush1.bf16.msra.mxu1 %v18993_v61 }
 0x9d4   : > { %7792 = vmatprep.subr.bf16.mxu1 %v18998_v49  ;;  %v19044_v49 = vld [vmem:[#allocation3 + $0x1b20] ss:$8 sps:$4 sm:$0xff]  }
 0x9d5   : > { %8272 = vmatpush1.bf16.msra.mxu0 %v19044_v49  ;;  %v19070_v49 = vld [vmem:[#allocation3 + $0x1924] ss:$8 sps:$4 sm:$0xff]  }
 0x9d6   : > { %8273 = vmatprep.subr.bf16.mxu0 %v19049_v50  ;;  %v19068_v50 = vld [vmem:[#allocation3 + $0x1920] ss:$8 sps:$4 sm:$0xff]  }
 0x9d7   : > { %7793 = vmatpush1.bf16.msra.mxu1 %v18996_v1  ;;  %v19047_v1 = vld [vmem:[#allocation3 + $0x1b30] ss:$8 sps:$4 sm:$0xff]  }
 0x9d8   : > { %7794 = vmatprep.subr.bf16.mxu1 %v19001_v51  ;;  %v19052_v51 = vld [vmem:[#allocation3 + $0x1b44] ss:$8 sps:$4 sm:$0xff]  }
 0x9d9   : > { %8274 = vmatpush1.bf16.msra.mxu0 %v19047_v1  ;;  %v19073_v1 = vld [vmem:[#allocation3 + $0x1934] ss:$8 sps:$4 sm:$0xff]  }
 0x9da   : > { %8286 = vmatprep.subr.bf16.mxu0 %v19052_v51  ;;  %v19071_v51 = vld [vmem:[#allocation3 + $0x1930] ss:$8 sps:$4 sm:$0xff]  }
 0x9db   : > { %7795 = vmatpush1.bf16.msra.mxu1 %v18999_v55 }
 0x9de   : > { %16560 = vmatmul.mubr.msk.bf16.vlgmr.msra.gmra.mrb[8].mxu1 %vm249_vm0, %v7539_v18 }
 0xab1   : > { %v7822_v31 = vpop.f32.mrb[8].mxu1 }
 0xab2   : > { %v7848_v4 = vadd.f32 %v7841_v23, %v7822_v31  ;;  %v7824_v32 = vpop.f32.mrb[9].mxu1 }
 0xab3   : > { %v7849_v33 = vadd.f32 %v7845_v26, %v7824_v32  ;;  %v7826_v34 = vpop.f32.mrb[10].mxu1 }
 0xab4   : > { %v7852_v43 = vmax.f32 %v7848_v4, 0.0  ;;  %v7850_v11 = vadd.f32 %v7841_v23, %v7826_v34  ;;  %v7828_v6 = vpop.f32.mrb[11].mxu1 }
 0xab5   : > { %v7853_v25 = vmax.f32 %v7849_v33, 0.0  ;;  %v7851_v13 = vadd.f32 %v7845_v26, %v7828_v6  ;;  %v19053_v33 = vld [vmem:[#allocation3 + $0x1b50] ss:$8 sps:$4 sm:$0xff]   ;;  %v19056_v6 = vld [vmem:[#allocation3 + $0x1b60] ss:$8 sps:$4 sm:$0xff]  }
 0xab6   : > { %v7860_v38 = vrot.slane %v7852_v43, 6  ;;  %v7854_v39 = vmax.f32 %v7850_v11, 0.0  ;;  %v19058_v43 = vld [vmem:[#allocation3 + $0x1b64] ss:$8 sps:$4 sm:$0xff]  }
 0xab7   : > { %v7861_v41 = vrot.slane %v7853_v25, 6  ;;  %v7855_v42 = vmax.f32 %v7851_v13, 0.0  ;;  %v19061_v13 = vld [vmem:[#allocation3 + $0x1b74] ss:$8 sps:$4 sm:$0xff]  }
 0xab8   : > { %v7862_v44 = vrot.slane %v7854_v39, 6  ;;  %7866 = vrot.lane.b32.xlu0 %v7860_v38, %s20307_s12  ;;  %v19064_v39 = vld [vmem:[#allocation3 + $0x1904] ss:$8 sps:$4 sm:$0xff]  }
 0xab9   : > { %v7864_v53 = vrot.slane %v7855_v42, 6  ;;  %7868 = vrot.lane.b32.xlu1 %v7861_v41, %s20307_s12 }
 0xaba   : > { %v7863_v48 = vsel %vm2129_vm6, %v7860_v38, %v7862_v44 }
 0xabb   : > { %v7865_v61 = vsel %vm2129_vm6, %v7861_v41, %v7864_v53 }
 0xabc   : > { %7870 = vrot.lane.b32.xlu0 %v7863_v48, %s20307_s12 }
 0xabd   : > { %7872 = vrot.lane.b32.xlu1 %v7865_v61, %s20307_s12  ;;  %v19065_v61 = vld [vmem:[#allocation3 + $0x1910] ss:$8 sps:$4 sm:$0xff]  }
 0xac0   : > { %7874 = vrot.lane.b32.xlu0 %v7862_v44, %s20307_s12 }
 0xac1   : > { %7876 = vrot.lane.b32.xlu1 %v7864_v53, %s20307_s12  ;;  %v19067_v53 = vld [vmem:[#allocation3 + $0x1914] ss:$8 sps:$4 sm:$0xff]  }
 0xb2a   : > { %v7867_v52 = vpop.permute.xlu0 %7866 }
 0xb2b   : > { %7890 = vst.msk [vmem:[#allocation2] sm:$0xfc] %vm2161_vm7, %v7867_v52  ;;  %v7869_v58 = vpop.permute.xlu1 %7868 }
 0xb2c   : > { %v7878_v55 = vsel %vm2148_vm9, %v7867_v52, %v7869_v58  ;;  %7892 = vst.msk [vmem:[#allocation2 + $0x10] sm:$0xfc] %vm2164_vm10, %v7869_v58  ;;  %v19076_v52 = vld [vmem:[#allocation3 + $0x1944] ss:$8 sps:$4 sm:$0xff]   ;;  %v19074_v58 = vld [vmem:[#allocation3 + $0x1940] ss:$8 sps:$4 sm:$0xff]  }
 0xb2d   : > { %7891 = vst [vmem:[#allocation2 + $0x8] sm:$0xfc] %v7878_v55  ;;  %v19079_v55 = vld [vmem:[#allocation3 + $0x1954] ss:$8 sps:$4 sm:$0xff]  }
 0xb2e   : > { %v7871_v57 = vpop.permute.xlu0 %7870 }
 0xb2f   : > { %7893 = vst.msk [vmem:[#allocation2 + $0x18] sm:$0xff] %vm2166_vm8, %v7871_v57  ;;  %v7873_v59 = vpop.permute.xlu1 %7872 }
 0xb30   : > { %7895 = vst.msk [vmem:[#allocation2 + $0x28] sm:$0xff] %vm2148_vm9, %v7873_v59  ;;  %v20729_v63 = vsel %vm2148_vm9, %v7871_v57, %v7873_v59  ;;  %v19077_v57 = vld [vmem:[#allocation3 + $0x1950] ss:$8 sps:$4 sm:$0xff]   ;;  %v19082_v59 = vld [vmem:[#allocation3 + $0x1964] ss:$8 sps:$4 sm:$0xff]  }
 0xb32   : > { %v7875_v62 = vpop.permute.xlu0 %7874  ;;  %v7949_v54 = vld [vmem:[#allocation2] sm:$0xfe] }
 0xb33   : > { %7896 = vst.msk [vmem:[#allocation2 + $0x30] sm:$0x3] %vm2170_vm11, %v7875_v62  ;;  %v7877_v18 = vpop.permute.xlu1 %7876  ;;  %v7951_v4 = vld [vmem:[#allocation2 + $0x10] sm:$0xfe] }
 0xb34   : > { %v7880_v2 = vsel %vm2148_vm9, %v7875_v62, %v7877_v18  ;;  %7898 = vst.msk [vmem:[#allocation2 + $0x40] sm:$0x3] %vm2173_vm12, %v7877_v18  ;;  %v7950_v21 = vld [vmem:[#allocation2 + $0x8] sm:$0xfe]  ;;  %v19085_v18 = vld [vmem:[#allocation3 + $0x1974] ss:$8 sps:$4 sm:$0xff]  }
 0xb35   : > { %7897 = vst [vmem:[#allocation2 + $0x38] sm:$0x3] %v7880_v2  ;;  %v7956_v3 = vpack.c.bf16 %v20729_v63, %v7950_v21  ;;  %v7900_v42 = vld [vmem:[#allocation2 + $0x8] sm:$0xff]  ;;  %v19083_v2 = vld [vmem:[#allocation3 + $0x1970] ss:$8 sps:$4 sm:$0xff]  }
 0xb36   : > { %v20734_v5 = vld [vmem:[#allocation2 + $0x18] sm:$0xff]  ;;  %v7906_v48 = vpack.c.bf16 %v20729_v63, %v7900_v42  ;;  %v19080_v62 = vld [vmem:[#allocation3 + $0x1960] ss:$8 sps:$4 sm:$0xff]   ;;  %v19088_v21 = vld [vmem:[#allocation3 + $0x1984] ss:$8 sps:$4 sm:$0xff]  }
 0xb37   : > { %v7955_v24 = vpack.c.bf16 %v20734_v5, %v7949_v54  ;;  %v8017_v28 = vshll.u32 %v7956_v3, 16  ;;  %v8015_v15 = vshrl.u32 %v7956_v3, 16  ;;  %v20738_v30 = vld [vmem:[#allocation2 + $0x28] sm:$0xff]  ;;  %v19091_v54 = vld [vmem:[#allocation3 + $0x1994] ss:$8 sps:$4 sm:$0xff]  }
 0xb38   : > { %v7957_v34 = vpack.c.bf16 %v20738_v30, %v7951_v4  ;;  %v19086_v3 = vld [vmem:[#allocation3 + $0x1980] ss:$8 sps:$4 sm:$0xff]   ;;  %v19130_v42 = vld [vmem:[#allocation3 + $0x1ba4] ss:$8 sps:$4 sm:$0xff]  }
 0xb39   : > { %v8005_v56 = vshll.u32 %v7955_v24, 16  ;;  %v8019_v12 = vrot.slane %v8017_v28, 1  ;;  %v8003_v17 = vshrl.u32 %v7955_v24, 16  ;;  %v19089_v24 = vld [vmem:[#allocation3 + $0x1990] ss:$8 sps:$4 sm:$0xff]  }
 0xb3a   : > { %v7952_v29 = vld [vmem:[#allocation2 + $0x30] sm:$0x1]  ;;  %v8029_v25 = vshll.u32 %v7957_v34, 16  ;;  %v8027_v40 = vshrl.u32 %v7957_v34, 16  ;;  %v19094_v28 = vld [vmem:[#allocation3 + $0x19a4] ss:$8 sps:$4 sm:$0xff]  }
 0xb3b   : > { %v7958_v9 = vpack.c.bf16 %v7952_v29, %v7952_v29  ;;  %v8007_v36 = vrot.slane %v8005_v56, 1  ;;  %v8020_v19 = vor.u32 %v8019_v12, %v8015_v15  ;;  %v7954_v32 = vld [vmem:[#allocation2 + $0x40] sm:$0x1]  ;;  %v19092_v29 = vld [vmem:[#allocation3 + $0x19a0] ss:$8 sps:$4 sm:$0xff]  }
 0xb3c   : > { %v7953_v10 = vld [vmem:[#allocation2 + $0x38] sm:$0x1]  ;;  %v7960_v11 = vpack.c.bf16 %v7954_v32, %v7954_v32  ;;  %v8031_v38 = vrot.slane %v8029_v25, 1  ;;  %v19097_v56 = vld [vmem:[#allocation3 + $0x19b4] ss:$8 sps:$4 sm:$0xff]  }
 0xb3d   : > { %v7959_v60 = vpack.c.bf16 %v7953_v10, %v7953_v10  ;;  %v8010_v14 = vshll.u32 %v7958_v9, 16  ;;  %v8008_v23 = vor.u32 %v8007_v36, %v8003_v17  ;;  %v19095_v9 = vld [vmem:[#allocation3 + $0x19b0] ss:$8 sps:$4 sm:$0xff]   ;;  %v19100_v10 = vld [vmem:[#allocation3 + $0x19c4] ss:$8 sps:$4 sm:$0xff]  }
 0xb3e   : > { %v8034_v35 = vshll.u32 %v7960_v11, 16  ;;  %v8032_v44 = vor.u32 %v8031_v38, %v8027_v40  ;;  %v19103_v12 = vld [vmem:[#allocation3 + $0x19d4] ss:$8 sps:$4 sm:$0xff]   ;;  %v19106_v36 = vld [vmem:[#allocation3 + $0x19e4] ss:$8 sps:$4 sm:$0xff]  }
 0xb3f   : > { %v8022_v16 = vshll.u32 %v7959_v60, 16  ;;  %v8012_v46 = vrot.slane %v8010_v14, 1  ;;  %v19098_v60 = vld [vmem:[#allocation3 + $0x19c0] ss:$8 sps:$4 sm:$0xff]   ;;  %v19101_v14 = vld [vmem:[#allocation3 + $0x19d0] ss:$8 sps:$4 sm:$0xff]  }
 0xb40   : > { %v8036_v41 = vrot.slane %v8034_v35, 1  ;;  %v19104_v15 = vld [vmem:[#allocation3 + $0x19e0] ss:$8 sps:$4 sm:$0xff]   ;;  %v19107_v17 = vld [vmem:[#allocation3 + $0x19f0] ss:$8 sps:$4 sm:$0xff]  }
 0xb41   : > { %v8024_v20 = vrot.slane %v8022_v16, 1  ;;  %v8013_v31 = vsel %vm360_vm2, %v8008_v23, %v8012_v46  ;;  %v19109_v16 = vld [vmem:[#allocation3 + $0x19f4] ss:$8 sps:$4 sm:$0xff]   ;;  %v19112_v46 = vld [vmem:[#allocation3 + $0x1a04] ss:$8 sps:$4 sm:$0xff]  }
 0xb42   : > { %v8037_v47 = vsel %vm360_vm2, %v8032_v44, %v8036_v41  ;;  %v19115_v23 = vld [vmem:[#allocation3 + $0x1a14] ss:$8 sps:$4 sm:$0xff]   ;;  %v8622_v4 = vld [vmem:[#allocation2 + $0x38] sm:$0x3]  ;;  %v19124_v11 = vld [vmem:[#allocation3 + $0x1b84] ss:$8 sps:$4 sm:$0xff]  }
 0xb43   : > { %v8025_v26 = vsel %vm360_vm2, %v8020_v19, %v8024_v20  ;;  %v7899_v19 = vld [vmem:[#allocation2] sm:$0xff]  ;;  %v19110_v20 = vld [vmem:[#allocation3 + $0x1a00] ss:$8 sps:$4 sm:$0xff]   ;;  %v8628_v34 = vpack.c.bf16 %v8622_v4, %v8622_v4 }
 0xb44   : > { %8275 = vmatprep.mubr.bf16.mxu0 %v8025_v26  ;;  %v19113_v26 = vld [vmem:[#allocation3 + $0x1a10] ss:$8 sps:$4 sm:$0xff]   ;;  %v19121_v32 = vld [vmem:[#allocation3 + $0x1a34] ss:$8 sps:$4 sm:$0xff]   ;;  %v19122_v35 = vld [vmem:[#allocation3 + $0x1b80] ss:$8 sps:$4 sm:$0xff]  }
 0xb45   : > { %8276 = vmatmul.mubr.bf16.vlgmr.msra.gmra.mrb[12].mxu0 %v8013_v31  ;;  %v19116_v31 = vld [vmem:[#allocation3 + $0x1a20] ss:$8 sps:$4 sm:$0xff]   ;;  %v8681_v25 = vrot.slane %v8628_v34, 1  ;;  %v19125_v41 = vld [vmem:[#allocation3 + $0x1b90] ss:$8 sps:$4 sm:$0xff]  }
 0xb46   : > { %8287 = vmatpush1.bf16.msra.mxu0 %v19050_v22  ;;  %8318 = vmatprep.mubr.bf16.mxu0 %v20306_v0  ;;  %v7905_v22 = vpack.c.bf16 %v20734_v5, %v7899_v19  ;;  %v19128_v44 = vld [vmem:[#allocation3 + $0x1ba0] ss:$8 sps:$4 sm:$0xff]   ;;  %v8985_v19 = vld [vmem:[#allocation2 + $0x38] sm:$0x7] }
 0xb47   : > { %8288 = vmatprep.subr.bf16.mxu0 %v19055_v27  ;;  %v19118_v27 = vld [vmem:[#allocation3 + $0x1a24] ss:$8 sps:$4 sm:$0xff]  }
 0xb4a   : > { %8289 = vmatpush1.bf16.msra.mxu0 %v19053_v33  ;;  %v8619_v33 = vld [vmem:[#allocation2 + $0x8] sm:$0xfc] }
 0xb4b   : > { %8290 = vmatprep.subr.bf16.mxu0 %v19058_v43  ;;  %v19119_v43 = vld [vmem:[#allocation3 + $0x1a30] ss:$8 sps:$4 sm:$0xff]  }
 0xb4e   : > { %8291 = vmatpush1.bf16.msra.mxu0 %v19056_v6  ;;  %v8625_v6 = vpack.c.bf16 %v20729_v63, %v8619_v33 }
 0xb4f   : > { %8292 = vmatprep.subr.bf16.mxu0 %v19061_v13  ;;  %v7901_v13 = vld [vmem:[#allocation2 + $0x10] sm:$0xff] }
 0xb50   : > { %v8680_v38 = vrot.slane %v8625_v6, 1 }
 0xb52   : > { %8293 = vmatpush1.bf16.msra.mxu0 %v19059_v37  ;;  %v7907_v37 = vpack.c.bf16 %v20738_v30, %v7901_v13  ;;  %v8682_v40 = vsel %vm1036_vm3, %v8680_v38, %v8681_v25 }
 0xb53   : > { %8532 = vmatprep.subr.bf16.mxu0 %v19064_v39  ;;  %v19127_v39 = vld [vmem:[#allocation3 + $0x1b94] ss:$8 sps:$4 sm:$0xff]  }
 0xb55   : > { %16602 = vmatmul.mubr.msk.bf16.vlgmr.msra.gmra.mrb[12].mxu0 %vm249_vm0, %v8037_v47  ;;  %v19136_v47 = vld [vmem:[#allocation3 + $0x1bc4] ss:$8 sps:$4 sm:$0xff]  }
 0xb56   : > { %8533 = vmatpush1.bf16.msra.mxu0 %v19062_v45  ;;  %8564 = vmatprep.mubr.bf16.mxu0 %v7906_v48  ;;  %v19133_v45 = vld [vmem:[#allocation3 + $0x1bb4] ss:$8 sps:$4 sm:$0xff]   ;;  %v19134_v48 = vld [vmem:[#allocation3 + $0x1bc0] ss:$8 sps:$4 sm:$0xff]  }
 0xb57   : > { %8534 = vmatprep.subr.bf16.mxu0 %v19067_v53  ;;  %v19131_v53 = vld [vmem:[#allocation3 + $0x1bb0] ss:$8 sps:$4 sm:$0xff]  }
 0xb5a   : > { %8535 = vmatpush1.bf16.msra.mxu0 %v19065_v61  ;;  %v19139_v61 = vld [vmem:[#allocation3 + $0x1bd4] ss:$8 sps:$4 sm:$0xff]  }
 0xb5b   : > { %8536 = vmatprep.subr.bf16.mxu0 %v19070_v49  ;;  %v19137_v49 = vld [vmem:[#allocation3 + $0x1bd0] ss:$8 sps:$4 sm:$0xff]  }
 0xb5e   : > { %8537 = vmatpush1.bf16.msra.mxu0 %v19068_v50  ;;  %v19142_v50 = vld [vmem:[#allocation3 + $0x1be4] ss:$8 sps:$4 sm:$0xff]  }
 0xb5f   : > { %8538 = vmatprep.subr.bf16.mxu0 %v19073_v1  ;;  %v19140_v1 = vld [vmem:[#allocation3 + $0x1be0] ss:$8 sps:$4 sm:$0xff]  }
 0xb62   : > { %8539 = vmatpush1.bf16.msra.mxu0 %v19071_v51  ;;  %v19145_v51 = vld [vmem:[#allocation3 + $0x1bf4] ss:$8 sps:$4 sm:$0xff]  }
 0xb63   : > { %8540 = vmatprep.subr.bf16.mxu0 %v19076_v52  ;;  %v19143_v52 = vld [vmem:[#allocation3 + $0x1bf0] ss:$8 sps:$4 sm:$0xff]  }
 0xb66   : > { %8541 = vmatpush1.bf16.msra.mxu0 %v19074_v58  ;;  %v19148_v58 = vld [vmem:[#allocation3 + $0x1c04] ss:$8 sps:$4 sm:$0xff]  }
 0xb67   : > { %8542 = vmatprep.subr.bf16.mxu0 %v19079_v55  ;;  %v19146_v55 = vld [vmem:[#allocation3 + $0x1c00] ss:$8 sps:$4 sm:$0xff]  }
 0xb6a   : > { %8543 = vmatpush1.bf16.msra.mxu0 %v19077_v57  ;;  %v19151_v57 = vld [vmem:[#allocation3 + $0x1c14] ss:$8 sps:$4 sm:$0xff]  }
 0xb6b   : > { %8544 = vmatprep.subr.bf16.mxu0 %v19082_v59  ;;  %v19149_v59 = vld [vmem:[#allocation3 + $0x1c10] ss:$8 sps:$4 sm:$0xff]  }
 0xb6e   : > { %8545 = vmatpush1.bf16.msra.mxu0 %v19080_v62  ;;  %v19154_v62 = vld [vmem:[#allocation3 + $0x1c24] ss:$8 sps:$4 sm:$0xff]  }
 0xb6f   : > { %8546 = vmatprep.subr.bf16.mxu0 %v19085_v18  ;;  %v19152_v18 = vld [vmem:[#allocation3 + $0x1c20] ss:$8 sps:$4 sm:$0xff]  }
 0xb72   : > { %8547 = vmatpush1.bf16.msra.mxu0 %v19083_v2  ;;  %v19157_v2 = vld [vmem:[#allocation3 + $0x1c34] ss:$8 sps:$4 sm:$0xff]  }
 0xb73   : > { %8548 = vmatprep.subr.bf16.mxu0 %v19088_v21  ;;  %v19155_v21 = vld [vmem:[#allocation3 + $0x1c30] ss:$8 sps:$4 sm:$0xff]  }
 0xb76   : > { %8549 = vmatpush1.bf16.msra.mxu0 %v19086_v3  ;;  %v19160_v3 = vld [vmem:[#allocation3 + $0x1c44] ss:$8 sps:$4 sm:$0xff]  }
 0xb77   : > { %8550 = vmatprep.subr.bf16.mxu0 %v19091_v54  ;;  %v19158_v54 = vld [vmem:[#allocation3 + $0x1c40] ss:$8 sps:$4 sm:$0xff]  }
 0xb7a   : > { %8551 = vmatpush1.bf16.msra.mxu0 %v19089_v24  ;;  %v19163_v24 = vld [vmem:[#allocation3 + $0x1c54] ss:$8 sps:$4 sm:$0xff]  }
 0xb7b   : > { %8552 = vmatprep.subr.bf16.mxu0 %v19094_v28  ;;  %v19161_v28 = vld [vmem:[#allocation3 + $0x1c50] ss:$8 sps:$4 sm:$0xff]  }
 0xb7e   : > { %8553 = vmatpush1.bf16.msra.mxu0 %v19092_v29  ;;  %v19166_v29 = vld [vmem:[#allocation3 + $0x1c64] ss:$8 sps:$4 sm:$0xff]  }
 0xb7f   : > { %8554 = vmatprep.subr.bf16.mxu0 %v19097_v56  ;;  %v8621_v56 = vld [vmem:[#allocation2 + $0x30] sm:$0x3] }
 0xb82   : > { %8555 = vmatpush1.bf16.msra.mxu0 %v19095_v9  ;;  %v19164_v9 = vld [vmem:[#allocation3 + $0x1c60] ss:$8 sps:$4 sm:$0xff]  }
 0xb83   : > { %8556 = vmatprep.subr.bf16.mxu0 %v19100_v10  ;;  %v19169_v10 = vld [vmem:[#allocation3 + $0x1c74] ss:$8 sps:$4 sm:$0xff]  }
 0xb86   : > { %8557 = vmatpush1.bf16.msra.mxu0 %v19098_v60  ;;  %v8627_v60 = vpack.c.bf16 %v8621_v56, %v8621_v56  ;;  %v19211_v56 = vld [vmem:[#allocation3 + $0x1d54] ss:$8 sps:$4 sm:$0xff]  }
 0xb87   : > { %8558 = vmatprep.subr.bf16.mxu0 %v19103_v12  ;;  %v8618_v12 = vld [vmem:[#allocation2] sm:$0xfc] }
 0xb8a   : > { %8559 = vmatpush1.bf16.msra.mxu0 %v19101_v14  ;;  %v19167_v14 = vld [vmem:[#allocation3 + $0x1c70] ss:$8 sps:$4 sm:$0xff]  }
 0xb8b   : > { %8560 = vmatprep.subr.bf16.mxu0 %v19106_v36  ;;  %v8624_v36 = vpack.c.bf16 %v20734_v5, %v8618_v12  ;;  %v19217_v12 = vld [vmem:[#allocation3 + $0x1d74] ss:$8 sps:$4 sm:$0xff]  }
 0xb8e   : > { %8561 = vmatpush1.bf16.msra.mxu0 %v19104_v15  ;;  %v19172_v15 = vld [vmem:[#allocation3 + $0x1c84] ss:$8 sps:$4 sm:$0xff]  }
 0xb8f   : > { %8562 = vmatprep.subr.bf16.mxu0 %v19109_v16  ;;  %v8678_v16 = vrot.slane %v8627_v60, 1  ;;  %v19212_v60 = vld [vmem:[#allocation3 + $0x1d60] ss:$8 sps:$4 sm:$0xff]  }
 0xb92   : > { %8563 = vmatpush1.bf16.msra.mxu0 %v19107_v17  ;;  %v8677_v17 = vrot.slane %v8624_v36, 1  ;;  %v19220_v36 = vld [vmem:[#allocation3 + $0x1d84] ss:$8 sps:$4 sm:$0xff]  }
 0xb93   : > { %8575 = vmatprep.subr.bf16.mxu0 %v19112_v46  ;;  %v19170_v46 = vld [vmem:[#allocation3 + $0x1c80] ss:$8 sps:$4 sm:$0xff]  }
 0xb95   : > { %8565 = vmatmul.mubr.bf16.vlgmr.msra.gmra.mrb[12].mxu0 %v7905_v22  ;;  %v8679_v22 = vsel %vm1036_vm3, %v8677_v17, %v8678_v16  ;;  %v19218_v16 = vld [vmem:[#allocation3 + $0x1d80] ss:$8 sps:$4 sm:$0xff]   ;;  %v19223_v17 = vld [vmem:[#allocation3 + $0x1d94] ss:$8 sps:$4 sm:$0xff]  }
 0xb96   : > { %8576 = vmatpush1.bf16.msra.mxu0 %v19110_v20  ;;  %8607 = vmatprep.mubr.bf16.mxu0 %v20306_v0  ;;  %v19175_v20 = vld [vmem:[#allocation3 + $0x1c94] ss:$8 sps:$4 sm:$0xff]  }
 0xb97   : > { %8577 = vmatprep.subr.bf16.mxu0 %v19115_v23  ;;  %v8982_v23 = vld [vmem:[#allocation2 + $0x8] sm:$0xf8] }
 0xb98   : > { %v8988_v4 = vpack.c.bf16 %v20729_v63, %v8982_v23  ;;  %v19226_v23 = vld [vmem:[#allocation3 + $0x1da4] ss:$8 sps:$4 sm:$0xff]  }
 0xb9a   : > { %8578 = vmatpush1.bf16.msra.mxu0 %v19113_v26  ;;  %v8991_v26 = vpack.c.bf16 %v8985_v19, %v8985_v19  ;;  %v9052_v6 = vshrl.u32 %v8988_v4, 16  ;;  %v9055_v25 = vshll.u32 %v8988_v4, 16  ;;  %v8981_v19 = vld [vmem:[#allocation2] sm:$0xf8] }
 0xb9b   : > { %8579 = vmatprep.subr.bf16.mxu0 %v19118_v27  ;;  %v19173_v27 = vld [vmem:[#allocation3 + $0x1c90] ss:$8 sps:$4 sm:$0xff]  }
 0xb9c   : > { %v9060_v33 = vshrl.u32 %v8991_v26, 16  ;;  %v9063_v34 = vshll.u32 %v8991_v26, 16 }
 0xb9e   : > { %8580 = vmatpush1.bf16.msra.mxu0 %v19116_v31  ;;  %v19178_v31 = vld [vmem:[#allocation3 + $0x1ca4] ss:$8 sps:$4 sm:$0xff]   ;;  %v9065_v38 = vrot.slane %v9063_v34, 2 }
 0xb9f   : > { %8581 = vmatprep.subr.bf16.mxu0 %v19121_v32  ;;  %v8623_v32 = vld [vmem:[#allocation2 + $0x40] sm:$0x3] }
 0xba0   : > { %v8629_v13 = vpack.c.bf16 %v8623_v32, %v8623_v32 }
 0xba2   : > { %8582 = vmatpush1.bf16.msra.mxu0 %v19119_v43  ;;  %v19176_v43 = vld [vmem:[#allocation3 + $0x1ca0] ss:$8 sps:$4 sm:$0xff]  }
 0xba3   : > { %8891 = vmatprep.subr.bf16.mxu0 %v19124_v11  ;;  %v19181_v11 = vld [vmem:[#allocation3 + $0x1cb4] ss:$8 sps:$4 sm:$0xff]  }
 0xba5   : > { %16643 = vmatmul.mubr.msk.bf16.vlgmr.msra.gmra.mrb[12].mxu0 %vm249_vm0, %v7907_v37  ;;  %v9062_v37 = vrot.slane %v9060_v33, 1  ;;  %v19229_v33 = vld [vmem:[#allocation3 + $0x1db4] ss:$8 sps:$4 sm:$0xff]  }
 0xba6   : > { %8892 = vmatpush1.bf16.msra.mxu0 %v19122_v35  ;;  %8923 = vmatprep.mubr.bf16.mxu0 %v8682_v40  ;;  %v8620_v35 = vld [vmem:[#allocation2 + $0x10] sm:$0xfc] }
 0xba7   : > { %8893 = vmatprep.subr.bf16.mxu0 %v19127_v39  ;;  %v19179_v39 = vld [vmem:[#allocation3 + $0x1cb0] ss:$8 sps:$4 sm:$0xff]   ;;  %v8626_v40 = vpack.c.bf16 %v20738_v30, %v8620_v35 }
 0xbaa   : > { %8894 = vmatpush1.bf16.msra.mxu0 %v19125_v41  ;;  %v19184_v41 = vld [vmem:[#allocation3 + $0x1cc4] ss:$8 sps:$4 sm:$0xff]  }
 0xbab   : > { %8895 = vmatprep.subr.bf16.mxu0 %v19130_v42  ;;  %v9054_v42 = vrot.slane %v9052_v6, 1 }
 0xbae   : > { %8896 = vmatpush1.bf16.msra.mxu0 %v19128_v44  ;;  %v9057_v44 = vrot.slane %v9055_v25, 2 }
 0xbaf   : > { %8897 = vmatprep.subr.bf16.mxu0 %v19133_v45  ;;  %v8684_v45 = vrot.slane %v8629_v13, 1  ;;  %v19232_v13 = vld [vmem:[#allocation3 + $0x1dc4] ss:$8 sps:$4 sm:$0xff]  }
 0xbb2   : > { %8898 = vmatpush1.bf16.msra.mxu0 %v19131_v53  ;;  %v9066_v53 = vor.u32 %v9065_v38, %v9062_v37  ;;  %v8986_v37 = vld [vmem:[#allocation2 + $0x40] sm:$0x7] }
 0xbb3   : > { %8899 = vmatprep.subr.bf16.mxu0 %v19136_v47  ;;  %v8683_v47 = vrot.slane %v8626_v40, 1  ;;  %v19235_v40 = vld [vmem:[#allocation3 + $0x1dd4] ss:$8 sps:$4 sm:$0xff]  }
 0xbb6   : > { %8900 = vmatpush1.bf16.msra.mxu0 %v19134_v48  ;;  %v19182_v48 = vld [vmem:[#allocation3 + $0x1cc0] ss:$8 sps:$4 sm:$0xff]  }
 0xbb7   : > { %8901 = vmatprep.subr.bf16.mxu0 %v19139_v61  ;;  %v9058_v61 = vor.u32 %v9057_v44, %v9054_v42  ;;  %v8992_v42 = vpack.c.bf16 %v8986_v37, %v8986_v37  ;;  %v8983_v44 = vld [vmem:[#allocation2 + $0x10] sm:$0xf8] }
 0xbb8   : > { %v19286_v37 = vld [vmem:[#allocation3 + $0x1ee4] ss:$8 sps:$4 sm:$0xff]  }
 0xbba   : > { %8902 = vmatpush1.bf16.msra.mxu0 %v19137_v49  ;;  %v19187_v49 = vld [vmem:[#allocation3 + $0x1cd4] ss:$8 sps:$4 sm:$0xff]  }
 0xbbb   : > { %8903 = vmatprep.subr.bf16.mxu0 %v19142_v50  ;;  %v8685_v50 = vsel %vm1036_vm3, %v8683_v47, %v8684_v45  ;;  %v19233_v45 = vld [vmem:[#allocation3 + $0x1dd0] ss:$8 sps:$4 sm:$0xff]   ;;  %v19238_v47 = vld [vmem:[#allocation3 + $0x1de4] ss:$8 sps:$4 sm:$0xff]  }
 0xbbe   : > { %8904 = vmatpush1.bf16.msra.mxu0 %v19140_v1  ;;  %v9067_v1 = vsel %vm1394_vm4, %v9058_v61, %v9066_v53  ;;  %v8989_v53 = vpack.c.bf16 %v20738_v30, %v8983_v44  ;;  %v9080_v61 = vshll.u32 %v8992_v42, 16  ;;  %v19287_v44 = vld [vmem:[#allocation3 + $0x1ef0] ss:$8 sps:$4 sm:$0xff]  }
 0xbbf   : > { %8905 = vmatprep.subr.bf16.mxu0 %v19145_v51  ;;  %v19185_v51 = vld [vmem:[#allocation3 + $0x1cd0] ss:$8 sps:$4 sm:$0xff]  }
 0xbc2   : > { %8906 = vmatpush1.bf16.msra.mxu0 %v19143_v52  ;;  %v19190_v52 = vld [vmem:[#allocation3 + $0x1ce4] ss:$8 sps:$4 sm:$0xff]  }
 0xbc3   : > { %8907 = vmatprep.subr.bf16.mxu0 %v19148_v58  ;;  %v19188_v58 = vld [vmem:[#allocation3 + $0x1ce0] ss:$8 sps:$4 sm:$0xff]  }
 0xbc6   : > { %8908 = vmatpush1.bf16.msra.mxu0 %v19146_v55  ;;  %v19193_v55 = vld [vmem:[#allocation3 + $0x1cf4] ss:$8 sps:$4 sm:$0xff]  }
 0xbc7   : > { %8909 = vmatprep.subr.bf16.mxu0 %v19151_v57  ;;  %v19191_v57 = vld [vmem:[#allocation3 + $0x1cf0] ss:$8 sps:$4 sm:$0xff]  }
 0xbca   : > { %8910 = vmatpush1.bf16.msra.mxu0 %v19149_v59  ;;  %v19196_v59 = vld [vmem:[#allocation3 + $0x1d04] ss:$8 sps:$4 sm:$0xff]  }
 0xbcb   : > { %8911 = vmatprep.subr.bf16.mxu0 %v19154_v62  ;;  %v19194_v62 = vld [vmem:[#allocation3 + $0x1d00] ss:$8 sps:$4 sm:$0xff]  }
 0xbce   : > { %8912 = vmatpush1.bf16.msra.mxu0 %v19152_v18  ;;  %v19199_v18 = vld [vmem:[#allocation3 + $0x1d14] ss:$8 sps:$4 sm:$0xff]  }
 0xbcf   : > { %8913 = vmatprep.subr.bf16.mxu0 %v19157_v2  ;;  %v19197_v2 = vld [vmem:[#allocation3 + $0x1d10] ss:$8 sps:$4 sm:$0xff]  }
 0xbd2   : > { %8914 = vmatpush1.bf16.msra.mxu0 %v19155_v21  ;;  %v19202_v21 = vld [vmem:[#allocation3 + $0x1d24] ss:$8 sps:$4 sm:$0xff]  }
 0xbd3   : > { %8915 = vmatprep.subr.bf16.mxu0 %v19160_v3  ;;  %v19200_v3 = vld [vmem:[#allocation3 + $0x1d20] ss:$8 sps:$4 sm:$0xff]  }
 0xbd6   : > { %8916 = vmatpush1.bf16.msra.mxu0 %v19158_v54  ;;  %v19205_v54 = vld [vmem:[#allocation3 + $0x1d34] ss:$8 sps:$4 sm:$0xff]  }
 0xbd7   : > { %8917 = vmatprep.subr.bf16.mxu0 %v19163_v24  ;;  %v19203_v24 = vld [vmem:[#allocation3 + $0x1d30] ss:$8 sps:$4 sm:$0xff]  }
 0xbda   : > { %8918 = vmatpush1.bf16.msra.mxu0 %v19161_v28  ;;  %v19208_v28 = vld [vmem:[#allocation3 + $0x1d44] ss:$8 sps:$4 sm:$0xff]  }
 0xbdb   : > { %8919 = vmatprep.subr.bf16.mxu0 %v19166_v29  ;;  %v19206_v29 = vld [vmem:[#allocation3 + $0x1d40] ss:$8 sps:$4 sm:$0xff]  }
 0xbde   : > { %8920 = vmatpush1.bf16.msra.mxu0 %v19164_v9  ;;  %v19209_v9 = vld [vmem:[#allocation3 + $0x1d50] ss:$8 sps:$4 sm:$0xff]  }
 0xbdf   : > { %8921 = vmatprep.subr.bf16.mxu0 %v19169_v10  ;;  %v19214_v10 = vld [vmem:[#allocation3 + $0x1d64] ss:$8 sps:$4 sm:$0xff]  }
 0xbe2   : > { %8922 = vmatpush1.bf16.msra.mxu0 %v19167_v14  ;;  %v19215_v14 = vld [vmem:[#allocation3 + $0x1d70] ss:$8 sps:$4 sm:$0xff]  }
 0xbe3   : > { %8934 = vmatprep.subr.bf16.mxu0 %v19172_v15  ;;  %v8984_v15 = vld [vmem:[#allocation2 + $0x30] sm:$0x7] }
 0xbe5   : > { %8924 = vmatmul.mubr.bf16.vlgmr.msra.gmra.mrb[12].mxu0 %v8679_v22  ;;  %v8987_v22 = vpack.c.bf16 %v20734_v5, %v8981_v19  ;;  %v19257_v19 = vld [vmem:[#allocation3 + $0x1e50] ss:$8 sps:$4 sm:$0xff]  }
 0xbe6   : > { %8935 = vmatpush1.bf16.msra.mxu0 %v19170_v46  ;;  %8966 = vmatprep.mubr.bf16.mxu0 %v20306_v0  ;;  %v8990_v46 = vpack.c.bf16 %v8984_v15, %v8984_v15  ;;  %v19251_v15 = vld [vmem:[#allocation3 + $0x1e30] ss:$8 sps:$4 sm:$0xff]  }
 0xbe7   : > { %8936 = vmatprep.subr.bf16.mxu0 %v19175_v20  ;;  %v19221_v20 = vld [vmem:[#allocation3 + $0x1d90] ss:$8 sps:$4 sm:$0xff]   ;;  %v9035_v4 = vshrl.u32 %v8987_v22, 16  ;;  %v9038_v32 = vshll.u32 %v8987_v22, 16  ;;  %v19260_v22 = vld [vmem:[#allocation3 + $0x1e60] ss:$8 sps:$4 sm:$0xff]  }
 0xbe8   : > { %v9043_v26 = vshrl.u32 %v8990_v46, 16 }
 0xbe9   : > { %v9037_v6 = vrot.slane %v9035_v4, 1  ;;  %v9040_v25 = vrot.slane %v9038_v32, 2  ;;  %v19271_v4 = vld [vmem:[#allocation3 + $0x1e94] ss:$8 sps:$4 sm:$0xff]   ;;  %v19269_v32 = vld [vmem:[#allocation3 + $0x1e90] ss:$8 sps:$4 sm:$0xff]  }
 0xbea   : > { %8937 = vmatpush1.bf16.msra.mxu0 %v19173_v27  ;;  %v9046_v27 = vshll.u32 %v8990_v46, 16  ;;  %v9045_v34 = vrot.slane %v9043_v26, 1  ;;  %v19259_v46 = vld [vmem:[#allocation3 + $0x1e54] ss:$8 sps:$4 sm:$0xff]   ;;  %v19263_v26 = vld [vmem:[#allocation3 + $0x1e70] ss:$8 sps:$4 sm:$0xff]  }
 0xbeb   : > { %8938 = vmatprep.subr.bf16.mxu0 %v19178_v31  ;;  %v19224_v31 = vld [vmem:[#allocation3 + $0x1da0] ss:$8 sps:$4 sm:$0xff]   ;;  %v9041_v38 = vor.u32 %v9040_v25, %v9037_v6  ;;  %v19280_v6 = vld [vmem:[#allocation3 + $0x1ec4] ss:$8 sps:$4 sm:$0xff]  }
 0xbec   : > { %v19278_v25 = vld [vmem:[#allocation3 + $0x1ec0] ss:$8 sps:$4 sm:$0xff]  }
 0xbee   : > { %8939 = vmatpush1.bf16.msra.mxu0 %v19176_v43  ;;  %v9048_v43 = vrot.slane %v9046_v27, 2  ;;  %v19268_v27 = vld [vmem:[#allocation3 + $0x1e84] ss:$8 sps:$4 sm:$0xff]  }
 0xbef   : > { %8940 = vmatprep.subr.bf16.mxu0 %v19181_v11  ;;  %v19227_v11 = vld [vmem:[#allocation3 + $0x1db0] ss:$8 sps:$4 sm:$0xff]  }
 0xbf0   : > { %v9049_v35 = vor.u32 %v9048_v43, %v9045_v34  ;;  %v19272_v34 = vld [vmem:[#allocation3 + $0x1ea0] ss:$8 sps:$4 sm:$0xff]   ;;  %v19277_v43 = vld [vmem:[#allocation3 + $0x1eb4] ss:$8 sps:$4 sm:$0xff]  }
 0xbf2   : > { %8941 = vmatpush1.bf16.msra.mxu0 %v19179_v39  ;;  %v19230_v39 = vld [vmem:[#allocation3 + $0x1dc0] ss:$8 sps:$4 sm:$0xff]  }
 0xbf3   : > { %9290 = vmatprep.subr.bf16.mxu0 %v19184_v41  ;;  %v9050_v41 = vsel %vm1394_vm4, %v9041_v38, %v9049_v35  ;;  %v19281_v35 = vld [vmem:[#allocation3 + $0x1ed0] ss:$8 sps:$4 sm:$0xff]   ;;  %v9383_v38 = vld [vmem:[#allocation2 + $0x30] sm:$0xf] }
 0xbf5   : > { %16684 = vmatmul.mubr.msk.bf16.vlgmr.msra.gmra.mrb[12].mxu0 %vm249_vm0, %v8685_v50  ;;  %v9069_v50 = vshrl.u32 %v8989_v53, 16 }
 0xbf6   : > { %9291 = vmatpush1.bf16.msra.mxu0 %v19182_v48  ;;  %9322 = vmatprep.mubr.bf16.mxu0 %v9067_v1  ;;  %v9077_v48 = vshrl.u32 %v8992_v42, 16  ;;  %v9072_v1 = vshll.u32 %v8989_v53, 16  ;;  %v9380_v42 = vld [vmem:[#allocation2] sm:$0xf0]  ;;  %v19292_v53 = vld [vmem:[#allocation3 + $0x1f04] ss:$8 sps:$4 sm:$0xff]  }
 0xbf7   : > { %9292 = vmatprep.subr.bf16.mxu0 %v19187_v49  ;;  %v19236_v49 = vld [vmem:[#allocation3 + $0x1de0] ss:$8 sps:$4 sm:$0xff]  }
 0xbfa   : > { %9293 = vmatpush1.bf16.msra.mxu0 %v19185_v51  ;;  %v9384_v51 = vld [vmem:[#allocation2 + $0x38] sm:$0xf] }
 0xbfb   : > { %9294 = vmatprep.subr.bf16.mxu0 %v19190_v52  ;;  %v19241_v52 = vld [vmem:[#allocation3 + $0x1df4] ss:$8 sps:$4 sm:$0xff]  }
 0xbfe   : > { %9295 = vmatpush1.bf16.msra.mxu0 %v19188_v58  ;;  %v9079_v58 = vrot.slane %v9077_v48, 1 }
 0xbff   : > { %9296 = vmatprep.subr.bf16.mxu0 %v19193_v55  ;;  %v9082_v55 = vrot.slane %v9080_v61, 2  ;;  %v19290_v61 = vld [vmem:[#allocation3 + $0x1f00] ss:$8 sps:$4 sm:$0xff]  }
 0xc02   : > { %9297 = vmatpush1.bf16.msra.mxu0 %v19191_v57  ;;  %v9381_v57 = vld [vmem:[#allocation2 + $0x8] sm:$0xf0] }
 0xc03   : > { %9298 = vmatprep.subr.bf16.mxu0 %v19196_v59  ;;  %v9390_v59 = vpack.c.bf16 %v9384_v51, %v9384_v51  ;;  %v19298_v51 = vld [vmem:[#allocation3 + $0x1f24] ss:$8 sps:$4 sm:$0xff]  }
 0xc06   : > { %9299 = vmatpush1.bf16.msra.mxu0 %v19194_v62  ;;  %v19239_v62 = vld [vmem:[#allocation3 + $0x1df0] ss:$8 sps:$4 sm:$0xff]  }
 0xc07   : > { %9300 = vmatprep.subr.bf16.mxu0 %v19199_v18  ;;  %v9071_v18 = vrot.slane %v9069_v50, 1 }
 0xc0a   : > { %9301 = vmatpush1.bf16.msra.mxu0 %v19197_v2  ;;  %v9074_v2 = vrot.slane %v9072_v1, 2  ;;  %v19293_v1 = vld [vmem:[#allocation3 + $0x1f10] ss:$8 sps:$4 sm:$0xff]  }
 0xc0b   : > { %9302 = vmatprep.subr.bf16.mxu0 %v19202_v21  ;;  %v19244_v21 = vld [vmem:[#allocation3 + $0x1e04] ss:$8 sps:$4 sm:$0xff]  }
 0xc0e   : > { %9303 = vmatpush1.bf16.msra.mxu0 %v19200_v3  ;;  %v9387_v3 = vpack.c.bf16 %v20729_v63, %v9381_v57  ;;  %v19248_v63 = vld [vmem:[#allocation3 + $0x1e20] ss:$8 sps:$4 sm:$0xff]   ;;  %v9382_v57 = vld [vmem:[#allocation2 + $0x10] sm:$0xf0] }
 0xc0f   : > { %9304 = vmatprep.subr.bf16.mxu0 %v19205_v54  ;;  %v9083_v54 = vor.u32 %v9082_v55, %v9079_v58  ;;  %v19301_v58 = vld [vmem:[#allocation3 + $0x1f34] ss:$8 sps:$4 sm:$0xff]  }
 0xc12   : > { %9305 = vmatpush1.bf16.msra.mxu0 %v19203_v24  ;;  %v9443_v24 = vrot.slane %v9390_v59, 2  ;;  %v19299_v59 = vld [vmem:[#allocation3 + $0x1f30] ss:$8 sps:$4 sm:$0xff]  }
 0xc13   : > { %9306 = vmatprep.subr.bf16.mxu0 %v19208_v28  ;;  %v9075_v28 = vor.u32 %v9074_v2, %v9071_v18 }
 0xc16   : > { %9307 = vmatpush1.bf16.msra.mxu0 %v19206_v29  ;;  %v19242_v29 = vld [vmem:[#allocation3 + $0x1e00] ss:$8 sps:$4 sm:$0xff]  }
 0xc17   : > { %9308 = vmatprep.subr.bf16.mxu0 %v19211_v56  ;;  %v9442_v56 = vrot.slane %v9387_v3, 2  ;;  %v19302_v3 = vld [vmem:[#allocation3 + $0x2080] ss:$8 sps:$4 sm:$0xff]  }
 0xc1a   : > { %9309 = vmatpush1.bf16.msra.mxu0 %v19209_v9  ;;  %v19247_v9 = vld [vmem:[#allocation3 + $0x1e14] ss:$8 sps:$4 sm:$0xff]  }
 0xc1b   : > { %9310 = vmatprep.subr.bf16.mxu0 %v19214_v10  ;;  %v9084_v10 = vsel %vm1394_vm4, %v9075_v28, %v9083_v54  ;;  %v19304_v54 = vld [vmem:[#allocation3 + $0x2084] ss:$8 sps:$4 sm:$0xff]   ;;  %v19305_v28 = vld [vmem:[#allocation3 + $0x2090] ss:$8 sps:$4 sm:$0xff]  }
 0xc1c   : > { %10151 = vmatprep.subr.bf16.mxu1 %v19304_v54 }
 0xc1d   : > { %10152 = vmatpush1.bf16.msra.mxu1 %v19302_v3 }
 0xc1e   : > { %9311 = vmatpush1.bf16.msra.mxu0 %v19212_v60  ;;  %v9444_v60 = vsel %vm1800_vm5, %v9442_v56, %v9443_v24  ;;  %v19307_v24 = vld [vmem:[#allocation3 + $0x2094] ss:$8 sps:$4 sm:$0xff]   ;;  %v19308_v56 = vld [vmem:[#allocation3 + $0x20a0] ss:$8 sps:$4 sm:$0xff]  }
 0xc1f   : > { %9312 = vmatprep.subr.bf16.mxu0 %v19217_v12  ;;  %v19245_v12 = vld [vmem:[#allocation3 + $0x1e10] ss:$8 sps:$4 sm:$0xff]   ;;  %10153 = vmatprep.subr.bf16.mxu1 %v19307_v24 }
 0xc21   : > { %10154 = vmatpush1.bf16.msra.mxu1 %v19305_v28 }
 0xc22   : > { %9313 = vmatpush1.bf16.msra.mxu0 %v19215_v14  ;;  %v19250_v14 = vld [vmem:[#allocation3 + $0x1e24] ss:$8 sps:$4 sm:$0xff]  }
 0xc23   : > { %9314 = vmatprep.subr.bf16.mxu0 %v19220_v36  ;;  %v19253_v36 = vld [vmem:[#allocation3 + $0x1e34] ss:$8 sps:$4 sm:$0xff]  }
 0xc26   : > { %9315 = vmatpush1.bf16.msra.mxu0 %v19218_v16  ;;  %v19256_v16 = vld [vmem:[#allocation3 + $0x1e44] ss:$8 sps:$4 sm:$0xff]  }
 0xc27   : > { %9316 = vmatprep.subr.bf16.mxu0 %v19223_v17  ;;  %v19254_v17 = vld [vmem:[#allocation3 + $0x1e40] ss:$8 sps:$4 sm:$0xff]  }
 0xc2a   : > { %9317 = vmatpush1.bf16.msra.mxu0 %v19221_v20  ;;  %v19262_v20 = vld [vmem:[#allocation3 + $0x1e64] ss:$8 sps:$4 sm:$0xff]  }
 0xc2b   : > { %9318 = vmatprep.subr.bf16.mxu0 %v19226_v23  ;;  %v19265_v23 = vld [vmem:[#allocation3 + $0x1e74] ss:$8 sps:$4 sm:$0xff]  }
 0xc2e   : > { %9319 = vmatpush1.bf16.msra.mxu0 %v19224_v31  ;;  %v19266_v31 = vld [vmem:[#allocation3 + $0x1e80] ss:$8 sps:$4 sm:$0xff]  }
 0xc2f   : > { %9320 = vmatprep.subr.bf16.mxu0 %v19229_v33  ;;  %v19274_v33 = vld [vmem:[#allocation3 + $0x1ea4] ss:$8 sps:$4 sm:$0xff]  }
 0xc32   : > { %9321 = vmatpush1.bf16.msra.mxu0 %v19227_v11  ;;  %v19275_v11 = vld [vmem:[#allocation3 + $0x1eb0] ss:$8 sps:$4 sm:$0xff]  }
 0xc33   : > { %9333 = vmatprep.subr.bf16.mxu0 %v19232_v13  ;;  %v19283_v13 = vld [vmem:[#allocation3 + $0x1ed4] ss:$8 sps:$4 sm:$0xff]  }
 0xc35   : > { %9323 = vmatmul.mubr.bf16.vlgmr.msra.gmra.mrb[12].mxu0 %v9050_v41  ;;  %v9389_v41 = vpack.c.bf16 %v9383_v38, %v9383_v38 }
 0xc36   : > { %9334 = vmatpush1.bf16.msra.mxu0 %v19230_v39  ;;  %9365 = vmatprep.mubr.bf16.mxu0 %v20306_v0  ;;  %v19284_v39 = vld [vmem:[#allocation3 + $0x1ee0] ss:$8 sps:$4 sm:$0xff]  }
 0xc37   : > { %9335 = vmatprep.subr.bf16.mxu0 %v19235_v40  ;;  %v19289_v40 = vld [vmem:[#allocation3 + $0x1ef4] ss:$8 sps:$4 sm:$0xff]  }
 0xc3a   : > { %9336 = vmatpush1.bf16.msra.mxu0 %v19233_v45  ;;  %v9386_v45 = vpack.c.bf16 %v20734_v5, %v9380_v42  ;;  %v19296_v5 = vld [vmem:[#allocation3 + $0x1f20] ss:$8 sps:$4 sm:$0xff]  }
 0xc3b   : > { %9337 = vmatprep.subr.bf16.mxu0 %v19238_v47  ;;  %v9440_v47 = vrot.slane %v9389_v41, 2 }
 0xc3c   : > { %v9439_v48 = vrot.slane %v9386_v45, 2 }
 0xc3e   : > { %9338 = vmatpush1.bf16.msra.mxu0 %v19236_v49  ;;  %v19295_v49 = vld [vmem:[#allocation3 + $0x1f14] ss:$8 sps:$4 sm:$0xff]   ;;  %v9441_v50 = vsel %vm1800_vm5, %v9439_v48, %v9440_v47  ;;  %v19341_v48 = vld [vmem:[#allocation3 + $0x2150] ss:$8 sps:$4 sm:$0xff]  }
 0xc3f   : > { %9339 = vmatprep.subr.bf16.mxu0 %v19241_v52  ;;  %v9385_v52 = vld [vmem:[#allocation2 + $0x40] sm:$0xf] }
 0xc40   : > { %v9391_v55 = vpack.c.bf16 %v9385_v52, %v9385_v52  ;;  %v19349_v52 = vld [vmem:[#allocation3 + $0x2174] ss:$8 sps:$4 sm:$0xff]  }
 0xc42   : > { %9340 = vmatpush1.bf16.msra.mxu0 %v19239_v62  ;;  %v9388_v62 = vpack.c.bf16 %v20738_v30, %v9382_v57  ;;  %v9446_v18 = vrot.slane %v9391_v55, 2  ;;  %v19313_v30 = vld [vmem:[#allocation3 + $0x20b4] ss:$8 sps:$4 sm:$0xff]  }
 0xc43   : > { %9653 = vmatprep.subr.bf16.mxu0 %v19244_v21 }
 0xc44   : > { %v9445_v2 = vrot.slane %v9388_v62, 2 }
 0xc45   : > { %16725 = vmatmul.mubr.msk.bf16.vlgmr.msra.gmra.mrb[12].mxu0 %vm249_vm0, %v9084_v10  ;;  %v19316_v10 = vld [vmem:[#allocation3 + $0x20c4] ss:$8 sps:$4 sm:$0xff]  }
 0xc46   : > { %9654 = vmatpush1.bf16.msra.mxu0 %v19242_v29  ;;  %9685 = vmatprep.mubr.bf16.mxu0 %v9444_v60  ;;  %v9447_v21 = vsel %vm1800_vm5, %v9445_v2, %v9446_v18  ;;  %v19310_v29 = vld [vmem:[#allocation3 + $0x20a4] ss:$8 sps:$4 sm:$0xff]   ;;  %v19314_v60 = vld [vmem:[#allocation3 + $0x20c0] ss:$8 sps:$4 sm:$0xff]  }
 0xc47   : > { %9655 = vmatprep.subr.bf16.mxu0 %v19247_v9  ;;  %10155 = vmatprep.subr.bf16.mxu1 %v19310_v29  ;;  %v19311_v9 = vld [vmem:[#allocation3 + $0x20b0] ss:$8 sps:$4 sm:$0xff]  }
 0xc48   : > { %10156 = vmatpush1.bf16.msra.mxu1 %v19308_v56 }
 0xc49   : > { %10157 = vmatprep.subr.bf16.mxu1 %v19313_v30 }
 0xc4a   : > { %9656 = vmatpush1.bf16.msra.mxu0 %v19245_v12  ;;  %v19319_v12 = vld [vmem:[#allocation3 + $0x20d4] ss:$8 sps:$4 sm:$0xff]  }
 0xc4b   : > { %9657 = vmatprep.subr.bf16.mxu0 %v19250_v14  ;;  %v19317_v14 = vld [vmem:[#allocation3 + $0x20d0] ss:$8 sps:$4 sm:$0xff]  }
 0xc4c   : > { %10158 = vmatpush1.bf16.msra.mxu1 %v19311_v9 }
 0xc4d   : > { %10159 = vmatprep.subr.bf16.mxu1 %v19316_v10 }
 0xc4e   : > { %9658 = vmatpush1.bf16.msra.mxu0 %v19248_v63  ;;  %v19322_v63 = vld [vmem:[#allocation3 + $0x20e4] ss:$8 sps:$4 sm:$0xff]  }
 0xc4f   : > { %9659 = vmatprep.subr.bf16.mxu0 %v19253_v36  ;;  %v19320_v36 = vld [vmem:[#allocation3 + $0x20e0] ss:$8 sps:$4 sm:$0xff]  }
 0xc50   : > { %10160 = vmatpush1.bf16.msra.mxu1 %v19314_v60 }
 0xc51   : > { %10161 = vmatprep.subr.bf16.mxu1 %v19319_v12 }
 0xc52   : > { %9660 = vmatpush1.bf16.msra.mxu0 %v19251_v15  ;;  %v19325_v15 = vld [vmem:[#allocation3 + $0x20f4] ss:$8 sps:$4 sm:$0xff]  }
 0xc53   : > { %9661 = vmatprep.subr.bf16.mxu0 %v19256_v16  ;;  %v19323_v16 = vld [vmem:[#allocation3 + $0x20f0] ss:$8 sps:$4 sm:$0xff]  }
 0xc54   : > { %10162 = vmatpush1.bf16.msra.mxu1 %v19317_v14 }
 0xc55   : > { %10163 = vmatprep.subr.bf16.mxu1 %v19322_v63 }
 0xc56   : > { %9662 = vmatpush1.bf16.msra.mxu0 %v19254_v17  ;;  %v19328_v17 = vld [vmem:[#allocation3 + $0x2104] ss:$8 sps:$4 sm:$0xff]  }
 0xc57   : > { %9663 = vmatprep.subr.bf16.mxu0 %v19259_v46  ;;  %v19326_v46 = vld [vmem:[#allocation3 + $0x2100] ss:$8 sps:$4 sm:$0xff]  }
 0xc58   : > { %10164 = vmatpush1.bf16.msra.mxu1 %v19320_v36 }
 0xc59   : > { %10165 = vmatprep.subr.bf16.mxu1 %v19325_v15 }
 0xc5a   : > { %9664 = vmatpush1.bf16.msra.mxu0 %v19257_v19  ;;  %v19331_v19 = vld [vmem:[#allocation3 + $0x2114] ss:$8 sps:$4 sm:$0xff]  }
 0xc5b   : > { %9665 = vmatprep.subr.bf16.mxu0 %v19262_v20  ;;  %v19329_v20 = vld [vmem:[#allocation3 + $0x2110] ss:$8 sps:$4 sm:$0xff]  }
 0xc5c   : > { %10166 = vmatpush1.bf16.msra.mxu1 %v19323_v16 }
 0xc5d   : > { %10167 = vmatprep.subr.bf16.mxu1 %v19328_v17 }
 0xc5e   : > { %9666 = vmatpush1.bf16.msra.mxu0 %v19260_v22  ;;  %v16767_v22 = vld [vmem:[%s21138_s2 + $0x8] sm:$0x3] }
 0xc5f   : > { %9667 = vmatprep.subr.bf16.mxu0 %v19265_v23  ;;  %v19332_v23 = vld [vmem:[#allocation3 + $0x2120] ss:$8 sps:$4 sm:$0xff]  }
 0xc60   : > { %10168 = vmatpush1.bf16.msra.mxu1 %v19326_v46 }
 0xc61   : > { %10169 = vmatprep.subr.bf16.mxu1 %v19331_v19 }
 0xc62   : > { %9668 = vmatpush1.bf16.msra.mxu0 %v19263_v26  ;;  %v19334_v26 = vld [vmem:[#allocation3 + $0x2124] ss:$8 sps:$4 sm:$0xff]  }
 0xc63   : > { %9669 = vmatprep.subr.bf16.mxu0 %v19268_v27  ;;  %v9749_v27 = vrot.slane %v16767_v22, %v20509_v7 }
 0xc64   : > { %10170 = vmatpush1.bf16.msra.mxu1 %v19329_v20 }
 0xc65   : > { %10171 = vmatprep.subr.bf16.mxu1 %v19334_v26  ;;  %v19350_v26 = vld [vmem:[#allocation3 + $0x2180] ss:$8 sps:$4 sm:$0xff]  }
 0xc66   : > { %9670 = vmatpush1.bf16.msra.mxu0 %v19266_v31  ;;  %v9753_v31 = vrot.slane %v16767_v22, %v20511_v8 }
 0xc67   : > { %9671 = vmatprep.subr.bf16.mxu0 %v19271_v4  ;;  %v19335_v4 = vld [vmem:[#allocation3 + $0x2130] ss:$8 sps:$4 sm:$0xff]  }
 0xc68   : > { %10172 = vmatpush1.bf16.msra.mxu1 %v19332_v23 }
 0xc6a   : > { %9672 = vmatpush1.bf16.msra.mxu0 %v19269_v32  ;;  %v19337_v32 = vld [vmem:[#allocation3 + $0x2134] ss:$8 sps:$4 sm:$0xff]  }
 0xc6b   : > { %9673 = vmatprep.subr.bf16.mxu0 %v19274_v33  ;;  %10173 = vmatprep.subr.bf16.mxu1 %v19337_v32 }
 0xc6c   : > { %10174 = vmatpush1.bf16.msra.mxu1 %v19335_v4  ;;  %v19355_v4 = vld [vmem:[#allocation3 + $0x2194] ss:$8 sps:$4 sm:$0xff]  }
 0xc6e   : > { %9674 = vmatpush1.bf16.msra.mxu0 %v19272_v34 }
 0xc6f   : > { %9675 = vmatprep.subr.bf16.mxu0 %v19277_v43 }
 0xc72   : > { %9676 = vmatpush1.bf16.msra.mxu0 %v19275_v11 }
 0xc73   : > { %9677 = vmatprep.subr.bf16.mxu0 %v19280_v6 }
 0xc76   : > { %9678 = vmatpush1.bf16.msra.mxu0 %v19278_v25 }
 0xc77   : > { %9679 = vmatprep.subr.bf16.mxu0 %v19283_v13 }
 0xc7a   : > { %9680 = vmatpush1.bf16.msra.mxu0 %v19281_v35 }
 0xc7b   : > { %9681 = vmatprep.subr.bf16.mxu0 %v19286_v37 }
 0xc7e   : > { %9682 = vmatpush1.bf16.msra.mxu0 %v19284_v39  ;;  %v19338_v39 = vld [vmem:[#allocation3 + $0x2140] ss:$8 sps:$4 sm:$0xff]  }
 0xc7f   : > { %9683 = vmatprep.subr.bf16.mxu0 %v19289_v40  ;;  %v19340_v40 = vld [vmem:[#allocation3 + $0x2144] ss:$8 sps:$4 sm:$0xff]  }
 0xc80   : > { %10175 = vmatprep.subr.bf16.mxu1 %v19340_v40  ;;  %v19359_v40 = vld [vmem:[#allocation3 + $0x21b0] ss:$8 sps:$4 sm:$0xff]  }
 0xc81   : > { %10176 = vmatpush1.bf16.msra.mxu1 %v19338_v39 }
 0xc82   : > { %9684 = vmatpush1.bf16.msra.mxu0 %v19287_v44  ;;  %v19343_v44 = vld [vmem:[#allocation3 + $0x2154] ss:$8 sps:$4 sm:$0xff]  }
 0xc83   : > { %9696 = vmatprep.subr.bf16.mxu0 %v19292_v53  ;;  %10177 = vmatprep.subr.bf16.mxu1 %v19343_v44 }
 0xc85   : > { %9686 = vmatmul.mubr.bf16.vlgmr.msra.gmra.mrb[12].mxu0 %v9441_v50  ;;  %10178 = vmatpush1.bf16.msra.mxu1 %v19341_v48  ;;  %v19362_v48 = vld [vmem:[#allocation3 + $0x1f40] ss:$8 sps:$4 sm:$0xff]  }
 0xc86   : > { %9697 = vmatpush1.bf16.msra.mxu0 %v19290_v61  ;;  %9728 = vmatprep.mubr.bf16.mxu0 %v20306_v0 }
 0xc87   : > { %9698 = vmatprep.subr.bf16.mxu0 %v19295_v49  ;;  %v19346_v49 = vld [vmem:[#allocation3 + $0x2164] ss:$8 sps:$4 sm:$0xff]  }
 0xc88   : > { %10179 = vmatprep.subr.bf16.mxu1 %v19346_v49 }
 0xc8a   : > { %9699 = vmatpush1.bf16.msra.mxu0 %v19293_v1 }
 0xc8b   : > { %9700 = vmatprep.subr.bf16.mxu0 %v19298_v51  ;;  %v19344_v51 = vld [vmem:[#allocation3 + $0x2160] ss:$8 sps:$4 sm:$0xff]  }
 0xc8c   : > { %10180 = vmatpush1.bf16.msra.mxu1 %v19344_v51  ;;  %v19370_v51 = vld [vmem:[#allocation3 + $0x1f64] ss:$8 sps:$4 sm:$0xff]  }
 0xc8d   : > { %10181 = vmatprep.subr.bf16.mxu1 %v19349_v52  ;;  %v19368_v52 = vld [vmem:[#allocation3 + $0x1f60] ss:$8 sps:$4 sm:$0xff]  }
 0xc8e   : > { %9701 = vmatpush1.bf16.msra.mxu0 %v19296_v5  ;;  %v19347_v5 = vld [vmem:[#allocation3 + $0x2170] ss:$8 sps:$4 sm:$0xff]  }
 0xc8f   : > { %9702 = vmatprep.subr.bf16.mxu0 %v19301_v58  ;;  %v19352_v58 = vld [vmem:[#allocation3 + $0x2184] ss:$8 sps:$4 sm:$0xff]  }
 0xc90   : > { %10182 = vmatpush1.bf16.msra.mxu1 %v19347_v5  ;;  %v19373_v5 = vld [vmem:[#allocation3 + $0x1f74] ss:$8 sps:$4 sm:$0xff]  }
 0xc91   : > { %10194 = vmatprep.subr.bf16.mxu1 %v19352_v58  ;;  %v19371_v58 = vld [vmem:[#allocation3 + $0x1f70] ss:$8 sps:$4 sm:$0xff]  }
 0xc92   : > { %9703 = vmatpush1.bf16.msra.mxu0 %v19299_v59 }
 0xc95   : > { %16766 = vmatmul.mubr.msk.bf16.vlgmr.msra.gmra.mrb[12].mxu0 %vm249_vm0, %v9447_v21 }
 0xd68   : > { %v9730_v33 = vpop.f32.mrb[12].mxu0 }
 0xd69   : > { %v9756_v34 = vadd.f32 %v9749_v27, %v9730_v33  ;;  %v9732_v43 = vpop.f32.mrb[13].mxu0 }
 0xd6a   : > { %v9757_v11 = vadd.f32 %v9753_v31, %v9732_v43  ;;  %v9734_v6 = vpop.f32.mrb[14].mxu0 }
 0xd6b   : > { %v9760_v25 = vmax.f32 %v9756_v34, 0.0  ;;  %v9758_v13 = vadd.f32 %v9749_v27, %v9734_v6  ;;  %v9736_v35 = vpop.f32.mrb[15].mxu0 }
 0xd6c   : > { %v9761_v37 = vmax.f32 %v9757_v11, 0.0  ;;  %v9759_v38 = vadd.f32 %v9753_v31, %v9736_v35  ;;  %v19353_v11 = vld [vmem:[#allocation3 + $0x2190] ss:$8 sps:$4 sm:$0xff]   ;;  %v19356_v35 = vld [vmem:[#allocation3 + $0x21a0] ss:$8 sps:$4 sm:$0xff]  }
 0xd6d   : > { %v9768_v41 = vrot.slane %v9760_v25, 6  ;;  %v9762_v42 = vmax.f32 %v9758_v13, 0.0  ;;  %v19358_v25 = vld [vmem:[#allocation3 + $0x21a4] ss:$8 sps:$4 sm:$0xff]  }
 0xd6e   : > { %v9769_v45 = vrot.slane %v9761_v37, 6  ;;  %v9763_v53 = vmax.f32 %v9759_v38, 0.0  ;;  %v19361_v38 = vld [vmem:[#allocation3 + $0x21b4] ss:$8 sps:$4 sm:$0xff]  }
 0xd6f   : > { %v9770_v47 = vrot.slane %v9762_v42, 6  ;;  %9774 = vrot.lane.b32.xlu0 %v9768_v41, %s20307_s12  ;;  %v19364_v42 = vld [vmem:[#allocation3 + $0x1f44] ss:$8 sps:$4 sm:$0xff]  }
 0xd70   : > { %v9772_v61 = vrot.slane %v9763_v53, 6  ;;  %9776 = vrot.lane.b32.xlu1 %v9769_v45, %s20307_s12 }
 0xd71   : > { %v9771_v50 = vsel %vm2129_vm6, %v9768_v41, %v9770_v47 }
 0xd72   : > { %v9773_v1 = vsel %vm2129_vm6, %v9769_v45, %v9772_v61 }
 0xd73   : > { %9778 = vrot.lane.b32.xlu0 %v9771_v50, %s20307_s12 }
 0xd74   : > { %9780 = vrot.lane.b32.xlu1 %v9773_v1, %s20307_s12  ;;  %v19365_v1 = vld [vmem:[#allocation3 + $0x1f50] ss:$8 sps:$4 sm:$0xff]  }
 0xd77   : > { %9782 = vrot.lane.b32.xlu0 %v9770_v47, %s20307_s12 }
 0xd78   : > { %9784 = vrot.lane.b32.xlu1 %v9772_v61, %s20307_s12  ;;  %v19367_v61 = vld [vmem:[#allocation3 + $0x1f54] ss:$8 sps:$4 sm:$0xff]  }
 0xde1   : > { %v9775_v55 = vpop.permute.xlu0 %9774 }
 0xde2   : > { %9798 = vst.msk [vmem:[#allocation2] sm:$0xfc] %vm2161_vm7, %v9775_v55  ;;  %v9777_v57 = vpop.permute.xlu1 %9776 }
 0xde3   : > { %v9786_v59 = vsel %vm2148_vm9, %v9775_v55, %v9777_v57  ;;  %9800 = vst.msk [vmem:[#allocation2 + $0x10] sm:$0xfc] %vm2164_vm10, %v9777_v57  ;;  %v19376_v55 = vld [vmem:[#allocation3 + $0x1f84] ss:$8 sps:$4 sm:$0xff]   ;;  %v19374_v57 = vld [vmem:[#allocation3 + $0x1f80] ss:$8 sps:$4 sm:$0xff]  }
 0xde4   : > { %9799 = vst [vmem:[#allocation2 + $0x8] sm:$0xfc] %v9786_v59  ;;  %v19379_v59 = vld [vmem:[#allocation3 + $0x1f94] ss:$8 sps:$4 sm:$0xff]  }
 0xde5   : > { %v9779_v62 = vpop.permute.xlu0 %9778 }
 0xde6   : > { %9801 = vst.msk [vmem:[#allocation2 + $0x18] sm:$0xff] %vm2166_vm8, %v9779_v62  ;;  %v9781_v18 = vpop.permute.xlu1 %9780 }
 0xde7   : > { %9803 = vst.msk [vmem:[#allocation2 + $0x28] sm:$0xff] %vm2148_vm9, %v9781_v18  ;;  %v20794_v3 = vsel %vm2148_vm9, %v9779_v62, %v9781_v18  ;;  %v19377_v62 = vld [vmem:[#allocation3 + $0x1f90] ss:$8 sps:$4 sm:$0xff]   ;;  %v19382_v18 = vld [vmem:[#allocation3 + $0x1fa4] ss:$8 sps:$4 sm:$0xff]  }
 0xde9   : > { %v9783_v2 = vpop.permute.xlu0 %9782  ;;  %v9857_v56 = vld [vmem:[#allocation2] sm:$0xfe] }
 0xdea   : > { %9804 = vst.msk [vmem:[#allocation2 + $0x30] sm:$0x3] %vm2170_vm11, %v9783_v2  ;;  %v9785_v21 = vpop.permute.xlu1 %9784  ;;  %v9859_v34 = vld [vmem:[#allocation2 + $0x10] sm:$0xfe] }
 0xdeb   : > { %v9788_v54 = vsel %vm2148_vm9, %v9783_v2, %v9785_v21  ;;  %9806 = vst.msk [vmem:[#allocation2 + $0x40] sm:$0x3] %vm2173_vm12, %v9785_v21  ;;  %v9858_v24 = vld [vmem:[#allocation2 + $0x8] sm:$0xfe]  ;;  %v19385_v21 = vld [vmem:[#allocation3 + $0x1fb4] ss:$8 sps:$4 sm:$0xff]  }
 0xdec   : > { %9805 = vst [vmem:[#allocation2 + $0x38] sm:$0x3] %v9788_v54  ;;  %v9864_v28 = vpack.c.bf16 %v20794_v3, %v9858_v24  ;;  %v9808_v53 = vld [vmem:[#allocation2 + $0x8] sm:$0xff]  ;;  %v19383_v54 = vld [vmem:[#allocation3 + $0x1fb0] ss:$8 sps:$4 sm:$0xff]  }
 0xded   : > { %v20799_v29 = vld [vmem:[#allocation2 + $0x18] sm:$0xff]  ;;  %v9814_v50 = vpack.c.bf16 %v20794_v3, %v9808_v53  ;;  %v19380_v2 = vld [vmem:[#allocation3 + $0x1fa0] ss:$8 sps:$4 sm:$0xff]   ;;  %v19388_v24 = vld [vmem:[#allocation3 + $0x1fc4] ss:$8 sps:$4 sm:$0xff]  }
 0xdee   : > { %v9863_v30 = vpack.c.bf16 %v20799_v29, %v9857_v56  ;;  %v9925_v9 = vshll.u32 %v9864_v28, 16  ;;  %v9923_v17 = vshrl.u32 %v9864_v28, 16  ;;  %v20803_v32 = vld [vmem:[#allocation2 + $0x28] sm:$0xff]  ;;  %v19391_v56 = vld [vmem:[#allocation3 + $0x1fd4] ss:$8 sps:$4 sm:$0xff]  }
 0xdef   : > { %v9865_v6 = vpack.c.bf16 %v20803_v32, %v9859_v34  ;;  %v19386_v28 = vld [vmem:[#allocation3 + $0x1fc0] ss:$8 sps:$4 sm:$0xff]   ;;  %v19430_v53 = vld [vmem:[#allocation3 + $0x21e4] ss:$8 sps:$4 sm:$0xff]  }
 0xdf0   : > { %v9913_v60 = vshll.u32 %v9863_v30, 16  ;;  %v9927_v36 = vrot.slane %v9925_v9, 1  ;;  %v9911_v19 = vshrl.u32 %v9863_v30, 16  ;;  %v19389_v30 = vld [vmem:[#allocation3 + $0x1fd0] ss:$8 sps:$4 sm:$0xff]  }
 0xdf1   : > { %v9860_v10 = vld [vmem:[#allocation2 + $0x30] sm:$0x1]  ;;  %v9937_v37 = vshll.u32 %v9865_v6, 16  ;;  %v9935_v44 = vshrl.u32 %v9865_v6, 16  ;;  %v19394_v9 = vld [vmem:[#allocation3 + $0x1fe4] ss:$8 sps:$4 sm:$0xff]  }
 0xdf2   : > { %v9866_v12 = vpack.c.bf16 %v9860_v10, %v9860_v10  ;;  %v9915_v16 = vrot.slane %v9913_v60, 1  ;;  %v9928_v22 = vor.u32 %v9927_v36, %v9923_v17  ;;  %v9862_v43 = vld [vmem:[#allocation2 + $0x40] sm:$0x1]  ;;  %v19392_v10 = vld [vmem:[#allocation3 + $0x1fe0] ss:$8 sps:$4 sm:$0xff]  }
 0xdf3   : > { %v9861_v14 = vld [vmem:[#allocation2 + $0x38] sm:$0x1]  ;;  %v9868_v13 = vpack.c.bf16 %v9862_v43, %v9862_v43  ;;  %v9939_v41 = vrot.slane %v9937_v37, 1  ;;  %v19397_v60 = vld [vmem:[#allocation3 + $0x1ff4] ss:$8 sps:$4 sm:$0xff]  }
 0xdf4   : > { %v9867_v63 = vpack.c.bf16 %v9861_v14, %v9861_v14  ;;  %v9918_v15 = vshll.u32 %v9866_v12, 16  ;;  %v9916_v27 = vor.u32 %v9915_v16, %v9911_v19  ;;  %v19395_v12 = vld [vmem:[#allocation3 + $0x1ff0] ss:$8 sps:$4 sm:$0xff]   ;;  %v19400_v14 = vld [vmem:[#allocation3 + $0x2004] ss:$8 sps:$4 sm:$0xff]  }
 0xdf5   : > { %v9942_v39 = vshll.u32 %v9868_v13, 16  ;;  %v9940_v47 = vor.u32 %v9939_v41, %v9935_v44  ;;  %v19403_v36 = vld [vmem:[#allocation3 + $0x2014] ss:$8 sps:$4 sm:$0xff]   ;;  %v19406_v16 = vld [vmem:[#allocation3 + $0x2024] ss:$8 sps:$4 sm:$0xff]  }
 0xdf6   : > { %v9930_v46 = vshll.u32 %v9867_v63, 16  ;;  %v9920_v20 = vrot.slane %v9918_v15, 1  ;;  %v19398_v63 = vld [vmem:[#allocation3 + $0x2000] ss:$8 sps:$4 sm:$0xff]   ;;  %v19401_v15 = vld [vmem:[#allocation3 + $0x2010] ss:$8 sps:$4 sm:$0xff]  }
 0xdf7   : > { %v9944_v45 = vrot.slane %v9942_v39, 1  ;;  %v19404_v17 = vld [vmem:[#allocation3 + $0x2020] ss:$8 sps:$4 sm:$0xff]   ;;  %v19407_v19 = vld [vmem:[#allocation3 + $0x2030] ss:$8 sps:$4 sm:$0xff]  }
 0xdf8   : > { %v9932_v23 = vrot.slane %v9930_v46, 1  ;;  %v9921_v33 = vsel %vm360_vm2, %v9916_v27, %v9920_v20  ;;  %v19409_v46 = vld [vmem:[#allocation3 + $0x2034] ss:$8 sps:$4 sm:$0xff]   ;;  %v19412_v20 = vld [vmem:[#allocation3 + $0x2044] ss:$8 sps:$4 sm:$0xff]  }
 0xdf9   : > { %v9945_v49 = vsel %vm360_vm2, %v9940_v47, %v9944_v45  ;;  %v19415_v27 = vld [vmem:[#allocation3 + $0x2054] ss:$8 sps:$4 sm:$0xff]   ;;  %v10530_v34 = vld [vmem:[#allocation2 + $0x38] sm:$0x3]  ;;  %v19424_v13 = vld [vmem:[#allocation3 + $0x21c4] ss:$8 sps:$4 sm:$0xff]  }
 0xdfa   : > { %v9933_v31 = vsel %vm360_vm2, %v9928_v22, %v9932_v23  ;;  %v9807_v22 = vld [vmem:[#allocation2] sm:$0xff]  ;;  %v19410_v23 = vld [vmem:[#allocation3 + $0x2040] ss:$8 sps:$4 sm:$0xff]   ;;  %v10536_v6 = vpack.c.bf16 %v10530_v34, %v10530_v34 }
 0xdfb   : > { %10183 = vmatprep.mubr.bf16.mxu1 %v9933_v31  ;;  %v19413_v31 = vld [vmem:[#allocation3 + $0x2050] ss:$8 sps:$4 sm:$0xff]   ;;  %v19421_v43 = vld [vmem:[#allocation3 + $0x2074] ss:$8 sps:$4 sm:$0xff]   ;;  %v19422_v39 = vld [vmem:[#allocation3 + $0x21c0] ss:$8 sps:$4 sm:$0xff]  }
 0xdfc   : > { %10184 = vmatmul.mubr.bf16.vlgmr.msra.gmra.mrb[12].mxu1 %v9921_v33  ;;  %v19416_v33 = vld [vmem:[#allocation3 + $0x2060] ss:$8 sps:$4 sm:$0xff]   ;;  %v10589_v37 = vrot.slane %v10536_v6, 1  ;;  %v19425_v45 = vld [vmem:[#allocation3 + $0x21d0] ss:$8 sps:$4 sm:$0xff]  }
 0xdfd   : > { %10195 = vmatpush1.bf16.msra.mxu1 %v19350_v26  ;;  %10226 = vmatprep.mubr.bf16.mxu1 %v20306_v0  ;;  %v9813_v26 = vpack.c.bf16 %v20799_v29, %v9807_v22  ;;  %v19428_v47 = vld [vmem:[#allocation3 + $0x21e0] ss:$8 sps:$4 sm:$0xff]   ;;  %v10893_v22 = vld [vmem:[#allocation2 + $0x38] sm:$0x7] }
 0xdfe   : > { %10196 = vmatprep.subr.bf16.mxu1 %v19355_v4  ;;  %v19418_v4 = vld [vmem:[#allocation3 + $0x2064] ss:$8 sps:$4 sm:$0xff]  }
 0xe01   : > { %10197 = vmatpush1.bf16.msra.mxu1 %v19353_v11  ;;  %v10527_v11 = vld [vmem:[#allocation2 + $0x8] sm:$0xfc] }
 0xe02   : > { %10198 = vmatprep.subr.bf16.mxu1 %v19358_v25  ;;  %v19419_v25 = vld [vmem:[#allocation3 + $0x2070] ss:$8 sps:$4 sm:$0xff]  }
 0xe05   : > { %10199 = vmatpush1.bf16.msra.mxu1 %v19356_v35  ;;  %v10533_v35 = vpack.c.bf16 %v20794_v3, %v10527_v11 }
 0xe06   : > { %10200 = vmatprep.subr.bf16.mxu1 %v19361_v38  ;;  %v9809_v38 = vld [vmem:[#allocation2 + $0x10] sm:$0xff] }
 0xe07   : > { %v10588_v41 = vrot.slane %v10533_v35, 1 }
 0xe09   : > { %10201 = vmatpush1.bf16.msra.mxu1 %v19359_v40  ;;  %v9815_v40 = vpack.c.bf16 %v20803_v32, %v9809_v38  ;;  %v10590_v44 = vsel %vm1036_vm3, %v10588_v41, %v10589_v37 }
 0xe0a   : > { %10440 = vmatprep.subr.bf16.mxu1 %v19364_v42  ;;  %v19427_v42 = vld [vmem:[#allocation3 + $0x21d4] ss:$8 sps:$4 sm:$0xff]  }
 0xe0c   : > { %16808 = vmatmul.mubr.msk.bf16.vlgmr.msra.gmra.mrb[12].mxu1 %vm249_vm0, %v9945_v49  ;;  %v19436_v49 = vld [vmem:[#allocation3 + $0x2204] ss:$8 sps:$4 sm:$0xff]  }
 0xe0d   : > { %10441 = vmatpush1.bf16.msra.mxu1 %v19362_v48  ;;  %10472 = vmatprep.mubr.bf16.mxu1 %v9814_v50  ;;  %v19433_v48 = vld [vmem:[#allocation3 + $0x21f4] ss:$8 sps:$4 sm:$0xff]   ;;  %v19434_v50 = vld [vmem:[#allocation3 + $0x2200] ss:$8 sps:$4 sm:$0xff]  }
 0xe0e   : > { %10442 = vmatprep.subr.bf16.mxu1 %v19367_v61  ;;  %v19431_v61 = vld [vmem:[#allocation3 + $0x21f0] ss:$8 sps:$4 sm:$0xff]  }
 0xe11   : > { %10443 = vmatpush1.bf16.msra.mxu1 %v19365_v1  ;;  %v19439_v1 = vld [vmem:[#allocation3 + $0x2214] ss:$8 sps:$4 sm:$0xff]  }
 0xe12   : > { %10444 = vmatprep.subr.bf16.mxu1 %v19370_v51  ;;  %v19437_v51 = vld [vmem:[#allocation3 + $0x2210] ss:$8 sps:$4 sm:$0xff]  }
 0xe15   : > { %10445 = vmatpush1.bf16.msra.mxu1 %v19368_v52  ;;  %v19442_v52 = vld [vmem:[#allocation3 + $0x2224] ss:$8 sps:$4 sm:$0xff]  }
 0xe16   : > { %10446 = vmatprep.subr.bf16.mxu1 %v19373_v5  ;;  %v19440_v5 = vld [vmem:[#allocation3 + $0x2220] ss:$8 sps:$4 sm:$0xff]  }
 0xe19   : > { %10447 = vmatpush1.bf16.msra.mxu1 %v19371_v58  ;;  %v19445_v58 = vld [vmem:[#allocation3 + $0x2234] ss:$8 sps:$4 sm:$0xff]  }
 0xe1a   : > { %10448 = vmatprep.subr.bf16.mxu1 %v19376_v55  ;;  %v19443_v55 = vld [vmem:[#allocation3 + $0x2230] ss:$8 sps:$4 sm:$0xff]  }
 0xe1d   : > { %10449 = vmatpush1.bf16.msra.mxu1 %v19374_v57  ;;  %v19448_v57 = vld [vmem:[#allocation3 + $0x2244] ss:$8 sps:$4 sm:$0xff]  }
 0xe1e   : > { %10450 = vmatprep.subr.bf16.mxu1 %v19379_v59  ;;  %v19446_v59 = vld [vmem:[#allocation3 + $0x2240] ss:$8 sps:$4 sm:$0xff]  }
 0xe21   : > { %10451 = vmatpush1.bf16.msra.mxu1 %v19377_v62  ;;  %v19451_v62 = vld [vmem:[#allocation3 + $0x2254] ss:$8 sps:$4 sm:$0xff]  }
 0xe22   : > { %10452 = vmatprep.subr.bf16.mxu1 %v19382_v18  ;;  %v19449_v18 = vld [vmem:[#allocation3 + $0x2250] ss:$8 sps:$4 sm:$0xff]  }
 0xe25   : > { %10453 = vmatpush1.bf16.msra.mxu1 %v19380_v2  ;;  %v19454_v2 = vld [vmem:[#allocation3 + $0x2264] ss:$8 sps:$4 sm:$0xff]  }
 0xe26   : > { %10454 = vmatprep.subr.bf16.mxu1 %v19385_v21  ;;  %v19452_v21 = vld [vmem:[#allocation3 + $0x2260] ss:$8 sps:$4 sm:$0xff]  }
 0xe29   : > { %10455 = vmatpush1.bf16.msra.mxu1 %v19383_v54  ;;  %v19457_v54 = vld [vmem:[#allocation3 + $0x2274] ss:$8 sps:$4 sm:$0xff]  }
 0xe2a   : > { %10456 = vmatprep.subr.bf16.mxu1 %v19388_v24  ;;  %v19455_v24 = vld [vmem:[#allocation3 + $0x2270] ss:$8 sps:$4 sm:$0xff]  }
 0xe2d   : > { %10457 = vmatpush1.bf16.msra.mxu1 %v19386_v28  ;;  %v19460_v28 = vld [vmem:[#allocation3 + $0x2284] ss:$8 sps:$4 sm:$0xff]  }
 0xe2e   : > { %10458 = vmatprep.subr.bf16.mxu1 %v19391_v56  ;;  %v19458_v56 = vld [vmem:[#allocation3 + $0x2280] ss:$8 sps:$4 sm:$0xff]  }
 0xe31   : > { %10459 = vmatpush1.bf16.msra.mxu1 %v19389_v30  ;;  %v19463_v30 = vld [vmem:[#allocation3 + $0x2294] ss:$8 sps:$4 sm:$0xff]  }
 0xe32   : > { %10460 = vmatprep.subr.bf16.mxu1 %v19394_v9  ;;  %v19461_v9 = vld [vmem:[#allocation3 + $0x2290] ss:$8 sps:$4 sm:$0xff]  }
 0xe35   : > { %10461 = vmatpush1.bf16.msra.mxu1 %v19392_v10  ;;  %v19466_v10 = vld [vmem:[#allocation3 + $0x22a4] ss:$8 sps:$4 sm:$0xff]  }
 0xe36   : > { %10462 = vmatprep.subr.bf16.mxu1 %v19397_v60  ;;  %v10529_v60 = vld [vmem:[#allocation2 + $0x30] sm:$0x3] }
 0xe39   : > { %10463 = vmatpush1.bf16.msra.mxu1 %v19395_v12  ;;  %v19464_v12 = vld [vmem:[#allocation3 + $0x22a0] ss:$8 sps:$4 sm:$0xff]  }
 0xe3a   : > { %10464 = vmatprep.subr.bf16.mxu1 %v19400_v14  ;;  %v19469_v14 = vld [vmem:[#allocation3 + $0x22b4] ss:$8 sps:$4 sm:$0xff]  }
 0xe3d   : > { %10465 = vmatpush1.bf16.msra.mxu1 %v19398_v63  ;;  %v10535_v63 = vpack.c.bf16 %v10529_v60, %v10529_v60  ;;  %v19511_v60 = vld [vmem:[#allocation3 + $0x2394] ss:$8 sps:$4 sm:$0xff]  }
 0xe3e   : > { %10466 = vmatprep.subr.bf16.mxu1 %v19403_v36  ;;  %v10526_v36 = vld [vmem:[#allocation2] sm:$0xfc] }
 0xe41   : > { %10467 = vmatpush1.bf16.msra.mxu1 %v19401_v15  ;;  %v19467_v15 = vld [vmem:[#allocation3 + $0x22b0] ss:$8 sps:$4 sm:$0xff]  }
 0xe42   : > { %10468 = vmatprep.subr.bf16.mxu1 %v19406_v16  ;;  %v10532_v16 = vpack.c.bf16 %v20799_v29, %v10526_v36  ;;  %v19517_v36 = vld [vmem:[#allocation3 + $0x23b4] ss:$8 sps:$4 sm:$0xff]  }
 0xe45   : > { %10469 = vmatpush1.bf16.msra.mxu1 %v19404_v17  ;;  %v19472_v17 = vld [vmem:[#allocation3 + $0x22c4] ss:$8 sps:$4 sm:$0xff]  }
 0xe46   : > { %10470 = vmatprep.subr.bf16.mxu1 %v19409_v46  ;;  %v10586_v46 = vrot.slane %v10535_v63, 1  ;;  %v19512_v63 = vld [vmem:[#allocation3 + $0x23a0] ss:$8 sps:$4 sm:$0xff]  }
 0xe49   : > { %10471 = vmatpush1.bf16.msra.mxu1 %v19407_v19  ;;  %v10585_v19 = vrot.slane %v10532_v16, 1  ;;  %v19520_v16 = vld [vmem:[#allocation3 + $0x23c4] ss:$8 sps:$4 sm:$0xff]  }
 0xe4a   : > { %10483 = vmatprep.subr.bf16.mxu1 %v19412_v20  ;;  %v19470_v20 = vld [vmem:[#allocation3 + $0x22c0] ss:$8 sps:$4 sm:$0xff]  }
 0xe4c   : > { %10473 = vmatmul.mubr.bf16.vlgmr.msra.gmra.mrb[12].mxu1 %v9813_v26  ;;  %v10587_v26 = vsel %vm1036_vm3, %v10585_v19, %v10586_v46  ;;  %v19518_v46 = vld [vmem:[#allocation3 + $0x23c0] ss:$8 sps:$4 sm:$0xff]   ;;  %v19523_v19 = vld [vmem:[#allocation3 + $0x23d4] ss:$8 sps:$4 sm:$0xff]  }
 0xe4d   : > { %10484 = vmatpush1.bf16.msra.mxu1 %v19410_v23  ;;  %10515 = vmatprep.mubr.bf16.mxu1 %v20306_v0  ;;  %v19475_v23 = vld [vmem:[#allocation3 + $0x22d4] ss:$8 sps:$4 sm:$0xff]  }
 0xe4e   : > { %10485 = vmatprep.subr.bf16.mxu1 %v19415_v27  ;;  %v10890_v27 = vld [vmem:[#allocation2 + $0x8] sm:$0xf8] }
 0xe4f   : > { %v10896_v34 = vpack.c.bf16 %v20794_v3, %v10890_v27  ;;  %v19526_v27 = vld [vmem:[#allocation3 + $0x23e4] ss:$8 sps:$4 sm:$0xff]  }
 0xe51   : > { %10486 = vmatpush1.bf16.msra.mxu1 %v19413_v31  ;;  %v10899_v31 = vpack.c.bf16 %v10893_v22, %v10893_v22  ;;  %v10960_v35 = vshrl.u32 %v10896_v34, 16  ;;  %v10963_v37 = vshll.u32 %v10896_v34, 16  ;;  %v10889_v22 = vld [vmem:[#allocation2] sm:$0xf8] }
 0xe52   : > { %10487 = vmatprep.subr.bf16.mxu1 %v19418_v4  ;;  %v19473_v4 = vld [vmem:[#allocation3 + $0x22d0] ss:$8 sps:$4 sm:$0xff]  }
 0xe53   : > { %v10968_v11 = vshrl.u32 %v10899_v31, 16  ;;  %v10971_v6 = vshll.u32 %v10899_v31, 16 }
 0xe55   : > { %10488 = vmatpush1.bf16.msra.mxu1 %v19416_v33  ;;  %v19478_v33 = vld [vmem:[#allocation3 + $0x22e4] ss:$8 sps:$4 sm:$0xff]   ;;  %v10973_v41 = vrot.slane %v10971_v6, 2 }
 0xe56   : > { %10489 = vmatprep.subr.bf16.mxu1 %v19421_v43  ;;  %v10531_v43 = vld [vmem:[#allocation2 + $0x40] sm:$0x3] }
 0xe57   : > { %v10537_v38 = vpack.c.bf16 %v10531_v43, %v10531_v43 }
 0xe59   : > { %10490 = vmatpush1.bf16.msra.mxu1 %v19419_v25  ;;  %v19476_v25 = vld [vmem:[#allocation3 + $0x22e0] ss:$8 sps:$4 sm:$0xff]  }
 0xe5a   : > { %10799 = vmatprep.subr.bf16.mxu1 %v19424_v13  ;;  %v19481_v13 = vld [vmem:[#allocation3 + $0x22f4] ss:$8 sps:$4 sm:$0xff]  }
 0xe5c   : > { %16849 = vmatmul.mubr.msk.bf16.vlgmr.msra.gmra.mrb[12].mxu1 %vm249_vm0, %v9815_v40  ;;  %v10970_v40 = vrot.slane %v10968_v11, 1  ;;  %v19529_v11 = vld [vmem:[#allocation3 + $0x23f4] ss:$8 sps:$4 sm:$0xff]  }
 0xe5d   : > { %10800 = vmatpush1.bf16.msra.mxu1 %v19422_v39  ;;  %10831 = vmatprep.mubr.bf16.mxu1 %v10590_v44  ;;  %v10528_v39 = vld [vmem:[#allocation2 + $0x10] sm:$0xfc] }
 0xe5e   : > { %10801 = vmatprep.subr.bf16.mxu1 %v19427_v42  ;;  %v19479_v42 = vld [vmem:[#allocation3 + $0x22f0] ss:$8 sps:$4 sm:$0xff]   ;;  %v10534_v44 = vpack.c.bf16 %v20803_v32, %v10528_v39 }
 0xe61   : > { %10802 = vmatpush1.bf16.msra.mxu1 %v19425_v45  ;;  %v19484_v45 = vld [vmem:[#allocation3 + $0x2304] ss:$8 sps:$4 sm:$0xff]  }
 0xe62   : > { %10803 = vmatprep.subr.bf16.mxu1 %v19430_v53  ;;  %v10962_v53 = vrot.slane %v10960_v35, 1 }
 0xe65   : > { %10804 = vmatpush1.bf16.msra.mxu1 %v19428_v47  ;;  %v10965_v47 = vrot.slane %v10963_v37, 2 }
 0xe66   : > { %10805 = vmatprep.subr.bf16.mxu1 %v19433_v48  ;;  %v10592_v48 = vrot.slane %v10537_v38, 1  ;;  %v19532_v38 = vld [vmem:[#allocation3 + $0x2404] ss:$8 sps:$4 sm:$0xff]  }
 0xe69   : > { %10806 = vmatpush1.bf16.msra.mxu1 %v19431_v61  ;;  %v10974_v61 = vor.u32 %v10973_v41, %v10970_v40  ;;  %v10894_v40 = vld [vmem:[#allocation2 + $0x40] sm:$0x7] }
 0xe6a   : > { %10807 = vmatprep.subr.bf16.mxu1 %v19436_v49  ;;  %v10591_v49 = vrot.slane %v10534_v44, 1  ;;  %v19535_v44 = vld [vmem:[#allocation3 + $0x2414] ss:$8 sps:$4 sm:$0xff]  }
 0xe6d   : > { %10808 = vmatpush1.bf16.msra.mxu1 %v19434_v50  ;;  %v19482_v50 = vld [vmem:[#allocation3 + $0x2300] ss:$8 sps:$4 sm:$0xff]  }
 0xe6e   : > { %10809 = vmatprep.subr.bf16.mxu1 %v19439_v1  ;;  %v10966_v1 = vor.u32 %v10965_v47, %v10962_v53  ;;  %v10900_v53 = vpack.c.bf16 %v10894_v40, %v10894_v40  ;;  %v10891_v47 = vld [vmem:[#allocation2 + $0x10] sm:$0xf8] }
 0xe6f   : > { %v19586_v40 = vld [vmem:[#allocation3 + $0x2524] ss:$8 sps:$4 sm:$0xff]  }
 0xe71   : > { %10810 = vmatpush1.bf16.msra.mxu1 %v19437_v51  ;;  %v19487_v51 = vld [vmem:[#allocation3 + $0x2314] ss:$8 sps:$4 sm:$0xff]  }
 0xe72   : > { %10811 = vmatprep.subr.bf16.mxu1 %v19442_v52  ;;  %v10593_v52 = vsel %vm1036_vm3, %v10591_v49, %v10592_v48  ;;  %v19533_v48 = vld [vmem:[#allocation3 + $0x2410] ss:$8 sps:$4 sm:$0xff]   ;;  %v19538_v49 = vld [vmem:[#allocation3 + $0x2424] ss:$8 sps:$4 sm:$0xff]  }
 0xe75   : > { %10812 = vmatpush1.bf16.msra.mxu1 %v19440_v5  ;;  %v10975_v5 = vsel %vm1394_vm4, %v10966_v1, %v10974_v61  ;;  %v10897_v61 = vpack.c.bf16 %v20803_v32, %v10891_v47  ;;  %v10988_v1 = vshll.u32 %v10900_v53, 16  ;;  %v19587_v47 = vld [vmem:[#allocation3 + $0x2530] ss:$8 sps:$4 sm:$0xff]  }
 0xe76   : > { %10813 = vmatprep.subr.bf16.mxu1 %v19445_v58  ;;  %v19485_v58 = vld [vmem:[#allocation3 + $0x2310] ss:$8 sps:$4 sm:$0xff]  }
 0xe79   : > { %10814 = vmatpush1.bf16.msra.mxu1 %v19443_v55  ;;  %v19490_v55 = vld [vmem:[#allocation3 + $0x2324] ss:$8 sps:$4 sm:$0xff]  }
 0xe7a   : > { %10815 = vmatprep.subr.bf16.mxu1 %v19448_v57  ;;  %v19488_v57 = vld [vmem:[#allocation3 + $0x2320] ss:$8 sps:$4 sm:$0xff]  }
 0xe7d   : > { %10816 = vmatpush1.bf16.msra.mxu1 %v19446_v59  ;;  %v19493_v59 = vld [vmem:[#allocation3 + $0x2334] ss:$8 sps:$4 sm:$0xff]  }
 0xe7e   : > { %10817 = vmatprep.subr.bf16.mxu1 %v19451_v62  ;;  %v19491_v62 = vld [vmem:[#allocation3 + $0x2330] ss:$8 sps:$4 sm:$0xff]  }
 0xe81   : > { %10818 = vmatpush1.bf16.msra.mxu1 %v19449_v18  ;;  %v19496_v18 = vld [vmem:[#allocation3 + $0x2344] ss:$8 sps:$4 sm:$0xff]  }
 0xe82   : > { %10819 = vmatprep.subr.bf16.mxu1 %v19454_v2  ;;  %v19494_v2 = vld [vmem:[#allocation3 + $0x2340] ss:$8 sps:$4 sm:$0xff]  }
 0xe85   : > { %10820 = vmatpush1.bf16.msra.mxu1 %v19452_v21  ;;  %v19499_v21 = vld [vmem:[#allocation3 + $0x2354] ss:$8 sps:$4 sm:$0xff]  }
 0xe86   : > { %10821 = vmatprep.subr.bf16.mxu1 %v19457_v54  ;;  %v19497_v54 = vld [vmem:[#allocation3 + $0x2350] ss:$8 sps:$4 sm:$0xff]  }
 0xe89   : > { %10822 = vmatpush1.bf16.msra.mxu1 %v19455_v24  ;;  %v19502_v24 = vld [vmem:[#allocation3 + $0x2364] ss:$8 sps:$4 sm:$0xff]  }
 0xe8a   : > { %10823 = vmatprep.subr.bf16.mxu1 %v19460_v28  ;;  %v19500_v28 = vld [vmem:[#allocation3 + $0x2360] ss:$8 sps:$4 sm:$0xff]  }
 0xe8d   : > { %10824 = vmatpush1.bf16.msra.mxu1 %v19458_v56  ;;  %v19505_v56 = vld [vmem:[#allocation3 + $0x2374] ss:$8 sps:$4 sm:$0xff]  }
 0xe8e   : > { %10825 = vmatprep.subr.bf16.mxu1 %v19463_v30  ;;  %v19503_v30 = vld [vmem:[#allocation3 + $0x2370] ss:$8 sps:$4 sm:$0xff]  }
 0xe91   : > { %10826 = vmatpush1.bf16.msra.mxu1 %v19461_v9  ;;  %v19508_v9 = vld [vmem:[#allocation3 + $0x2384] ss:$8 sps:$4 sm:$0xff]  }
 0xe92   : > { %10827 = vmatprep.subr.bf16.mxu1 %v19466_v10  ;;  %v19506_v10 = vld [vmem:[#allocation3 + $0x2380] ss:$8 sps:$4 sm:$0xff]  }
 0xe95   : > { %10828 = vmatpush1.bf16.msra.mxu1 %v19464_v12  ;;  %v19509_v12 = vld [vmem:[#allocation3 + $0x2390] ss:$8 sps:$4 sm:$0xff]  }
 0xe96   : > { %10829 = vmatprep.subr.bf16.mxu1 %v19469_v14  ;;  %v19514_v14 = vld [vmem:[#allocation3 + $0x23a4] ss:$8 sps:$4 sm:$0xff]  }
 0xe99   : > { %10830 = vmatpush1.bf16.msra.mxu1 %v19467_v15  ;;  %v19515_v15 = vld [vmem:[#allocation3 + $0x23b0] ss:$8 sps:$4 sm:$0xff]  }
 0xe9a   : > { %10842 = vmatprep.subr.bf16.mxu1 %v19472_v17  ;;  %v10892_v17 = vld [vmem:[#allocation2 + $0x30] sm:$0x7] }
 0xe9c   : > { %10832 = vmatmul.mubr.bf16.vlgmr.msra.gmra.mrb[12].mxu1 %v10587_v26  ;;  %v10895_v26 = vpack.c.bf16 %v20799_v29, %v10889_v22  ;;  %v19557_v22 = vld [vmem:[#allocation3 + $0x2490] ss:$8 sps:$4 sm:$0xff]  }
 0xe9d   : > { %10843 = vmatpush1.bf16.msra.mxu1 %v19470_v20  ;;  %10874 = vmatprep.mubr.bf16.mxu1 %v20306_v0  ;;  %v10898_v20 = vpack.c.bf16 %v10892_v17, %v10892_v17  ;;  %v19551_v17 = vld [vmem:[#allocation3 + $0x2470] ss:$8 sps:$4 sm:$0xff]  }
 0xe9e   : > { %10844 = vmatprep.subr.bf16.mxu1 %v19475_v23  ;;  %v19521_v23 = vld [vmem:[#allocation3 + $0x23d0] ss:$8 sps:$4 sm:$0xff]   ;;  %v10943_v34 = vshrl.u32 %v10895_v26, 16  ;;  %v10946_v43 = vshll.u32 %v10895_v26, 16  ;;  %v19560_v26 = vld [vmem:[#allocation3 + $0x24a0] ss:$8 sps:$4 sm:$0xff]  }
 0xe9f   : > { %v10951_v31 = vshrl.u32 %v10898_v20, 16 }
 0xea0   : > { %v10945_v35 = vrot.slane %v10943_v34, 1  ;;  %v10948_v37 = vrot.slane %v10946_v43, 2  ;;  %v19571_v34 = vld [vmem:[#allocation3 + $0x24d4] ss:$8 sps:$4 sm:$0xff]   ;;  %v19569_v43 = vld [vmem:[#allocation3 + $0x24d0] ss:$8 sps:$4 sm:$0xff]  }
 0xea1   : > { %10845 = vmatpush1.bf16.msra.mxu1 %v19473_v4  ;;  %v10954_v4 = vshll.u32 %v10898_v20, 16  ;;  %v10953_v6 = vrot.slane %v10951_v31, 1  ;;  %v19559_v20 = vld [vmem:[#allocation3 + $0x2494] ss:$8 sps:$4 sm:$0xff]   ;;  %v19563_v31 = vld [vmem:[#allocation3 + $0x24b0] ss:$8 sps:$4 sm:$0xff]  }
 0xea2   : > { %10846 = vmatprep.subr.bf16.mxu1 %v19478_v33  ;;  %v19524_v33 = vld [vmem:[#allocation3 + $0x23e0] ss:$8 sps:$4 sm:$0xff]   ;;  %v10949_v41 = vor.u32 %v10948_v37, %v10945_v35  ;;  %v19580_v35 = vld [vmem:[#allocation3 + $0x2504] ss:$8 sps:$4 sm:$0xff]  }
 0xea3   : > { %v19578_v37 = vld [vmem:[#allocation3 + $0x2500] ss:$8 sps:$4 sm:$0xff]  }
 0xea5   : > { %10847 = vmatpush1.bf16.msra.mxu1 %v19476_v25  ;;  %v10956_v25 = vrot.slane %v10954_v4, 2  ;;  %v19568_v4 = vld [vmem:[#allocation3 + $0x24c4] ss:$8 sps:$4 sm:$0xff]  }
 0xea6   : > { %10848 = vmatprep.subr.bf16.mxu1 %v19481_v13  ;;  %v19527_v13 = vld [vmem:[#allocation3 + $0x23f0] ss:$8 sps:$4 sm:$0xff]  }
 0xea7   : > { %v10957_v39 = vor.u32 %v10956_v25, %v10953_v6  ;;  %v19572_v6 = vld [vmem:[#allocation3 + $0x24e0] ss:$8 sps:$4 sm:$0xff]   ;;  %v19577_v25 = vld [vmem:[#allocation3 + $0x24f4] ss:$8 sps:$4 sm:$0xff]  }
 0xea9   : > { %10849 = vmatpush1.bf16.msra.mxu1 %v19479_v42  ;;  %v19530_v42 = vld [vmem:[#allocation3 + $0x2400] ss:$8 sps:$4 sm:$0xff]  }
 0xeaa   : > { %11198 = vmatprep.subr.bf16.mxu1 %v19484_v45  ;;  %v10958_v45 = vsel %vm1394_vm4, %v10949_v41, %v10957_v39  ;;  %v19581_v39 = vld [vmem:[#allocation3 + $0x2510] ss:$8 sps:$4 sm:$0xff]   ;;  %v11291_v41 = vld [vmem:[#allocation2 + $0x30] sm:$0xf] }
 0xeac   : > { %16890 = vmatmul.mubr.msk.bf16.vlgmr.msra.gmra.mrb[12].mxu1 %vm249_vm0, %v10593_v52  ;;  %v10977_v52 = vshrl.u32 %v10897_v61, 16 }
 0xead   : > { %11199 = vmatpush1.bf16.msra.mxu1 %v19482_v50  ;;  %11230 = vmatprep.mubr.bf16.mxu1 %v10975_v5  ;;  %v10985_v50 = vshrl.u32 %v10900_v53, 16  ;;  %v10980_v5 = vshll.u32 %v10897_v61, 16  ;;  %v11288_v53 = vld [vmem:[#allocation2] sm:$0xf0]  ;;  %v19592_v61 = vld [vmem:[#allocation3 + $0x2544] ss:$8 sps:$4 sm:$0xff]  }
 0xeae   : > { %11200 = vmatprep.subr.bf16.mxu1 %v19487_v51  ;;  %v19536_v51 = vld [vmem:[#allocation3 + $0x2420] ss:$8 sps:$4 sm:$0xff]  }
 0xeb1   : > { %11201 = vmatpush1.bf16.msra.mxu1 %v19485_v58  ;;  %v11292_v58 = vld [vmem:[#allocation2 + $0x38] sm:$0xf] }
 0xeb2   : > { %11202 = vmatprep.subr.bf16.mxu1 %v19490_v55  ;;  %v19541_v55 = vld [vmem:[#allocation3 + $0x2434] ss:$8 sps:$4 sm:$0xff]  }
 0xeb5   : > { %11203 = vmatpush1.bf16.msra.mxu1 %v19488_v57  ;;  %v10987_v57 = vrot.slane %v10985_v50, 1 }
 0xeb6   : > { %11204 = vmatprep.subr.bf16.mxu1 %v19493_v59  ;;  %v10990_v59 = vrot.slane %v10988_v1, 2  ;;  %v19590_v1 = vld [vmem:[#allocation3 + $0x2540] ss:$8 sps:$4 sm:$0xff]  }
 0xeb9   : > { %11205 = vmatpush1.bf16.msra.mxu1 %v19491_v62  ;;  %v11289_v62 = vld [vmem:[#allocation2 + $0x8] sm:$0xf0] }
 0xeba   : > { %11206 = vmatprep.subr.bf16.mxu1 %v19496_v18  ;;  %v11298_v18 = vpack.c.bf16 %v11292_v58, %v11292_v58  ;;  %v19598_v58 = vld [vmem:[#allocation3 + $0x2564] ss:$8 sps:$4 sm:$0xff]  }
 0xebd   : > { %11207 = vmatpush1.bf16.msra.mxu1 %v19494_v2  ;;  %v19539_v2 = vld [vmem:[#allocation3 + $0x2430] ss:$8 sps:$4 sm:$0xff]  }
 0xebe   : > { %11208 = vmatprep.subr.bf16.mxu1 %v19499_v21  ;;  %v10979_v21 = vrot.slane %v10977_v52, 1 }
 0xec1   : > { %11209 = vmatpush1.bf16.msra.mxu1 %v19497_v54  ;;  %v10982_v54 = vrot.slane %v10980_v5, 2  ;;  %v19593_v5 = vld [vmem:[#allocation3 + $0x2550] ss:$8 sps:$4 sm:$0xff]  }
 0xec2   : > { %11210 = vmatprep.subr.bf16.mxu1 %v19502_v24  ;;  %v19544_v24 = vld [vmem:[#allocation3 + $0x2444] ss:$8 sps:$4 sm:$0xff]  }
 0xec5   : > { %11211 = vmatpush1.bf16.msra.mxu1 %v19500_v28  ;;  %v11295_v28 = vpack.c.bf16 %v20794_v3, %v11289_v62  ;;  %v19548_v3 = vld [vmem:[#allocation3 + $0x2460] ss:$8 sps:$4 sm:$0xff]   ;;  %v11290_v62 = vld [vmem:[#allocation2 + $0x10] sm:$0xf0] }
 0xec6   : > { %11212 = vmatprep.subr.bf16.mxu1 %v19505_v56  ;;  %v10991_v56 = vor.u32 %v10990_v59, %v10987_v57  ;;  %v19601_v57 = vld [vmem:[#allocation3 + $0x2574] ss:$8 sps:$4 sm:$0xff]  }
 0xec9   : > { %11213 = vmatpush1.bf16.msra.mxu1 %v19503_v30  ;;  %v11351_v30 = vrot.slane %v11298_v18, 2  ;;  %v19599_v18 = vld [vmem:[#allocation3 + $0x2570] ss:$8 sps:$4 sm:$0xff]  }
 0xeca   : > { %11214 = vmatprep.subr.bf16.mxu1 %v19508_v9  ;;  %v10983_v9 = vor.u32 %v10982_v54, %v10979_v21 }
 0xecd   : > { %11215 = vmatpush1.bf16.msra.mxu1 %v19506_v10  ;;  %v19542_v10 = vld [vmem:[#allocation3 + $0x2440] ss:$8 sps:$4 sm:$0xff]  }
 0xece   : > { %11216 = vmatprep.subr.bf16.mxu1 %v19511_v60  ;;  %v11350_v60 = vrot.slane %v11295_v28, 2  ;;  %v19602_v28 = vld [vmem:[#allocation3 + $0x26c0] ss:$8 sps:$4 sm:$0xff]  }
 0xed1   : > { %11217 = vmatpush1.bf16.msra.mxu1 %v19509_v12  ;;  %v19547_v12 = vld [vmem:[#allocation3 + $0x2454] ss:$8 sps:$4 sm:$0xff]  }
 0xed2   : > { %11218 = vmatprep.subr.bf16.mxu1 %v19514_v14  ;;  %v10992_v14 = vsel %vm1394_vm4, %v10983_v9, %v10991_v56  ;;  %v19604_v56 = vld [vmem:[#allocation3 + $0x26c4] ss:$8 sps:$4 sm:$0xff]   ;;  %v19605_v9 = vld [vmem:[#allocation3 + $0x26d0] ss:$8 sps:$4 sm:$0xff]  }
 0xed3   : > { %12059 = vmatprep.subr.bf16.mxu0 %v19604_v56 }
 0xed4   : > { %12060 = vmatpush1.bf16.msra.mxu0 %v19602_v28 }
 0xed5   : > { %11219 = vmatpush1.bf16.msra.mxu1 %v19512_v63  ;;  %v11352_v63 = vsel %vm1800_vm5, %v11350_v60, %v11351_v30  ;;  %v19607_v30 = vld [vmem:[#allocation3 + $0x26d4] ss:$8 sps:$4 sm:$0xff]   ;;  %v19608_v60 = vld [vmem:[#allocation3 + $0x26e0] ss:$8 sps:$4 sm:$0xff]  }
 0xed6   : > { %11220 = vmatprep.subr.bf16.mxu1 %v19517_v36  ;;  %v19545_v36 = vld [vmem:[#allocation3 + $0x2450] ss:$8 sps:$4 sm:$0xff]   ;;  %12061 = vmatprep.subr.bf16.mxu0 %v19607_v30 }
 0xed8   : > { %12062 = vmatpush1.bf16.msra.mxu0 %v19605_v9 }
 0xed9   : > { %11221 = vmatpush1.bf16.msra.mxu1 %v19515_v15  ;;  %v19550_v15 = vld [vmem:[#allocation3 + $0x2464] ss:$8 sps:$4 sm:$0xff]  }
 0xeda   : > { %11222 = vmatprep.subr.bf16.mxu1 %v19520_v16  ;;  %v19553_v16 = vld [vmem:[#allocation3 + $0x2474] ss:$8 sps:$4 sm:$0xff]  }
 0xedd   : > { %11223 = vmatpush1.bf16.msra.mxu1 %v19518_v46  ;;  %v19556_v46 = vld [vmem:[#allocation3 + $0x2484] ss:$8 sps:$4 sm:$0xff]  }
 0xede   : > { %11224 = vmatprep.subr.bf16.mxu1 %v19523_v19  ;;  %v19554_v19 = vld [vmem:[#allocation3 + $0x2480] ss:$8 sps:$4 sm:$0xff]  }
 0xee1   : > { %11225 = vmatpush1.bf16.msra.mxu1 %v19521_v23  ;;  %v19562_v23 = vld [vmem:[#allocation3 + $0x24a4] ss:$8 sps:$4 sm:$0xff]  }
 0xee2   : > { %11226 = vmatprep.subr.bf16.mxu1 %v19526_v27  ;;  %v19565_v27 = vld [vmem:[#allocation3 + $0x24b4] ss:$8 sps:$4 sm:$0xff]  }
 0xee5   : > { %11227 = vmatpush1.bf16.msra.mxu1 %v19524_v33  ;;  %v19566_v33 = vld [vmem:[#allocation3 + $0x24c0] ss:$8 sps:$4 sm:$0xff]  }
 0xee6   : > { %11228 = vmatprep.subr.bf16.mxu1 %v19529_v11  ;;  %v19574_v11 = vld [vmem:[#allocation3 + $0x24e4] ss:$8 sps:$4 sm:$0xff]  }
 0xee9   : > { %11229 = vmatpush1.bf16.msra.mxu1 %v19527_v13  ;;  %v19575_v13 = vld [vmem:[#allocation3 + $0x24f0] ss:$8 sps:$4 sm:$0xff]  }
 0xeea   : > { %11241 = vmatprep.subr.bf16.mxu1 %v19532_v38  ;;  %v19583_v38 = vld [vmem:[#allocation3 + $0x2514] ss:$8 sps:$4 sm:$0xff]  }
 0xeec   : > { %11231 = vmatmul.mubr.bf16.vlgmr.msra.gmra.mrb[12].mxu1 %v10958_v45  ;;  %v11297_v45 = vpack.c.bf16 %v11291_v41, %v11291_v41 }
 0xeed   : > { %11242 = vmatpush1.bf16.msra.mxu1 %v19530_v42  ;;  %11273 = vmatprep.mubr.bf16.mxu1 %v20306_v0  ;;  %v19584_v42 = vld [vmem:[#allocation3 + $0x2520] ss:$8 sps:$4 sm:$0xff]  }
 0xeee   : > { %11243 = vmatprep.subr.bf16.mxu1 %v19535_v44  ;;  %v19589_v44 = vld [vmem:[#allocation3 + $0x2534] ss:$8 sps:$4 sm:$0xff]  }
 0xef1   : > { %11244 = vmatpush1.bf16.msra.mxu1 %v19533_v48  ;;  %v11294_v48 = vpack.c.bf16 %v20799_v29, %v11288_v53  ;;  %v19596_v29 = vld [vmem:[#allocation3 + $0x2560] ss:$8 sps:$4 sm:$0xff]  }
 0xef2   : > { %11245 = vmatprep.subr.bf16.mxu1 %v19538_v49  ;;  %v11348_v49 = vrot.slane %v11297_v45, 2 }
 0xef3   : > { %v11347_v50 = vrot.slane %v11294_v48, 2 }
 0xef5   : > { %11246 = vmatpush1.bf16.msra.mxu1 %v19536_v51  ;;  %v19595_v51 = vld [vmem:[#allocation3 + $0x2554] ss:$8 sps:$4 sm:$0xff]   ;;  %v11349_v52 = vsel %vm1800_vm5, %v11347_v50, %v11348_v49  ;;  %v19641_v50 = vld [vmem:[#allocation3 + $0x2790] ss:$8 sps:$4 sm:$0xff]  }
 0xef6   : > { %11247 = vmatprep.subr.bf16.mxu1 %v19541_v55  ;;  %v11293_v55 = vld [vmem:[#allocation2 + $0x40] sm:$0xf] }
 0xef7   : > { %v11299_v59 = vpack.c.bf16 %v11293_v55, %v11293_v55  ;;  %v19649_v55 = vld [vmem:[#allocation3 + $0x27b4] ss:$8 sps:$4 sm:$0xff]  }
 0xef9   : > { %11248 = vmatpush1.bf16.msra.mxu1 %v19539_v2  ;;  %v11296_v2 = vpack.c.bf16 %v20803_v32, %v11290_v62  ;;  %v11354_v21 = vrot.slane %v11299_v59, 2  ;;  %v19613_v32 = vld [vmem:[#allocation3 + $0x26f4] ss:$8 sps:$4 sm:$0xff]  }
 0xefa   : > { %11561 = vmatprep.subr.bf16.mxu1 %v19544_v24 }
 0xefb   : > { %v11353_v54 = vrot.slane %v11296_v2, 2 }
 0xefc   : > { %16931 = vmatmul.mubr.msk.bf16.vlgmr.msra.gmra.mrb[12].mxu1 %vm249_vm0, %v10992_v14  ;;  %v19616_v14 = vld [vmem:[#allocation3 + $0x2704] ss:$8 sps:$4 sm:$0xff]  }
 0xefd   : > { %11562 = vmatpush1.bf16.msra.mxu1 %v19542_v10  ;;  %11593 = vmatprep.mubr.bf16.mxu1 %v11352_v63  ;;  %v11355_v24 = vsel %vm1800_vm5, %v11353_v54, %v11354_v21  ;;  %v19610_v10 = vld [vmem:[#allocation3 + $0x26e4] ss:$8 sps:$4 sm:$0xff]   ;;  %v19614_v63 = vld [vmem:[#allocation3 + $0x2700] ss:$8 sps:$4 sm:$0xff]  }
 0xefe   : > { %11563 = vmatprep.subr.bf16.mxu1 %v19547_v12  ;;  %12063 = vmatprep.subr.bf16.mxu0 %v19610_v10  ;;  %v19611_v12 = vld [vmem:[#allocation3 + $0x26f0] ss:$8 sps:$4 sm:$0xff]  }
 0xeff   : > { %12064 = vmatpush1.bf16.msra.mxu0 %v19608_v60 }
 0xf00   : > { %12065 = vmatprep.subr.bf16.mxu0 %v19613_v32 }
 0xf01   : > { %11564 = vmatpush1.bf16.msra.mxu1 %v19545_v36  ;;  %v19619_v36 = vld [vmem:[#allocation3 + $0x2714] ss:$8 sps:$4 sm:$0xff]  }
 0xf02   : > { %11565 = vmatprep.subr.bf16.mxu1 %v19550_v15  ;;  %v19617_v15 = vld [vmem:[#allocation3 + $0x2710] ss:$8 sps:$4 sm:$0xff]  }
 0xf03   : > { %12066 = vmatpush1.bf16.msra.mxu0 %v19611_v12 }
 0xf04   : > { %12067 = vmatprep.subr.bf16.mxu0 %v19616_v14 }
 0xf05   : > { %11566 = vmatpush1.bf16.msra.mxu1 %v19548_v3  ;;  %v19622_v3 = vld [vmem:[#allocation3 + $0x2724] ss:$8 sps:$4 sm:$0xff]  }
 0xf06   : > { %11567 = vmatprep.subr.bf16.mxu1 %v19553_v16  ;;  %v19620_v16 = vld [vmem:[#allocation3 + $0x2720] ss:$8 sps:$4 sm:$0xff]  }
 0xf07   : > { %12068 = vmatpush1.bf16.msra.mxu0 %v19614_v63 }
 0xf08   : > { %12069 = vmatprep.subr.bf16.mxu0 %v19619_v36 }
 0xf09   : > { %11568 = vmatpush1.bf16.msra.mxu1 %v19551_v17  ;;  %v19625_v17 = vld [vmem:[#allocation3 + $0x2734] ss:$8 sps:$4 sm:$0xff]  }
 0xf0a   : > { %11569 = vmatprep.subr.bf16.mxu1 %v19556_v46  ;;  %v19623_v46 = vld [vmem:[#allocation3 + $0x2730] ss:$8 sps:$4 sm:$0xff]  }
 0xf0b   : > { %12070 = vmatpush1.bf16.msra.mxu0 %v19617_v15 }
 0xf0c   : > { %12071 = vmatprep.subr.bf16.mxu0 %v19622_v3 }
 0xf0d   : > { %11570 = vmatpush1.bf16.msra.mxu1 %v19554_v19  ;;  %v19628_v19 = vld [vmem:[#allocation3 + $0x2744] ss:$8 sps:$4 sm:$0xff]  }
 0xf0e   : > { %11571 = vmatprep.subr.bf16.mxu1 %v19559_v20  ;;  %v19626_v20 = vld [vmem:[#allocation3 + $0x2740] ss:$8 sps:$4 sm:$0xff]  }
 0xf0f   : > { %12072 = vmatpush1.bf16.msra.mxu0 %v19620_v16 }
 0xf10   : > { %12073 = vmatprep.subr.bf16.mxu0 %v19625_v17 }
 0xf11   : > { %11572 = vmatpush1.bf16.msra.mxu1 %v19557_v22  ;;  %v19631_v22 = vld [vmem:[#allocation3 + $0x2754] ss:$8 sps:$4 sm:$0xff]  }
 0xf12   : > { %11573 = vmatprep.subr.bf16.mxu1 %v19562_v23  ;;  %v19629_v23 = vld [vmem:[#allocation3 + $0x2750] ss:$8 sps:$4 sm:$0xff]  }
 0xf13   : > { %12074 = vmatpush1.bf16.msra.mxu0 %v19623_v46 }
 0xf14   : > { %12075 = vmatprep.subr.bf16.mxu0 %v19628_v19 }
 0xf15   : > { %11574 = vmatpush1.bf16.msra.mxu1 %v19560_v26  ;;  %v16973_v26 = vld [vmem:[%s21138_s2 + $0xa] sm:$0x3] }
 0xf16   : > { %11575 = vmatprep.subr.bf16.mxu1 %v19565_v27  ;;  %v19632_v27 = vld [vmem:[#allocation3 + $0x2760] ss:$8 sps:$4 sm:$0xff]  }
 0xf17   : > { %12076 = vmatpush1.bf16.msra.mxu0 %v19626_v20 }
 0xf18   : > { %12077 = vmatprep.subr.bf16.mxu0 %v19631_v22 }
 0xf19   : > { %11576 = vmatpush1.bf16.msra.mxu1 %v19563_v31  ;;  %v19634_v31 = vld [vmem:[#allocation3 + $0x2764] ss:$8 sps:$4 sm:$0xff]  }
 0xf1a   : > { %11577 = vmatprep.subr.bf16.mxu1 %v19568_v4  ;;  %v11657_v4 = vrot.slane %v16973_v26, %v20509_v7 }
 0xf1b   : > { %12078 = vmatpush1.bf16.msra.mxu0 %v19629_v23 }
 0xf1c   : > { %12079 = vmatprep.subr.bf16.mxu0 %v19634_v31  ;;  %v19650_v31 = vld [vmem:[#allocation3 + $0x27c0] ss:$8 sps:$4 sm:$0xff]  }
 0xf1d   : > { %11578 = vmatpush1.bf16.msra.mxu1 %v19566_v33  ;;  %v11661_v33 = vrot.slane %v16973_v26, %v20511_v8 }
 0xf1e   : > { %11579 = vmatprep.subr.bf16.mxu1 %v19571_v34  ;;  %v19635_v34 = vld [vmem:[#allocation3 + $0x2770] ss:$8 sps:$4 sm:$0xff]  }
 0xf1f   : > { %12080 = vmatpush1.bf16.msra.mxu0 %v19632_v27 }
 0xf21   : > { %11580 = vmatpush1.bf16.msra.mxu1 %v19569_v43  ;;  %v19637_v43 = vld [vmem:[#allocation3 + $0x2774] ss:$8 sps:$4 sm:$0xff]  }
 0xf22   : > { %11581 = vmatprep.subr.bf16.mxu1 %v19574_v11  ;;  %12081 = vmatprep.subr.bf16.mxu0 %v19637_v43 }
 0xf23   : > { %12082 = vmatpush1.bf16.msra.mxu0 %v19635_v34  ;;  %v19655_v34 = vld [vmem:[#allocation3 + $0x27d4] ss:$8 sps:$4 sm:$0xff]  }
 0xf25   : > { %11582 = vmatpush1.bf16.msra.mxu1 %v19572_v6 }
 0xf26   : > { %11583 = vmatprep.subr.bf16.mxu1 %v19577_v25 }
 0xf29   : > { %11584 = vmatpush1.bf16.msra.mxu1 %v19575_v13 }
 0xf2a   : > { %11585 = vmatprep.subr.bf16.mxu1 %v19580_v35 }
 0xf2d   : > { %11586 = vmatpush1.bf16.msra.mxu1 %v19578_v37 }
 0xf2e   : > { %11587 = vmatprep.subr.bf16.mxu1 %v19583_v38 }
 0xf31   : > { %11588 = vmatpush1.bf16.msra.mxu1 %v19581_v39 }
 0xf32   : > { %11589 = vmatprep.subr.bf16.mxu1 %v19586_v40 }
 0xf35   : > { %11590 = vmatpush1.bf16.msra.mxu1 %v19584_v42  ;;  %v19638_v42 = vld [vmem:[#allocation3 + $0x2780] ss:$8 sps:$4 sm:$0xff]  }
 0xf36   : > { %11591 = vmatprep.subr.bf16.mxu1 %v19589_v44  ;;  %v19640_v44 = vld [vmem:[#allocation3 + $0x2784] ss:$8 sps:$4 sm:$0xff]  }
 0xf37   : > { %12083 = vmatprep.subr.bf16.mxu0 %v19640_v44  ;;  %v19659_v44 = vld [vmem:[#allocation3 + $0x27f0] ss:$8 sps:$4 sm:$0xff]  }
 0xf38   : > { %12084 = vmatpush1.bf16.msra.mxu0 %v19638_v42 }
 0xf39   : > { %11592 = vmatpush1.bf16.msra.mxu1 %v19587_v47  ;;  %v19643_v47 = vld [vmem:[#allocation3 + $0x2794] ss:$8 sps:$4 sm:$0xff]  }
 0xf3a   : > { %11604 = vmatprep.subr.bf16.mxu1 %v19592_v61  ;;  %12085 = vmatprep.subr.bf16.mxu0 %v19643_v47 }
 0xf3c   : > { %11594 = vmatmul.mubr.bf16.vlgmr.msra.gmra.mrb[12].mxu1 %v11349_v52  ;;  %12086 = vmatpush1.bf16.msra.mxu0 %v19641_v50  ;;  %v19662_v50 = vld [vmem:[#allocation3 + $0x2580] ss:$8 sps:$4 sm:$0xff]  }
 0xf3d   : > { %11605 = vmatpush1.bf16.msra.mxu1 %v19590_v1  ;;  %11636 = vmatprep.mubr.bf16.mxu1 %v20306_v0 }
 0xf3e   : > { %11606 = vmatprep.subr.bf16.mxu1 %v19595_v51  ;;  %v19646_v51 = vld [vmem:[#allocation3 + $0x27a4] ss:$8 sps:$4 sm:$0xff]  }
 0xf3f   : > { %12087 = vmatprep.subr.bf16.mxu0 %v19646_v51 }
 0xf41   : > { %11607 = vmatpush1.bf16.msra.mxu1 %v19593_v5 }
 0xf42   : > { %11608 = vmatprep.subr.bf16.mxu1 %v19598_v58  ;;  %v19644_v58 = vld [vmem:[#allocation3 + $0x27a0] ss:$8 sps:$4 sm:$0xff]  }
 0xf43   : > { %12088 = vmatpush1.bf16.msra.mxu0 %v19644_v58  ;;  %v19670_v58 = vld [vmem:[#allocation3 + $0x25a4] ss:$8 sps:$4 sm:$0xff]  }
 0xf44   : > { %12089 = vmatprep.subr.bf16.mxu0 %v19649_v55  ;;  %v19668_v55 = vld [vmem:[#allocation3 + $0x25a0] ss:$8 sps:$4 sm:$0xff]  }
 0xf45   : > { %11609 = vmatpush1.bf16.msra.mxu1 %v19596_v29  ;;  %v19647_v29 = vld [vmem:[#allocation3 + $0x27b0] ss:$8 sps:$4 sm:$0xff]  }
 0xf46   : > { %11610 = vmatprep.subr.bf16.mxu1 %v19601_v57  ;;  %v19652_v57 = vld [vmem:[#allocation3 + $0x27c4] ss:$8 sps:$4 sm:$0xff]  }
 0xf47   : > { %12090 = vmatpush1.bf16.msra.mxu0 %v19647_v29  ;;  %v19673_v29 = vld [vmem:[#allocation3 + $0x25b4] ss:$8 sps:$4 sm:$0xff]  }
 0xf48   : > { %12102 = vmatprep.subr.bf16.mxu0 %v19652_v57  ;;  %v19671_v57 = vld [vmem:[#allocation3 + $0x25b0] ss:$8 sps:$4 sm:$0xff]  }
 0xf49   : > { %11611 = vmatpush1.bf16.msra.mxu1 %v19599_v18 }
 0xf4c   : > { %16972 = vmatmul.mubr.msk.bf16.vlgmr.msra.gmra.mrb[12].mxu1 %vm249_vm0, %v11355_v24 }
0x101f   : > { %v11638_v11 = vpop.f32.mrb[12].mxu1 }
0x1020   : > { %v11664_v6 = vadd.f32 %v11657_v4, %v11638_v11  ;;  %v11640_v25 = vpop.f32.mrb[13].mxu1 }
0x1021   : > { %v11665_v13 = vadd.f32 %v11661_v33, %v11640_v25  ;;  %v11642_v35 = vpop.f32.mrb[14].mxu1 }
0x1022   : > { %v11668_v37 = vmax.f32 %v11664_v6, 0.0  ;;  %v11666_v38 = vadd.f32 %v11657_v4, %v11642_v35  ;;  %v11644_v39 = vpop.f32.mrb[15].mxu1 }
0x1023   : > { %v11669_v40 = vmax.f32 %v11665_v13, 0.0  ;;  %v11667_v41 = vadd.f32 %v11661_v33, %v11644_v39  ;;  %v19653_v13 = vld [vmem:[#allocation3 + $0x27d0] ss:$8 sps:$4 sm:$0xff]   ;;  %v19656_v39 = vld [vmem:[#allocation3 + $0x27e0] ss:$8 sps:$4 sm:$0xff]  }
0x1024   : > { %v11676_v45 = vrot.slane %v11668_v37, 6  ;;  %v11670_v53 = vmax.f32 %v11666_v38, 0.0  ;;  %v19658_v37 = vld [vmem:[#allocation3 + $0x27e4] ss:$8 sps:$4 sm:$0xff]  }
0x1025   : > { %v11677_v48 = vrot.slane %v11669_v40, 6  ;;  %v11671_v61 = vmax.f32 %v11667_v41, 0.0  ;;  %v19661_v41 = vld [vmem:[#allocation3 + $0x27f4] ss:$8 sps:$4 sm:$0xff]  }
0x1026   : > { %v11678_v49 = vrot.slane %v11670_v53, 6  ;;  %11682 = vrot.lane.b32.xlu0 %v11676_v45, %s20307_s12  ;;  %v19664_v53 = vld [vmem:[#allocation3 + $0x2584] ss:$8 sps:$4 sm:$0xff]  }
0x1027   : > { %v11680_v1 = vrot.slane %v11671_v61, 6  ;;  %11684 = vrot.lane.b32.xlu1 %v11677_v48, %s20307_s12 }
0x1028   : > { %v11679_v52 = vsel %vm2129_vm6, %v11676_v45, %v11678_v49 }
0x1029   : > { %v11681_v5 = vsel %vm2129_vm6, %v11677_v48, %v11680_v1 }
0x102a   : > { %11686 = vrot.lane.b32.xlu0 %v11679_v52, %s20307_s12 }
0x102b   : > { %11688 = vrot.lane.b32.xlu1 %v11681_v5, %s20307_s12  ;;  %v19665_v5 = vld [vmem:[#allocation3 + $0x2590] ss:$8 sps:$4 sm:$0xff]  }
0x102e   : > { %11690 = vrot.lane.b32.xlu0 %v11678_v49, %s20307_s12 }
0x102f   : > { %11692 = vrot.lane.b32.xlu1 %v11680_v1, %s20307_s12  ;;  %v19667_v1 = vld [vmem:[#allocation3 + $0x2594] ss:$8 sps:$4 sm:$0xff]  }
0x1098   : > { %v11683_v59 = vpop.permute.xlu0 %11682 }
0x1099   : > { %11706 = vst.msk [vmem:[#allocation2] sm:$0xfc] %vm2161_vm7, %v11683_v59  ;;  %v11685_v62 = vpop.permute.xlu1 %11684 }
0x109a   : > { %v11694_v18 = vsel %vm2148_vm9, %v11683_v59, %v11685_v62  ;;  %11708 = vst.msk [vmem:[#allocation2 + $0x10] sm:$0xfc] %vm2164_vm10, %v11685_v62  ;;  %v19676_v59 = vld [vmem:[#allocation3 + $0x25c4] ss:$8 sps:$4 sm:$0xff]   ;;  %v19674_v62 = vld [vmem:[#allocation3 + $0x25c0] ss:$8 sps:$4 sm:$0xff]  }
0x109b   : > { %11707 = vst [vmem:[#allocation2 + $0x8] sm:$0xfc] %v11694_v18  ;;  %v19679_v18 = vld [vmem:[#allocation3 + $0x25d4] ss:$8 sps:$4 sm:$0xff]  }
0x109c   : > { %v11687_v2 = vpop.permute.xlu0 %11686 }
0x109d   : > { %11709 = vst.msk [vmem:[#allocation2 + $0x18] sm:$0xff] %vm2166_vm8, %v11687_v2  ;;  %v11689_v21 = vpop.permute.xlu1 %11688 }
0x109e   : > { %11711 = vst.msk [vmem:[#allocation2 + $0x28] sm:$0xff] %vm2148_vm9, %v11689_v21  ;;  %v20859_v28 = vsel %vm2148_vm9, %v11687_v2, %v11689_v21  ;;  %v19677_v2 = vld [vmem:[#allocation3 + $0x25d0] ss:$8 sps:$4 sm:$0xff]   ;;  %v19682_v21 = vld [vmem:[#allocation3 + $0x25e4] ss:$8 sps:$4 sm:$0xff]  }
0x10a0   : > { %v11691_v54 = vpop.permute.xlu0 %11690  ;;  %v11765_v60 = vld [vmem:[#allocation2] sm:$0xfe] }
0x10a1   : > { %11712 = vst.msk [vmem:[#allocation2 + $0x30] sm:$0x3] %vm2170_vm11, %v11691_v54  ;;  %v11693_v24 = vpop.permute.xlu1 %11692  ;;  %v11767_v6 = vld [vmem:[#allocation2 + $0x10] sm:$0xfe] }
0x10a2   : > { %v11696_v56 = vsel %vm2148_vm9, %v11691_v54, %v11693_v24  ;;  %11714 = vst.msk [vmem:[#allocation2 + $0x40] sm:$0x3] %vm2173_vm12, %v11693_v24  ;;  %v11766_v30 = vld [vmem:[#allocation2 + $0x8] sm:$0xfe]  ;;  %v19685_v24 = vld [vmem:[#allocation3 + $0x25f4] ss:$8 sps:$4 sm:$0xff]  }
0x10a3   : > { %11713 = vst [vmem:[#allocation2 + $0x38] sm:$0x3] %v11696_v56  ;;  %v11772_v9 = vpack.c.bf16 %v20859_v28, %v11766_v30  ;;  %v11716_v61 = vld [vmem:[#allocation2 + $0x8] sm:$0xff]  ;;  %v19683_v56 = vld [vmem:[#allocation3 + $0x25f0] ss:$8 sps:$4 sm:$0xff]  }
0x10a4   : > { %v20864_v10 = vld [vmem:[#allocation2 + $0x18] sm:$0xff]  ;;  %v11722_v52 = vpack.c.bf16 %v20859_v28, %v11716_v61  ;;  %v19680_v54 = vld [vmem:[#allocation3 + $0x25e0] ss:$8 sps:$4 sm:$0xff]   ;;  %v19688_v30 = vld [vmem:[#allocation3 + $0x2604] ss:$8 sps:$4 sm:$0xff]  }
0x10a5   : > { %v11771_v32 = vpack.c.bf16 %v20864_v10, %v11765_v60  ;;  %v11833_v12 = vshll.u32 %v11772_v9, 16  ;;  %v11831_v19 = vshrl.u32 %v11772_v9, 16  ;;  %v20868_v43 = vld [vmem:[#allocation2 + $0x28] sm:$0xff]  ;;  %v19691_v60 = vld [vmem:[#allocation3 + $0x2614] ss:$8 sps:$4 sm:$0xff]  }
0x10a6   : > { %v11773_v35 = vpack.c.bf16 %v20868_v43, %v11767_v6  ;;  %v19686_v9 = vld [vmem:[#allocation3 + $0x2600] ss:$8 sps:$4 sm:$0xff]   ;;  %v19730_v61 = vld [vmem:[#allocation3 + $0x2824] ss:$8 sps:$4 sm:$0xff]  }
0x10a7   : > { %v11821_v63 = vshll.u32 %v11771_v32, 16  ;;  %v11835_v16 = vrot.slane %v11833_v12, 1  ;;  %v11819_v22 = vshrl.u32 %v11771_v32, 16  ;;  %v19689_v32 = vld [vmem:[#allocation3 + $0x2610] ss:$8 sps:$4 sm:$0xff]  }
0x10a8   : > { %v11768_v14 = vld [vmem:[#allocation2 + $0x30] sm:$0x1]  ;;  %v11845_v40 = vshll.u32 %v11773_v35, 16  ;;  %v11843_v47 = vshrl.u32 %v11773_v35, 16  ;;  %v19694_v12 = vld [vmem:[#allocation3 + $0x2624] ss:$8 sps:$4 sm:$0xff]  }
0x10a9   : > { %v11774_v36 = vpack.c.bf16 %v11768_v14, %v11768_v14  ;;  %v11823_v46 = vrot.slane %v11821_v63, 1  ;;  %v11836_v26 = vor.u32 %v11835_v16, %v11831_v19  ;;  %v11770_v25 = vld [vmem:[#allocation2 + $0x40] sm:$0x1]  ;;  %v19692_v14 = vld [vmem:[#allocation3 + $0x2620] ss:$8 sps:$4 sm:$0xff]  }
0x10aa   : > { %v11769_v15 = vld [vmem:[#allocation2 + $0x38] sm:$0x1]  ;;  %v11776_v38 = vpack.c.bf16 %v11770_v25, %v11770_v25  ;;  %v11847_v45 = vrot.slane %v11845_v40, 1  ;;  %v19697_v63 = vld [vmem:[#allocation3 + $0x2634] ss:$8 sps:$4 sm:$0xff]  }
0x10ab   : > { %v11775_v3 = vpack.c.bf16 %v11769_v15, %v11769_v15  ;;  %v11826_v17 = vshll.u32 %v11774_v36, 16  ;;  %v11824_v4 = vor.u32 %v11823_v46, %v11819_v22  ;;  %v19695_v36 = vld [vmem:[#allocation3 + $0x2630] ss:$8 sps:$4 sm:$0xff]   ;;  %v19700_v15 = vld [vmem:[#allocation3 + $0x2644] ss:$8 sps:$4 sm:$0xff]  }
0x10ac   : > { %v11850_v42 = vshll.u32 %v11776_v38, 16  ;;  %v11848_v49 = vor.u32 %v11847_v45, %v11843_v47  ;;  %v19703_v16 = vld [vmem:[#allocation3 + $0x2654] ss:$8 sps:$4 sm:$0xff]   ;;  %v19706_v46 = vld [vmem:[#allocation3 + $0x2664] ss:$8 sps:$4 sm:$0xff]  }
0x10ad   : > { %v11838_v20 = vshll.u32 %v11775_v3, 16  ;;  %v11828_v23 = vrot.slane %v11826_v17, 1  ;;  %v19698_v3 = vld [vmem:[#allocation3 + $0x2640] ss:$8 sps:$4 sm:$0xff]   ;;  %v19701_v17 = vld [vmem:[#allocation3 + $0x2650] ss:$8 sps:$4 sm:$0xff]  }
0x10ae   : > { %v11852_v48 = vrot.slane %v11850_v42, 1  ;;  %v19704_v19 = vld [vmem:[#allocation3 + $0x2660] ss:$8 sps:$4 sm:$0xff]   ;;  %v19707_v22 = vld [vmem:[#allocation3 + $0x2670] ss:$8 sps:$4 sm:$0xff]  }
0x10af   : > { %v11840_v27 = vrot.slane %v11838_v20, 1  ;;  %v11829_v11 = vsel %vm360_vm2, %v11824_v4, %v11828_v23  ;;  %v19709_v20 = vld [vmem:[#allocation3 + $0x2674] ss:$8 sps:$4 sm:$0xff]   ;;  %v19712_v23 = vld [vmem:[#allocation3 + $0x2684] ss:$8 sps:$4 sm:$0xff]  }
0x10b0   : > { %v11853_v51 = vsel %vm360_vm2, %v11848_v49, %v11852_v48  ;;  %v19715_v4 = vld [vmem:[#allocation3 + $0x2694] ss:$8 sps:$4 sm:$0xff]   ;;  %v12438_v6 = vld [vmem:[#allocation2 + $0x38] sm:$0x3]  ;;  %v19724_v38 = vld [vmem:[#allocation3 + $0x2804] ss:$8 sps:$4 sm:$0xff]  }
0x10b1   : > { %v11841_v33 = vsel %vm360_vm2, %v11836_v26, %v11840_v27  ;;  %v11715_v26 = vld [vmem:[#allocation2] sm:$0xff]  ;;  %v19710_v27 = vld [vmem:[#allocation3 + $0x2680] ss:$8 sps:$4 sm:$0xff]   ;;  %v12444_v35 = vpack.c.bf16 %v12438_v6, %v12438_v6 }
0x10b2   : > { %12091 = vmatprep.mubr.bf16.mxu0 %v11841_v33  ;;  %v19713_v33 = vld [vmem:[#allocation3 + $0x2690] ss:$8 sps:$4 sm:$0xff]   ;;  %v19721_v25 = vld [vmem:[#allocation3 + $0x26b4] ss:$8 sps:$4 sm:$0xff]   ;;  %v19722_v42 = vld [vmem:[#allocation3 + $0x2800] ss:$8 sps:$4 sm:$0xff]  }
0x10b3   : > { %12092 = vmatmul.mubr.bf16.vlgmr.msra.gmra.mrb[16].mxu0 %v11829_v11  ;;  %v19716_v11 = vld [vmem:[#allocation3 + $0x26a0] ss:$8 sps:$4 sm:$0xff]   ;;  %v12497_v40 = vrot.slane %v12444_v35, 1  ;;  %v19725_v48 = vld [vmem:[#allocation3 + $0x2810] ss:$8 sps:$4 sm:$0xff]  }
0x10b4   : > { %12103 = vmatpush1.bf16.msra.mxu0 %v19650_v31  ;;  %12134 = vmatprep.mubr.bf16.mxu0 %v20306_v0  ;;  %v11721_v31 = vpack.c.bf16 %v20864_v10, %v11715_v26  ;;  %v19728_v49 = vld [vmem:[#allocation3 + $0x2820] ss:$8 sps:$4 sm:$0xff]   ;;  %v12801_v26 = vld [vmem:[#allocation2 + $0x38] sm:$0x7] }
0x10b5   : > { %12104 = vmatprep.subr.bf16.mxu0 %v19655_v34  ;;  %v19718_v34 = vld [vmem:[#allocation3 + $0x26a4] ss:$8 sps:$4 sm:$0xff]  }
0x10b8   : > { %12105 = vmatpush1.bf16.msra.mxu0 %v19653_v13  ;;  %v12435_v13 = vld [vmem:[#allocation2 + $0x8] sm:$0xfc] }
0x10b9   : > { %12106 = vmatprep.subr.bf16.mxu0 %v19658_v37  ;;  %v19719_v37 = vld [vmem:[#allocation3 + $0x26b0] ss:$8 sps:$4 sm:$0xff]  }
0x10bc   : > { %12107 = vmatpush1.bf16.msra.mxu0 %v19656_v39  ;;  %v12441_v39 = vpack.c.bf16 %v20859_v28, %v12435_v13 }
0x10bd   : > { %12108 = vmatprep.subr.bf16.mxu0 %v19661_v41  ;;  %v11717_v41 = vld [vmem:[#allocation2 + $0x10] sm:$0xff] }
0x10be   : > { %v12496_v45 = vrot.slane %v12441_v39, 1 }
0x10c0   : > { %12109 = vmatpush1.bf16.msra.mxu0 %v19659_v44  ;;  %v11723_v44 = vpack.c.bf16 %v20868_v43, %v11717_v41  ;;  %v12498_v47 = vsel %vm1036_vm3, %v12496_v45, %v12497_v40 }
0x10c1   : > { %12348 = vmatprep.subr.bf16.mxu0 %v19664_v53  ;;  %v19727_v53 = vld [vmem:[#allocation3 + $0x2814] ss:$8 sps:$4 sm:$0xff]  }
0x10c3   : > { %17014 = vmatmul.mubr.msk.bf16.vlgmr.msra.gmra.mrb[16].mxu0 %vm249_vm0, %v11853_v51  ;;  %v19736_v51 = vld [vmem:[#allocation3 + $0x2844] ss:$8 sps:$4 sm:$0xff]  }
0x10c4   : > { %12349 = vmatpush1.bf16.msra.mxu0 %v19662_v50  ;;  %12380 = vmatprep.mubr.bf16.mxu0 %v11722_v52  ;;  %v19733_v50 = vld [vmem:[#allocation3 + $0x2834] ss:$8 sps:$4 sm:$0xff]   ;;  %v19734_v52 = vld [vmem:[#allocation3 + $0x2840] ss:$8 sps:$4 sm:$0xff]  }
0x10c5   : > { %12350 = vmatprep.subr.bf16.mxu0 %v19667_v1  ;;  %v19731_v1 = vld [vmem:[#allocation3 + $0x2830] ss:$8 sps:$4 sm:$0xff]  }
0x10c8   : > { %12351 = vmatpush1.bf16.msra.mxu0 %v19665_v5  ;;  %v19739_v5 = vld [vmem:[#allocation3 + $0x2854] ss:$8 sps:$4 sm:$0xff]  }
0x10c9   : > { %12352 = vmatprep.subr.bf16.mxu0 %v19670_v58  ;;  %v19737_v58 = vld [vmem:[#allocation3 + $0x2850] ss:$8 sps:$4 sm:$0xff]  }
0x10cc   : > { %12353 = vmatpush1.bf16.msra.mxu0 %v19668_v55  ;;  %v19742_v55 = vld [vmem:[#allocation3 + $0x2864] ss:$8 sps:$4 sm:$0xff]  }
0x10cd   : > { %12354 = vmatprep.subr.bf16.mxu0 %v19673_v29  ;;  %v19740_v29 = vld [vmem:[#allocation3 + $0x2860] ss:$8 sps:$4 sm:$0xff]  }
0x10d0   : > { %12355 = vmatpush1.bf16.msra.mxu0 %v19671_v57  ;;  %v19745_v57 = vld [vmem:[#allocation3 + $0x2874] ss:$8 sps:$4 sm:$0xff]  }
0x10d1   : > { %12356 = vmatprep.subr.bf16.mxu0 %v19676_v59  ;;  %v19743_v59 = vld [vmem:[#allocation3 + $0x2870] ss:$8 sps:$4 sm:$0xff]  }
0x10d4   : > { %12357 = vmatpush1.bf16.msra.mxu0 %v19674_v62  ;;  %v19748_v62 = vld [vmem:[#allocation3 + $0x2884] ss:$8 sps:$4 sm:$0xff]  }
0x10d5   : > { %12358 = vmatprep.subr.bf16.mxu0 %v19679_v18  ;;  %v19746_v18 = vld [vmem:[#allocation3 + $0x2880] ss:$8 sps:$4 sm:$0xff]  }
0x10d8   : > { %12359 = vmatpush1.bf16.msra.mxu0 %v19677_v2  ;;  %v19751_v2 = vld [vmem:[#allocation3 + $0x2894] ss:$8 sps:$4 sm:$0xff]  }
0x10d9   : > { %12360 = vmatprep.subr.bf16.mxu0 %v19682_v21  ;;  %v19749_v21 = vld [vmem:[#allocation3 + $0x2890] ss:$8 sps:$4 sm:$0xff]  }
0x10dc   : > { %12361 = vmatpush1.bf16.msra.mxu0 %v19680_v54  ;;  %v19754_v54 = vld [vmem:[#allocation3 + $0x28a4] ss:$8 sps:$4 sm:$0xff]  }
0x10dd   : > { %12362 = vmatprep.subr.bf16.mxu0 %v19685_v24  ;;  %v19752_v24 = vld [vmem:[#allocation3 + $0x28a0] ss:$8 sps:$4 sm:$0xff]  }
0x10e0   : > { %12363 = vmatpush1.bf16.msra.mxu0 %v19683_v56  ;;  %v19757_v56 = vld [vmem:[#allocation3 + $0x28b4] ss:$8 sps:$4 sm:$0xff]  }
0x10e1   : > { %12364 = vmatprep.subr.bf16.mxu0 %v19688_v30  ;;  %v19755_v30 = vld [vmem:[#allocation3 + $0x28b0] ss:$8 sps:$4 sm:$0xff]  }
0x10e4   : > { %12365 = vmatpush1.bf16.msra.mxu0 %v19686_v9  ;;  %v19760_v9 = vld [vmem:[#allocation3 + $0x28c4] ss:$8 sps:$4 sm:$0xff]  }
0x10e5   : > { %12366 = vmatprep.subr.bf16.mxu0 %v19691_v60  ;;  %v19758_v60 = vld [vmem:[#allocation3 + $0x28c0] ss:$8 sps:$4 sm:$0xff]  }
0x10e8   : > { %12367 = vmatpush1.bf16.msra.mxu0 %v19689_v32  ;;  %v19763_v32 = vld [vmem:[#allocation3 + $0x28d4] ss:$8 sps:$4 sm:$0xff]  }
0x10e9   : > { %12368 = vmatprep.subr.bf16.mxu0 %v19694_v12  ;;  %v19761_v12 = vld [vmem:[#allocation3 + $0x28d0] ss:$8 sps:$4 sm:$0xff]  }
0x10ec   : > { %12369 = vmatpush1.bf16.msra.mxu0 %v19692_v14  ;;  %v19766_v14 = vld [vmem:[#allocation3 + $0x28e4] ss:$8 sps:$4 sm:$0xff]  }
0x10ed   : > { %12370 = vmatprep.subr.bf16.mxu0 %v19697_v63  ;;  %v12437_v63 = vld [vmem:[#allocation2 + $0x30] sm:$0x3] }
0x10f0   : > { %12371 = vmatpush1.bf16.msra.mxu0 %v19695_v36  ;;  %v19764_v36 = vld [vmem:[#allocation3 + $0x28e0] ss:$8 sps:$4 sm:$0xff]  }
0x10f1   : > { %12372 = vmatprep.subr.bf16.mxu0 %v19700_v15  ;;  %v19769_v15 = vld [vmem:[#allocation3 + $0x28f4] ss:$8 sps:$4 sm:$0xff]  }
0x10f4   : > { %12373 = vmatpush1.bf16.msra.mxu0 %v19698_v3  ;;  %v12443_v3 = vpack.c.bf16 %v12437_v63, %v12437_v63  ;;  %v19811_v63 = vld [vmem:[#allocation3 + $0x29d4] ss:$8 sps:$4 sm:$0xff]  }
0x10f5   : > { %12374 = vmatprep.subr.bf16.mxu0 %v19703_v16  ;;  %v12434_v16 = vld [vmem:[#allocation2] sm:$0xfc] }
0x10f8   : > { %12375 = vmatpush1.bf16.msra.mxu0 %v19701_v17  ;;  %v19767_v17 = vld [vmem:[#allocation3 + $0x28f0] ss:$8 sps:$4 sm:$0xff]  }
0x10f9   : > { %12376 = vmatprep.subr.bf16.mxu0 %v19706_v46  ;;  %v12440_v46 = vpack.c.bf16 %v20864_v10, %v12434_v16  ;;  %v19817_v16 = vld [vmem:[#allocation3 + $0x29f4] ss:$8 sps:$4 sm:$0xff]  }
0x10fc   : > { %12377 = vmatpush1.bf16.msra.mxu0 %v19704_v19  ;;  %v19772_v19 = vld [vmem:[#allocation3 + $0x2904] ss:$8 sps:$4 sm:$0xff]  }
0x10fd   : > { %12378 = vmatprep.subr.bf16.mxu0 %v19709_v20  ;;  %v12494_v20 = vrot.slane %v12443_v3, 1  ;;  %v19812_v3 = vld [vmem:[#allocation3 + $0x29e0] ss:$8 sps:$4 sm:$0xff]  }
0x1100   : > { %12379 = vmatpush1.bf16.msra.mxu0 %v19707_v22  ;;  %v12493_v22 = vrot.slane %v12440_v46, 1  ;;  %v19820_v46 = vld [vmem:[#allocation3 + $0x2a04] ss:$8 sps:$4 sm:$0xff]  }
0x1101   : > { %12391 = vmatprep.subr.bf16.mxu0 %v19712_v23  ;;  %v19770_v23 = vld [vmem:[#allocation3 + $0x2900] ss:$8 sps:$4 sm:$0xff]  }
0x1103   : > { %12381 = vmatmul.mubr.bf16.vlgmr.msra.gmra.mrb[16].mxu0 %v11721_v31  ;;  %v12495_v31 = vsel %vm1036_vm3, %v12493_v22, %v12494_v20  ;;  %v19818_v20 = vld [vmem:[#allocation3 + $0x2a00] ss:$8 sps:$4 sm:$0xff]   ;;  %v19823_v22 = vld [vmem:[#allocation3 + $0x2a14] ss:$8 sps:$4 sm:$0xff]  }
0x1104   : > { %12392 = vmatpush1.bf16.msra.mxu0 %v19710_v27  ;;  %12423 = vmatprep.mubr.bf16.mxu0 %v20306_v0  ;;  %v19775_v27 = vld [vmem:[#allocation3 + $0x2914] ss:$8 sps:$4 sm:$0xff]  }
0x1105   : > { %12393 = vmatprep.subr.bf16.mxu0 %v19715_v4  ;;  %v12798_v4 = vld [vmem:[#allocation2 + $0x8] sm:$0xf8] }
0x1106   : > { %v12804_v6 = vpack.c.bf16 %v20859_v28, %v12798_v4  ;;  %v19826_v4 = vld [vmem:[#allocation3 + $0x2a24] ss:$8 sps:$4 sm:$0xff]  }
0x1108   : > { %12394 = vmatpush1.bf16.msra.mxu0 %v19713_v33  ;;  %v12807_v33 = vpack.c.bf16 %v12801_v26, %v12801_v26  ;;  %v12868_v39 = vshrl.u32 %v12804_v6, 16  ;;  %v12871_v40 = vshll.u32 %v12804_v6, 16  ;;  %v12797_v26 = vld [vmem:[#allocation2] sm:$0xf8] }
0x1109   : > { %12395 = vmatprep.subr.bf16.mxu0 %v19718_v34  ;;  %v19773_v34 = vld [vmem:[#allocation3 + $0x2910] ss:$8 sps:$4 sm:$0xff]  }
0x110a   : > { %v12876_v13 = vshrl.u32 %v12807_v33, 16  ;;  %v12879_v35 = vshll.u32 %v12807_v33, 16 }
0x110c   : > { %12396 = vmatpush1.bf16.msra.mxu0 %v19716_v11  ;;  %v19778_v11 = vld [vmem:[#allocation3 + $0x2924] ss:$8 sps:$4 sm:$0xff]   ;;  %v12881_v45 = vrot.slane %v12879_v35, 2 }
0x110d   : > { %12397 = vmatprep.subr.bf16.mxu0 %v19721_v25  ;;  %v12439_v25 = vld [vmem:[#allocation2 + $0x40] sm:$0x3] }
0x110e   : > { %v12445_v41 = vpack.c.bf16 %v12439_v25, %v12439_v25 }
0x1110   : > { %12398 = vmatpush1.bf16.msra.mxu0 %v19719_v37  ;;  %v19776_v37 = vld [vmem:[#allocation3 + $0x2920] ss:$8 sps:$4 sm:$0xff]  }
0x1111   : > { %12707 = vmatprep.subr.bf16.mxu0 %v19724_v38  ;;  %v19781_v38 = vld [vmem:[#allocation3 + $0x2934] ss:$8 sps:$4 sm:$0xff]  }
0x1113   : > { %17055 = vmatmul.mubr.msk.bf16.vlgmr.msra.gmra.mrb[16].mxu0 %vm249_vm0, %v11723_v44  ;;  %v12878_v44 = vrot.slane %v12876_v13, 1  ;;  %v19829_v13 = vld [vmem:[#allocation3 + $0x2a34] ss:$8 sps:$4 sm:$0xff]  }
0x1114   : > { %12708 = vmatpush1.bf16.msra.mxu0 %v19722_v42  ;;  %12739 = vmatprep.mubr.bf16.mxu0 %v12498_v47  ;;  %v12436_v42 = vld [vmem:[#allocation2 + $0x10] sm:$0xfc] }
0x1115   : > { %12709 = vmatprep.subr.bf16.mxu0 %v19727_v53  ;;  %v19779_v53 = vld [vmem:[#allocation3 + $0x2930] ss:$8 sps:$4 sm:$0xff]   ;;  %v12442_v47 = vpack.c.bf16 %v20868_v43, %v12436_v42 }
0x1118   : > { %12710 = vmatpush1.bf16.msra.mxu0 %v19725_v48  ;;  %v19784_v48 = vld [vmem:[#allocation3 + $0x2944] ss:$8 sps:$4 sm:$0xff]  }
0x1119   : > { %12711 = vmatprep.subr.bf16.mxu0 %v19730_v61  ;;  %v12870_v61 = vrot.slane %v12868_v39, 1 }
0x111c   : > { %12712 = vmatpush1.bf16.msra.mxu0 %v19728_v49  ;;  %v12873_v49 = vrot.slane %v12871_v40, 2 }
0x111d   : > { %12713 = vmatprep.subr.bf16.mxu0 %v19733_v50  ;;  %v12500_v50 = vrot.slane %v12445_v41, 1  ;;  %v19832_v41 = vld [vmem:[#allocation3 + $0x2a44] ss:$8 sps:$4 sm:$0xff]  }
0x1120   : > { %12714 = vmatpush1.bf16.msra.mxu0 %v19731_v1  ;;  %v12882_v1 = vor.u32 %v12881_v45, %v12878_v44  ;;  %v12802_v44 = vld [vmem:[#allocation2 + $0x40] sm:$0x7] }
0x1121   : > { %12715 = vmatprep.subr.bf16.mxu0 %v19736_v51  ;;  %v12499_v51 = vrot.slane %v12442_v47, 1  ;;  %v19835_v47 = vld [vmem:[#allocation3 + $0x2a54] ss:$8 sps:$4 sm:$0xff]  }
0x1124   : > { %12716 = vmatpush1.bf16.msra.mxu0 %v19734_v52  ;;  %v19782_v52 = vld [vmem:[#allocation3 + $0x2940] ss:$8 sps:$4 sm:$0xff]  }
0x1125   : > { %12717 = vmatprep.subr.bf16.mxu0 %v19739_v5  ;;  %v12874_v5 = vor.u32 %v12873_v49, %v12870_v61  ;;  %v12808_v61 = vpack.c.bf16 %v12802_v44, %v12802_v44  ;;  %v12799_v49 = vld [vmem:[#allocation2 + $0x10] sm:$0xf8] }
0x1126   : > { %v19886_v44 = vld [vmem:[#allocation3 + $0x2b64] ss:$8 sps:$4 sm:$0xff]  }
0x1128   : > { %12718 = vmatpush1.bf16.msra.mxu0 %v19737_v58  ;;  %v19787_v58 = vld [vmem:[#allocation3 + $0x2954] ss:$8 sps:$4 sm:$0xff]  }
0x1129   : > { %12719 = vmatprep.subr.bf16.mxu0 %v19742_v55  ;;  %v12501_v55 = vsel %vm1036_vm3, %v12499_v51, %v12500_v50  ;;  %v19833_v50 = vld [vmem:[#allocation3 + $0x2a50] ss:$8 sps:$4 sm:$0xff]   ;;  %v19838_v51 = vld [vmem:[#allocation3 + $0x2a64] ss:$8 sps:$4 sm:$0xff]  }
0x112c   : > { %12720 = vmatpush1.bf16.msra.mxu0 %v19740_v29  ;;  %v12883_v29 = vsel %vm1394_vm4, %v12874_v5, %v12882_v1  ;;  %v12805_v1 = vpack.c.bf16 %v20868_v43, %v12799_v49  ;;  %v12896_v5 = vshll.u32 %v12808_v61, 16  ;;  %v19887_v49 = vld [vmem:[#allocation3 + $0x2b70] ss:$8 sps:$4 sm:$0xff]  }
0x112d   : > { %12721 = vmatprep.subr.bf16.mxu0 %v19745_v57  ;;  %v19785_v57 = vld [vmem:[#allocation3 + $0x2950] ss:$8 sps:$4 sm:$0xff]  }
0x1130   : > { %12722 = vmatpush1.bf16.msra.mxu0 %v19743_v59  ;;  %v19790_v59 = vld [vmem:[#allocation3 + $0x2964] ss:$8 sps:$4 sm:$0xff]  }
0x1131   : > { %12723 = vmatprep.subr.bf16.mxu0 %v19748_v62  ;;  %v19788_v62 = vld [vmem:[#allocation3 + $0x2960] ss:$8 sps:$4 sm:$0xff]  }
0x1134   : > { %12724 = vmatpush1.bf16.msra.mxu0 %v19746_v18  ;;  %v19793_v18 = vld [vmem:[#allocation3 + $0x2974] ss:$8 sps:$4 sm:$0xff]  }
0x1135   : > { %12725 = vmatprep.subr.bf16.mxu0 %v19751_v2  ;;  %v19791_v2 = vld [vmem:[#allocation3 + $0x2970] ss:$8 sps:$4 sm:$0xff]  }
0x1138   : > { %12726 = vmatpush1.bf16.msra.mxu0 %v19749_v21  ;;  %v19796_v21 = vld [vmem:[#allocation3 + $0x2984] ss:$8 sps:$4 sm:$0xff]  }
0x1139   : > { %12727 = vmatprep.subr.bf16.mxu0 %v19754_v54  ;;  %v19794_v54 = vld [vmem:[#allocation3 + $0x2980] ss:$8 sps:$4 sm:$0xff]  }
0x113c   : > { %12728 = vmatpush1.bf16.msra.mxu0 %v19752_v24  ;;  %v19799_v24 = vld [vmem:[#allocation3 + $0x2994] ss:$8 sps:$4 sm:$0xff]  }
0x113d   : > { %12729 = vmatprep.subr.bf16.mxu0 %v19757_v56  ;;  %v19797_v56 = vld [vmem:[#allocation3 + $0x2990] ss:$8 sps:$4 sm:$0xff]  }
0x1140   : > { %12730 = vmatpush1.bf16.msra.mxu0 %v19755_v30  ;;  %v19802_v30 = vld [vmem:[#allocation3 + $0x29a4] ss:$8 sps:$4 sm:$0xff]  }
0x1141   : > { %12731 = vmatprep.subr.bf16.mxu0 %v19760_v9  ;;  %v19800_v9 = vld [vmem:[#allocation3 + $0x29a0] ss:$8 sps:$4 sm:$0xff]  }
0x1144   : > { %12732 = vmatpush1.bf16.msra.mxu0 %v19758_v60  ;;  %v19805_v60 = vld [vmem:[#allocation3 + $0x29b4] ss:$8 sps:$4 sm:$0xff]  }
0x1145   : > { %12733 = vmatprep.subr.bf16.mxu0 %v19763_v32  ;;  %v19803_v32 = vld [vmem:[#allocation3 + $0x29b0] ss:$8 sps:$4 sm:$0xff]  }
0x1148   : > { %12734 = vmatpush1.bf16.msra.mxu0 %v19761_v12  ;;  %v19808_v12 = vld [vmem:[#allocation3 + $0x29c4] ss:$8 sps:$4 sm:$0xff]  }
0x1149   : > { %12735 = vmatprep.subr.bf16.mxu0 %v19766_v14  ;;  %v19806_v14 = vld [vmem:[#allocation3 + $0x29c0] ss:$8 sps:$4 sm:$0xff]  }
0x114c   : > { %12736 = vmatpush1.bf16.msra.mxu0 %v19764_v36  ;;  %v19809_v36 = vld [vmem:[#allocation3 + $0x29d0] ss:$8 sps:$4 sm:$0xff]  }
0x114d   : > { %12737 = vmatprep.subr.bf16.mxu0 %v19769_v15  ;;  %v19814_v15 = vld [vmem:[#allocation3 + $0x29e4] ss:$8 sps:$4 sm:$0xff]  }
0x1150   : > { %12738 = vmatpush1.bf16.msra.mxu0 %v19767_v17  ;;  %v19815_v17 = vld [vmem:[#allocation3 + $0x29f0] ss:$8 sps:$4 sm:$0xff]  }
0x1151   : > { %12750 = vmatprep.subr.bf16.mxu0 %v19772_v19  ;;  %v12800_v19 = vld [vmem:[#allocation2 + $0x30] sm:$0x7] }
0x1153   : > { %12740 = vmatmul.mubr.bf16.vlgmr.msra.gmra.mrb[16].mxu0 %v12495_v31  ;;  %v12803_v31 = vpack.c.bf16 %v20864_v10, %v12797_v26  ;;  %v19857_v26 = vld [vmem:[#allocation3 + $0x2ad0] ss:$8 sps:$4 sm:$0xff]  }
0x1154   : > { %12751 = vmatpush1.bf16.msra.mxu0 %v19770_v23  ;;  %12782 = vmatprep.mubr.bf16.mxu0 %v20306_v0  ;;  %v12806_v23 = vpack.c.bf16 %v12800_v19, %v12800_v19  ;;  %v19851_v19 = vld [vmem:[#allocation3 + $0x2ab0] ss:$8 sps:$4 sm:$0xff]  }
0x1155   : > { %12752 = vmatprep.subr.bf16.mxu0 %v19775_v27  ;;  %v19821_v27 = vld [vmem:[#allocation3 + $0x2a10] ss:$8 sps:$4 sm:$0xff]   ;;  %v12851_v6 = vshrl.u32 %v12803_v31, 16  ;;  %v12854_v25 = vshll.u32 %v12803_v31, 16  ;;  %v19860_v31 = vld [vmem:[#allocation3 + $0x2ae0] ss:$8 sps:$4 sm:$0xff]  }
0x1156   : > { %v12859_v33 = vshrl.u32 %v12806_v23, 16 }
0x1157   : > { %v12853_v39 = vrot.slane %v12851_v6, 1  ;;  %v12856_v40 = vrot.slane %v12854_v25, 2  ;;  %v19871_v6 = vld [vmem:[#allocation3 + $0x2b14] ss:$8 sps:$4 sm:$0xff]   ;;  %v19869_v25 = vld [vmem:[#allocation3 + $0x2b10] ss:$8 sps:$4 sm:$0xff]  }
0x1158   : > { %12753 = vmatpush1.bf16.msra.mxu0 %v19773_v34  ;;  %v12862_v34 = vshll.u32 %v12806_v23, 16  ;;  %v12861_v35 = vrot.slane %v12859_v33, 1  ;;  %v19859_v23 = vld [vmem:[#allocation3 + $0x2ad4] ss:$8 sps:$4 sm:$0xff]   ;;  %v19863_v33 = vld [vmem:[#allocation3 + $0x2af0] ss:$8 sps:$4 sm:$0xff]  }
0x1159   : > { %12754 = vmatprep.subr.bf16.mxu0 %v19778_v11  ;;  %v19824_v11 = vld [vmem:[#allocation3 + $0x2a20] ss:$8 sps:$4 sm:$0xff]   ;;  %v12857_v45 = vor.u32 %v12856_v40, %v12853_v39  ;;  %v19880_v39 = vld [vmem:[#allocation3 + $0x2b44] ss:$8 sps:$4 sm:$0xff]  }
0x115a   : > { %v19878_v40 = vld [vmem:[#allocation3 + $0x2b40] ss:$8 sps:$4 sm:$0xff]  }
0x115c   : > { %12755 = vmatpush1.bf16.msra.mxu0 %v19776_v37  ;;  %v12864_v37 = vrot.slane %v12862_v34, 2  ;;  %v19868_v34 = vld [vmem:[#allocation3 + $0x2b04] ss:$8 sps:$4 sm:$0xff]  }
0x115d   : > { %12756 = vmatprep.subr.bf16.mxu0 %v19781_v38  ;;  %v19827_v38 = vld [vmem:[#allocation3 + $0x2a30] ss:$8 sps:$4 sm:$0xff]  }
0x115e   : > { %v12865_v42 = vor.u32 %v12864_v37, %v12861_v35  ;;  %v19872_v35 = vld [vmem:[#allocation3 + $0x2b20] ss:$8 sps:$4 sm:$0xff]   ;;  %v19877_v37 = vld [vmem:[#allocation3 + $0x2b34] ss:$8 sps:$4 sm:$0xff]  }
0x1160   : > { %12757 = vmatpush1.bf16.msra.mxu0 %v19779_v53  ;;  %v19830_v53 = vld [vmem:[#allocation3 + $0x2a40] ss:$8 sps:$4 sm:$0xff]  }
0x1161   : > { %13106 = vmatprep.subr.bf16.mxu0 %v19784_v48  ;;  %v12866_v48 = vsel %vm1394_vm4, %v12857_v45, %v12865_v42  ;;  %v19881_v42 = vld [vmem:[#allocation3 + $0x2b50] ss:$8 sps:$4 sm:$0xff]   ;;  %v13199_v45 = vld [vmem:[#allocation2 + $0x30] sm:$0xf] }
0x1163   : > { %17096 = vmatmul.mubr.msk.bf16.vlgmr.msra.gmra.mrb[16].mxu0 %vm249_vm0, %v12501_v55  ;;  %v12885_v55 = vshrl.u32 %v12805_v1, 16 }
0x1164   : > { %13107 = vmatpush1.bf16.msra.mxu0 %v19782_v52  ;;  %13138 = vmatprep.mubr.bf16.mxu0 %v12883_v29  ;;  %v12893_v52 = vshrl.u32 %v12808_v61, 16  ;;  %v12888_v29 = vshll.u32 %v12805_v1, 16  ;;  %v13196_v61 = vld [vmem:[#allocation2] sm:$0xf0]  ;;  %v19892_v1 = vld [vmem:[#allocation3 + $0x2b84] ss:$8 sps:$4 sm:$0xff]  }
0x1165   : > { %13108 = vmatprep.subr.bf16.mxu0 %v19787_v58  ;;  %v19836_v58 = vld [vmem:[#allocation3 + $0x2a60] ss:$8 sps:$4 sm:$0xff]  }
0x1168   : > { %13109 = vmatpush1.bf16.msra.mxu0 %v19785_v57  ;;  %v13200_v57 = vld [vmem:[#allocation2 + $0x38] sm:$0xf] }
0x1169   : > { %13110 = vmatprep.subr.bf16.mxu0 %v19790_v59  ;;  %v19841_v59 = vld [vmem:[#allocation3 + $0x2a74] ss:$8 sps:$4 sm:$0xff]  }
0x116c   : > { %13111 = vmatpush1.bf16.msra.mxu0 %v19788_v62  ;;  %v12895_v62 = vrot.slane %v12893_v52, 1 }
0x116d   : > { %13112 = vmatprep.subr.bf16.mxu0 %v19793_v18  ;;  %v12898_v18 = vrot.slane %v12896_v5, 2  ;;  %v19890_v5 = vld [vmem:[#allocation3 + $0x2b80] ss:$8 sps:$4 sm:$0xff]  }
0x1170   : > { %13113 = vmatpush1.bf16.msra.mxu0 %v19791_v2  ;;  %v13197_v2 = vld [vmem:[#allocation2 + $0x8] sm:$0xf0] }
0x1171   : > { %13114 = vmatprep.subr.bf16.mxu0 %v19796_v21  ;;  %v13206_v21 = vpack.c.bf16 %v13200_v57, %v13200_v57  ;;  %v19898_v57 = vld [vmem:[#allocation3 + $0x2ba4] ss:$8 sps:$4 sm:$0xff]  }
0x1174   : > { %13115 = vmatpush1.bf16.msra.mxu0 %v19794_v54  ;;  %v19839_v54 = vld [vmem:[#allocation3 + $0x2a70] ss:$8 sps:$4 sm:$0xff]  }
0x1175   : > { %13116 = vmatprep.subr.bf16.mxu0 %v19799_v24  ;;  %v12887_v24 = vrot.slane %v12885_v55, 1 }
0x1178   : > { %13117 = vmatpush1.bf16.msra.mxu0 %v19797_v56  ;;  %v12890_v56 = vrot.slane %v12888_v29, 2  ;;  %v19893_v29 = vld [vmem:[#allocation3 + $0x2b90] ss:$8 sps:$4 sm:$0xff]  }
0x1179   : > { %13118 = vmatprep.subr.bf16.mxu0 %v19802_v30  ;;  %v19844_v30 = vld [vmem:[#allocation3 + $0x2a84] ss:$8 sps:$4 sm:$0xff]  }
0x117c   : > { %13119 = vmatpush1.bf16.msra.mxu0 %v19800_v9  ;;  %v13203_v9 = vpack.c.bf16 %v20859_v28, %v13197_v2  ;;  %v19848_v28 = vld [vmem:[#allocation3 + $0x2aa0] ss:$8 sps:$4 sm:$0xff]   ;;  %v13198_v2 = vld [vmem:[#allocation2 + $0x10] sm:$0xf0] }
0x117d   : > { %13120 = vmatprep.subr.bf16.mxu0 %v19805_v60  ;;  %v12899_v60 = vor.u32 %v12898_v18, %v12895_v62  ;;  %v19901_v62 = vld [vmem:[#allocation3 + $0x2bb4] ss:$8 sps:$4 sm:$0xff]  }
0x1180   : > { %13121 = vmatpush1.bf16.msra.mxu0 %v19803_v32  ;;  %v13259_v32 = vrot.slane %v13206_v21, 2  ;;  %v19899_v21 = vld [vmem:[#allocation3 + $0x2bb0] ss:$8 sps:$4 sm:$0xff]  }
0x1181   : > { %13122 = vmatprep.subr.bf16.mxu0 %v19808_v12  ;;  %v12891_v12 = vor.u32 %v12890_v56, %v12887_v24 }
0x1184   : > { %13123 = vmatpush1.bf16.msra.mxu0 %v19806_v14  ;;  %v19842_v14 = vld [vmem:[#allocation3 + $0x2a80] ss:$8 sps:$4 sm:$0xff]  }
0x1185   : > { %13124 = vmatprep.subr.bf16.mxu0 %v19811_v63  ;;  %v13258_v63 = vrot.slane %v13203_v9, 2  ;;  %v19902_v9 = vld [vmem:[#allocation3 + $0x2d00] ss:$8 sps:$4 sm:$0xff]  }
0x1188   : > { %13125 = vmatpush1.bf16.msra.mxu0 %v19809_v36  ;;  %v19847_v36 = vld [vmem:[#allocation3 + $0x2a94] ss:$8 sps:$4 sm:$0xff]  }
0x1189   : > { %13126 = vmatprep.subr.bf16.mxu0 %v19814_v15  ;;  %v12900_v15 = vsel %vm1394_vm4, %v12891_v12, %v12899_v60  ;;  %v19904_v60 = vld [vmem:[#allocation3 + $0x2d04] ss:$8 sps:$4 sm:$0xff]   ;;  %v19905_v12 = vld [vmem:[#allocation3 + $0x2d10] ss:$8 sps:$4 sm:$0xff]  }
0x118a   : > { %13967 = vmatprep.subr.bf16.mxu1 %v19904_v60 }
0x118b   : > { %13968 = vmatpush1.bf16.msra.mxu1 %v19902_v9 }
0x118c   : > { %13127 = vmatpush1.bf16.msra.mxu0 %v19812_v3  ;;  %v13260_v3 = vsel %vm1800_vm5, %v13258_v63, %v13259_v32  ;;  %v19907_v32 = vld [vmem:[#allocation3 + $0x2d14] ss:$8 sps:$4 sm:$0xff]   ;;  %v19908_v63 = vld [vmem:[#allocation3 + $0x2d20] ss:$8 sps:$4 sm:$0xff]  }
0x118d   : > { %13128 = vmatprep.subr.bf16.mxu0 %v19817_v16  ;;  %v19845_v16 = vld [vmem:[#allocation3 + $0x2a90] ss:$8 sps:$4 sm:$0xff]   ;;  %13969 = vmatprep.subr.bf16.mxu1 %v19907_v32 }
0x118f   : > { %13970 = vmatpush1.bf16.msra.mxu1 %v19905_v12 }
0x1190   : > { %13129 = vmatpush1.bf16.msra.mxu0 %v19815_v17  ;;  %v19850_v17 = vld [vmem:[#allocation3 + $0x2aa4] ss:$8 sps:$4 sm:$0xff]  }
0x1191   : > { %13130 = vmatprep.subr.bf16.mxu0 %v19820_v46  ;;  %v19853_v46 = vld [vmem:[#allocation3 + $0x2ab4] ss:$8 sps:$4 sm:$0xff]  }
0x1194   : > { %13131 = vmatpush1.bf16.msra.mxu0 %v19818_v20  ;;  %v19856_v20 = vld [vmem:[#allocation3 + $0x2ac4] ss:$8 sps:$4 sm:$0xff]  }
0x1195   : > { %13132 = vmatprep.subr.bf16.mxu0 %v19823_v22  ;;  %v19854_v22 = vld [vmem:[#allocation3 + $0x2ac0] ss:$8 sps:$4 sm:$0xff]  }
0x1198   : > { %13133 = vmatpush1.bf16.msra.mxu0 %v19821_v27  ;;  %v19862_v27 = vld [vmem:[#allocation3 + $0x2ae4] ss:$8 sps:$4 sm:$0xff]  }
0x1199   : > { %13134 = vmatprep.subr.bf16.mxu0 %v19826_v4  ;;  %v19865_v4 = vld [vmem:[#allocation3 + $0x2af4] ss:$8 sps:$4 sm:$0xff]  }
0x119c   : > { %13135 = vmatpush1.bf16.msra.mxu0 %v19824_v11  ;;  %v19866_v11 = vld [vmem:[#allocation3 + $0x2b00] ss:$8 sps:$4 sm:$0xff]  }
0x119d   : > { %13136 = vmatprep.subr.bf16.mxu0 %v19829_v13  ;;  %v19874_v13 = vld [vmem:[#allocation3 + $0x2b24] ss:$8 sps:$4 sm:$0xff]  }
0x11a0   : > { %13137 = vmatpush1.bf16.msra.mxu0 %v19827_v38  ;;  %v19875_v38 = vld [vmem:[#allocation3 + $0x2b30] ss:$8 sps:$4 sm:$0xff]  }
0x11a1   : > { %13149 = vmatprep.subr.bf16.mxu0 %v19832_v41  ;;  %v19883_v41 = vld [vmem:[#allocation3 + $0x2b54] ss:$8 sps:$4 sm:$0xff]  }
0x11a3   : > { %13139 = vmatmul.mubr.bf16.vlgmr.msra.gmra.mrb[16].mxu0 %v12866_v48  ;;  %v13205_v48 = vpack.c.bf16 %v13199_v45, %v13199_v45 }
0x11a4   : > { %13150 = vmatpush1.bf16.msra.mxu0 %v19830_v53  ;;  %13181 = vmatprep.mubr.bf16.mxu0 %v20306_v0  ;;  %v19884_v53 = vld [vmem:[#allocation3 + $0x2b60] ss:$8 sps:$4 sm:$0xff]  }
0x11a5   : > { %13151 = vmatprep.subr.bf16.mxu0 %v19835_v47  ;;  %v19889_v47 = vld [vmem:[#allocation3 + $0x2b74] ss:$8 sps:$4 sm:$0xff]  }
0x11a8   : > { %13152 = vmatpush1.bf16.msra.mxu0 %v19833_v50  ;;  %v13202_v50 = vpack.c.bf16 %v20864_v10, %v13196_v61  ;;  %v19896_v10 = vld [vmem:[#allocation3 + $0x2ba0] ss:$8 sps:$4 sm:$0xff]  }
0x11a9   : > { %13153 = vmatprep.subr.bf16.mxu0 %v19838_v51  ;;  %v13256_v51 = vrot.slane %v13205_v48, 2 }
0x11aa   : > { %v13255_v52 = vrot.slane %v13202_v50, 2 }
0x11ac   : > { %13154 = vmatpush1.bf16.msra.mxu0 %v19836_v58  ;;  %v19895_v58 = vld [vmem:[#allocation3 + $0x2b94] ss:$8 sps:$4 sm:$0xff]   ;;  %v13257_v55 = vsel %vm1800_vm5, %v13255_v52, %v13256_v51  ;;  %v19941_v52 = vld [vmem:[#allocation3 + $0x2dd0] ss:$8 sps:$4 sm:$0xff]  }
0x11ad   : > { %13155 = vmatprep.subr.bf16.mxu0 %v19841_v59  ;;  %v13201_v59 = vld [vmem:[#allocation2 + $0x40] sm:$0xf] }
0x11ae   : > { %v13207_v18 = vpack.c.bf16 %v13201_v59, %v13201_v59  ;;  %v19949_v59 = vld [vmem:[#allocation3 + $0x2df4] ss:$8 sps:$4 sm:$0xff]  }
0x11b0   : > { %13156 = vmatpush1.bf16.msra.mxu0 %v19839_v54  ;;  %v13204_v54 = vpack.c.bf16 %v20868_v43, %v13198_v2  ;;  %v13262_v24 = vrot.slane %v13207_v18, 2  ;;  %v19913_v43 = vld [vmem:[#allocation3 + $0x2d34] ss:$8 sps:$4 sm:$0xff]  }
0x11b1   : > { %13469 = vmatprep.subr.bf16.mxu0 %v19844_v30 }
0x11b2   : > { %v13261_v56 = vrot.slane %v13204_v54, 2 }
0x11b3   : > { %17137 = vmatmul.mubr.msk.bf16.vlgmr.msra.gmra.mrb[16].mxu0 %vm249_vm0, %v12900_v15  ;;  %v19916_v15 = vld [vmem:[#allocation3 + $0x2d44] ss:$8 sps:$4 sm:$0xff]  }
0x11b4   : > { %13470 = vmatpush1.bf16.msra.mxu0 %v19842_v14  ;;  %13501 = vmatprep.mubr.bf16.mxu0 %v13260_v3  ;;  %v13263_v30 = vsel %vm1800_vm5, %v13261_v56, %v13262_v24  ;;  %v19910_v14 = vld [vmem:[#allocation3 + $0x2d24] ss:$8 sps:$4 sm:$0xff]   ;;  %v19914_v3 = vld [vmem:[#allocation3 + $0x2d40] ss:$8 sps:$4 sm:$0xff]  }
0x11b5   : > { %13471 = vmatprep.subr.bf16.mxu0 %v19847_v36  ;;  %13971 = vmatprep.subr.bf16.mxu1 %v19910_v14  ;;  %v19911_v36 = vld [vmem:[#allocation3 + $0x2d30] ss:$8 sps:$4 sm:$0xff]  }
0x11b6   : > { %13972 = vmatpush1.bf16.msra.mxu1 %v19908_v63 }
0x11b7   : > { %13973 = vmatprep.subr.bf16.mxu1 %v19913_v43 }
0x11b8   : > { %13472 = vmatpush1.bf16.msra.mxu0 %v19845_v16  ;;  %v19919_v16 = vld [vmem:[#allocation3 + $0x2d54] ss:$8 sps:$4 sm:$0xff]  }
0x11b9   : > { %13473 = vmatprep.subr.bf16.mxu0 %v19850_v17  ;;  %v19917_v17 = vld [vmem:[#allocation3 + $0x2d50] ss:$8 sps:$4 sm:$0xff]  }
0x11ba   : > { %13974 = vmatpush1.bf16.msra.mxu1 %v19911_v36 }
0x11bb   : > { %13975 = vmatprep.subr.bf16.mxu1 %v19916_v15 }
0x11bc   : > { %13474 = vmatpush1.bf16.msra.mxu0 %v19848_v28  ;;  %v19922_v28 = vld [vmem:[#allocation3 + $0x2d64] ss:$8 sps:$4 sm:$0xff]  }
0x11bd   : > { %13475 = vmatprep.subr.bf16.mxu0 %v19853_v46  ;;  %v19920_v46 = vld [vmem:[#allocation3 + $0x2d60] ss:$8 sps:$4 sm:$0xff]  }
0x11be   : > { %13976 = vmatpush1.bf16.msra.mxu1 %v19914_v3 }
0x11bf   : > { %13977 = vmatprep.subr.bf16.mxu1 %v19919_v16 }
0x11c0   : > { %13476 = vmatpush1.bf16.msra.mxu0 %v19851_v19  ;;  %v19925_v19 = vld [vmem:[#allocation3 + $0x2d74] ss:$8 sps:$4 sm:$0xff]  }
0x11c1   : > { %13477 = vmatprep.subr.bf16.mxu0 %v19856_v20  ;;  %v19923_v20 = vld [vmem:[#allocation3 + $0x2d70] ss:$8 sps:$4 sm:$0xff]  }
0x11c2   : > { %13978 = vmatpush1.bf16.msra.mxu1 %v19917_v17 }
0x11c3   : > { %13979 = vmatprep.subr.bf16.mxu1 %v19922_v28 }
0x11c4   : > { %13478 = vmatpush1.bf16.msra.mxu0 %v19854_v22  ;;  %v19928_v22 = vld [vmem:[#allocation3 + $0x2d84] ss:$8 sps:$4 sm:$0xff]  }
0x11c5   : > { %13479 = vmatprep.subr.bf16.mxu0 %v19859_v23  ;;  %v19926_v23 = vld [vmem:[#allocation3 + $0x2d80] ss:$8 sps:$4 sm:$0xff]  }
0x11c6   : > { %13980 = vmatpush1.bf16.msra.mxu1 %v19920_v46 }
0x11c7   : > { %13981 = vmatprep.subr.bf16.mxu1 %v19925_v19 }
0x11c8   : > { %13480 = vmatpush1.bf16.msra.mxu0 %v19857_v26  ;;  %v19931_v26 = vld [vmem:[#allocation3 + $0x2d94] ss:$8 sps:$4 sm:$0xff]  }
0x11c9   : > { %13481 = vmatprep.subr.bf16.mxu0 %v19862_v27  ;;  %v19929_v27 = vld [vmem:[#allocation3 + $0x2d90] ss:$8 sps:$4 sm:$0xff]  }
0x11ca   : > { %13982 = vmatpush1.bf16.msra.mxu1 %v19923_v20 }
0x11cb   : > { %13983 = vmatprep.subr.bf16.mxu1 %v19928_v22 }
0x11cc   : > { %13482 = vmatpush1.bf16.msra.mxu0 %v19860_v31  ;;  %v17179_v31 = vld [vmem:[%s21138_s2 + $0xc] sm:$0x3] }
0x11cd   : > { %13483 = vmatprep.subr.bf16.mxu0 %v19865_v4  ;;  %v19932_v4 = vld [vmem:[#allocation3 + $0x2da0] ss:$8 sps:$4 sm:$0xff]  }
0x11ce   : > { %13984 = vmatpush1.bf16.msra.mxu1 %v19926_v23 }
0x11cf   : > { %13985 = vmatprep.subr.bf16.mxu1 %v19931_v26 }
0x11d0   : > { %13484 = vmatpush1.bf16.msra.mxu0 %v19863_v33  ;;  %v19934_v33 = vld [vmem:[#allocation3 + $0x2da4] ss:$8 sps:$4 sm:$0xff]  }
0x11d1   : > { %13485 = vmatprep.subr.bf16.mxu0 %v19868_v34  ;;  %v13565_v34 = vrot.slane %v17179_v31, %v20509_v7 }
0x11d2   : > { %13986 = vmatpush1.bf16.msra.mxu1 %v19929_v27 }
0x11d3   : > { %13987 = vmatprep.subr.bf16.mxu1 %v19934_v33  ;;  %v19950_v33 = vld [vmem:[#allocation3 + $0x2e00] ss:$8 sps:$4 sm:$0xff]  }
0x11d4   : > { %13486 = vmatpush1.bf16.msra.mxu0 %v19866_v11  ;;  %v13569_v11 = vrot.slane %v17179_v31, %v20511_v8 }
0x11d5   : > { %13487 = vmatprep.subr.bf16.mxu0 %v19871_v6  ;;  %v19935_v6 = vld [vmem:[#allocation3 + $0x2db0] ss:$8 sps:$4 sm:$0xff]  }
0x11d6   : > { %13988 = vmatpush1.bf16.msra.mxu1 %v19932_v4 }
0x11d8   : > { %13488 = vmatpush1.bf16.msra.mxu0 %v19869_v25  ;;  %v19937_v25 = vld [vmem:[#allocation3 + $0x2db4] ss:$8 sps:$4 sm:$0xff]  }
0x11d9   : > { %13489 = vmatprep.subr.bf16.mxu0 %v19874_v13  ;;  %13989 = vmatprep.subr.bf16.mxu1 %v19937_v25 }
0x11da   : > { %13990 = vmatpush1.bf16.msra.mxu1 %v19935_v6  ;;  %v19955_v6 = vld [vmem:[#allocation3 + $0x2e14] ss:$8 sps:$4 sm:$0xff]  }
0x11dc   : > { %13490 = vmatpush1.bf16.msra.mxu0 %v19872_v35 }
0x11dd   : > { %13491 = vmatprep.subr.bf16.mxu0 %v19877_v37 }
0x11e0   : > { %13492 = vmatpush1.bf16.msra.mxu0 %v19875_v38 }
0x11e1   : > { %13493 = vmatprep.subr.bf16.mxu0 %v19880_v39 }
0x11e4   : > { %13494 = vmatpush1.bf16.msra.mxu0 %v19878_v40 }
0x11e5   : > { %13495 = vmatprep.subr.bf16.mxu0 %v19883_v41 }
0x11e8   : > { %13496 = vmatpush1.bf16.msra.mxu0 %v19881_v42 }
0x11e9   : > { %13497 = vmatprep.subr.bf16.mxu0 %v19886_v44 }
0x11ec   : > { %13498 = vmatpush1.bf16.msra.mxu0 %v19884_v53  ;;  %v19938_v53 = vld [vmem:[#allocation3 + $0x2dc0] ss:$8 sps:$4 sm:$0xff]  }
0x11ed   : > { %13499 = vmatprep.subr.bf16.mxu0 %v19889_v47  ;;  %v19940_v47 = vld [vmem:[#allocation3 + $0x2dc4] ss:$8 sps:$4 sm:$0xff]  }
0x11ee   : > { %13991 = vmatprep.subr.bf16.mxu1 %v19940_v47  ;;  %v19959_v47 = vld [vmem:[#allocation3 + $0x2e30] ss:$8 sps:$4 sm:$0xff]  }
0x11ef   : > { %13992 = vmatpush1.bf16.msra.mxu1 %v19938_v53 }
0x11f0   : > { %13500 = vmatpush1.bf16.msra.mxu0 %v19887_v49  ;;  %v19943_v49 = vld [vmem:[#allocation3 + $0x2dd4] ss:$8 sps:$4 sm:$0xff]  }
0x11f1   : > { %13512 = vmatprep.subr.bf16.mxu0 %v19892_v1  ;;  %13993 = vmatprep.subr.bf16.mxu1 %v19943_v49 }
0x11f3   : > { %13502 = vmatmul.mubr.bf16.vlgmr.msra.gmra.mrb[16].mxu0 %v13257_v55  ;;  %13994 = vmatpush1.bf16.msra.mxu1 %v19941_v52  ;;  %v19962_v52 = vld [vmem:[#allocation3 + $0x2bc0] ss:$8 sps:$4 sm:$0xff]  }
0x11f4   : > { %13513 = vmatpush1.bf16.msra.mxu0 %v19890_v5  ;;  %13544 = vmatprep.mubr.bf16.mxu0 %v20306_v0 }
0x11f5   : > { %13514 = vmatprep.subr.bf16.mxu0 %v19895_v58  ;;  %v19946_v58 = vld [vmem:[#allocation3 + $0x2de4] ss:$8 sps:$4 sm:$0xff]  }
0x11f6   : > { %13995 = vmatprep.subr.bf16.mxu1 %v19946_v58 }
0x11f8   : > { %13515 = vmatpush1.bf16.msra.mxu0 %v19893_v29 }
0x11f9   : > { %13516 = vmatprep.subr.bf16.mxu0 %v19898_v57  ;;  %v19944_v57 = vld [vmem:[#allocation3 + $0x2de0] ss:$8 sps:$4 sm:$0xff]  }
0x11fa   : > { %13996 = vmatpush1.bf16.msra.mxu1 %v19944_v57  ;;  %v19970_v57 = vld [vmem:[#allocation3 + $0x2be4] ss:$8 sps:$4 sm:$0xff]  }
0x11fb   : > { %13997 = vmatprep.subr.bf16.mxu1 %v19949_v59  ;;  %v19968_v59 = vld [vmem:[#allocation3 + $0x2be0] ss:$8 sps:$4 sm:$0xff]  }
0x11fc   : > { %13517 = vmatpush1.bf16.msra.mxu0 %v19896_v10  ;;  %v19947_v10 = vld [vmem:[#allocation3 + $0x2df0] ss:$8 sps:$4 sm:$0xff]  }
0x11fd   : > { %13518 = vmatprep.subr.bf16.mxu0 %v19901_v62  ;;  %v19952_v62 = vld [vmem:[#allocation3 + $0x2e04] ss:$8 sps:$4 sm:$0xff]  }
0x11fe   : > { %13998 = vmatpush1.bf16.msra.mxu1 %v19947_v10  ;;  %v19973_v10 = vld [vmem:[#allocation3 + $0x2bf4] ss:$8 sps:$4 sm:$0xff]  }
0x11ff   : > { %14010 = vmatprep.subr.bf16.mxu1 %v19952_v62  ;;  %v19971_v62 = vld [vmem:[#allocation3 + $0x2bf0] ss:$8 sps:$4 sm:$0xff]  }
0x1200   : > { %13519 = vmatpush1.bf16.msra.mxu0 %v19899_v21 }
0x1203   : > { %17178 = vmatmul.mubr.msk.bf16.vlgmr.msra.gmra.mrb[16].mxu0 %vm249_vm0, %v13263_v30 }
0x12d6   : > { %v13546_v13 = vpop.f32.mrb[16].mxu0 }
0x12d7   : > { %v13572_v35 = vadd.f32 %v13565_v34, %v13546_v13  ;;  %v13548_v37 = vpop.f32.mrb[17].mxu0 }
0x12d8   : > { %v13573_v38 = vadd.f32 %v13569_v11, %v13548_v37  ;;  %v13550_v39 = vpop.f32.mrb[18].mxu0 }
0x12d9   : > { %v13576_v40 = vmax.f32 %v13572_v35, 0.0  ;;  %v13574_v41 = vadd.f32 %v13565_v34, %v13550_v39  ;;  %v13552_v42 = vpop.f32.mrb[19].mxu0 }
0x12da   : > { %v13577_v44 = vmax.f32 %v13573_v38, 0.0  ;;  %v13575_v45 = vadd.f32 %v13569_v11, %v13552_v42  ;;  %v19953_v38 = vld [vmem:[#allocation3 + $0x2e10] ss:$8 sps:$4 sm:$0xff]   ;;  %v19956_v42 = vld [vmem:[#allocation3 + $0x2e20] ss:$8 sps:$4 sm:$0xff]  }
0x12db   : > { %v13584_v48 = vrot.slane %v13576_v40, 6  ;;  %v13578_v61 = vmax.f32 %v13574_v41, 0.0  ;;  %v19958_v40 = vld [vmem:[#allocation3 + $0x2e24] ss:$8 sps:$4 sm:$0xff]  }
0x12dc   : > { %v13585_v50 = vrot.slane %v13577_v44, 6  ;;  %v13579_v1 = vmax.f32 %v13575_v45, 0.0  ;;  %v19961_v45 = vld [vmem:[#allocation3 + $0x2e34] ss:$8 sps:$4 sm:$0xff]  }
0x12dd   : > { %v13586_v51 = vrot.slane %v13578_v61, 6  ;;  %13590 = vrot.lane.b32.xlu0 %v13584_v48, %s20307_s12  ;;  %v19964_v61 = vld [vmem:[#allocation3 + $0x2bc4] ss:$8 sps:$4 sm:$0xff]  }
0x12de   : > { %v13588_v5 = vrot.slane %v13579_v1, 6  ;;  %13592 = vrot.lane.b32.xlu1 %v13585_v50, %s20307_s12 }
0x12df   : > { %v13587_v55 = vsel %vm2129_vm6, %v13584_v48, %v13586_v51 }
0x12e0   : > { %v13589_v29 = vsel %vm2129_vm6, %v13585_v50, %v13588_v5 }
0x12e1   : > { %13594 = vrot.lane.b32.xlu0 %v13587_v55, %s20307_s12 }
0x12e2   : > { %13596 = vrot.lane.b32.xlu1 %v13589_v29, %s20307_s12  ;;  %v19965_v29 = vld [vmem:[#allocation3 + $0x2bd0] ss:$8 sps:$4 sm:$0xff]  }
0x12e5   : > { %13598 = vrot.lane.b32.xlu0 %v13586_v51, %s20307_s12 }
0x12e6   : > { %13600 = vrot.lane.b32.xlu1 %v13588_v5, %s20307_s12  ;;  %v19967_v5 = vld [vmem:[#allocation3 + $0x2bd4] ss:$8 sps:$4 sm:$0xff]  }
0x134f   : > { %v13591_v18 = vpop.permute.xlu0 %13590 }
0x1350   : > { %13614 = vst.msk [vmem:[#allocation2] sm:$0xfc] %vm2161_vm7, %v13591_v18  ;;  %v13593_v2 = vpop.permute.xlu1 %13592 }
0x1351   : > { %v13602_v21 = vsel %vm2148_vm9, %v13591_v18, %v13593_v2  ;;  %13616 = vst.msk [vmem:[#allocation2 + $0x10] sm:$0xfc] %vm2164_vm10, %v13593_v2  ;;  %v19976_v18 = vld [vmem:[#allocation3 + $0x2c04] ss:$8 sps:$4 sm:$0xff]   ;;  %v19974_v2 = vld [vmem:[#allocation3 + $0x2c00] ss:$8 sps:$4 sm:$0xff]  }
0x1352   : > { %13615 = vst [vmem:[#allocation2 + $0x8] sm:$0xfc] %v13602_v21  ;;  %v19979_v21 = vld [vmem:[#allocation3 + $0x2c14] ss:$8 sps:$4 sm:$0xff]  }
0x1353   : > { %v13595_v54 = vpop.permute.xlu0 %13594 }
0x1354   : > { %13617 = vst.msk [vmem:[#allocation2 + $0x18] sm:$0xff] %vm2166_vm8, %v13595_v54  ;;  %v13597_v24 = vpop.permute.xlu1 %13596 }
0x1355   : > { %13619 = vst.msk [vmem:[#allocation2 + $0x28] sm:$0xff] %vm2148_vm9, %v13597_v24  ;;  %v20924_v9 = vsel %vm2148_vm9, %v13595_v54, %v13597_v24  ;;  %v19977_v54 = vld [vmem:[#allocation3 + $0x2c10] ss:$8 sps:$4 sm:$0xff]   ;;  %v19982_v24 = vld [vmem:[#allocation3 + $0x2c24] ss:$8 sps:$4 sm:$0xff]  }
0x1357   : > { %v13599_v56 = vpop.permute.xlu0 %13598  ;;  %v13673_v63 = vld [vmem:[#allocation2] sm:$0xfe] }
0x1358   : > { %13620 = vst.msk [vmem:[#allocation2 + $0x30] sm:$0x3] %vm2170_vm11, %v13599_v56  ;;  %v13601_v30 = vpop.permute.xlu1 %13600  ;;  %v13675_v35 = vld [vmem:[#allocation2 + $0x10] sm:$0xfe] }
0x1359   : > { %v13604_v60 = vsel %vm2148_vm9, %v13599_v56, %v13601_v30  ;;  %13622 = vst.msk [vmem:[#allocation2 + $0x40] sm:$0x3] %vm2173_vm12, %v13601_v30  ;;  %v13674_v32 = vld [vmem:[#allocation2 + $0x8] sm:$0xfe]  ;;  %v19985_v30 = vld [vmem:[#allocation3 + $0x2c34] ss:$8 sps:$4 sm:$0xff]  }
0x135a   : > { %13621 = vst [vmem:[#allocation2 + $0x38] sm:$0x3] %v13604_v60  ;;  %v13680_v12 = vpack.c.bf16 %v20924_v9, %v13674_v32  ;;  %v13624_v1 = vld [vmem:[#allocation2 + $0x8] sm:$0xff]  ;;  %v19983_v60 = vld [vmem:[#allocation3 + $0x2c30] ss:$8 sps:$4 sm:$0xff]  }
0x135b   : > { %v20929_v14 = vld [vmem:[#allocation2 + $0x18] sm:$0xff]  ;;  %v13630_v55 = vpack.c.bf16 %v20924_v9, %v13624_v1  ;;  %v19980_v56 = vld [vmem:[#allocation3 + $0x2c20] ss:$8 sps:$4 sm:$0xff]   ;;  %v19988_v32 = vld [vmem:[#allocation3 + $0x2c44] ss:$8 sps:$4 sm:$0xff]  }
0x135c   : > { %v13679_v43 = vpack.c.bf16 %v20929_v14, %v13673_v63  ;;  %v13741_v36 = vshll.u32 %v13680_v12, 16  ;;  %v13739_v22 = vshrl.u32 %v13680_v12, 16  ;;  %v20933_v25 = vld [vmem:[#allocation2 + $0x28] sm:$0xff]  ;;  %v19991_v63 = vld [vmem:[#allocation3 + $0x2c54] ss:$8 sps:$4 sm:$0xff]  }
0x135d   : > { %v13681_v39 = vpack.c.bf16 %v20933_v25, %v13675_v35  ;;  %v19986_v12 = vld [vmem:[#allocation3 + $0x2c40] ss:$8 sps:$4 sm:$0xff]   ;;  %v20030_v1 = vld [vmem:[#allocation3 + $0x2e64] ss:$8 sps:$4 sm:$0xff]  }
0x135e   : > { %v13729_v3 = vshll.u32 %v13679_v43, 16  ;;  %v13743_v46 = vrot.slane %v13741_v36, 1  ;;  %v13727_v26 = vshrl.u32 %v13679_v43, 16  ;;  %v19989_v43 = vld [vmem:[#allocation3 + $0x2c50] ss:$8 sps:$4 sm:$0xff]  }
0x135f   : > { %v13676_v15 = vld [vmem:[#allocation2 + $0x30] sm:$0x1]  ;;  %v13753_v44 = vshll.u32 %v13681_v39, 16  ;;  %v13751_v49 = vshrl.u32 %v13681_v39, 16  ;;  %v19994_v36 = vld [vmem:[#allocation3 + $0x2c64] ss:$8 sps:$4 sm:$0xff]  }
0x1360   : > { %v13682_v16 = vpack.c.bf16 %v13676_v15, %v13676_v15  ;;  %v13731_v20 = vrot.slane %v13729_v3, 1  ;;  %v13744_v31 = vor.u32 %v13743_v46, %v13739_v22  ;;  %v13678_v37 = vld [vmem:[#allocation2 + $0x40] sm:$0x1]  ;;  %v19992_v15 = vld [vmem:[#allocation3 + $0x2c60] ss:$8 sps:$4 sm:$0xff]  }
0x1361   : > { %v13677_v17 = vld [vmem:[#allocation2 + $0x38] sm:$0x1]  ;;  %v13684_v41 = vpack.c.bf16 %v13678_v37, %v13678_v37  ;;  %v13755_v48 = vrot.slane %v13753_v44, 1  ;;  %v19997_v3 = vld [vmem:[#allocation3 + $0x2c74] ss:$8 sps:$4 sm:$0xff]  }
0x1362   : > { %v13683_v28 = vpack.c.bf16 %v13677_v17, %v13677_v17  ;;  %v13734_v19 = vshll.u32 %v13682_v16, 16  ;;  %v13732_v34 = vor.u32 %v13731_v20, %v13727_v26  ;;  %v19995_v16 = vld [vmem:[#allocation3 + $0x2c70] ss:$8 sps:$4 sm:$0xff]   ;;  %v20000_v17 = vld [vmem:[#allocation3 + $0x2c84] ss:$8 sps:$4 sm:$0xff]  }
0x1363   : > { %v13758_v53 = vshll.u32 %v13684_v41, 16  ;;  %v13756_v51 = vor.u32 %v13755_v48, %v13751_v49  ;;  %v20003_v46 = vld [vmem:[#allocation3 + $0x2c94] ss:$8 sps:$4 sm:$0xff]   ;;  %v20006_v20 = vld [vmem:[#allocation3 + $0x2ca4] ss:$8 sps:$4 sm:$0xff]  }
0x1364   : > { %v13746_v23 = vshll.u32 %v13683_v28, 16  ;;  %v13736_v27 = vrot.slane %v13734_v19, 1  ;;  %v19998_v28 = vld [vmem:[#allocation3 + $0x2c80] ss:$8 sps:$4 sm:$0xff]   ;;  %v20001_v19 = vld [vmem:[#allocation3 + $0x2c90] ss:$8 sps:$4 sm:$0xff]  }
0x1365   : > { %v13760_v50 = vrot.slane %v13758_v53, 1  ;;  %v20004_v22 = vld [vmem:[#allocation3 + $0x2ca0] ss:$8 sps:$4 sm:$0xff]   ;;  %v20007_v26 = vld [vmem:[#allocation3 + $0x2cb0] ss:$8 sps:$4 sm:$0xff]  }
0x1366   : > { %v13748_v4 = vrot.slane %v13746_v23, 1  ;;  %v13737_v13 = vsel %vm360_vm2, %v13732_v34, %v13736_v27  ;;  %v20009_v23 = vld [vmem:[#allocation3 + $0x2cb4] ss:$8 sps:$4 sm:$0xff]   ;;  %v20012_v27 = vld [vmem:[#allocation3 + $0x2cc4] ss:$8 sps:$4 sm:$0xff]  }
0x1367   : > { %v13761_v58 = vsel %vm360_vm2, %v13756_v51, %v13760_v50  ;;  %v20015_v34 = vld [vmem:[#allocation3 + $0x2cd4] ss:$8 sps:$4 sm:$0xff]   ;;  %v14346_v35 = vld [vmem:[#allocation2 + $0x38] sm:$0x3]  ;;  %v20024_v41 = vld [vmem:[#allocation3 + $0x2e44] ss:$8 sps:$4 sm:$0xff]  }
0x1368   : > { %v13749_v11 = vsel %vm360_vm2, %v13744_v31, %v13748_v4  ;;  %v13623_v31 = vld [vmem:[#allocation2] sm:$0xff]  ;;  %v20010_v4 = vld [vmem:[#allocation3 + $0x2cc0] ss:$8 sps:$4 sm:$0xff]   ;;  %v14352_v39 = vpack.c.bf16 %v14346_v35, %v14346_v35 }
0x1369   : > { %13999 = vmatprep.mubr.bf16.mxu1 %v13749_v11  ;;  %v20013_v11 = vld [vmem:[#allocation3 + $0x2cd0] ss:$8 sps:$4 sm:$0xff]   ;;  %v20021_v37 = vld [vmem:[#allocation3 + $0x2cf4] ss:$8 sps:$4 sm:$0xff]   ;;  %v20022_v53 = vld [vmem:[#allocation3 + $0x2e40] ss:$8 sps:$4 sm:$0xff]  }
0x136a   : > { %14000 = vmatmul.mubr.bf16.vlgmr.msra.gmra.mrb[16].mxu1 %v13737_v13  ;;  %v20016_v13 = vld [vmem:[#allocation3 + $0x2ce0] ss:$8 sps:$4 sm:$0xff]   ;;  %v14405_v44 = vrot.slane %v14352_v39, 1  ;;  %v20025_v50 = vld [vmem:[#allocation3 + $0x2e50] ss:$8 sps:$4 sm:$0xff]  }
0x136b   : > { %14011 = vmatpush1.bf16.msra.mxu1 %v19950_v33  ;;  %14042 = vmatprep.mubr.bf16.mxu1 %v20306_v0  ;;  %v13629_v33 = vpack.c.bf16 %v20929_v14, %v13623_v31  ;;  %v20028_v51 = vld [vmem:[#allocation3 + $0x2e60] ss:$8 sps:$4 sm:$0xff]   ;;  %v14709_v31 = vld [vmem:[#allocation2 + $0x38] sm:$0x7] }
0x136c   : > { %14012 = vmatprep.subr.bf16.mxu1 %v19955_v6  ;;  %v20018_v6 = vld [vmem:[#allocation3 + $0x2ce4] ss:$8 sps:$4 sm:$0xff]  }
0x136f   : > { %14013 = vmatpush1.bf16.msra.mxu1 %v19953_v38  ;;  %v14343_v38 = vld [vmem:[#allocation2 + $0x8] sm:$0xfc] }
0x1370   : > { %14014 = vmatprep.subr.bf16.mxu1 %v19958_v40  ;;  %v20019_v40 = vld [vmem:[#allocation3 + $0x2cf0] ss:$8 sps:$4 sm:$0xff]  }
0x1373   : > { %14015 = vmatpush1.bf16.msra.mxu1 %v19956_v42  ;;  %v14349_v42 = vpack.c.bf16 %v20924_v9, %v14343_v38 }
0x1374   : > { %14016 = vmatprep.subr.bf16.mxu1 %v19961_v45  ;;  %v13625_v45 = vld [vmem:[#allocation2 + $0x10] sm:$0xff] }
0x1375   : > { %v14404_v48 = vrot.slane %v14349_v42, 1 }
0x1377   : > { %14017 = vmatpush1.bf16.msra.mxu1 %v19959_v47  ;;  %v13631_v47 = vpack.c.bf16 %v20933_v25, %v13625_v45  ;;  %v14406_v49 = vsel %vm1036_vm3, %v14404_v48, %v14405_v44 }
0x1378   : > { %14256 = vmatprep.subr.bf16.mxu1 %v19964_v61  ;;  %v20027_v61 = vld [vmem:[#allocation3 + $0x2e54] ss:$8 sps:$4 sm:$0xff]  }
0x137a   : > { %17220 = vmatmul.mubr.msk.bf16.vlgmr.msra.gmra.mrb[16].mxu1 %vm249_vm0, %v13761_v58  ;;  %v20036_v58 = vld [vmem:[#allocation3 + $0x2e84] ss:$8 sps:$4 sm:$0xff]  }
0x137b   : > { %14257 = vmatpush1.bf16.msra.mxu1 %v19962_v52  ;;  %14288 = vmatprep.mubr.bf16.mxu1 %v13630_v55  ;;  %v20033_v52 = vld [vmem:[#allocation3 + $0x2e74] ss:$8 sps:$4 sm:$0xff]   ;;  %v20034_v55 = vld [vmem:[#allocation3 + $0x2e80] ss:$8 sps:$4 sm:$0xff]  }
0x137c   : > { %14258 = vmatprep.subr.bf16.mxu1 %v19967_v5  ;;  %v20031_v5 = vld [vmem:[#allocation3 + $0x2e70] ss:$8 sps:$4 sm:$0xff]  }
0x137f   : > { %14259 = vmatpush1.bf16.msra.mxu1 %v19965_v29  ;;  %v20039_v29 = vld [vmem:[#allocation3 + $0x2e94] ss:$8 sps:$4 sm:$0xff]  }
0x1380   : > { %14260 = vmatprep.subr.bf16.mxu1 %v19970_v57  ;;  %v20037_v57 = vld [vmem:[#allocation3 + $0x2e90] ss:$8 sps:$4 sm:$0xff]  }
0x1383   : > { %14261 = vmatpush1.bf16.msra.mxu1 %v19968_v59  ;;  %v20042_v59 = vld [vmem:[#allocation3 + $0x2ea4] ss:$8 sps:$4 sm:$0xff]  }
0x1384   : > { %14262 = vmatprep.subr.bf16.mxu1 %v19973_v10  ;;  %v20040_v10 = vld [vmem:[#allocation3 + $0x2ea0] ss:$8 sps:$4 sm:$0xff]  }
0x1387   : > { %14263 = vmatpush1.bf16.msra.mxu1 %v19971_v62  ;;  %v20045_v62 = vld [vmem:[#allocation3 + $0x2eb4] ss:$8 sps:$4 sm:$0xff]  }
0x1388   : > { %14264 = vmatprep.subr.bf16.mxu1 %v19976_v18  ;;  %v20043_v18 = vld [vmem:[#allocation3 + $0x2eb0] ss:$8 sps:$4 sm:$0xff]  }
0x138b   : > { %14265 = vmatpush1.bf16.msra.mxu1 %v19974_v2  ;;  %v20048_v2 = vld [vmem:[#allocation3 + $0x2ec4] ss:$8 sps:$4 sm:$0xff]  }
0x138c   : > { %14266 = vmatprep.subr.bf16.mxu1 %v19979_v21  ;;  %v20046_v21 = vld [vmem:[#allocation3 + $0x2ec0] ss:$8 sps:$4 sm:$0xff]  }
0x138f   : > { %14267 = vmatpush1.bf16.msra.mxu1 %v19977_v54  ;;  %v20051_v54 = vld [vmem:[#allocation3 + $0x2ed4] ss:$8 sps:$4 sm:$0xff]  }
0x1390   : > { %14268 = vmatprep.subr.bf16.mxu1 %v19982_v24  ;;  %v20049_v24 = vld [vmem:[#allocation3 + $0x2ed0] ss:$8 sps:$4 sm:$0xff]  }
0x1393   : > { %14269 = vmatpush1.bf16.msra.mxu1 %v19980_v56  ;;  %v20054_v56 = vld [vmem:[#allocation3 + $0x2ee4] ss:$8 sps:$4 sm:$0xff]  }
0x1394   : > { %14270 = vmatprep.subr.bf16.mxu1 %v19985_v30  ;;  %v20052_v30 = vld [vmem:[#allocation3 + $0x2ee0] ss:$8 sps:$4 sm:$0xff]  }
0x1397   : > { %14271 = vmatpush1.bf16.msra.mxu1 %v19983_v60  ;;  %v20057_v60 = vld [vmem:[#allocation3 + $0x2ef4] ss:$8 sps:$4 sm:$0xff]  }
0x1398   : > { %14272 = vmatprep.subr.bf16.mxu1 %v19988_v32  ;;  %v20055_v32 = vld [vmem:[#allocation3 + $0x2ef0] ss:$8 sps:$4 sm:$0xff]  }
0x139b   : > { %14273 = vmatpush1.bf16.msra.mxu1 %v19986_v12  ;;  %v20060_v12 = vld [vmem:[#allocation3 + $0x2f04] ss:$8 sps:$4 sm:$0xff]  }
0x139c   : > { %14274 = vmatprep.subr.bf16.mxu1 %v19991_v63  ;;  %v20058_v63 = vld [vmem:[#allocation3 + $0x2f00] ss:$8 sps:$4 sm:$0xff]  }
0x139f   : > { %14275 = vmatpush1.bf16.msra.mxu1 %v19989_v43  ;;  %v20063_v43 = vld [vmem:[#allocation3 + $0x2f14] ss:$8 sps:$4 sm:$0xff]  }
0x13a0   : > { %14276 = vmatprep.subr.bf16.mxu1 %v19994_v36  ;;  %v20061_v36 = vld [vmem:[#allocation3 + $0x2f10] ss:$8 sps:$4 sm:$0xff]  }
0x13a3   : > { %14277 = vmatpush1.bf16.msra.mxu1 %v19992_v15  ;;  %v20066_v15 = vld [vmem:[#allocation3 + $0x2f24] ss:$8 sps:$4 sm:$0xff]  }
0x13a4   : > { %14278 = vmatprep.subr.bf16.mxu1 %v19997_v3  ;;  %v14345_v3 = vld [vmem:[#allocation2 + $0x30] sm:$0x3] }
0x13a7   : > { %14279 = vmatpush1.bf16.msra.mxu1 %v19995_v16  ;;  %v20064_v16 = vld [vmem:[#allocation3 + $0x2f20] ss:$8 sps:$4 sm:$0xff]  }
0x13a8   : > { %14280 = vmatprep.subr.bf16.mxu1 %v20000_v17  ;;  %v20069_v17 = vld [vmem:[#allocation3 + $0x2f34] ss:$8 sps:$4 sm:$0xff]  }
0x13ab   : > { %14281 = vmatpush1.bf16.msra.mxu1 %v19998_v28  ;;  %v14351_v28 = vpack.c.bf16 %v14345_v3, %v14345_v3  ;;  %v20111_v3 = vld [vmem:[#allocation3 + $0x3014] ss:$8 sps:$4 sm:$0xff]  }
0x13ac   : > { %14282 = vmatprep.subr.bf16.mxu1 %v20003_v46  ;;  %v14342_v46 = vld [vmem:[#allocation2] sm:$0xfc] }
0x13af   : > { %14283 = vmatpush1.bf16.msra.mxu1 %v20001_v19  ;;  %v20067_v19 = vld [vmem:[#allocation3 + $0x2f30] ss:$8 sps:$4 sm:$0xff]  }
0x13b0   : > { %14284 = vmatprep.subr.bf16.mxu1 %v20006_v20  ;;  %v14348_v20 = vpack.c.bf16 %v20929_v14, %v14342_v46  ;;  %v15548_v46 = vld [vmem:[%s21139_s3 + $0x88] sm:$0xff] }
0x13b3   : > { %14285 = vmatpush1.bf16.msra.mxu1 %v20004_v22  ;;  %v20072_v22 = vld [vmem:[#allocation3 + $0x2f44] ss:$8 sps:$4 sm:$0xff]  }
0x13b4   : > { %14286 = vmatprep.subr.bf16.mxu1 %v20009_v23  ;;  %v14402_v23 = vrot.slane %v14351_v28, 1  ;;  %v15547_v28 = vld [vmem:[%s21139_s3 + $0x80] sm:$0xff] }
0x13b7   : > { %14287 = vmatpush1.bf16.msra.mxu1 %v20007_v26  ;;  %v14401_v26 = vrot.slane %v14348_v20, 1  ;;  %v17427_v20 = vpack.c.bf16 %v15548_v46, %v15547_v28  ;;  %v20127_v46 = vld [vmem:[#allocation3 + $0x3070] ss:$8 sps:$4 sm:$0xff]  }
0x13b8   : > { %14299 = vmatprep.subr.bf16.mxu1 %v20012_v27  ;;  %v20070_v27 = vld [vmem:[#allocation3 + $0x2f40] ss:$8 sps:$4 sm:$0xff]  }
0x13b9   : > { %17428 = vmatprep.subr.bf16.mxu0 %v17427_v20 }
0x13ba   : > { %14289 = vmatmul.mubr.bf16.vlgmr.msra.gmra.mrb[16].mxu1 %v13629_v33  ;;  %v14403_v33 = vsel %vm1036_vm3, %v14401_v26, %v14402_v23  ;;  %v15549_v23 = vld [vmem:[%s21139_s3 + $0x90] sm:$0xff]  ;;  %v15550_v26 = vld [vmem:[%s21139_s3 + $0x98] sm:$0xff] }
0x13bb   : > { %14300 = vmatpush1.bf16.msra.mxu1 %v20010_v4  ;;  %14331 = vmatprep.mubr.bf16.mxu1 %v20306_v0  ;;  %v20075_v4 = vld [vmem:[#allocation3 + $0x2f54] ss:$8 sps:$4 sm:$0xff]  }
0x13bc   : > { %14301 = vmatprep.subr.bf16.mxu1 %v20015_v34  ;;  %v14706_v34 = vld [vmem:[#allocation2 + $0x8] sm:$0xf8] }
0x13bd   : > { %v14712_v35 = vpack.c.bf16 %v20924_v9, %v14706_v34  ;;  %v15551_v34 = vld [vmem:[%s21139_s3 + $0xa0] sm:$0xff] }
0x13bf   : > { %14302 = vmatpush1.bf16.msra.mxu1 %v20013_v11  ;;  %v14715_v11 = vpack.c.bf16 %v14709_v31, %v14709_v31  ;;  %v14776_v42 = vshrl.u32 %v14712_v35, 16  ;;  %v14779_v44 = vshll.u32 %v14712_v35, 16  ;;  %v17431_v31 = vpack.c.bf16 %v15550_v26, %v15549_v23  ;;  %v14710_v26 = vld [vmem:[#allocation2 + $0x40] sm:$0x7] }
0x13c0   : > { %14303 = vmatprep.subr.bf16.mxu1 %v20018_v6  ;;  %v20073_v6 = vld [vmem:[#allocation3 + $0x2f50] ss:$8 sps:$4 sm:$0xff]  }
0x13c1   : > { %v14784_v38 = vshrl.u32 %v14715_v11, 16  ;;  %v14787_v39 = vshll.u32 %v14715_v11, 16  ;;  %v15552_v11 = vld [vmem:[%s21139_s3 + $0xa8] sm:$0xff] }
0x13c2   : > { %v17435_v35 = vpack.c.bf16 %v15552_v11, %v15551_v34  ;;  %v14716_v34 = vpack.c.bf16 %v14710_v26, %v14710_v26  ;;  %v14707_v11 = vld [vmem:[#allocation2 + $0x10] sm:$0xf8] }
0x13c3   : > { %14304 = vmatpush1.bf16.msra.mxu1 %v20016_v13  ;;  %v20078_v13 = vld [vmem:[#allocation3 + $0x2f64] ss:$8 sps:$4 sm:$0xff]   ;;  %v14789_v48 = vrot.slane %v14787_v39, 2  ;;  %v20117_v39 = vld [vmem:[#allocation3 + $0x3034] ss:$8 sps:$4 sm:$0xff]  }
0x13c4   : > { %14305 = vmatprep.subr.bf16.mxu1 %v20021_v37  ;;  %v14347_v37 = vld [vmem:[#allocation2 + $0x40] sm:$0x3]  ;;  %v20186_v26 = vld [vmem:[#allocation3 + $0x31a4] ss:$8 sps:$4 sm:$0xff]  }
0x13c5   : > { %v14353_v45 = vpack.c.bf16 %v14347_v37, %v14347_v37  ;;  %v15535_v37 = vld [vmem:[%s21139_s3 + $0x20] sm:$0xff] }
0x13c7   : > { %14306 = vmatpush1.bf16.msra.mxu1 %v20019_v40  ;;  %v20076_v40 = vld [vmem:[#allocation3 + $0x2f60] ss:$8 sps:$4 sm:$0xff]  }
0x13c8   : > { %14615 = vmatprep.subr.bf16.mxu1 %v20024_v41  ;;  %v20081_v41 = vld [vmem:[#allocation3 + $0x2f74] ss:$8 sps:$4 sm:$0xff]  }
0x13ca   : > { %17261 = vmatmul.mubr.msk.bf16.vlgmr.msra.gmra.mrb[16].mxu1 %vm249_vm0, %v13631_v47  ;;  %v14786_v47 = vrot.slane %v14784_v38, 1  ;;  %v15536_v38 = vld [vmem:[%s21139_s3 + $0x28] sm:$0xff] }
0x13cb   : > { %14616 = vmatpush1.bf16.msra.mxu1 %v20022_v53  ;;  %14647 = vmatprep.mubr.bf16.mxu1 %v14406_v49  ;;  %v14344_v53 = vld [vmem:[#allocation2 + $0x10] sm:$0xfc] }
0x13cc   : > { %14617 = vmatprep.subr.bf16.mxu1 %v20027_v61  ;;  %v20079_v61 = vld [vmem:[#allocation3 + $0x2f70] ss:$8 sps:$4 sm:$0xff]   ;;  %v14350_v49 = vpack.c.bf16 %v20933_v25, %v14344_v53 }
0x13cd   : > { %v15537_v53 = vld [vmem:[%s21139_s3 + $0x30] sm:$0xff] }
0x13cf   : > { %14618 = vmatpush1.bf16.msra.mxu1 %v20025_v50  ;;  %v20084_v50 = vld [vmem:[#allocation3 + $0x2f84] ss:$8 sps:$4 sm:$0xff]  }
0x13d0   : > { %14619 = vmatprep.subr.bf16.mxu1 %v20030_v1  ;;  %v14778_v1 = vrot.slane %v14776_v42, 1  ;;  %v17437_v42 = vpack.c.bf16 %v15536_v38, %v15535_v37  ;;  %v14801_v37 = vshrl.u32 %v14716_v34, 16  ;;  %v14804_v38 = vshll.u32 %v14716_v34, 16  ;;  %v15104_v34 = vld [vmem:[#allocation2] sm:$0xf0] }
0x13d3   : > { %14620 = vmatpush1.bf16.msra.mxu1 %v20028_v51  ;;  %v14781_v51 = vrot.slane %v14779_v44, 2  ;;  %v20115_v44 = vld [vmem:[#allocation3 + $0x3030] ss:$8 sps:$4 sm:$0xff]  }
0x13d4   : > { %14621 = vmatprep.subr.bf16.mxu1 %v20033_v52  ;;  %v14408_v52 = vrot.slane %v14353_v45, 1 }
0x13d7   : > { %14622 = vmatpush1.bf16.msra.mxu1 %v20031_v5  ;;  %v14790_v5 = vor.u32 %v14789_v48, %v14786_v47  ;;  %v15538_v47 = vld [vmem:[%s21139_s3 + $0x38] sm:$0xff] }
0x13d8   : > { %14623 = vmatprep.subr.bf16.mxu1 %v20036_v58  ;;  %v14407_v58 = vrot.slane %v14350_v49, 1  ;;  %v20120_v48 = vld [vmem:[#allocation3 + $0x3044] ss:$8 sps:$4 sm:$0xff]   ;;  %v15556_v49 = vld [vmem:[%s21139_s3 + $0xc8] sm:$0xff] }
0x13db   : > { %14624 = vmatpush1.bf16.msra.mxu1 %v20034_v55  ;;  %v20082_v55 = vld [vmem:[#allocation3 + $0x2f80] ss:$8 sps:$4 sm:$0xff]  }
0x13dc   : > { %14625 = vmatprep.subr.bf16.mxu1 %v20039_v29  ;;  %v14782_v29 = vor.u32 %v14781_v51, %v14778_v1  ;;  %v17441_v1 = vpack.c.bf16 %v15538_v47, %v15537_v53  ;;  %v20118_v51 = vld [vmem:[#allocation3 + $0x3040] ss:$8 sps:$4 sm:$0xff]   ;;  %v14806_v53 = vrot.slane %v14804_v38, 2  ;;  %v15105_v47 = vld [vmem:[#allocation2 + $0x8] sm:$0xf0] }
0x13dd   : > { %v20190_v38 = vld [vmem:[#allocation3 + $0x31c0] ss:$8 sps:$4 sm:$0xff]  }
0x13df   : > { %14626 = vmatpush1.bf16.msra.mxu1 %v20037_v57  ;;  %v20087_v57 = vld [vmem:[#allocation3 + $0x2f94] ss:$8 sps:$4 sm:$0xff]  }
0x13e0   : > { %14627 = vmatprep.subr.bf16.mxu1 %v20042_v59  ;;  %v14409_v59 = vsel %vm1036_vm3, %v14407_v58, %v14408_v52  ;;  %v15540_v58 = vld [vmem:[%s21139_s3 + $0x48] sm:$0xff] }
0x13e3   : > { %14628 = vmatpush1.bf16.msra.mxu1 %v20040_v10  ;;  %v14791_v10 = vsel %vm1394_vm4, %v14782_v29, %v14790_v5  ;;  %v15539_v5 = vld [vmem:[%s21139_s3 + $0x40] sm:$0xff]  ;;  %v15557_v29 = vld [vmem:[%s21139_s3 + $0xd0] sm:$0xff] }
0x13e4   : > { %14629 = vmatprep.subr.bf16.mxu1 %v20045_v62  ;;  %v20085_v62 = vld [vmem:[#allocation3 + $0x2f90] ss:$8 sps:$4 sm:$0xff]  }
0x13e7   : > { %14630 = vmatpush1.bf16.msra.mxu1 %v20043_v18  ;;  %v20090_v18 = vld [vmem:[#allocation3 + $0x2fa4] ss:$8 sps:$4 sm:$0xff]  }
0x13e8   : > { %14631 = vmatprep.subr.bf16.mxu1 %v20048_v2  ;;  %v20088_v2 = vld [vmem:[#allocation3 + $0x2fa0] ss:$8 sps:$4 sm:$0xff]  }
0x13eb   : > { %14632 = vmatpush1.bf16.msra.mxu1 %v20046_v21  ;;  %v20093_v21 = vld [vmem:[#allocation3 + $0x2fb4] ss:$8 sps:$4 sm:$0xff]  }
0x13ec   : > { %14633 = vmatprep.subr.bf16.mxu1 %v20051_v54  ;;  %v20091_v54 = vld [vmem:[#allocation3 + $0x2fb0] ss:$8 sps:$4 sm:$0xff]  }
0x13ef   : > { %14634 = vmatpush1.bf16.msra.mxu1 %v20049_v24  ;;  %v20096_v24 = vld [vmem:[#allocation3 + $0x2fc4] ss:$8 sps:$4 sm:$0xff]  }
0x13f0   : > { %14635 = vmatprep.subr.bf16.mxu1 %v20054_v56  ;;  %v20094_v56 = vld [vmem:[#allocation3 + $0x2fc0] ss:$8 sps:$4 sm:$0xff]  }
0x13f3   : > { %14636 = vmatpush1.bf16.msra.mxu1 %v20052_v30  ;;  %v20099_v30 = vld [vmem:[#allocation3 + $0x2fd4] ss:$8 sps:$4 sm:$0xff]  }
0x13f4   : > { %14637 = vmatprep.subr.bf16.mxu1 %v20057_v60  ;;  %v20097_v60 = vld [vmem:[#allocation3 + $0x2fd0] ss:$8 sps:$4 sm:$0xff]  }
0x13f7   : > { %14638 = vmatpush1.bf16.msra.mxu1 %v20055_v32  ;;  %v20102_v32 = vld [vmem:[#allocation3 + $0x2fe4] ss:$8 sps:$4 sm:$0xff]  }
0x13f8   : > { %14639 = vmatprep.subr.bf16.mxu1 %v20060_v12  ;;  %v20100_v12 = vld [vmem:[#allocation3 + $0x2fe0] ss:$8 sps:$4 sm:$0xff]  }
0x13fb   : > { %14640 = vmatpush1.bf16.msra.mxu1 %v20058_v63  ;;  %v20105_v63 = vld [vmem:[#allocation3 + $0x2ff4] ss:$8 sps:$4 sm:$0xff]  }
0x13fc   : > { %14641 = vmatprep.subr.bf16.mxu1 %v20063_v43  ;;  %v20103_v43 = vld [vmem:[#allocation3 + $0x2ff0] ss:$8 sps:$4 sm:$0xff]  }
0x13ff   : > { %14642 = vmatpush1.bf16.msra.mxu1 %v20061_v36  ;;  %v20108_v36 = vld [vmem:[#allocation3 + $0x3004] ss:$8 sps:$4 sm:$0xff]  }
0x1400   : > { %14643 = vmatprep.subr.bf16.mxu1 %v20066_v15  ;;  %v20106_v15 = vld [vmem:[#allocation3 + $0x3000] ss:$8 sps:$4 sm:$0xff]  }
0x1403   : > { %14644 = vmatpush1.bf16.msra.mxu1 %v20064_v16  ;;  %v20109_v16 = vld [vmem:[#allocation3 + $0x3010] ss:$8 sps:$4 sm:$0xff]  }
0x1404   : > { %14645 = vmatprep.subr.bf16.mxu1 %v20069_v17  ;;  %v20114_v17 = vld [vmem:[#allocation3 + $0x3024] ss:$8 sps:$4 sm:$0xff]  }
0x1407   : > { %14646 = vmatpush1.bf16.msra.mxu1 %v20067_v19  ;;  %v15531_v19 = vld [vmem:[%s21139_s3] sm:$0xff] }
0x1408   : > { %14658 = vmatprep.subr.bf16.mxu1 %v20072_v22  ;;  %v15532_v22 = vld [vmem:[%s21139_s3 + $0x8] sm:$0xff] }
0x140a   : > { %14648 = vmatmul.mubr.bf16.vlgmr.msra.gmra.mrb[16].mxu1 %v14403_v33  ;;  %v15534_v33 = vld [vmem:[%s21139_s3 + $0x18] sm:$0xff] }
0x140b   : > { %14659 = vmatpush1.bf16.msra.mxu1 %v20070_v27  ;;  %14690 = vmatprep.mubr.bf16.mxu1 %v20306_v0  ;;  %v17429_v27 = vpack.c.bf16 %v15532_v22, %v15531_v19  ;;  %v20132_v22 = vld [vmem:[#allocation3 + $0x3084] ss:$8 sps:$4 sm:$0xff]  }
0x140c   : > { %14660 = vmatprep.subr.bf16.mxu1 %v20075_v4  ;;  %v15533_v4 = vld [vmem:[%s21139_s3 + $0x10] sm:$0xff] }
0x140d   : > { %17430 = vmatpush3.bf16.msra.mxu0 %v17429_v27 }
0x140e   : > { %17432 = vmatprep.subr.bf16.mxu0 %v17431_v31  ;;  %v20130_v31 = vld [vmem:[#allocation3 + $0x3080] ss:$8 sps:$4 sm:$0xff]  }
0x140f   : > { %14661 = vmatpush1.bf16.msra.mxu1 %v20073_v6  ;;  %v17433_v6 = vpack.c.bf16 %v15534_v33, %v15533_v4  ;;  %v20135_v4 = vld [vmem:[#allocation3 + $0x3094] ss:$8 sps:$4 sm:$0xff]  }
0x1410   : > { %14662 = vmatprep.subr.bf16.mxu1 %v20078_v13  ;;  %v20112_v13 = vld [vmem:[#allocation3 + $0x3020] ss:$8 sps:$4 sm:$0xff]  }
0x1411   : > { %17434 = vmatpush3.bf16.msra.mxu0 %v17433_v6  ;;  %v20133_v6 = vld [vmem:[#allocation3 + $0x3090] ss:$8 sps:$4 sm:$0xff]  }
0x1412   : > { %17436 = vmatprep.subr.bf16.mxu0 %v17435_v35  ;;  %v20138_v35 = vld [vmem:[#allocation3 + $0x30a4] ss:$8 sps:$4 sm:$0xff]  }
0x1413   : > { %14663 = vmatpush1.bf16.msra.mxu1 %v20076_v40  ;;  %v15553_v40 = vld [vmem:[%s21139_s3 + $0xb0] sm:$0xff] }
0x1414   : > { %14664 = vmatprep.subr.bf16.mxu1 %v20081_v41  ;;  %v15554_v41 = vld [vmem:[%s21139_s3 + $0xb8] sm:$0xff] }
0x1415   : > { %v17439_v45 = vpack.c.bf16 %v15554_v41, %v15553_v40  ;;  %17438 = vmatpush3.bf16.msra.mxu0 %v17437_v42  ;;  %v15108_v42 = vld [vmem:[#allocation2 + $0x38] sm:$0xf] }
0x1417   : > { %14665 = vmatpush1.bf16.msra.mxu1 %v20079_v61  ;;  %v15555_v61 = vld [vmem:[%s21139_s3 + $0xc0] sm:$0xff]  ;;  %17440 = vmatprep.subr.bf16.mxu0 %v17439_v45  ;;  %v14803_v45 = vrot.slane %v14801_v37, 1 }
0x1418   : > { %15014 = vmatprep.subr.bf16.mxu1 %v20084_v50  ;;  %v14708_v50 = vld [vmem:[#allocation2 + $0x30] sm:$0x7]  ;;  %v17443_v52 = vpack.c.bf16 %v15556_v49, %v15555_v61  ;;  %v20139_v61 = vld [vmem:[#allocation3 + $0x30b0] ss:$8 sps:$4 sm:$0xff]  }
0x1419   : > { %17442 = vmatpush3.bf16.msra.mxu0 %v17441_v1  ;;  %v20144_v1 = vld [vmem:[#allocation3 + $0x30c4] ss:$8 sps:$4 sm:$0xff]  }
0x141a   : > { %17302 = vmatmul.mubr.msk.bf16.vlgmr.msra.gmra.mrb[16].mxu1 %vm249_vm0, %v14409_v59  ;;  %v14714_v59 = vpack.c.bf16 %v14708_v50, %v14708_v50  ;;  %17444 = vmatprep.subr.bf16.mxu0 %v17443_v52  ;;  %v14807_v52 = vor.u32 %v14806_v53, %v14803_v45  ;;  %v20201_v45 = vld [vmem:[#allocation3 + $0x31f4] ss:$8 sps:$4 sm:$0xff]  }
0x141b   : > { %15015 = vmatpush1.bf16.msra.mxu1 %v20082_v55  ;;  %15046 = vmatprep.mubr.bf16.mxu1 %v14791_v10  ;;  %v20123_v55 = vld [vmem:[#allocation3 + $0x3054] ss:$8 sps:$4 sm:$0xff]  }
0x141c   : > { %15016 = vmatprep.subr.bf16.mxu1 %v20087_v57  ;;  %v15558_v57 = vld [vmem:[%s21139_s3 + $0xd8] sm:$0xff]  ;;  %v14705_v10 = vld [vmem:[#allocation2] sm:$0xf8] }
0x141f   : > { %15017 = vmatpush1.bf16.msra.mxu1 %v20085_v62  ;;  %v17445_v62 = vpack.c.bf16 %v15540_v58, %v15539_v5 }
0x1420   : > { %15018 = vmatprep.subr.bf16.mxu1 %v20090_v18  ;;  %v20121_v18 = vld [vmem:[#allocation3 + $0x3050] ss:$8 sps:$4 sm:$0xff]  }
0x1421   : > { %17446 = vmatpush3.bf16.msra.mxu0 %v17445_v62  ;;  %v20145_v62 = vld [vmem:[#allocation3 + $0x30d0] ss:$8 sps:$4 sm:$0xff]  }
0x1423   : > { %15019 = vmatpush1.bf16.msra.mxu1 %v20088_v2  ;;  %v14711_v2 = vpack.c.bf16 %v20929_v14, %v14705_v10 }
0x1424   : > { %15020 = vmatprep.subr.bf16.mxu1 %v20093_v21  ;;  %v17447_v21 = vpack.c.bf16 %v15558_v57, %v15557_v29  ;;  %v20147_v57 = vld [vmem:[#allocation3 + $0x30d4] ss:$8 sps:$4 sm:$0xff]  }
0x1426   : > { %17448 = vmatprep.subr.bf16.mxu0 %v17447_v21  ;;  %v20151_v21 = vld [vmem:[#allocation3 + $0x30f0] ss:$8 sps:$4 sm:$0xff]  }
0x1427   : > { %15021 = vmatpush1.bf16.msra.mxu1 %v20091_v54  ;;  %v15541_v54 = vld [vmem:[%s21139_s3 + $0x50] sm:$0xff] }
0x1428   : > { %15022 = vmatprep.subr.bf16.mxu1 %v20096_v24  ;;  %v15542_v24 = vld [vmem:[%s21139_s3 + $0x58] sm:$0xff] }
0x142b   : > { %15023 = vmatpush1.bf16.msra.mxu1 %v20094_v56  ;;  %v20126_v56 = vld [vmem:[#allocation3 + $0x3064] ss:$8 sps:$4 sm:$0xff]  }
0x142c   : > { %15024 = vmatprep.subr.bf16.mxu1 %v20099_v30  ;;  %v15559_v30 = vld [vmem:[%s21139_s3 + $0xe0] sm:$0xff] }
0x142f   : > { %15025 = vmatpush1.bf16.msra.mxu1 %v20097_v60  ;;  %v15560_v60 = vld [vmem:[%s21139_s3 + $0xe8] sm:$0xff] }
0x1430   : > { %15026 = vmatprep.subr.bf16.mxu1 %v20102_v32  ;;  %v14767_v32 = vshrl.u32 %v14714_v59, 16 }
0x1433   : > { %15027 = vmatpush1.bf16.msra.mxu1 %v20100_v12  ;;  %v14770_v12 = vshll.u32 %v14714_v59, 16 }
0x1434   : > { %15028 = vmatprep.subr.bf16.mxu1 %v20105_v63  ;;  %v17449_v63 = vpack.c.bf16 %v15542_v24, %v15541_v54  ;;  %v20156_v54 = vld [vmem:[#allocation3 + $0x3104] ss:$8 sps:$4 sm:$0xff]   ;;  %v20154_v24 = vld [vmem:[#allocation3 + $0x3100] ss:$8 sps:$4 sm:$0xff]  }
0x1435   : > { %v14772_v28 = vrot.slane %v14770_v12, 2  ;;  %v20165_v12 = vld [vmem:[#allocation3 + $0x3134] ss:$8 sps:$4 sm:$0xff]  }
0x1436   : > { %17450 = vmatpush3.bf16.msra.mxu0 %v17449_v63  ;;  %v20163_v63 = vld [vmem:[#allocation3 + $0x3130] ss:$8 sps:$4 sm:$0xff]  }
0x1437   : > { %15029 = vmatpush1.bf16.msra.mxu1 %v20103_v43  ;;  %v20124_v43 = vld [vmem:[#allocation3 + $0x3060] ss:$8 sps:$4 sm:$0xff]  }
0x1438   : > { %15030 = vmatprep.subr.bf16.mxu1 %v20108_v36  ;;  %v14759_v36 = vshrl.u32 %v14711_v2, 16 }
0x143a   : > { %v14761_v19 = vrot.slane %v14759_v36, 1  ;;  %v20166_v36 = vld [vmem:[#allocation3 + $0x3140] ss:$8 sps:$4 sm:$0xff]  }
0x143b   : > { %15031 = vmatpush1.bf16.msra.mxu1 %v20106_v15  ;;  %v14762_v15 = vshll.u32 %v14711_v2, 16  ;;  %v20153_v2 = vld [vmem:[#allocation3 + $0x30f4] ss:$8 sps:$4 sm:$0xff]  }
0x143c   : > { %15032 = vmatprep.subr.bf16.mxu1 %v20111_v3  ;;  %v17451_v3 = vpack.c.bf16 %v15560_v60, %v15559_v30  ;;  %v20157_v30 = vld [vmem:[#allocation3 + $0x3110] ss:$8 sps:$4 sm:$0xff]   ;;  %v20162_v60 = vld [vmem:[#allocation3 + $0x3124] ss:$8 sps:$4 sm:$0xff]  }
0x143d   : > { %v14764_v20 = vrot.slane %v14762_v15, 2  ;;  %v20171_v15 = vld [vmem:[#allocation3 + $0x3154] ss:$8 sps:$4 sm:$0xff]  }
0x143e   : > { %17452 = vmatprep.subr.bf16.mxu0 %v17451_v3  ;;  %v20169_v3 = vld [vmem:[#allocation3 + $0x3150] ss:$8 sps:$4 sm:$0xff]  }
0x143f   : > { %15033 = vmatpush1.bf16.msra.mxu1 %v20109_v16  ;;  %v20129_v16 = vld [vmem:[#allocation3 + $0x3074] ss:$8 sps:$4 sm:$0xff]   ;;  %v14765_v27 = vor.u32 %v14764_v20, %v14761_v19  ;;  %v20180_v19 = vld [vmem:[#allocation3 + $0x3184] ss:$8 sps:$4 sm:$0xff]   ;;  %v20178_v20 = vld [vmem:[#allocation3 + $0x3180] ss:$8 sps:$4 sm:$0xff]  }
0x1440   : > { %15034 = vmatprep.subr.bf16.mxu1 %v20114_v17  ;;  %v14769_v17 = vrot.slane %v14767_v32, 1  ;;  %v20160_v32 = vld [vmem:[#allocation3 + $0x3120] ss:$8 sps:$4 sm:$0xff]  }
0x1442   : > { %v14773_v23 = vor.u32 %v14772_v28, %v14769_v17  ;;  %v20172_v17 = vld [vmem:[#allocation3 + $0x3160] ss:$8 sps:$4 sm:$0xff]   ;;  %v20177_v28 = vld [vmem:[#allocation3 + $0x3174] ss:$8 sps:$4 sm:$0xff]  }
0x1443   : > { %15035 = vmatpush1.bf16.msra.mxu1 %v20112_v13  ;;  %v14713_v13 = vpack.c.bf16 %v20933_v25, %v14707_v11  ;;  %v20187_v11 = vld [vmem:[#allocation3 + $0x31b0] ss:$8 sps:$4 sm:$0xff]  }
0x1444   : > { %15036 = vmatprep.subr.bf16.mxu1 %v20117_v39  ;;  %v14774_v33 = vsel %vm1394_vm4, %v14765_v27, %v14773_v23  ;;  %v20136_v39 = vld [vmem:[#allocation3 + $0x30a0] ss:$8 sps:$4 sm:$0xff]   ;;  %v20181_v23 = vld [vmem:[#allocation3 + $0x3190] ss:$8 sps:$4 sm:$0xff]  }
0x1445   : > { %v14793_v40 = vshrl.u32 %v14713_v13, 16  ;;  %v14796_v41 = vshll.u32 %v14713_v13, 16  ;;  %v15107_v27 = vld [vmem:[#allocation2 + $0x30] sm:$0xf]  ;;  %v20192_v13 = vld [vmem:[#allocation3 + $0x31c4] ss:$8 sps:$4 sm:$0xff]  }
0x1447   : > { %15037 = vmatpush1.bf16.msra.mxu1 %v20115_v44  ;;  %v20141_v44 = vld [vmem:[#allocation3 + $0x30b4] ss:$8 sps:$4 sm:$0xff]   ;;  %v14795_v49 = vrot.slane %v14793_v40, 1  ;;  %v14798_v50 = vrot.slane %v14796_v41, 2  ;;  %v20193_v41 = vld [vmem:[#allocation3 + $0x31d0] ss:$8 sps:$4 sm:$0xff]  }
0x1448   : > { %15038 = vmatprep.subr.bf16.mxu1 %v20120_v48  ;;  %v15114_v48 = vpack.c.bf16 %v15108_v42, %v15108_v42  ;;  %v20198_v42 = vld [vmem:[#allocation3 + $0x31e4] ss:$8 sps:$4 sm:$0xff]  }
0x1449   : > { %v14799_v58 = vor.u32 %v14798_v50, %v14795_v49 }
0x144a   : > { %v15167_v5 = vrot.slane %v15114_v48, 2  ;;  %v20199_v48 = vld [vmem:[#allocation3 + $0x31f0] ss:$8 sps:$4 sm:$0xff]  }
0x144b   : > { %15039 = vmatpush1.bf16.msra.mxu1 %v20118_v51  ;;  %v15111_v51 = vpack.c.bf16 %v20924_v9, %v15105_v47  ;;  %v14808_v59 = vsel %vm1394_vm4, %v14799_v58, %v14807_v52  ;;  %v20148_v9 = vld [vmem:[#allocation3 + $0x30e0] ss:$8 sps:$4 sm:$0xff]   ;;  %v15106_v47 = vld [vmem:[#allocation2 + $0x10] sm:$0xf0]  ;;  %v15545_v58 = vld [vmem:[%s21139_s3 + $0x70] sm:$0xff] }
0x144c   : > { %15040 = vmatprep.subr.bf16.mxu1 %v20123_v55  ;;  %v20142_v55 = vld [vmem:[#allocation3 + $0x30c0] ss:$8 sps:$4 sm:$0xff]  }
0x144d   : > { %v15166_v29 = vrot.slane %v15111_v51, 2  ;;  %v15544_v51 = vld [vmem:[%s21139_s3 + $0x68] sm:$0xff] }
0x144f   : > { %15041 = vmatpush1.bf16.msra.mxu1 %v20121_v18  ;;  %v15168_v10 = vsel %vm1800_vm5, %v15166_v29, %v15167_v5  ;;  %v20150_v18 = vld [vmem:[#allocation3 + $0x30e4] ss:$8 sps:$4 sm:$0xff]  }
0x1450   : > { %15042 = vmatprep.subr.bf16.mxu1 %v20126_v56  ;;  %v20159_v56 = vld [vmem:[#allocation3 + $0x3114] ss:$8 sps:$4 sm:$0xff]   ;;  %v15562_v5 = vld [vmem:[%s21139_s3 + $0xf8] sm:$0xff] }
0x1451   : > { %v15546_v29 = vld [vmem:[%s21139_s3 + $0x78] sm:$0xff] }
0x1453   : > { %15043 = vmatpush1.bf16.msra.mxu1 %v20124_v43  ;;  %v20168_v43 = vld [vmem:[#allocation3 + $0x3144] ss:$8 sps:$4 sm:$0xff]  }
0x1454   : > { %15044 = vmatprep.subr.bf16.mxu1 %v20129_v16  ;;  %v20174_v16 = vld [vmem:[#allocation3 + $0x3164] ss:$8 sps:$4 sm:$0xff]  }
0x1457   : > { %15045 = vmatpush1.bf16.msra.mxu1 %v20127_v46  ;;  %v20175_v46 = vld [vmem:[#allocation3 + $0x3170] ss:$8 sps:$4 sm:$0xff]  }
0x1458   : > { %15057 = vmatprep.subr.bf16.mxu1 %v20132_v22  ;;  %v20183_v22 = vld [vmem:[#allocation3 + $0x3194] ss:$8 sps:$4 sm:$0xff]  }
0x145a   : > { %15047 = vmatmul.mubr.bf16.vlgmr.msra.gmra.mrb[16].mxu1 %v14774_v33  ;;  %v15113_v33 = vpack.c.bf16 %v15107_v27, %v15107_v27 }
0x145b   : > { %15058 = vmatpush1.bf16.msra.mxu1 %v20130_v31  ;;  %15089 = vmatprep.mubr.bf16.mxu1 %v20306_v0  ;;  %v20184_v31 = vld [vmem:[#allocation3 + $0x31a0] ss:$8 sps:$4 sm:$0xff]  }
0x145c   : > { %15059 = vmatprep.subr.bf16.mxu1 %v20135_v4  ;;  %v20189_v4 = vld [vmem:[#allocation3 + $0x31b4] ss:$8 sps:$4 sm:$0xff]  }
0x145f   : > { %15060 = vmatpush1.bf16.msra.mxu1 %v20133_v6  ;;  %v15110_v6 = vpack.c.bf16 %v20929_v14, %v15104_v34  ;;  %v20196_v14 = vld [vmem:[#allocation3 + $0x31e0] ss:$8 sps:$4 sm:$0xff]  }
0x1460   : > { %15061 = vmatprep.subr.bf16.mxu1 %v20138_v35  ;;  %v15164_v35 = vrot.slane %v15113_v33, 2 }
0x1461   : > { %v15163_v37 = vrot.slane %v15110_v6, 2 }
0x1463   : > { %15062 = vmatpush1.bf16.msra.mxu1 %v20136_v39  ;;  %v20195_v39 = vld [vmem:[#allocation3 + $0x31d4] ss:$8 sps:$4 sm:$0xff]   ;;  %v15165_v40 = vsel %vm1800_vm5, %v15163_v37, %v15164_v35 }
0x1464   : > { %15063 = vmatprep.subr.bf16.mxu1 %v20141_v44  ;;  %v15109_v44 = vld [vmem:[#allocation2 + $0x40] sm:$0xf] }
0x1465   : > { %v15115_v53 = vpack.c.bf16 %v15109_v44, %v15109_v44 }
0x1467   : > { %15064 = vmatpush1.bf16.msra.mxu1 %v20139_v61  ;;  %v15112_v61 = vpack.c.bf16 %v20933_v25, %v15106_v47  ;;  %v15170_v49 = vrot.slane %v15115_v53, 2  ;;  %v15561_v25 = vld [vmem:[%s21139_s3 + $0xf0] sm:$0xff] }
0x1468   : > { %15377 = vmatprep.subr.bf16.mxu1 %v20144_v1 }
0x1469   : > { %v15169_v50 = vrot.slane %v15112_v61, 2 }
0x146a   : > { %17343 = vmatmul.mubr.msk.bf16.vlgmr.msra.gmra.mrb[16].mxu1 %vm249_vm0, %v14808_v59  ;;  %v17385_v59 = vld [vmem:[%s21138_s2 + $0xe] sm:$0x3] }
0x146b   : > { %15378 = vmatpush1.bf16.msra.mxu1 %v20142_v55  ;;  %15409 = vmatprep.mubr.bf16.mxu1 %v15168_v10  ;;  %v15171_v1 = vsel %vm1800_vm5, %v15169_v50, %v15170_v49  ;;  %v17455_v55 = vpack.c.bf16 %v15562_v5, %v15561_v25  ;;  %v15473_v10 = vrot.slane %v17385_v59, %v20509_v7 }
0x146c   : > { %15379 = vmatprep.subr.bf16.mxu1 %v20147_v57  ;;  %v17457_v57 = vpack.c.bf16 %v15546_v29, %v15545_v58 }
0x146f   : > { %15380 = vmatpush1.bf16.msra.mxu1 %v20145_v62  ;;  %v15477_v62 = vrot.slane %v17385_v59, %v20511_v8 }
0x1470   : > { %15381 = vmatprep.subr.bf16.mxu1 %v20150_v18 }
0x1473   : > { %15382 = vmatpush1.bf16.msra.mxu1 %v20148_v9 }
0x1474   : > { %15383 = vmatprep.subr.bf16.mxu1 %v20153_v2 }
0x1477   : > { %15384 = vmatpush1.bf16.msra.mxu1 %v20151_v21 }
0x1478   : > { %15385 = vmatprep.subr.bf16.mxu1 %v20156_v54 }
0x147b   : > { %15386 = vmatpush1.bf16.msra.mxu1 %v20154_v24 }
0x147c   : > { %15387 = vmatprep.subr.bf16.mxu1 %v20159_v56 }
0x147f   : > { %15388 = vmatpush1.bf16.msra.mxu1 %v20157_v30 }
0x1480   : > { %15389 = vmatprep.subr.bf16.mxu1 %v20162_v60 }
0x1483   : > { %15390 = vmatpush1.bf16.msra.mxu1 %v20160_v32 }
0x1484   : > { %15391 = vmatprep.subr.bf16.mxu1 %v20165_v12 }
0x1487   : > { %15392 = vmatpush1.bf16.msra.mxu1 %v20163_v63 }
0x1488   : > { %15393 = vmatprep.subr.bf16.mxu1 %v20168_v43 }
0x148b   : > { %15394 = vmatpush1.bf16.msra.mxu1 %v20166_v36 }
0x148c   : > { %15395 = vmatprep.subr.bf16.mxu1 %v20171_v15 }
0x148f   : > { %15396 = vmatpush1.bf16.msra.mxu1 %v20169_v3 }
0x1490   : > { %15397 = vmatprep.subr.bf16.mxu1 %v20174_v16 }
0x1493   : > { %15398 = vmatpush1.bf16.msra.mxu1 %v20172_v17 }
0x1494   : > { %15399 = vmatprep.subr.bf16.mxu1 %v20177_v28 }
0x1497   : > { %15400 = vmatpush1.bf16.msra.mxu1 %v20175_v46 }
0x1498   : > { %15401 = vmatprep.subr.bf16.mxu1 %v20180_v19 }
0x149b   : > { %15402 = vmatpush1.bf16.msra.mxu1 %v20178_v20 }
0x149c   : > { %15403 = vmatprep.subr.bf16.mxu1 %v20183_v22 }
0x149f   : > { %15404 = vmatpush1.bf16.msra.mxu1 %v20181_v23 }
0x14a0   : > { %15405 = vmatprep.subr.bf16.mxu1 %v20186_v26 }
0x14a3   : > { %15406 = vmatpush1.bf16.msra.mxu1 %v20184_v31 }
0x14a4   : > { %15407 = vmatprep.subr.bf16.mxu1 %v20189_v4 }
0x14a7   : > { %15408 = vmatpush1.bf16.msra.mxu1 %v20187_v11 }
0x14a8   : > { %15420 = vmatprep.subr.bf16.mxu1 %v20192_v13 }
0x14aa   : > { %15410 = vmatmul.mubr.bf16.vlgmr.msra.gmra.mrb[16].mxu1 %v15165_v40 }
0x14ab   : > { %15421 = vmatpush1.bf16.msra.mxu1 %v20190_v38  ;;  %15452 = vmatprep.mubr.bf16.mxu1 %v20306_v0  ;;  %v15543_v0 = vld [vmem:[%s21139_s3 + $0x60] sm:$0xff] }
0x14ac   : > { %15422 = vmatprep.subr.bf16.mxu1 %v20195_v39  ;;  %v17453_v52 = vpack.c.bf16 %v15544_v51, %v15543_v0 }
0x14ae   : > { %17454 = vmatpush3.bf16.msra.mxu0 %v17453_v52 }
0x14af   : > { %15423 = vmatpush1.bf16.msra.mxu1 %v20193_v41  ;;  %17456 = vmatprep.subr.bf16.mxu0 %v17455_v55  ;;  %v15648_v41 = vld [vmem:[%s21140_s4] sm:$0x1] }
0x14b0   : > { %15424 = vmatprep.subr.bf16.mxu1 %v20198_v42 }
0x14b2   : > { %17458 = vmatpush3.bf16.msra.mxu0 %v17457_v57 }
0x14b3   : > { %15425 = vmatpush1.bf16.msra.mxu1 %v20196_v14 }
0x14b4   : > { %15426 = vmatprep.subr.bf16.mxu1 %v20201_v45 }
0x14b7   : > { %15427 = vmatpush1.bf16.msra.mxu1 %v20199_v48 }
0x14ba   : > { %17384 = vmatmul.mubr.msk.bf16.vlgmr.msra.gmra.mrb[16].mxu1 %vm249_vm0, %v15171_v1 }
0x158d   : > { %v15454_v18 = vpop.f32.mrb[16].mxu1 }
0x158e   : > { %v15480_v9 = vadd.f32 %v15473_v10, %v15454_v18  ;;  %v15456_v2 = vpop.f32.mrb[17].mxu1 }
0x158f   : > { %v15481_v21 = vadd.f32 %v15477_v62, %v15456_v2  ;;  %v15458_v54 = vpop.f32.mrb[18].mxu1 }
0x1590   : > { %v15484_v24 = vmax.f32 %v15480_v9, 0.0  ;;  %v15482_v56 = vadd.f32 %v15473_v10, %v15458_v54  ;;  %v15460_v30 = vpop.f32.mrb[19].mxu1 }
0x1591   : > { %v15485_v60 = vmax.f32 %v15481_v21, 0.0  ;;  %v15483_v32 = vadd.f32 %v15477_v62, %v15460_v30 }
0x1592   : > { %v15492_v12 = vrot.slane %v15484_v24, 6  ;;  %v15486_v63 = vmax.f32 %v15482_v56, 0.0 }
0x1593   : > { %v15493_v43 = vrot.slane %v15485_v60, 6  ;;  %v15487_v36 = vmax.f32 %v15483_v32, 0.0  ;;  %15627 = vmatprep.mubr.f32.mxu0 %v15485_v60 }
0x1594   : > { %v15494_v15 = vrot.slane %v15486_v63, 6  ;;  %15498 = vrot.lane.b32.xlu0 %v15492_v12, %s20307_s12  ;;  %15628 = vmatmul.mubr.f32.vlgmr.msra.gmra.mrb[20].mxu0 %v15484_v24 }
0x1595   : > { %v15496_v7 = vrot.slane %v15487_v36, 6  ;;  %15500 = vrot.lane.b32.xlu1 %v15493_v43, %s20307_s12  ;;  %15632 = vmatprep.mubr.f32.mxu0 %v15487_v36 }
0x1596   : > { %v15495_v8 = vsel %vm2129_vm6, %v15492_v12, %v15494_v15 }
0x1597   : > { %v15497_v3 = vsel %vm2129_vm6, %v15493_v43, %v15496_v7 }
0x1598   : > { %15502 = vrot.lane.b32.xlu0 %v15495_v8, %s20307_s12  ;;  %15633 = vmatmul.mubr.f32.gmra.mrb[22].mxu0 %v15486_v63 }
0x1599   : > { %15504 = vrot.lane.b32.xlu1 %v15497_v3, %s20307_s12 }
0x159c   : > { %15506 = vrot.lane.b32.xlu0 %v15494_v15, %s20307_s12 }
0x159d   : > { %15508 = vrot.lane.b32.xlu1 %v15496_v7, %s20307_s12  ;;  %s230_s12 = sand.u32 1, %s20293_s19  }
0x159e   : > { %s231_s25 = scalar_lea.vmem [#allocation6], %s230_s12  ;;  %s15653_s8 = scalar_lea.sflag [#allocation5], %s230_s12 }
0x159f   : > { %s15665_s26 = sshll.u32 %s231_s25, 4  ;;  %s21096_s26 = int_to_ptr.vmem [resolvable:$true] %s15665_s26 }
0x15a0   : > { %s20235_s9 = scalar_lea.vmem %s21096_s26, 16  ;;  %p20242_p2 = scmp.lt.s32.totalorder %s21096_s26, %s20240_s10 }
0x15a1   : > { %p20236_p6 = scmp.ne.s32.totalorder %s21096_s26, %s20235_s9  ;;  %p20243_p3 = scmp.lt.s32.totalorder %s20241_s11, %s20235_s9 }
0x15a3   : > { %p20237_p10 = pnand %p20236_p6, %p21152_p9  ;;  %p20244_p4 = por %p20243_p3, %p20242_p2 }
0x15a5   : > { %p20238_p12 = pneg %p20237_p10 }
0x15a7   : > { %p20245_p7 = pnand %p20244_p4, %p20238_p12 }
0x1606   : > { %v15499_v16 = vpop.permute.xlu0 %15498 }
0x1607   : > { %15522 = vst.msk [vmem:[#allocation2] sm:$0xfc] %vm2161_vm7, %v15499_v16  ;;  %v15501_v17 = vpop.permute.xlu1 %15500 }
0x1608   : > { %v15510_v28 = vsel %vm2148_vm9, %v15499_v16, %v15501_v17  ;;  %15524 = vst.msk [vmem:[#allocation2 + $0x10] sm:$0xfc] %vm2164_vm10, %v15501_v17 }
0x1609   : > { %15523 = vst [vmem:[#allocation2 + $0x8] sm:$0xfc] %v15510_v28 }
0x160a   : > { %v15503_v46 = vpop.permute.xlu0 %15502 }
0x160b   : > { %15525 = vst.msk [vmem:[#allocation2 + $0x18] sm:$0xff] %vm2166_vm8, %v15503_v46  ;;  %v15505_v19 = vpop.permute.xlu1 %15504 }
0x160c   : > { %15527 = vst.msk [vmem:[#allocation2 + $0x28] sm:$0xff] %vm2148_vm9, %v15505_v19 }
0x160e   : > { %v15507_v20 = vpop.permute.xlu0 %15506 }
0x160f   : > { %15528 = vst.msk [vmem:[#allocation2 + $0x30] sm:$0x3] %vm2170_vm11, %v15507_v20  ;;  %v15509_v22 = vpop.permute.xlu1 %15508 }
0x1610   : > { %v15512_v23 = vsel %vm2148_vm9, %v15507_v20, %v15509_v22  ;;  %15530 = vst.msk [vmem:[#allocation2 + $0x40] sm:$0x3] %vm2173_vm12, %v15509_v22 }
0x1611   : > { %15529 = vst [vmem:[#allocation2 + $0x38] sm:$0x3] %v15512_v23 }
0x1667   : > { %v17421_v26 = vpop.f32.mrb[20].mxu0 }
0x1668   : > { %v17422_v27 = vpop.f32.mrb[21].mxu0 }
0x1669   : > { %v17423_v31 = vadd.f32 %v17422_v27, %v17421_v26 }
0x166b   : > { %v17424_v4 = vpop.f32.mrb[22].mxu0  ;;  %v15639_v11 = vsel %vm15638_vm13, %v17423_v31, 0.0 }
0x166c   : > { %v17425_v33 = vpop.f32.mrb[23].mxu0 }
0x166d   : > { %v17426_v34 = vadd.f32 %v17425_v33, %v17424_v4 }
0x166f   : > { %v15640_v6 = vsel %vm15638_vm13, %v17426_v34, 0.0 }
0x1670   : > { %v15641_v13 = vadd.f32 %v15640_v6, %v15639_v11 }
0x1672   : > { %v15642_v35 = vrot.slane %v15641_v13, 4 }
0x1674   : > { %v15643_v37 = vadd.f32 %v15642_v35, %v15641_v13 }
0x1676   : > { %v15644_v38 = vrot.slane %v15643_v37, 2 }
0x1678   : > { %v15645_v39 = vadd.f32 %v15644_v38, %v15643_v37 }
0x167a   : > { %v15646_v40 = vrot.slane %v15645_v39, 1 }
0x167c   : > { %v15647_v42 = vadd.f32 %v15646_v40, %v15645_v39 }
0x167e   : > { %v15649_v44 = vadd.f32 %v15648_v41, %v15647_v42 }
0x1680   : > { %15651 = vst.msk [vmem:[%s231_s25] sm:$0x1] %vm15650_vm14, %v15649_v44 }
0x1681   : > { %20248 = shalt.err (!%p20245_p7)
}
0x1682   : > { %s20249_s13 = scalar_lea.hbm %s21094_s7, 16  ;;  %s20253_s12 = scalar_lea.hbm %s21141_s5, 32 }
0x1683   : > { %p20250_p8 = scmp.ne.s32.totalorder %s21094_s7, %s20249_s13  ;;  %p20254_p1 = scmp.lt.u32.totalorder %s21094_s7, %s21141_s5 }
0x1684   : > { %p20255_p0 = scmp.lt.u32.totalorder %s20253_s12, %s20249_s13  ;;  %p20257_p6 = scmp.lt.u32.totalorder %s20249_s13, %s21094_s7 }
0x1685   : > { %p20251_p11 = pnand %p20250_p8, %p21152_p9 }
0x1686   : > { %p20256_p5 = por %p20255_p0, %p20254_p1 }
0x1687   : > { %p20252_p13 = pneg %p20251_p11 }
0x1688   : > { %p20258_p10 = por %p20257_p6, %p20256_p5 }
0x168a   : > { %p20259_p12 = pnand %p20258_p10, %p20252_p13 }
0x168c   : > { %20262 = shalt.err (!%p20259_p12)
}
0x168d   : > { %17752 = dma.vmem_to_hbm [thread:$0]  (%p21152_p9), %s21096_s26, 16, %s21094_s7, %s15653_s8  }
0x168e PF: > { %p17764_p2 = scmp.ge.s32.totalorder %s20301_s21, 2  ;;  %s15677_s23 = sand.u32 1, %s20289_s18  }
0x168f   : > { %p21153_p3 = scmp.ne.s32.totalorder %s21146_s29, 0  ;;  %s15678_s25 = scalar_lea.sflag [#allocation5], %s15677_s23 }
0x1691   : > { %p17759_p4 = pnand %p17764_p2, %p21153_p3 }
0x1693   : > { %20284 = dma.done.wait (!%p17759_p4), %s15678_s25, 16  }
0x1694   : > { %20286 = vsyncadd (!%p17759_p4), %s15678_s25, 4294967280  ;;  %p16_p7 = scmp.ge.s32.totalorder %s20364_s24, 4   ;;  %s21154_s18 = smov %s20293_s19 }
0x1695   : > { %s21155_s19 = smov %s20297_s20  ;;  %s21156_s20 = smov %s20375_s27 }
0x1696   : > { %s21157_s21 = smov %s20364_s24  ;;  %18 = sbr.rel (!%p16_p7) target bundleno = 4 (0x4), region = 126 }
0x169d   :  { %15682 = vsyncpa [#allocation4], 1 }
0x169e   :  { %15684 = vsyncpa [#allocation4 + $0x1], 1 }
0x169f   :  { %15685 = vsyncpa [#allocation5], 1 }
0x16a0   :  { %15687 = vsyncpa [#allocation5 + $0x1], 1 }

</bundles_post_ra>
